<compile_context>
chip_gen: v7x
topology: tpu7x:2x2x1
jax: 0.10.0
libtpu: 0.0.40
codegen_flags: <defaults>
</compile_context>

<pallas_src>
import numpy as np
import jax
import jax.numpy as jnp
from jax.experimental import pallas as pl
from jax.experimental.pallas import tpu as pltpu

F32 = jnp.float32
BF16 = jnp.bfloat16
EPS = 1e-4


# ----------------------------------------------------------------------------
# one-time weight / constant preparation (hoisted out of the forward pass)
# ----------------------------------------------------------------------------

def _rowify_conv3x3(w, W):
    """(3,3,Cin,Cout) -> (3, W*Cin, W*Cout) W-Toeplitz form ('same' padding)."""
    kh, kw, _, _ = w.shape
    blocks = []
    for i in range(kh):
        m = None
        for j in range(kw):
            e = np.eye(W, W, k=1 - j, dtype=np.float32)
            blk = jnp.kron(jnp.asarray(e), w[i, j].astype(F32))
            m = blk if m is None else m + blk
        blocks.append(m)
    return jnp.stack(blocks, axis=0).astype(BF16)


def _rowify_conv1x1(w4, W):
    """(1,1,Cin,Cout) -> (W*Cin, W*Cout) block-diagonal form."""
    return jnp.kron(jnp.eye(W, dtype=F32), w4[0, 0].astype(F32)).astype(BF16)


def _tile_bias(b, W):
    return jnp.tile(b.astype(F32), W).reshape(1, -1)


def _row_pool_mats(nh_out):
    """Even/odd row-selection matrices (nh_out, 2*nh_out) for 2x2 pooling of a
    batch-stacked slab (out stacked row r <- in rows 2r, 2r+1)."""
    e = np.eye(2 * nh_out, dtype=np.float32)
    return e[0::2, :], e[1::2, :]


def _lane_pool_mats(w_out, c):
    """Even/odd lane-selection matrices (2*w_out*c, w_out*c)."""
    e = np.eye(2 * w_out, dtype=np.float32)
    se = np.kron(e[:, 0::2], np.eye(c, dtype=np.float32))
    so = np.kron(e[:, 1::2], np.eye(c, dtype=np.float32))
    return se, so


def _row_up_mat(nh_in):
    """Row-duplication matrix (2*nh_in, nh_in): out[r] = in[r//2]."""
    return np.repeat(np.eye(nh_in, dtype=np.float32), 2, axis=0)


def _lane_up_mat(w_in, c):
    """Lane-duplication matrix (w_in*c, 2*w_in*c) for nearest 2x upsample."""
    return np.kron(np.repeat(np.eye(w_in, dtype=np.float32), 2, axis=1),
                   np.eye(c, dtype=np.float32))


def _normalize_fusion(w):
    wp = jnp.maximum(w.astype(F32), 0.0)
    return wp / (jnp.sum(wp) + EPS)


def prepare_consts(params, *, N, in_ch, H0, W0):
    """Build all layout-transformed weights and selection constants once."""
    bb_ch = [p["w"].shape[-1] for p in params["bb"]]
    Cb = params["lateral"][0]["w"].shape[-1]
    L = len(bb_ch)
    hw = [(H0 >> l, W0 >> l) for l in range(L)]
    c = {}

    # backbone 3x3 convs + 1x1 laterals, rowified for the slab layout
    bb = []
    for l in range(L):
        _, W = hw[l]
        bb.append({
            "wt": _rowify_conv3x3(params["bb"][l]["w"], W),
            "b": _tile_bias(params["bb"][l]["b"], W),
            "lat_wt": _rowify_conv1x1(params["lateral"][l]["w"], W),
            "lat_b": _tile_bias(params["lateral"][l]["b"], W),
        })
    c["bb"] = bb

    # resampling selection matrices over batch-stacked slabs
    down_rows, down_lanes_bb, down_lanes_bif, ups = [], [], [], []
    for i in range(1, L):
        Hi, Wi = hw[i]
        re, ro = _row_pool_mats(N * Hi)
        down_rows.append({"e": jnp.asarray(re, BF16), "o": jnp.asarray(ro, BF16)})
        se, so = _lane_pool_mats(Wi, bb_ch[i - 1])
        down_lanes_bb.append({"e": jnp.asarray(se, BF16), "o": jnp.asarray(so, BF16)})
        se, so = _lane_pool_mats(Wi, Cb)
        down_lanes_bif.append({"e": jnp.asarray(se, BF16), "o": jnp.asarray(so, BF16)})
    for i in range(L - 1):
        Hn, Wn = hw[i + 1]
        ups.append({"rows": jnp.asarray(_row_up_mat(N * Hn), BF16),
                    "lanes": jnp.asarray(_lane_up_mat(Wn, Cb), BF16)})
    c["down_rows"] = down_rows
    c["down_lanes_bb"] = down_lanes_bb
    c["down_lanes_bif"] = down_lanes_bif
    c["up"] = ups

    # BiFPN conv weights per layer / level
    layers = []
    for lp in params["layers"]:
        td, bu = [], []
        for i in range(L - 1):
            W = hw[i][1]
            td.append({"wt": _rowify_conv3x3(lp["td_conv"][i]["w"], W),
                       "b": _tile_bias(lp["td_conv"][i]["b"], W)})
        for i in range(1, L):
            W = hw[i][1]
            bu.append({"wt": _rowify_conv3x3(lp["bu_conv"][i - 1]["w"], W),
                       "b": _tile_bias(lp["bu_conv"][i - 1]["b"], W)})
        layers.append({"td": td, "bu": bu})
    c["layers"] = layers

    # global-average-pool + classifier constants
    HL, WL = hw[-1]
    bsum = np.zeros((N, N * HL), np.float32)
    for n in range(N):
        bsum[n, n * HL:(n + 1) * HL] = 1.0
    c["bsum"] = jnp.asarray(bsum, F32)
    c["csel"] = jnp.asarray(np.kron(np.ones((WL, 1), np.float32),
                                    np.eye(Cb, dtype=np.float32)), F32)
    c["cls_w"] = params["cls"]["w"].astype(F32)
    c["cls_b"] = params["cls"]["b"].reshape(1, -1).astype(F32)
    return c


# ----------------------------------------------------------------------------
# the single fused kernel
# ----------------------------------------------------------------------------

def _make_fused_kernel(treedef, n_in, meta):
    N = meta["N"]
    hw = meta["hw"]
    nlayers = meta["nlayers"]
    L = len(hw)
    inv_hw_last = 1.0 / float(hw[-1][0] * hw[-1][1])

    def conv3x3_relu(x_bf, pad_ref, wt_ref, b_ref, NH, H):
        """'same' 3x3 conv + bias + ReLU on a batch-stacked (NH, W*Cin) slab."""
        WC = x_bf.shape[1]
        zero = jnp.zeros((1, WC), BF16)
        pad_ref[0:1, :] = zero
        pad_ref[NH + 1:NH + 2, :] = zero
        pad_ref[1:NH + 1, :] = x_bf
        # rows that would read across a stacked-batch boundary -> zero (VPU)
        r = jax.lax.broadcasted_iota(jnp.int32, (NH, 1), 0)
        m_top = (r % H) != 0
        m_bot = (r % H) != (H - 1)
        lhs0 = pad_ref[0:NH, :]
        lhs0 = jnp.where(m_top, lhs0, jnp.zeros_like(lhs0))
        lhs1 = pad_ref[1:NH + 1, :]
        lhs2 = pad_ref[2:NH + 2, :]
        lhs2 = jnp.where(m_bot, lhs2, jnp.zeros_like(lhs2))
        acc = jnp.dot(lhs0, wt_ref[0], preferred_element_type=F32)
        acc = acc + jnp.dot(lhs1, wt_ref[1], preferred_element_type=F32)
        acc = acc + jnp.dot(lhs2, wt_ref[2], preferred_element_type=F32)
        acc = acc + b_ref[...]
        return jnp.maximum(acc, 0.0)

    def maxpool2(x_bf, re, ro, se, so):
        """2x2 max-pool of a bf16 slab via exact 0/1 selection dots -> f32."""
        xr = jnp.maximum(jnp.dot(re, x_bf, preferred_element_type=F32),
                         jnp.dot(ro, x_bf, preferred_element_type=F32)).astype(BF16)
        return jnp.maximum(jnp.dot(xr, se, preferred_element_type=F32),
                           jnp.dot(xr, so, preferred_element_type=F32))

    def upsample2(t_bf, rrows, rlanes):
        """Nearest 2x upsample via duplication dots (lanes then rows) -> f32."""
        tw = jnp.dot(t_bf, rlanes, preferred_element_type=F32).astype(BF16)
        return jnp.dot(rrows, tw, preferred_element_type=F32)

    def kernel(*refs):
        ins = jax.tree_util.tree_unflatten(treedef, refs[:n_in])
        logits_ref = refs[n_in]
        feat_refs = refs[n_in + 1:n_in + 1 + L]
        pads_bb = refs[n_in + 1 + L:n_in + 1 + 2 * L]
        pads_bif = refs[n_in + 1 + 2 * L:n_in + 1 + 3 * L]
        c, fw, x_ref = ins["c"], ins["fw"], ins["x"]

        # ------------------ backbone + 1x1 lateral projections ------------------
        cur = x_ref[...]                                   # (N*H0, W0*Cin) bf16
        feats = []
        for l in range(L):
            H, _ = hw[l]
            if l > 0:
                dr = c["down_rows"][l - 1]
                dl = c["down_lanes_bb"][l - 1]
                cur = maxpool2(cur, dr["e"][...], dr["o"][...],
                               dl["e"][...], dl["o"][...]).astype(BF16)
            bb = c["bb"][l]
            cur = conv3x3_relu(cur, pads_bb[l], bb["wt"], bb["b"],
                               N * H, H).astype(BF16)
            lat = jnp.dot(cur, bb["lat_wt"][...],
                          preferred_element_type=F32) + bb["lat_b"][...]
            feats.append(lat.astype(BF16))

        # ------------------ repeated BiFPN layers ------------------
        for li in range(nlayers):
            lw = c["layers"][li]
            lf = fw["layers"][li]
            # top-down pathway (coarse -> fine)
            td = [None] * L
            td[L - 1] = feats[L - 1]
            for i in range(L - 2, -1, -1):
                H, _ = hw[i]
                up = upsample2(td[i + 1], c["up"][i]["rows"][...],
                               c["up"][i]["lanes"][...])
                w = lf["td"][i]
                fused = w[0] * feats[i].astype(F32) + w[1] * up
                td[i] = conv3x3_relu(fused.astype(BF16), pads_bif[i],
                                     lw["td"][i]["wt"], lw["td"][i]["b"],
                                     N * H, H).astype(BF16)
            # bottom-up pathway (fine -> coarse)
            out = [None] * L
            out[0] = td[0]
            for i in range(1, L):
                H, _ = hw[i]
                dr = c["down_rows"][i - 1]
                dl = c["down_lanes_bif"][i - 1]
                pooled = maxpool2(out[i - 1], dr["e"][...], dr["o"][...],
                                  dl["e"][...], dl["o"][...])
                w = lf["bu"][i - 1]
                fused = w[0] * feats[i].astype(F32)
                if i < L - 1:
                    fused = fused + w[1] * td[i].astype(F32) + w[2] * pooled
                else:
                    fused = fused + w[1] * pooled
                out[i] = conv3x3_relu(fused.astype(BF16), pads_bif[i],
                                      lw["bu"][i - 1]["wt"], lw["bu"][i - 1]["b"],
                                      N * H, H).astype(BF16)
            feats = out

        # ------------------ global average pool + classifier ------------------
        v = feats[L - 1].astype(F32)                               # (N*HL, WL*Cb)
        s = jnp.dot(c["bsum"][...], v, preferred_element_type=F32)  # (N, WL*Cb)
        pooled = jnp.dot(s, c["csel"][...],
                         preferred_element_type=F32) * inv_hw_last  # (N, Cb)
        logits_ref[...] = (jnp.dot(pooled, c["cls_w"][...],
                                   preferred_element_type=F32) + c["cls_b"][...])

        # BiFPN feature outputs (f32 batch-stacked slabs)
        for l in range(L):
            feat_refs[l][...] = feats[l].astype(F32)

    return kernel


# ----------------------------------------------------------------------------
# forward wrapper (single pallas_call)
# ----------------------------------------------------------------------------

def model_forward(consts, params, x_nchw):
    N, Cin, H0, W0 = x_nchw.shape
    bb_ch = [p["w"].shape[-1] for p in params["bb"]]
    Cb = params["lateral"][0]["w"].shape[-1]
    ncls = params["cls"]["w"].shape[-1]
    L = len(bb_ch)
    hw = [(H0 >> l, W0 >> l) for l in range(L)]
    nlayers = len(params["layers"])

    # NCHW -> batch-stacked, lane-dense bf16 slab (N*H, W*C)
    x_slab = jnp.transpose(x_nchw, (0, 2, 3, 1)).reshape(N * H0, W0 * Cin).astype(BF16)

    # fast-normalized fusion weights (tiny per-forward scalar work)
    fw = {"layers": [
        {"td": [_normalize_fusion(w) for w in lp["td_w"]],
         "bu": [_normalize_fusion(w) for w in lp["bu_w"]]}
        for lp in params["layers"]]}

    inputs = {"c": consts, "fw": fw, "x": x_slab}
    flat, treedef = jax.tree_util.tree_flatten(inputs)
    n_in = len(flat)
    in_specs = [pl.BlockSpec(memory_space=pltpu.MemorySpace.SMEM) if a.ndim == 1
                else pl.BlockSpec(memory_space=pltpu.MemorySpace.VMEM)
                for a in flat]

    meta = dict(N=N, hw=tuple(hw), nlayers=nlayers)
    kernel = _make_fused_kernel(treedef, n_in, meta)

    out_shape = tuple([jax.ShapeDtypeStruct((N, ncls), F32)]
                      + [jax.ShapeDtypeStruct((N * h, w * Cb), F32) for h, w in hw])
    out_specs = tuple(pl.BlockSpec(memory_space=pltpu.MemorySpace.VMEM)
                      for _ in out_shape)

    # conv-padding scratch, one per conv-input slab shape (reused across layers)
    bb_in_ch = [Cin] + list(bb_ch[:-1])
    scratch = [pltpu.VMEM((N * h + 2, w * bb_in_ch[l]), BF16)
               for l, (h, w) in enumerate(hw)]
    scratch += [pltpu.VMEM((N * h + 2, w * Cb), BF16) for h, w in hw]

    outs = pl.pallas_call(
        kernel,
        out_shape=out_shape,
        in_specs=in_specs,
        out_specs=out_specs,
        scratch_shapes=scratch,
    )(*flat)

    logits = outs[0]
    feats = [outs[1 + l].reshape(N, hw[l][0], hw[l][1], Cb) for l in range(L)]
    return logits, feats


# ----------------------------------------------------------------------------
# parameters (reference snippet does not define backbone / BiFPN: a small
# 3-level conv backbone + EfficientDet-style BiFPN is used, as before)
# ----------------------------------------------------------------------------

def _conv_init(key, kh, kw, cin, cout):
    kw_, kb = jax.random.split(key)
    scale = 1.0 / float(kh * kw * cin) ** 0.5
    return {"w": jax.random.normal(kw_, (kh, kw, cin, cout), jnp.float32) * scale,
            "b": jax.random.normal(kb, (cout,), jnp.float32) * 0.01}


def init_params(key, *, in_ch, backbone_channels, bifpn_channels,
                bifpn_layers, num_classes):
    keys = iter(jax.random.split(key, 64))
    bb = []
    c_prev = in_ch
    for c in backbone_channels:
        bb.append(_conv_init(next(keys), 3, 3, c_prev, c))
        c_prev = c
    L = len(backbone_channels)
    lateral = [_conv_init(next(keys), 1, 1, c, bifpn_channels)
               for c in backbone_channels]
    layers = []
    for _ in range(bifpn_layers):
        layers.append({
            "td_conv": [_conv_init(next(keys), 3, 3, bifpn_channels, bifpn_channels)
                        for _ in range(L - 1)],
            "td_w": [jnp.ones((2,), jnp.float32) for _ in range(L - 1)],
            "bu_conv": [_conv_init(next(keys), 3, 3, bifpn_channels, bifpn_channels)
                        for _ in range(L - 1)],
            "bu_w": [jnp.ones((3,), jnp.float32) if i < L - 1
                     else jnp.ones((2,), jnp.float32)
                     for i in range(1, L)],
        })
    kcw, _ = jax.random.split(next(keys))
    cls = {"w": jax.random.normal(kcw, (bifpn_channels, num_classes), jnp.float32)
                * (1.0 / float(bifpn_channels) ** 0.5),
           "b": jnp.zeros((num_classes,), jnp.float32)}
    return {"bb": bb, "lateral": lateral, "layers": layers, "cls": cls}


if __name__ == "__main__":
    key = jax.random.PRNGKey(0)
    kx, kp = jax.random.split(key)
    x = jax.random.normal(kx, (2, 4, 16, 16), jnp.float32)    # NCHW, like PyTorch
    params = init_params(
        kp, in_ch=4, backbone_channels=(8, 16, 32),
        bifpn_channels=16, bifpn_layers=2, num_classes=10,
    )
    consts = prepare_consts(params, N=2, in_ch=4, H0=16, W0=16)   # one-time prep
    fwd = jax.jit(model_forward)
    logits, bifpn_feats = fwd(consts, params, x)
    jax.block_until_ready(logits)
    jax.block_until_ready(bifpn_feats)
    assert logits.shape == (2, 10)
    assert bifpn_feats[-1].shape == (2, 4, 4, 16)
    assert bool(jnp.isfinite(logits).all())
    print("KERNEL_OK")
</pallas_src>

<mosaic_0001>
module attributes {stable_mosaic.version = 11 : i64} {
  func.func @kernel(%arg0: memref<1x128xf32, #tpu.memory_space<vmem>>, %arg1: memref<1x256xf32, #tpu.memory_space<vmem>>, %arg2: memref<128x256xbf16, #tpu.memory_space<vmem>>, %arg3: memref<3x64x128xbf16, #tpu.memory_space<vmem>>, %arg4: memref<1x128xf32, #tpu.memory_space<vmem>>, %arg5: memref<1x128xf32, #tpu.memory_space<vmem>>, %arg6: memref<128x128xbf16, #tpu.memory_space<vmem>>, %arg7: memref<3x64x128xbf16, #tpu.memory_space<vmem>>, %arg8: memref<1x128xf32, #tpu.memory_space<vmem>>, %arg9: memref<1x64xf32, #tpu.memory_space<vmem>>, %arg10: memref<128x64xbf16, #tpu.memory_space<vmem>>, %arg11: memref<3x64x128xbf16, #tpu.memory_space<vmem>>, %arg12: memref<2x8xf32, #tpu.memory_space<vmem>>, %arg13: memref<1x10xf32, #tpu.memory_space<vmem>>, %arg14: memref<16x10xf32, #tpu.memory_space<vmem>>, %arg15: memref<64x16xf32, #tpu.memory_space<vmem>>, %arg16: memref<128x64xbf16, #tpu.memory_space<vmem>>, %arg17: memref<128x64xbf16, #tpu.memory_space<vmem>>, %arg18: memref<128x64xbf16, #tpu.memory_space<vmem>>, %arg19: memref<128x64xbf16, #tpu.memory_space<vmem>>, %arg20: memref<256x128xbf16, #tpu.memory_space<vmem>>, %arg21: memref<256x128xbf16, #tpu.memory_space<vmem>>, %arg22: memref<128x64xbf16, #tpu.memory_space<vmem>>, %arg23: memref<128x64xbf16, #tpu.memory_space<vmem>>, %arg24: memref<16x32xbf16, #tpu.memory_space<vmem>>, %arg25: memref<16x32xbf16, #tpu.memory_space<vmem>>, %arg26: memref<8x16xbf16, #tpu.memory_space<vmem>>, %arg27: memref<8x16xbf16, #tpu.memory_space<vmem>>, %arg28: memref<1x128xf32, #tpu.memory_space<vmem>>, %arg29: memref<3x128x128xbf16, #tpu.memory_space<vmem>>, %arg30: memref<1x64xf32, #tpu.memory_space<vmem>>, %arg31: memref<3x64x64xbf16, #tpu.memory_space<vmem>>, %arg32: memref<1x256xf32, #tpu.memory_space<vmem>>, %arg33: memref<3x256x256xbf16, #tpu.memory_space<vmem>>, %arg34: memref<1x128xf32, #tpu.memory_space<vmem>>, %arg35: memref<3x128x128xbf16, #tpu.memory_space<vmem>>, %arg36: memref<1x128xf32, #tpu.memory_space<vmem>>, %arg37: memref<3x128x128xbf16, #tpu.memory_space<vmem>>, %arg38: memref<1x64xf32, #tpu.memory_space<vmem>>, %arg39: memref<3x64x64xbf16, #tpu.memory_space<vmem>>, %arg40: memref<1x256xf32, #tpu.memory_space<vmem>>, %arg41: memref<3x256x256xbf16, #tpu.memory_space<vmem>>, %arg42: memref<1x128xf32, #tpu.memory_space<vmem>>, %arg43: memref<3x128x128xbf16, #tpu.memory_space<vmem>>, %arg44: memref<128x256xbf16, #tpu.memory_space<vmem>>, %arg45: memref<32x16xbf16, #tpu.memory_space<vmem>>, %arg46: memref<64x128xbf16, #tpu.memory_space<vmem>>, %arg47: memref<16x8xbf16, #tpu.memory_space<vmem>>, %arg48: memref<3xf32, #tpu.memory_space<smem>>, %arg49: memref<2xf32, #tpu.memory_space<smem>>, %arg50: memref<2xf32, #tpu.memory_space<smem>>, %arg51: memref<2xf32, #tpu.memory_space<smem>>, %arg52: memref<3xf32, #tpu.memory_space<smem>>, %arg53: memref<2xf32, #tpu.memory_space<smem>>, %arg54: memref<2xf32, #tpu.memory_space<smem>>, %arg55: memref<2xf32, #tpu.memory_space<smem>>, %arg56: memref<32x64xbf16, #tpu.memory_space<vmem>>, %arg57: memref<2x10xf32, #tpu.memory_space<vmem>>, %arg58: memref<32x256xf32, #tpu.memory_space<vmem>>, %arg59: memref<16x128xf32, #tpu.memory_space<vmem>>, %arg60: memref<8x64xf32, #tpu.memory_space<vmem>>, %arg61: memref<34x64xbf16, #tpu.memory_space<vmem>>, %arg62: memref<18x64xbf16, #tpu.memory_space<vmem>>, %arg63: memref<10x64xbf16, #tpu.memory_space<vmem>>, %arg64: memref<34x256xbf16, #tpu.memory_space<vmem>>, %arg65: memref<18x128xbf16, #tpu.memory_space<vmem>>, %arg66: memref<10x64xbf16, #tpu.memory_space<vmem>>) attributes {dimension_semantics = [], scalar_prefetch = 0 : i64, scratch_operands = 6 : i64, tpu.core_type = #tpu.core_type<tc>} {
    %c0 = arith.constant 0 : index
    %c0_0 = arith.constant 0 : index
    %0 = vector.load %arg56[%c0, %c0_0] : memref<32x64xbf16, #tpu.memory_space<vmem>>, vector<32x64xbf16>
    %cst = arith.constant 0.000000e+00 : bf16
    %1 = vector.broadcast %cst : bf16 to vector<1x64xbf16>
    %c0_1 = arith.constant 0 : index
    %c0_2 = arith.constant 0 : index
    %2 = vector.load %arg61[%c0_1, %c0_2] : memref<34x64xbf16, #tpu.memory_space<vmem>>, vector<1x64xbf16>
    tpu.vector_store %arg61[%c0_1, %c0_2], %1 {strides = array<i32>} : memref<34x64xbf16, #tpu.memory_space<vmem>>, vector<1x64xbf16>,
    %c33 = arith.constant 33 : index
    %c0_3 = arith.constant 0 : index
    %3 = vector.load %arg61[%c33, %c0_3] : memref<34x64xbf16, #tpu.memory_space<vmem>>, vector<1x64xbf16>
    tpu.vector_store %arg61[%c33, %c0_3], %1 {strides = array<i32>} : memref<34x64xbf16, #tpu.memory_space<vmem>>, vector<1x64xbf16>,
    %c1 = arith.constant 1 : index
    %c0_4 = arith.constant 0 : index
    %4 = vector.load %arg61[%c1, %c0_4] : memref<34x64xbf16, #tpu.memory_space<vmem>>, vector<32x64xbf16>
    tpu.vector_store %arg61[%c1, %c0_4], %0 {strides = array<i32>} : memref<34x64xbf16, #tpu.memory_space<vmem>>, vector<32x64xbf16>,
    %5 = tpu.iota {dimensions = array<i32: 0>} : vector<32x1xi32>
    %c16_i32 = arith.constant 16 : i32
    %c0_i32 = arith.constant 0 : i32
    %6 = arith.cmpi eq, %c16_i32, %c0_i32 : i32
    %c1_i32 = arith.constant 1 : i32
    %7 = arith.select %6, %c1_i32, %c16_i32 : i32
    %8 = vector.broadcast %7 : i32 to vector<32x1xi32>
    %9 = arith.remsi %5, %8 : vector<32x1xi32>
    %c0_i32_5 = arith.constant 0 : i32
    %10 = vector.broadcast %c0_i32_5 : i32 to vector<32x1xi32>
    %11 = arith.cmpi ne, %9, %10 : vector<32x1xi32>
    %c0_i32_6 = arith.constant 0 : i32
    %12 = vector.broadcast %c0_i32_6 : i32 to vector<32x1xi32>
    %13 = arith.cmpi slt, %9, %12 : vector<32x1xi32>
    %c0_i32_7 = arith.constant 0 : i32
    %14 = arith.cmpi slt, %7, %c0_i32_7 : i32
    %15 = vector.broadcast %14 : i1 to vector<32x1xi1>
    %16 = vector.broadcast %15 : vector<32x1xi1> to vector<32x1xi1>
    %17 = arith.xori %13, %16 : vector<32x1xi1>
    %18 = arith.andi %17, %11 : vector<32x1xi1>
    %19 = vector.broadcast %7 : i32 to vector<32x1xi32>
    %20 = arith.addi %9, %19 : vector<32x1xi32>
    %21 = arith.select %18, %20, %9 : vector<32x1xi1>, vector<32x1xi32>
    %c0_i32_8 = arith.constant 0 : i32
    %22 = vector.broadcast %c0_i32_8 : i32 to vector<32x1xi32>
    %23 = arith.cmpi ne, %21, %22 : vector<32x1xi32>
    %c16_i32_9 = arith.constant 16 : i32
    %c0_i32_10 = arith.constant 0 : i32
    %24 = arith.cmpi eq, %c16_i32_9, %c0_i32_10 : i32
    %c1_i32_11 = arith.constant 1 : i32
    %25 = arith.select %24, %c1_i32_11, %c16_i32_9 : i32
    %26 = vector.broadcast %25 : i32 to vector<32x1xi32>
    %27 = arith.remsi %5, %26 : vector<32x1xi32>
    %c0_i32_12 = arith.constant 0 : i32
    %28 = vector.broadcast %c0_i32_12 : i32 to vector<32x1xi32>
    %29 = arith.cmpi ne, %27, %28 : vector<32x1xi32>
    %c0_i32_13 = arith.constant 0 : i32
    %30 = vector.broadcast %c0_i32_13 : i32 to vector<32x1xi32>
    %31 = arith.cmpi slt, %27, %30 : vector<32x1xi32>
    %c0_i32_14 = arith.constant 0 : i32
    %32 = arith.cmpi slt, %25, %c0_i32_14 : i32
    %33 = vector.broadcast %32 : i1 to vector<32x1xi1>
    %34 = vector.broadcast %33 : vector<32x1xi1> to vector<32x1xi1>
    %35 = arith.xori %31, %34 : vector<32x1xi1>
    %36 = arith.andi %35, %29 : vector<32x1xi1>
    %37 = vector.broadcast %25 : i32 to vector<32x1xi32>
    %38 = arith.addi %27, %37 : vector<32x1xi32>
    %39 = arith.select %36, %38, %27 : vector<32x1xi1>, vector<32x1xi32>
    %c15_i32 = arith.constant 15 : i32
    %40 = vector.broadcast %c15_i32 : i32 to vector<32x1xi32>
    %41 = arith.cmpi ne, %39, %40 : vector<32x1xi32>
    %c0_15 = arith.constant 0 : index
    %c0_16 = arith.constant 0 : index
    %42 = vector.load %arg61[%c0_15, %c0_16] : memref<34x64xbf16, #tpu.memory_space<vmem>>, vector<32x64xbf16>
    %cst_17 = arith.constant 0.000000e+00 : bf16
    %43 = vector.broadcast %cst_17 : bf16 to vector<32x64xbf16>
    %44 = vector.shape_cast %23 : vector<32x1xi1> to vector<32x1xi1>
    %45 = vector.broadcast %44 : vector<32x1xi1> to vector<32x64xi1>
    %46 = arith.select %45, %42, %43 : vector<32x64xi1>, vector<32x64xbf16>
    %c1_18 = arith.constant 1 : index
    %c0_19 = arith.constant 0 : index
    %47 = vector.load %arg61[%c1_18, %c0_19] : memref<34x64xbf16, #tpu.memory_space<vmem>>, vector<32x64xbf16>
    %c2 = arith.constant 2 : index
    %c0_20 = arith.constant 0 : index
    %48 = vector.load %arg61[%c2, %c0_20] : memref<34x64xbf16, #tpu.memory_space<vmem>>, vector<32x64xbf16>
    %cst_21 = arith.constant 0.000000e+00 : bf16
    %49 = vector.broadcast %cst_21 : bf16 to vector<32x64xbf16>
    %50 = vector.shape_cast %41 : vector<32x1xi1> to vector<32x1xi1>
    %51 = vector.broadcast %50 : vector<32x1xi1> to vector<32x64xi1>
    %52 = arith.select %51, %48, %49 : vector<32x64xi1>, vector<32x64xbf16>
    %c0_22 = arith.constant 0 : index
    %c0_23 = arith.constant 0 : index
    %c0_24 = arith.constant 0 : index
    %53 = vector.load %arg3[%c0_22, %c0_23, %c0_24] : memref<3x64x128xbf16, #tpu.memory_space<vmem>>, vector<1x64x128xbf16>
    %54 = vector.shape_cast %53 : vector<1x64x128xbf16> to vector<64x128xbf16>
    %cst_25 = arith.constant dense<0.000000e+00> : vector<32x128xf32>
    %55 = tpu.matmul %46, %54, %cst_25 {dimension_numbers = #tpu.dot_dimension_numbers<[1], [0], [0], [1], [0, 0, 1, 1], [], []>} : vector<32x64xbf16>, vector<64x128xbf16>, vector<32x128xf32> -> vector<32x128xf32>
    %c1_26 = arith.constant 1 : index
    %c0_27 = arith.constant 0 : index
    %c0_28 = arith.constant 0 : index
    %56 = vector.load %arg3[%c1_26, %c0_27, %c0_28] : memref<3x64x128xbf16, #tpu.memory_space<vmem>>, vector<1x64x128xbf16>
    %57 = vector.shape_cast %56 : vector<1x64x128xbf16> to vector<64x128xbf16>
    %cst_29 = arith.constant dense<0.000000e+00> : vector<32x128xf32>
    %58 = tpu.matmul %47, %57, %cst_29 {dimension_numbers = #tpu.dot_dimension_numbers<[1], [0], [0], [1], [0, 0, 1, 1], [], []>} : vector<32x64xbf16>, vector<64x128xbf16>, vector<32x128xf32> -> vector<32x128xf32>
    %59 = arith.addf %55, %58 : vector<32x128xf32>
    %c2_30 = arith.constant 2 : index
    %c0_31 = arith.constant 0 : index
    %c0_32 = arith.constant 0 : index
    %60 = vector.load %arg3[%c2_30, %c0_31, %c0_32] : memref<3x64x128xbf16, #tpu.memory_space<vmem>>, vector<1x64x128xbf16>
    %61 = vector.shape_cast %60 : vector<1x64x128xbf16> to vector<64x128xbf16>
    %cst_33 = arith.constant dense<0.000000e+00> : vector<32x128xf32>
    %62 = tpu.matmul %52, %61, %cst_33 {dimension_numbers = #tpu.dot_dimension_numbers<[1], [0], [0], [1], [0, 0, 1, 1], [], []>} : vector<32x64xbf16>, vector<64x128xbf16>, vector<32x128xf32> -> vector<32x128xf32>
    %63 = arith.addf %59, %62 : vector<32x128xf32>
    %c0_34 = arith.constant 0 : index
    %c0_35 = arith.constant 0 : index
    %64 = vector.load %arg0[%c0_34, %c0_35] : memref<1x128xf32, #tpu.memory_space<vmem>>, vector<1x128xf32>
    %65 = vector.broadcast %64 : vector<1x128xf32> to vector<32x128xf32>
    %66 = arith.addf %63, %65 : vector<32x128xf32>
    %cst_36 = arith.constant 0.000000e+00 : f32
    %67 = vector.broadcast %cst_36 : f32 to vector<32x128xf32>
    %68 = arith.maximumf %66, %67 : vector<32x128xf32>
    %69 = arith.truncf %68 : vector<32x128xf32> to vector<32x128xbf16>
    %c0_37 = arith.constant 0 : index
    %c0_38 = arith.constant 0 : index
    %70 = vector.load %arg2[%c0_37, %c0_38] : memref<128x256xbf16, #tpu.memory_space<vmem>>, vector<128x256xbf16>
    %cst_39 = arith.constant dense<0.000000e+00> : vector<32x256xf32>
    %71 = tpu.matmul %69, %70, %cst_39 {dimension_numbers = #tpu.dot_dimension_numbers<[1], [0], [0], [1], [0, 0, 1, 1], [], []>} : vector<32x128xbf16>, vector<128x256xbf16>, vector<32x256xf32> -> vector<32x256xf32>
    %c0_40 = arith.constant 0 : index
    %c0_41 = arith.constant 0 : index
    %72 = vector.load %arg1[%c0_40, %c0_41] : memref<1x256xf32, #tpu.memory_space<vmem>>, vector<1x256xf32>
    %73 = vector.broadcast %72 : vector<1x256xf32> to vector<32x256xf32>
    %74 = arith.addf %71, %73 : vector<32x256xf32>
    %75 = arith.truncf %74 : vector<32x256xf32> to vector<32x256xbf16>
    %c0_42 = arith.constant 0 : index
    %c0_43 = arith.constant 0 : index
    %76 = vector.load %arg24[%c0_42, %c0_43] : memref<16x32xbf16, #tpu.memory_space<vmem>>, vector<16x32xbf16>
    %c0_44 = arith.constant 0 : index
    %c0_45 = arith.constant 0 : index
    %77 = vector.load %arg25[%c0_44, %c0_45] : memref<16x32xbf16, #tpu.memory_space<vmem>>, vector<16x32xbf16>
    %c0_46 = arith.constant 0 : index
    %c0_47 = arith.constant 0 : index
    %78 = vector.load %arg16[%c0_46, %c0_47] : memref<128x64xbf16, #tpu.memory_space<vmem>>, vector<128x64xbf16>
    %c0_48 = arith.constant 0 : index
    %c0_49 = arith.constant 0 : index
    %79 = vector.load %arg17[%c0_48, %c0_49] : memref<128x64xbf16, #tpu.memory_space<vmem>>, vector<128x64xbf16>
    %cst_50 = arith.constant dense<0.000000e+00> : vector<16x128xf32>
    %80 = tpu.matmul %76, %69, %cst_50 {dimension_numbers = #tpu.dot_dimension_numbers<[1], [0], [0], [1], [0, 0, 1, 1], [], []>} : vector<16x32xbf16>, vector<32x128xbf16>, vector<16x128xf32> -> vector<16x128xf32>
    %cst_51 = arith.constant dense<0.000000e+00> : vector<16x128xf32>
    %81 = tpu.matmul %77, %69, %cst_51 {dimension_numbers = #tpu.dot_dimension_numbers<[1], [0], [0], [1], [0, 0, 1, 1], [], []>} : vector<16x32xbf16>, vector<32x128xbf16>, vector<16x128xf32> -> vector<16x128xf32>
    %82 = arith.maximumf %80, %81 : vector<16x128xf32>
    %83 = arith.truncf %82 : vector<16x128xf32> to vector<16x128xbf16>
    %cst_52 = arith.constant dense<0.000000e+00> : vector<16x64xf32>
    %84 = tpu.matmul %83, %78, %cst_52 {dimension_numbers = #tpu.dot_dimension_numbers<[1], [0], [0], [1], [0, 0, 1, 1], [], []>} : vector<16x128xbf16>, vector<128x64xbf16>, vector<16x64xf32> -> vector<16x64xf32>
    %cst_53 = arith.constant dense<0.000000e+00> : vector<16x64xf32>
    %85 = tpu.matmul %83, %79, %cst_53 {dimension_numbers = #tpu.dot_dimension_numbers<[1], [0], [0], [1], [0, 0, 1, 1], [], []>} : vector<16x128xbf16>, vector<128x64xbf16>, vector<16x64xf32> -> vector<16x64xf32>
    %86 = arith.maximumf %84, %85 : vector<16x64xf32>
    %87 = arith.truncf %86 : vector<16x64xf32> to vector<16x64xbf16>
    %cst_54 = arith.constant 0.000000e+00 : bf16
    %88 = vector.broadcast %cst_54 : bf16 to vector<1x64xbf16>
    %c0_55 = arith.constant 0 : index
    %c0_56 = arith.constant 0 : index
    %89 = vector.load %arg62[%c0_55, %c0_56] : memref<18x64xbf16, #tpu.memory_space<vmem>>, vector<1x64xbf16>
    tpu.vector_store %arg62[%c0_55, %c0_56], %88 {strides = array<i32>} : memref<18x64xbf16, #tpu.memory_space<vmem>>, vector<1x64xbf16>,
    %c17 = arith.constant 17 : index
    %c0_57 = arith.constant 0 : index
    %90 = vector.load %arg62[%c17, %c0_57] : memref<18x64xbf16, #tpu.memory_space<vmem>>, vector<1x64xbf16>
    tpu.vector_store %arg62[%c17, %c0_57], %88 {strides = array<i32>} : memref<18x64xbf16, #tpu.memory_space<vmem>>, vector<1x64xbf16>,
    %c1_58 = arith.constant 1 : index
    %c0_59 = arith.constant 0 : index
    %91 = vector.load %arg62[%c1_58, %c0_59] : memref<18x64xbf16, #tpu.memory_space<vmem>>, vector<16x64xbf16>
    tpu.vector_store %arg62[%c1_58, %c0_59], %87 {strides = array<i32>} : memref<18x64xbf16, #tpu.memory_space<vmem>>, vector<16x64xbf16>,
    %92 = tpu.iota {dimensions = array<i32: 0>} : vector<16x1xi32>
    %c8_i32 = arith.constant 8 : i32
    %c0_i32_60 = arith.constant 0 : i32
    %93 = arith.cmpi eq, %c8_i32, %c0_i32_60 : i32
    %c1_i32_61 = arith.constant 1 : i32
    %94 = arith.select %93, %c1_i32_61, %c8_i32 : i32
    %95 = vector.broadcast %94 : i32 to vector<16x1xi32>
    %96 = arith.remsi %92, %95 : vector<16x1xi32>
    %c0_i32_62 = arith.constant 0 : i32
    %97 = vector.broadcast %c0_i32_62 : i32 to vector<16x1xi32>
    %98 = arith.cmpi ne, %96, %97 : vector<16x1xi32>
    %c0_i32_63 = arith.constant 0 : i32
    %99 = vector.broadcast %c0_i32_63 : i32 to vector<16x1xi32>
    %100 = arith.cmpi slt, %96, %99 : vector<16x1xi32>
    %c0_i32_64 = arith.constant 0 : i32
    %101 = arith.cmpi slt, %94, %c0_i32_64 : i32
    %102 = vector.broadcast %101 : i1 to vector<16x1xi1>
    %103 = vector.broadcast %102 : vector<16x1xi1> to vector<16x1xi1>
    %104 = arith.xori %100, %103 : vector<16x1xi1>
    %105 = arith.andi %104, %98 : vector<16x1xi1>
    %106 = vector.broadcast %94 : i32 to vector<16x1xi32>
    %107 = arith.addi %96, %106 : vector<16x1xi32>
    %108 = arith.select %105, %107, %96 : vector<16x1xi1>, vector<16x1xi32>
    %c0_i32_65 = arith.constant 0 : i32
    %109 = vector.broadcast %c0_i32_65 : i32 to vector<16x1xi32>
    %110 = arith.cmpi ne, %108, %109 : vector<16x1xi32>
    %c8_i32_66 = arith.constant 8 : i32
    %c0_i32_67 = arith.constant 0 : i32
    %111 = arith.cmpi eq, %c8_i32_66, %c0_i32_67 : i32
    %c1_i32_68 = arith.constant 1 : i32
    %112 = arith.select %111, %c1_i32_68, %c8_i32_66 : i32
    %113 = vector.broadcast %112 : i32 to vector<16x1xi32>
    %114 = arith.remsi %92, %113 : vector<16x1xi32>
    %c0_i32_69 = arith.constant 0 : i32
    %115 = vector.broadcast %c0_i32_69 : i32 to vector<16x1xi32>
    %116 = arith.cmpi ne, %114, %115 : vector<16x1xi32>
    %c0_i32_70 = arith.constant 0 : i32
    %117 = vector.broadcast %c0_i32_70 : i32 to vector<16x1xi32>
    %118 = arith.cmpi slt, %114, %117 : vector<16x1xi32>
    %c0_i32_71 = arith.constant 0 : i32
    %119 = arith.cmpi slt, %112, %c0_i32_71 : i32
    %120 = vector.broadcast %119 : i1 to vector<16x1xi1>
    %121 = vector.broadcast %120 : vector<16x1xi1> to vector<16x1xi1>
    %122 = arith.xori %118, %121 : vector<16x1xi1>
    %123 = arith.andi %122, %116 : vector<16x1xi1>
    %124 = vector.broadcast %112 : i32 to vector<16x1xi32>
    %125 = arith.addi %114, %124 : vector<16x1xi32>
    %126 = arith.select %123, %125, %114 : vector<16x1xi1>, vector<16x1xi32>
    %c7_i32 = arith.constant 7 : i32
    %127 = vector.broadcast %c7_i32 : i32 to vector<16x1xi32>
    %128 = arith.cmpi ne, %126, %127 : vector<16x1xi32>
    %c0_72 = arith.constant 0 : index
    %c0_73 = arith.constant 0 : index
    %129 = vector.load %arg62[%c0_72, %c0_73] : memref<18x64xbf16, #tpu.memory_space<vmem>>, vector<16x64xbf16>
    %cst_74 = arith.constant 0.000000e+00 : bf16
    %130 = vector.broadcast %cst_74 : bf16 to vector<16x64xbf16>
    %131 = vector.shape_cast %110 : vector<16x1xi1> to vector<16x1xi1>
    %132 = vector.broadcast %131 : vector<16x1xi1> to vector<16x64xi1>
    %133 = arith.select %132, %129, %130 : vector<16x64xi1>, vector<16x64xbf16>
    %c1_75 = arith.constant 1 : index
    %c0_76 = arith.constant 0 : index
    %134 = vector.load %arg62[%c1_75, %c0_76] : memref<18x64xbf16, #tpu.memory_space<vmem>>, vector<16x64xbf16>
    %c2_77 = arith.constant 2 : index
    %c0_78 = arith.constant 0 : index
    %135 = vector.load %arg62[%c2_77, %c0_78] : memref<18x64xbf16, #tpu.memory_space<vmem>>, vector<16x64xbf16>
    %cst_79 = arith.constant 0.000000e+00 : bf16
    %136 = vector.broadcast %cst_79 : bf16 to vector<16x64xbf16>
    %137 = vector.shape_cast %128 : vector<16x1xi1> to vector<16x1xi1>
    %138 = vector.broadcast %137 : vector<16x1xi1> to vector<16x64xi1>
    %139 = arith.select %138, %135, %136 : vector<16x64xi1>, vector<16x64xbf16>
    %c0_80 = arith.constant 0 : index
    %c0_81 = arith.constant 0 : index
    %c0_82 = arith.constant 0 : index
    %140 = vector.load %arg7[%c0_80, %c0_81, %c0_82] : memref<3x64x128xbf16, #tpu.memory_space<vmem>>, vector<1x64x128xbf16>
    %141 = vector.shape_cast %140 : vector<1x64x128xbf16> to vector<64x128xbf16>
    %cst_83 = arith.constant dense<0.000000e+00> : vector<16x128xf32>
    %142 = tpu.matmul %133, %141, %cst_83 {dimension_numbers = #tpu.dot_dimension_numbers<[1], [0], [0], [1], [0, 0, 1, 1], [], []>} : vector<16x64xbf16>, vector<64x128xbf16>, vector<16x128xf32> -> vector<16x128xf32>
    %c1_84 = arith.constant 1 : index
    %c0_85 = arith.constant 0 : index
    %c0_86 = arith.constant 0 : index
    %143 = vector.load %arg7[%c1_84, %c0_85, %c0_86] : memref<3x64x128xbf16, #tpu.memory_space<vmem>>, vector<1x64x128xbf16>
    %144 = vector.shape_cast %143 : vector<1x64x128xbf16> to vector<64x128xbf16>
    %cst_87 = arith.constant dense<0.000000e+00> : vector<16x128xf32>
    %145 = tpu.matmul %134, %144, %cst_87 {dimension_numbers = #tpu.dot_dimension_numbers<[1], [0], [0], [1], [0, 0, 1, 1], [], []>} : vector<16x64xbf16>, vector<64x128xbf16>, vector<16x128xf32> -> vector<16x128xf32>
    %146 = arith.addf %142, %145 : vector<16x128xf32>
    %c2_88 = arith.constant 2 : index
    %c0_89 = arith.constant 0 : index
    %c0_90 = arith.constant 0 : index
    %147 = vector.load %arg7[%c2_88, %c0_89, %c0_90] : memref<3x64x128xbf16, #tpu.memory_space<vmem>>, vector<1x64x128xbf16>
    %148 = vector.shape_cast %147 : vector<1x64x128xbf16> to vector<64x128xbf16>
    %cst_91 = arith.constant dense<0.000000e+00> : vector<16x128xf32>
    %149 = tpu.matmul %139, %148, %cst_91 {dimension_numbers = #tpu.dot_dimension_numbers<[1], [0], [0], [1], [0, 0, 1, 1], [], []>} : vector<16x64xbf16>, vector<64x128xbf16>, vector<16x128xf32> -> vector<16x128xf32>
    %150 = arith.addf %146, %149 : vector<16x128xf32>
    %c0_92 = arith.constant 0 : index
    %c0_93 = arith.constant 0 : index
    %151 = vector.load %arg4[%c0_92, %c0_93] : memref<1x128xf32, #tpu.memory_space<vmem>>, vector<1x128xf32>
    %152 = vector.broadcast %151 : vector<1x128xf32> to vector<16x128xf32>
    %153 = arith.addf %150, %152 : vector<16x128xf32>
    %cst_94 = arith.constant 0.000000e+00 : f32
    %154 = vector.broadcast %cst_94 : f32 to vector<16x128xf32>
    %155 = arith.maximumf %153, %154 : vector<16x128xf32>
    %156 = arith.truncf %155 : vector<16x128xf32> to vector<16x128xbf16>
    %c0_95 = arith.constant 0 : index
    %c0_96 = arith.constant 0 : index
    %157 = vector.load %arg6[%c0_95, %c0_96] : memref<128x128xbf16, #tpu.memory_space<vmem>>, vector<128x128xbf16>
    %cst_97 = arith.constant dense<0.000000e+00> : vector<16x128xf32>
    %158 = tpu.matmul %156, %157, %cst_97 {dimension_numbers = #tpu.dot_dimension_numbers<[1], [0], [0], [1], [0, 0, 1, 1], [], []>} : vector<16x128xbf16>, vector<128x128xbf16>, vector<16x128xf32> -> vector<16x128xf32>
    %c0_98 = arith.constant 0 : index
    %c0_99 = arith.constant 0 : index
    %159 = vector.load %arg5[%c0_98, %c0_99] : memref<1x128xf32, #tpu.memory_space<vmem>>, vector<1x128xf32>
    %160 = vector.broadcast %159 : vector<1x128xf32> to vector<16x128xf32>
    %161 = arith.addf %158, %160 : vector<16x128xf32>
    %162 = arith.truncf %161 : vector<16x128xf32> to vector<16x128xbf16>
    %c0_100 = arith.constant 0 : index
    %c0_101 = arith.constant 0 : index
    %163 = vector.load %arg26[%c0_100, %c0_101] : memref<8x16xbf16, #tpu.memory_space<vmem>>, vector<8x16xbf16>
    %c0_102 = arith.constant 0 : index
    %c0_103 = arith.constant 0 : index
    %164 = vector.load %arg27[%c0_102, %c0_103] : memref<8x16xbf16, #tpu.memory_space<vmem>>, vector<8x16xbf16>
    %c0_104 = arith.constant 0 : index
    %c0_105 = arith.constant 0 : index
    %165 = vector.load %arg18[%c0_104, %c0_105] : memref<128x64xbf16, #tpu.memory_space<vmem>>, vector<128x64xbf16>
    %c0_106 = arith.constant 0 : index
    %c0_107 = arith.constant 0 : index
    %166 = vector.load %arg19[%c0_106, %c0_107] : memref<128x64xbf16, #tpu.memory_space<vmem>>, vector<128x64xbf16>
    %cst_108 = arith.constant dense<0.000000e+00> : vector<8x128xf32>
    %167 = tpu.matmul %163, %156, %cst_108 {dimension_numbers = #tpu.dot_dimension_numbers<[1], [0], [0], [1], [0, 0, 1, 1], [], []>} : vector<8x16xbf16>, vector<16x128xbf16>, vector<8x128xf32> -> vector<8x128xf32>
    %cst_109 = arith.constant dense<0.000000e+00> : vector<8x128xf32>
    %168 = tpu.matmul %164, %156, %cst_109 {dimension_numbers = #tpu.dot_dimension_numbers<[1], [0], [0], [1], [0, 0, 1, 1], [], []>} : vector<8x16xbf16>, vector<16x128xbf16>, vector<8x128xf32> -> vector<8x128xf32>
    %169 = arith.maximumf %167, %168 : vector<8x128xf32>
    %170 = arith.truncf %169 : vector<8x128xf32> to vector<8x128xbf16>
    %cst_110 = arith.constant dense<0.000000e+00> : vector<8x64xf32>
    %171 = tpu.matmul %170, %165, %cst_110 {dimension_numbers = #tpu.dot_dimension_numbers<[1], [0], [0], [1], [0, 0, 1, 1], [], []>} : vector<8x128xbf16>, vector<128x64xbf16>, vector<8x64xf32> -> vector<8x64xf32>
    %cst_111 = arith.constant dense<0.000000e+00> : vector<8x64xf32>
    %172 = tpu.matmul %170, %166, %cst_111 {dimension_numbers = #tpu.dot_dimension_numbers<[1], [0], [0], [1], [0, 0, 1, 1], [], []>} : vector<8x128xbf16>, vector<128x64xbf16>, vector<8x64xf32> -> vector<8x64xf32>
    %173 = arith.maximumf %171, %172 : vector<8x64xf32>
    %174 = arith.truncf %173 : vector<8x64xf32> to vector<8x64xbf16>
    %cst_112 = arith.constant 0.000000e+00 : bf16
    %175 = vector.broadcast %cst_112 : bf16 to vector<1x64xbf16>
    %c0_113 = arith.constant 0 : index
    %c0_114 = arith.constant 0 : index
    %176 = vector.load %arg63[%c0_113, %c0_114] : memref<10x64xbf16, #tpu.memory_space<vmem>>, vector<1x64xbf16>
    tpu.vector_store %arg63[%c0_113, %c0_114], %175 {strides = array<i32>} : memref<10x64xbf16, #tpu.memory_space<vmem>>, vector<1x64xbf16>,
    %c9 = arith.constant 9 : index
    %c0_115 = arith.constant 0 : index
    %177 = vector.load %arg63[%c9, %c0_115] : memref<10x64xbf16, #tpu.memory_space<vmem>>, vector<1x64xbf16>
    tpu.vector_store %arg63[%c9, %c0_115], %175 {strides = array<i32>} : memref<10x64xbf16, #tpu.memory_space<vmem>>, vector<1x64xbf16>,
    %c1_116 = arith.constant 1 : index
    %c0_117 = arith.constant 0 : index
    %178 = vector.load %arg63[%c1_116, %c0_117] : memref<10x64xbf16, #tpu.memory_space<vmem>>, vector<8x64xbf16>
    tpu.vector_store %arg63[%c1_116, %c0_117], %174 {strides = array<i32>} : memref<10x64xbf16, #tpu.memory_space<vmem>>, vector<8x64xbf16>,
    %179 = tpu.iota {dimensions = array<i32: 0>} : vector<8x1xi32>
    %c4_i32 = arith.constant 4 : i32
    %c0_i32_118 = arith.constant 0 : i32
    %180 = arith.cmpi eq, %c4_i32, %c0_i32_118 : i32
    %c1_i32_119 = arith.constant 1 : i32
    %181 = arith.select %180, %c1_i32_119, %c4_i32 : i32
    %182 = vector.broadcast %181 : i32 to vector<8x1xi32>
    %183 = arith.remsi %179, %182 : vector<8x1xi32>
    %c0_i32_120 = arith.constant 0 : i32
    %184 = vector.broadcast %c0_i32_120 : i32 to vector<8x1xi32>
    %185 = arith.cmpi ne, %183, %184 : vector<8x1xi32>
    %c0_i32_121 = arith.constant 0 : i32
    %186 = vector.broadcast %c0_i32_121 : i32 to vector<8x1xi32>
    %187 = arith.cmpi slt, %183, %186 : vector<8x1xi32>
    %c0_i32_122 = arith.constant 0 : i32
    %188 = arith.cmpi slt, %181, %c0_i32_122 : i32
    %189 = vector.broadcast %188 : i1 to vector<8x1xi1>
    %190 = vector.broadcast %189 : vector<8x1xi1> to vector<8x1xi1>
    %191 = arith.xori %187, %190 : vector<8x1xi1>
    %192 = arith.andi %191, %185 : vector<8x1xi1>
    %193 = vector.broadcast %181 : i32 to vector<8x1xi32>
    %194 = arith.addi %183, %193 : vector<8x1xi32>
    %195 = arith.select %192, %194, %183 : vector<8x1xi1>, vector<8x1xi32>
    %c0_i32_123 = arith.constant 0 : i32
    %196 = vector.broadcast %c0_i32_123 : i32 to vector<8x1xi32>
    %197 = arith.cmpi ne, %195, %196 : vector<8x1xi32>
    %c4_i32_124 = arith.constant 4 : i32
    %c0_i32_125 = arith.constant 0 : i32
    %198 = arith.cmpi eq, %c4_i32_124, %c0_i32_125 : i32
    %c1_i32_126 = arith.constant 1 : i32
    %199 = arith.select %198, %c1_i32_126, %c4_i32_124 : i32
    %200 = vector.broadcast %199 : i32 to vector<8x1xi32>
    %201 = arith.remsi %179, %200 : vector<8x1xi32>
    %c0_i32_127 = arith.constant 0 : i32
    %202 = vector.broadcast %c0_i32_127 : i32 to vector<8x1xi32>
    %203 = arith.cmpi ne, %201, %202 : vector<8x1xi32>
    %c0_i32_128 = arith.constant 0 : i32
    %204 = vector.broadcast %c0_i32_128 : i32 to vector<8x1xi32>
    %205 = arith.cmpi slt, %201, %204 : vector<8x1xi32>
    %c0_i32_129 = arith.constant 0 : i32
    %206 = arith.cmpi slt, %199, %c0_i32_129 : i32
    %207 = vector.broadcast %206 : i1 to vector<8x1xi1>
    %208 = vector.broadcast %207 : vector<8x1xi1> to vector<8x1xi1>
    %209 = arith.xori %205, %208 : vector<8x1xi1>
    %210 = arith.andi %209, %203 : vector<8x1xi1>
    %211 = vector.broadcast %199 : i32 to vector<8x1xi32>
    %212 = arith.addi %201, %211 : vector<8x1xi32>
    %213 = arith.select %210, %212, %201 : vector<8x1xi1>, vector<8x1xi32>
    %c3_i32 = arith.constant 3 : i32
    %214 = vector.broadcast %c3_i32 : i32 to vector<8x1xi32>
    %215 = arith.cmpi ne, %213, %214 : vector<8x1xi32>
    %c0_130 = arith.constant 0 : index
    %c0_131 = arith.constant 0 : index
    %216 = vector.load %arg63[%c0_130, %c0_131] : memref<10x64xbf16, #tpu.memory_space<vmem>>, vector<8x64xbf16>
    %cst_132 = arith.constant 0.000000e+00 : bf16
    %217 = vector.broadcast %cst_132 : bf16 to vector<8x64xbf16>
    %218 = vector.shape_cast %197 : vector<8x1xi1> to vector<8x1xi1>
    %219 = vector.broadcast %218 : vector<8x1xi1> to vector<8x64xi1>
    %220 = arith.select %219, %216, %217 : vector<8x64xi1>, vector<8x64xbf16>
    %c1_133 = arith.constant 1 : index
    %c0_134 = arith.constant 0 : index
    %221 = vector.load %arg63[%c1_133, %c0_134] : memref<10x64xbf16, #tpu.memory_space<vmem>>, vector<8x64xbf16>
    %c2_135 = arith.constant 2 : index
    %c0_136 = arith.constant 0 : index
    %222 = vector.load %arg63[%c2_135, %c0_136] : memref<10x64xbf16, #tpu.memory_space<vmem>>, vector<8x64xbf16>
    %cst_137 = arith.constant 0.000000e+00 : bf16
    %223 = vector.broadcast %cst_137 : bf16 to vector<8x64xbf16>
    %224 = vector.shape_cast %215 : vector<8x1xi1> to vector<8x1xi1>
    %225 = vector.broadcast %224 : vector<8x1xi1> to vector<8x64xi1>
    %226 = arith.select %225, %222, %223 : vector<8x64xi1>, vector<8x64xbf16>
    %c0_138 = arith.constant 0 : index
    %c0_139 = arith.constant 0 : index
    %c0_140 = arith.constant 0 : index
    %227 = vector.load %arg11[%c0_138, %c0_139, %c0_140] : memref<3x64x128xbf16, #tpu.memory_space<vmem>>, vector<1x64x128xbf16>
    %228 = vector.shape_cast %227 : vector<1x64x128xbf16> to vector<64x128xbf16>
    %cst_141 = arith.constant dense<0.000000e+00> : vector<8x128xf32>
    %229 = tpu.matmul %220, %228, %cst_141 {dimension_numbers = #tpu.dot_dimension_numbers<[1], [0], [0], [1], [0, 0, 1, 1], [], []>} : vector<8x64xbf16>, vector<64x128xbf16>, vector<8x128xf32> -> vector<8x128xf32>
    %c1_142 = arith.constant 1 : index
    %c0_143 = arith.constant 0 : index
    %c0_144 = arith.constant 0 : index
    %230 = vector.load %arg11[%c1_142, %c0_143, %c0_144] : memref<3x64x128xbf16, #tpu.memory_space<vmem>>, vector<1x64x128xbf16>
    %231 = vector.shape_cast %230 : vector<1x64x128xbf16> to vector<64x128xbf16>
    %cst_145 = arith.constant dense<0.000000e+00> : vector<8x128xf32>
    %232 = tpu.matmul %221, %231, %cst_145 {dimension_numbers = #tpu.dot_dimension_numbers<[1], [0], [0], [1], [0, 0, 1, 1], [], []>} : vector<8x64xbf16>, vector<64x128xbf16>, vector<8x128xf32> -> vector<8x128xf32>
    %233 = arith.addf %229, %232 : vector<8x128xf32>
    %c2_146 = arith.constant 2 : index
    %c0_147 = arith.constant 0 : index
    %c0_148 = arith.constant 0 : index
    %234 = vector.load %arg11[%c2_146, %c0_147, %c0_148] : memref<3x64x128xbf16, #tpu.memory_space<vmem>>, vector<1x64x128xbf16>
    %235 = vector.shape_cast %234 : vector<1x64x128xbf16> to vector<64x128xbf16>
    %cst_149 = arith.constant dense<0.000000e+00> : vector<8x128xf32>
    %236 = tpu.matmul %226, %235, %cst_149 {dimension_numbers = #tpu.dot_dimension_numbers<[1], [0], [0], [1], [0, 0, 1, 1], [], []>} : vector<8x64xbf16>, vector<64x128xbf16>, vector<8x128xf32> -> vector<8x128xf32>
    %237 = arith.addf %233, %236 : vector<8x128xf32>
    %c0_150 = arith.constant 0 : index
    %c0_151 = arith.constant 0 : index
    %238 = vector.load %arg8[%c0_150, %c0_151] : memref<1x128xf32, #tpu.memory_space<vmem>>, vector<1x128xf32>
    %239 = vector.broadcast %238 : vector<1x128xf32> to vector<8x128xf32>
    %240 = arith.addf %237, %239 : vector<8x128xf32>
    %cst_152 = arith.constant 0.000000e+00 : f32
    %241 = vector.broadcast %cst_152 : f32 to vector<8x128xf32>
    %242 = arith.maximumf %240, %241 : vector<8x128xf32>
    %243 = arith.truncf %242 : vector<8x128xf32> to vector<8x128xbf16>
    %c0_153 = arith.constant 0 : index
    %c0_154 = arith.constant 0 : index
    %244 = vector.load %arg10[%c0_153, %c0_154] : memref<128x64xbf16, #tpu.memory_space<vmem>>, vector<128x64xbf16>
    %cst_155 = arith.constant dense<0.000000e+00> : vector<8x64xf32>
    %245 = tpu.matmul %243, %244, %cst_155 {dimension_numbers = #tpu.dot_dimension_numbers<[1], [0], [0], [1], [0, 0, 1, 1], [], []>} : vector<8x128xbf16>, vector<128x64xbf16>, vector<8x64xf32> -> vector<8x64xf32>
    %c0_156 = arith.constant 0 : index
    %c0_157 = arith.constant 0 : index
    %246 = vector.load %arg9[%c0_156, %c0_157] : memref<1x64xf32, #tpu.memory_space<vmem>>, vector<1x64xf32>
    %247 = vector.broadcast %246 : vector<1x64xf32> to vector<8x64xf32>
    %248 = arith.addf %245, %247 : vector<8x64xf32>
    %249 = arith.truncf %248 : vector<8x64xf32> to vector<8x64xbf16>
    %c0_158 = arith.constant 0 : index
    %c0_159 = arith.constant 0 : index
    %250 = vector.load %arg47[%c0_158, %c0_159] : memref<16x8xbf16, #tpu.memory_space<vmem>>, vector<16x8xbf16>
    %c0_160 = arith.constant 0 : index
    %c0_161 = arith.constant 0 : index
    %251 = vector.load %arg46[%c0_160, %c0_161] : memref<64x128xbf16, #tpu.memory_space<vmem>>, vector<64x128xbf16>
    %cst_162 = arith.constant dense<0.000000e+00> : vector<8x128xf32>
    %252 = tpu.matmul %249, %251, %cst_162 {dimension_numbers = #tpu.dot_dimension_numbers<[1], [0], [0], [1], [0, 0, 1, 1], [], []>} : vector<8x64xbf16>, vector<64x128xbf16>, vector<8x128xf32> -> vector<8x128xf32>
    %253 = arith.truncf %252 : vector<8x128xf32> to vector<8x128xbf16>
    %cst_163 = arith.constant dense<0.000000e+00> : vector<16x128xf32>
    %254 = tpu.matmul %250, %253, %cst_163 {dimension_numbers = #tpu.dot_dimension_numbers<[1], [0], [0], [1], [0, 0, 1, 1], [], []>} : vector<16x8xbf16>, vector<8x128xbf16>, vector<16x128xf32> -> vector<16x128xf32>
    %c0_164 = arith.constant 0 : index
    %255 = memref.load %arg51[%c0_164] : memref<2xf32, #tpu.memory_space<smem>>
    %256 = arith.extf %162 : vector<16x128xbf16> to vector<16x128xf32>
    %257 = vector.broadcast %255 : f32 to vector<16x128xf32>
    %258 = arith.mulf %257, %256 : vector<16x128xf32>
    %c1_165 = arith.constant 1 : index
    %259 = memref.load %arg51[%c1_165] : memref<2xf32, #tpu.memory_space<smem>>
    %260 = vector.broadcast %259 : f32 to vector<16x128xf32>
    %261 = arith.mulf %260, %254 : vector<16x128xf32>
    %262 = arith.addf %258, %261 : vector<16x128xf32>
    %263 = arith.truncf %262 : vector<16x128xf32> to vector<16x128xbf16>
    %cst_166 = arith.constant 0.000000e+00 : bf16
    %264 = vector.broadcast %cst_166 : bf16 to vector<1x128xbf16>
    %c0_167 = arith.constant 0 : index
    %c0_168 = arith.constant 0 : index
    %265 = vector.load %arg65[%c0_167, %c0_168] : memref<18x128xbf16, #tpu.memory_space<vmem>>, vector<1x128xbf16>
    tpu.vector_store %arg65[%c0_167, %c0_168], %264 {strides = array<i32>} : memref<18x128xbf16, #tpu.memory_space<vmem>>, vector<1x128xbf16>,
    %c17_169 = arith.constant 17 : index
    %c0_170 = arith.constant 0 : index
    %266 = vector.load %arg65[%c17_169, %c0_170] : memref<18x128xbf16, #tpu.memory_space<vmem>>, vector<1x128xbf16>
    tpu.vector_store %arg65[%c17_169, %c0_170], %264 {strides = array<i32>} : memref<18x128xbf16, #tpu.memory_space<vmem>>, vector<1x128xbf16>,
    %c1_171 = arith.constant 1 : index
    %c0_172 = arith.constant 0 : index
    %267 = vector.load %arg65[%c1_171, %c0_172] : memref<18x128xbf16, #tpu.memory_space<vmem>>, vector<16x128xbf16>
    tpu.vector_store %arg65[%c1_171, %c0_172], %263 {strides = array<i32>} : memref<18x128xbf16, #tpu.memory_space<vmem>>, vector<16x128xbf16>,
    %268 = tpu.iota {dimensions = array<i32: 0>} : vector<16x1xi32>
    %c8_i32_173 = arith.constant 8 : i32
    %c0_i32_174 = arith.constant 0 : i32
    %269 = arith.cmpi eq, %c8_i32_173, %c0_i32_174 : i32
    %c1_i32_175 = arith.constant 1 : i32
    %270 = arith.select %269, %c1_i32_175, %c8_i32_173 : i32
    %271 = vector.broadcast %270 : i32 to vector<16x1xi32>
    %272 = arith.remsi %268, %271 : vector<16x1xi32>
    %c0_i32_176 = arith.constant 0 : i32
    %273 = vector.broadcast %c0_i32_176 : i32 to vector<16x1xi32>
    %274 = arith.cmpi ne, %272, %273 : vector<16x1xi32>
    %c0_i32_177 = arith.constant 0 : i32
    %275 = vector.broadcast %c0_i32_177 : i32 to vector<16x1xi32>
    %276 = arith.cmpi slt, %272, %275 : vector<16x1xi32>
    %c0_i32_178 = arith.constant 0 : i32
    %277 = arith.cmpi slt, %270, %c0_i32_178 : i32
    %278 = vector.broadcast %277 : i1 to vector<16x1xi1>
    %279 = vector.broadcast %278 : vector<16x1xi1> to vector<16x1xi1>
    %280 = arith.xori %276, %279 : vector<16x1xi1>
    %281 = arith.andi %280, %274 : vector<16x1xi1>
    %282 = vector.broadcast %270 : i32 to vector<16x1xi32>
    %283 = arith.addi %272, %282 : vector<16x1xi32>
    %284 = arith.select %281, %283, %272 : vector<16x1xi1>, vector<16x1xi32>
    %c0_i32_179 = arith.constant 0 : i32
    %285 = vector.broadcast %c0_i32_179 : i32 to vector<16x1xi32>
    %286 = arith.cmpi ne, %284, %285 : vector<16x1xi32>
    %c8_i32_180 = arith.constant 8 : i32
    %c0_i32_181 = arith.constant 0 : i32
    %287 = arith.cmpi eq, %c8_i32_180, %c0_i32_181 : i32
    %c1_i32_182 = arith.constant 1 : i32
    %288 = arith.select %287, %c1_i32_182, %c8_i32_180 : i32
    %289 = vector.broadcast %288 : i32 to vector<16x1xi32>
    %290 = arith.remsi %268, %289 : vector<16x1xi32>
    %c0_i32_183 = arith.constant 0 : i32
    %291 = vector.broadcast %c0_i32_183 : i32 to vector<16x1xi32>
    %292 = arith.cmpi ne, %290, %291 : vector<16x1xi32>
    %c0_i32_184 = arith.constant 0 : i32
    %293 = vector.broadcast %c0_i32_184 : i32 to vector<16x1xi32>
    %294 = arith.cmpi slt, %290, %293 : vector<16x1xi32>
    %c0_i32_185 = arith.constant 0 : i32
    %295 = arith.cmpi slt, %288, %c0_i32_185 : i32
    %296 = vector.broadcast %295 : i1 to vector<16x1xi1>
    %297 = vector.broadcast %296 : vector<16x1xi1> to vector<16x1xi1>
    %298 = arith.xori %294, %297 : vector<16x1xi1>
    %299 = arith.andi %298, %292 : vector<16x1xi1>
    %300 = vector.broadcast %288 : i32 to vector<16x1xi32>
    %301 = arith.addi %290, %300 : vector<16x1xi32>
    %302 = arith.select %299, %301, %290 : vector<16x1xi1>, vector<16x1xi32>
    %c7_i32_186 = arith.constant 7 : i32
    %303 = vector.broadcast %c7_i32_186 : i32 to vector<16x1xi32>
    %304 = arith.cmpi ne, %302, %303 : vector<16x1xi32>
    %c0_187 = arith.constant 0 : index
    %c0_188 = arith.constant 0 : index
    %305 = vector.load %arg65[%c0_187, %c0_188] : memref<18x128xbf16, #tpu.memory_space<vmem>>, vector<16x128xbf16>
    %cst_189 = arith.constant 0.000000e+00 : bf16
    %306 = vector.broadcast %cst_189 : bf16 to vector<16x128xbf16>
    %307 = vector.shape_cast %286 : vector<16x1xi1> to vector<16x1xi1>
    %308 = vector.broadcast %307 : vector<16x1xi1> to vector<16x128xi1>
    %309 = arith.select %308, %305, %306 : vector<16x128xi1>, vector<16x128xbf16>
    %c1_190 = arith.constant 1 : index
    %c0_191 = arith.constant 0 : index
    %310 = vector.load %arg65[%c1_190, %c0_191] : memref<18x128xbf16, #tpu.memory_space<vmem>>, vector<16x128xbf16>
    %c2_192 = arith.constant 2 : index
    %c0_193 = arith.constant 0 : index
    %311 = vector.load %arg65[%c2_192, %c0_193] : memref<18x128xbf16, #tpu.memory_space<vmem>>, vector<16x128xbf16>
    %cst_194 = arith.constant 0.000000e+00 : bf16
    %312 = vector.broadcast %cst_194 : bf16 to vector<16x128xbf16>
    %313 = vector.shape_cast %304 : vector<16x1xi1> to vector<16x1xi1>
    %314 = vector.broadcast %313 : vector<16x1xi1> to vector<16x128xi1>
    %315 = arith.select %314, %311, %312 : vector<16x128xi1>, vector<16x128xbf16>
    %c0_195 = arith.constant 0 : index
    %c0_196 = arith.constant 0 : index
    %c0_197 = arith.constant 0 : index
    %316 = vector.load %arg35[%c0_195, %c0_196, %c0_197] : memref<3x128x128xbf16, #tpu.memory_space<vmem>>, vector<1x128x128xbf16>
    %317 = vector.shape_cast %316 : vector<1x128x128xbf16> to vector<128x128xbf16>
    %cst_198 = arith.constant dense<0.000000e+00> : vector<16x128xf32>
    %318 = tpu.matmul %309, %317, %cst_198 {dimension_numbers = #tpu.dot_dimension_numbers<[1], [0], [0], [1], [0, 0, 1, 1], [], []>} : vector<16x128xbf16>, vector<128x128xbf16>, vector<16x128xf32> -> vector<16x128xf32>
    %c1_199 = arith.constant 1 : index
    %c0_200 = arith.constant 0 : index
    %c0_201 = arith.constant 0 : index
    %319 = vector.load %arg35[%c1_199, %c0_200, %c0_201] : memref<3x128x128xbf16, #tpu.memory_space<vmem>>, vector<1x128x128xbf16>
    %320 = vector.shape_cast %319 : vector<1x128x128xbf16> to vector<128x128xbf16>
    %cst_202 = arith.constant dense<0.000000e+00> : vector<16x128xf32>
    %321 = tpu.matmul %310, %320, %cst_202 {dimension_numbers = #tpu.dot_dimension_numbers<[1], [0], [0], [1], [0, 0, 1, 1], [], []>} : vector<16x128xbf16>, vector<128x128xbf16>, vector<16x128xf32> -> vector<16x128xf32>
    %322 = arith.addf %318, %321 : vector<16x128xf32>
    %c2_203 = arith.constant 2 : index
    %c0_204 = arith.constant 0 : index
    %c0_205 = arith.constant 0 : index
    %323 = vector.load %arg35[%c2_203, %c0_204, %c0_205] : memref<3x128x128xbf16, #tpu.memory_space<vmem>>, vector<1x128x128xbf16>
    %324 = vector.shape_cast %323 : vector<1x128x128xbf16> to vector<128x128xbf16>
    %cst_206 = arith.constant dense<0.000000e+00> : vector<16x128xf32>
    %325 = tpu.matmul %315, %324, %cst_206 {dimension_numbers = #tpu.dot_dimension_numbers<[1], [0], [0], [1], [0, 0, 1, 1], [], []>} : vector<16x128xbf16>, vector<128x128xbf16>, vector<16x128xf32> -> vector<16x128xf32>
    %326 = arith.addf %322, %325 : vector<16x128xf32>
    %c0_207 = arith.constant 0 : index
    %c0_208 = arith.constant 0 : index
    %327 = vector.load %arg34[%c0_207, %c0_208] : memref<1x128xf32, #tpu.memory_space<vmem>>, vector<1x128xf32>
    %328 = vector.broadcast %327 : vector<1x128xf32> to vector<16x128xf32>
    %329 = arith.addf %326, %328 : vector<16x128xf32>
    %cst_209 = arith.constant 0.000000e+00 : f32
    %330 = vector.broadcast %cst_209 : f32 to vector<16x128xf32>
    %331 = arith.maximumf %329, %330 : vector<16x128xf32>
    %332 = arith.truncf %331 : vector<16x128xf32> to vector<16x128xbf16>
    %c0_210 = arith.constant 0 : index
    %c0_211 = arith.constant 0 : index
    %333 = vector.load %arg45[%c0_210, %c0_211] : memref<32x16xbf16, #tpu.memory_space<vmem>>, vector<32x16xbf16>
    %c0_212 = arith.constant 0 : index
    %c0_213 = arith.constant 0 : index
    %334 = vector.load %arg44[%c0_212, %c0_213] : memref<128x256xbf16, #tpu.memory_space<vmem>>, vector<128x256xbf16>
    %cst_214 = arith.constant dense<0.000000e+00> : vector<16x256xf32>
    %335 = tpu.matmul %332, %334, %cst_214 {dimension_numbers = #tpu.dot_dimension_numbers<[1], [0], [0], [1], [0, 0, 1, 1], [], []>} : vector<16x128xbf16>, vector<128x256xbf16>, vector<16x256xf32> -> vector<16x256xf32>
    %336 = arith.truncf %335 : vector<16x256xf32> to vector<16x256xbf16>
    %cst_215 = arith.constant dense<0.000000e+00> : vector<32x256xf32>
    %337 = tpu.matmul %333, %336, %cst_215 {dimension_numbers = #tpu.dot_dimension_numbers<[1], [0], [0], [1], [0, 0, 1, 1], [], []>} : vector<32x16xbf16>, vector<16x256xbf16>, vector<32x256xf32> -> vector<32x256xf32>
    %c0_216 = arith.constant 0 : index
    %338 = memref.load %arg50[%c0_216] : memref<2xf32, #tpu.memory_space<smem>>
    %339 = arith.extf %75 : vector<32x256xbf16> to vector<32x256xf32>
    %340 = vector.broadcast %338 : f32 to vector<32x256xf32>
    %341 = arith.mulf %340, %339 : vector<32x256xf32>
    %c1_217 = arith.constant 1 : index
    %342 = memref.load %arg50[%c1_217] : memref<2xf32, #tpu.memory_space<smem>>
    %343 = vector.broadcast %342 : f32 to vector<32x256xf32>
    %344 = arith.mulf %343, %337 : vector<32x256xf32>
    %345 = arith.addf %341, %344 : vector<32x256xf32>
    %346 = arith.truncf %345 : vector<32x256xf32> to vector<32x256xbf16>
    %cst_218 = arith.constant 0.000000e+00 : bf16
    %347 = vector.broadcast %cst_218 : bf16 to vector<1x256xbf16>
    %c0_219 = arith.constant 0 : index
    %c0_220 = arith.constant 0 : index
    %348 = vector.load %arg64[%c0_219, %c0_220] : memref<34x256xbf16, #tpu.memory_space<vmem>>, vector<1x256xbf16>
    tpu.vector_store %arg64[%c0_219, %c0_220], %347 {strides = array<i32>} : memref<34x256xbf16, #tpu.memory_space<vmem>>, vector<1x256xbf16>,
    %c33_221 = arith.constant 33 : index
    %c0_222 = arith.constant 0 : index
    %349 = vector.load %arg64[%c33_221, %c0_222] : memref<34x256xbf16, #tpu.memory_space<vmem>>, vector<1x256xbf16>
    tpu.vector_store %arg64[%c33_221, %c0_222], %347 {strides = array<i32>} : memref<34x256xbf16, #tpu.memory_space<vmem>>, vector<1x256xbf16>,
    %c1_223 = arith.constant 1 : index
    %c0_224 = arith.constant 0 : index
    %350 = vector.load %arg64[%c1_223, %c0_224] : memref<34x256xbf16, #tpu.memory_space<vmem>>, vector<32x256xbf16>
    tpu.vector_store %arg64[%c1_223, %c0_224], %346 {strides = array<i32>} : memref<34x256xbf16, #tpu.memory_space<vmem>>, vector<32x256xbf16>,
    %351 = tpu.iota {dimensions = array<i32: 0>} : vector<32x1xi32>
    %c16_i32_225 = arith.constant 16 : i32
    %c0_i32_226 = arith.constant 0 : i32
    %352 = arith.cmpi eq, %c16_i32_225, %c0_i32_226 : i32
    %c1_i32_227 = arith.constant 1 : i32
    %353 = arith.select %352, %c1_i32_227, %c16_i32_225 : i32
    %354 = vector.broadcast %353 : i32 to vector<32x1xi32>
    %355 = arith.remsi %351, %354 : vector<32x1xi32>
    %c0_i32_228 = arith.constant 0 : i32
    %356 = vector.broadcast %c0_i32_228 : i32 to vector<32x1xi32>
    %357 = arith.cmpi ne, %355, %356 : vector<32x1xi32>
    %c0_i32_229 = arith.constant 0 : i32
    %358 = vector.broadcast %c0_i32_229 : i32 to vector<32x1xi32>
    %359 = arith.cmpi slt, %355, %358 : vector<32x1xi32>
    %c0_i32_230 = arith.constant 0 : i32
    %360 = arith.cmpi slt, %353, %c0_i32_230 : i32
    %361 = vector.broadcast %360 : i1 to vector<32x1xi1>
    %362 = vector.broadcast %361 : vector<32x1xi1> to vector<32x1xi1>
    %363 = arith.xori %359, %362 : vector<32x1xi1>
    %364 = arith.andi %363, %357 : vector<32x1xi1>
    %365 = vector.broadcast %353 : i32 to vector<32x1xi32>
    %366 = arith.addi %355, %365 : vector<32x1xi32>
    %367 = arith.select %364, %366, %355 : vector<32x1xi1>, vector<32x1xi32>
    %c0_i32_231 = arith.constant 0 : i32
    %368 = vector.broadcast %c0_i32_231 : i32 to vector<32x1xi32>
    %369 = arith.cmpi ne, %367, %368 : vector<32x1xi32>
    %c16_i32_232 = arith.constant 16 : i32
    %c0_i32_233 = arith.constant 0 : i32
    %370 = arith.cmpi eq, %c16_i32_232, %c0_i32_233 : i32
    %c1_i32_234 = arith.constant 1 : i32
    %371 = arith.select %370, %c1_i32_234, %c16_i32_232 : i32
    %372 = vector.broadcast %371 : i32 to vector<32x1xi32>
    %373 = arith.remsi %351, %372 : vector<32x1xi32>
    %c0_i32_235 = arith.constant 0 : i32
    %374 = vector.broadcast %c0_i32_235 : i32 to vector<32x1xi32>
    %375 = arith.cmpi ne, %373, %374 : vector<32x1xi32>
    %c0_i32_236 = arith.constant 0 : i32
    %376 = vector.broadcast %c0_i32_236 : i32 to vector<32x1xi32>
    %377 = arith.cmpi slt, %373, %376 : vector<32x1xi32>
    %c0_i32_237 = arith.constant 0 : i32
    %378 = arith.cmpi slt, %371, %c0_i32_237 : i32
    %379 = vector.broadcast %378 : i1 to vector<32x1xi1>
    %380 = vector.broadcast %379 : vector<32x1xi1> to vector<32x1xi1>
    %381 = arith.xori %377, %380 : vector<32x1xi1>
    %382 = arith.andi %381, %375 : vector<32x1xi1>
    %383 = vector.broadcast %371 : i32 to vector<32x1xi32>
    %384 = arith.addi %373, %383 : vector<32x1xi32>
    %385 = arith.select %382, %384, %373 : vector<32x1xi1>, vector<32x1xi32>
    %c15_i32_238 = arith.constant 15 : i32
    %386 = vector.broadcast %c15_i32_238 : i32 to vector<32x1xi32>
    %387 = arith.cmpi ne, %385, %386 : vector<32x1xi32>
    %c0_239 = arith.constant 0 : index
    %c0_240 = arith.constant 0 : index
    %388 = vector.load %arg64[%c0_239, %c0_240] : memref<34x256xbf16, #tpu.memory_space<vmem>>, vector<32x256xbf16>
    %cst_241 = arith.constant 0.000000e+00 : bf16
    %389 = vector.broadcast %cst_241 : bf16 to vector<32x256xbf16>
    %390 = vector.shape_cast %369 : vector<32x1xi1> to vector<32x1xi1>
    %391 = vector.broadcast %390 : vector<32x1xi1> to vector<32x256xi1>
    %392 = arith.select %391, %388, %389 : vector<32x256xi1>, vector<32x256xbf16>
    %c1_242 = arith.constant 1 : index
    %c0_243 = arith.constant 0 : index
    %393 = vector.load %arg64[%c1_242, %c0_243] : memref<34x256xbf16, #tpu.memory_space<vmem>>, vector<32x256xbf16>
    %c2_244 = arith.constant 2 : index
    %c0_245 = arith.constant 0 : index
    %394 = vector.load %arg64[%c2_244, %c0_245] : memref<34x256xbf16, #tpu.memory_space<vmem>>, vector<32x256xbf16>
    %cst_246 = arith.constant 0.000000e+00 : bf16
    %395 = vector.broadcast %cst_246 : bf16 to vector<32x256xbf16>
    %396 = vector.shape_cast %387 : vector<32x1xi1> to vector<32x1xi1>
    %397 = vector.broadcast %396 : vector<32x1xi1> to vector<32x256xi1>
    %398 = arith.select %397, %394, %395 : vector<32x256xi1>, vector<32x256xbf16>
    %c0_247 = arith.constant 0 : index
    %c0_248 = arith.constant 0 : index
    %c0_249 = arith.constant 0 : index
    %399 = vector.load %arg33[%c0_247, %c0_248, %c0_249] : memref<3x256x256xbf16, #tpu.memory_space<vmem>>, vector<1x256x256xbf16>
    %400 = vector.shape_cast %399 : vector<1x256x256xbf16> to vector<256x256xbf16>
    %cst_250 = arith.constant dense<0.000000e+00> : vector<32x256xf32>
    %401 = tpu.matmul %392, %400, %cst_250 {dimension_numbers = #tpu.dot_dimension_numbers<[1], [0], [0], [1], [0, 0, 1, 1], [], []>} : vector<32x256xbf16>, vector<256x256xbf16>, vector<32x256xf32> -> vector<32x256xf32>
    %c1_251 = arith.constant 1 : index
    %c0_252 = arith.constant 0 : index
    %c0_253 = arith.constant 0 : index
    %402 = vector.load %arg33[%c1_251, %c0_252, %c0_253] : memref<3x256x256xbf16, #tpu.memory_space<vmem>>, vector<1x256x256xbf16>
    %403 = vector.shape_cast %402 : vector<1x256x256xbf16> to vector<256x256xbf16>
    %cst_254 = arith.constant dense<0.000000e+00> : vector<32x256xf32>
    %404 = tpu.matmul %393, %403, %cst_254 {dimension_numbers = #tpu.dot_dimension_numbers<[1], [0], [0], [1], [0, 0, 1, 1], [], []>} : vector<32x256xbf16>, vector<256x256xbf16>, vector<32x256xf32> -> vector<32x256xf32>
    %405 = arith.addf %401, %404 : vector<32x256xf32>
    %c2_255 = arith.constant 2 : index
    %c0_256 = arith.constant 0 : index
    %c0_257 = arith.constant 0 : index
    %406 = vector.load %arg33[%c2_255, %c0_256, %c0_257] : memref<3x256x256xbf16, #tpu.memory_space<vmem>>, vector<1x256x256xbf16>
    %407 = vector.shape_cast %406 : vector<1x256x256xbf16> to vector<256x256xbf16>
    %cst_258 = arith.constant dense<0.000000e+00> : vector<32x256xf32>
    %408 = tpu.matmul %398, %407, %cst_258 {dimension_numbers = #tpu.dot_dimension_numbers<[1], [0], [0], [1], [0, 0, 1, 1], [], []>} : vector<32x256xbf16>, vector<256x256xbf16>, vector<32x256xf32> -> vector<32x256xf32>
    %409 = arith.addf %405, %408 : vector<32x256xf32>
    %c0_259 = arith.constant 0 : index
    %c0_260 = arith.constant 0 : index
    %410 = vector.load %arg32[%c0_259, %c0_260] : memref<1x256xf32, #tpu.memory_space<vmem>>, vector<1x256xf32>
    %411 = vector.broadcast %410 : vector<1x256xf32> to vector<32x256xf32>
    %412 = arith.addf %409, %411 : vector<32x256xf32>
    %cst_261 = arith.constant 0.000000e+00 : f32
    %413 = vector.broadcast %cst_261 : f32 to vector<32x256xf32>
    %414 = arith.maximumf %412, %413 : vector<32x256xf32>
    %415 = arith.truncf %414 : vector<32x256xf32> to vector<32x256xbf16>
    %c0_262 = arith.constant 0 : index
    %c0_263 = arith.constant 0 : index
    %416 = vector.load %arg24[%c0_262, %c0_263] : memref<16x32xbf16, #tpu.memory_space<vmem>>, vector<16x32xbf16>
    %c0_264 = arith.constant 0 : index
    %c0_265 = arith.constant 0 : index
    %417 = vector.load %arg25[%c0_264, %c0_265] : memref<16x32xbf16, #tpu.memory_space<vmem>>, vector<16x32xbf16>
    %c0_266 = arith.constant 0 : index
    %c0_267 = arith.constant 0 : index
    %418 = vector.load %arg20[%c0_266, %c0_267] : memref<256x128xbf16, #tpu.memory_space<vmem>>, vector<256x128xbf16>
    %c0_268 = arith.constant 0 : index
    %c0_269 = arith.constant 0 : index
    %419 = vector.load %arg21[%c0_268, %c0_269] : memref<256x128xbf16, #tpu.memory_space<vmem>>, vector<256x128xbf16>
    %cst_270 = arith.constant dense<0.000000e+00> : vector<16x256xf32>
    %420 = tpu.matmul %416, %415, %cst_270 {dimension_numbers = #tpu.dot_dimension_numbers<[1], [0], [0], [1], [0, 0, 1, 1], [], []>} : vector<16x32xbf16>, vector<32x256xbf16>, vector<16x256xf32> -> vector<16x256xf32>
    %cst_271 = arith.constant dense<0.000000e+00> : vector<16x256xf32>
    %421 = tpu.matmul %417, %415, %cst_271 {dimension_numbers = #tpu.dot_dimension_numbers<[1], [0], [0], [1], [0, 0, 1, 1], [], []>} : vector<16x32xbf16>, vector<32x256xbf16>, vector<16x256xf32> -> vector<16x256xf32>
    %422 = arith.maximumf %420, %421 : vector<16x256xf32>
    %423 = arith.truncf %422 : vector<16x256xf32> to vector<16x256xbf16>
    %cst_272 = arith.constant dense<0.000000e+00> : vector<16x128xf32>
    %424 = tpu.matmul %423, %418, %cst_272 {dimension_numbers = #tpu.dot_dimension_numbers<[1], [0], [0], [1], [0, 0, 1, 1], [], []>} : vector<16x256xbf16>, vector<256x128xbf16>, vector<16x128xf32> -> vector<16x128xf32>
    %cst_273 = arith.constant dense<0.000000e+00> : vector<16x128xf32>
    %425 = tpu.matmul %423, %419, %cst_273 {dimension_numbers = #tpu.dot_dimension_numbers<[1], [0], [0], [1], [0, 0, 1, 1], [], []>} : vector<16x256xbf16>, vector<256x128xbf16>, vector<16x128xf32> -> vector<16x128xf32>
    %426 = arith.maximumf %424, %425 : vector<16x128xf32>
    %c0_274 = arith.constant 0 : index
    %427 = memref.load %arg48[%c0_274] : memref<3xf32, #tpu.memory_space<smem>>
    %428 = arith.extf %162 : vector<16x128xbf16> to vector<16x128xf32>
    %429 = vector.broadcast %427 : f32 to vector<16x128xf32>
    %430 = arith.mulf %429, %428 : vector<16x128xf32>
    %c1_275 = arith.constant 1 : index
    %431 = memref.load %arg48[%c1_275] : memref<3xf32, #tpu.memory_space<smem>>
    %432 = arith.extf %332 : vector<16x128xbf16> to vector<16x128xf32>
    %433 = vector.broadcast %431 : f32 to vector<16x128xf32>
    %434 = arith.mulf %433, %432 : vector<16x128xf32>
    %435 = arith.addf %430, %434 : vector<16x128xf32>
    %c2_276 = arith.constant 2 : index
    %436 = memref.load %arg48[%c2_276] : memref<3xf32, #tpu.memory_space<smem>>
    %437 = vector.broadcast %436 : f32 to vector<16x128xf32>
    %438 = arith.mulf %437, %426 : vector<16x128xf32>
    %439 = arith.addf %435, %438 : vector<16x128xf32>
    %440 = arith.truncf %439 : vector<16x128xf32> to vector<16x128xbf16>
    %cst_277 = arith.constant 0.000000e+00 : bf16
    %441 = vector.broadcast %cst_277 : bf16 to vector<1x128xbf16>
    %c0_278 = arith.constant 0 : index
    %c0_279 = arith.constant 0 : index
    %442 = vector.load %arg65[%c0_278, %c0_279] : memref<18x128xbf16, #tpu.memory_space<vmem>>, vector<1x128xbf16>
    tpu.vector_store %arg65[%c0_278, %c0_279], %441 {strides = array<i32>} : memref<18x128xbf16, #tpu.memory_space<vmem>>, vector<1x128xbf16>,
    %c17_280 = arith.constant 17 : index
    %c0_281 = arith.constant 0 : index
    %443 = vector.load %arg65[%c17_280, %c0_281] : memref<18x128xbf16, #tpu.memory_space<vmem>>, vector<1x128xbf16>
    tpu.vector_store %arg65[%c17_280, %c0_281], %441 {strides = array<i32>} : memref<18x128xbf16, #tpu.memory_space<vmem>>, vector<1x128xbf16>,
    %c1_282 = arith.constant 1 : index
    %c0_283 = arith.constant 0 : index
    %444 = vector.load %arg65[%c1_282, %c0_283] : memref<18x128xbf16, #tpu.memory_space<vmem>>, vector<16x128xbf16>
    tpu.vector_store %arg65[%c1_282, %c0_283], %440 {strides = array<i32>} : memref<18x128xbf16, #tpu.memory_space<vmem>>, vector<16x128xbf16>,
    %445 = tpu.iota {dimensions = array<i32: 0>} : vector<16x1xi32>
    %c8_i32_284 = arith.constant 8 : i32
    %c0_i32_285 = arith.constant 0 : i32
    %446 = arith.cmpi eq, %c8_i32_284, %c0_i32_285 : i32
    %c1_i32_286 = arith.constant 1 : i32
    %447 = arith.select %446, %c1_i32_286, %c8_i32_284 : i32
    %448 = vector.broadcast %447 : i32 to vector<16x1xi32>
    %449 = arith.remsi %445, %448 : vector<16x1xi32>
    %c0_i32_287 = arith.constant 0 : i32
    %450 = vector.broadcast %c0_i32_287 : i32 to vector<16x1xi32>
    %451 = arith.cmpi ne, %449, %450 : vector<16x1xi32>
    %c0_i32_288 = arith.constant 0 : i32
    %452 = vector.broadcast %c0_i32_288 : i32 to vector<16x1xi32>
    %453 = arith.cmpi slt, %449, %452 : vector<16x1xi32>
    %c0_i32_289 = arith.constant 0 : i32
    %454 = arith.cmpi slt, %447, %c0_i32_289 : i32
    %455 = vector.broadcast %454 : i1 to vector<16x1xi1>
    %456 = vector.broadcast %455 : vector<16x1xi1> to vector<16x1xi1>
    %457 = arith.xori %453, %456 : vector<16x1xi1>
    %458 = arith.andi %457, %451 : vector<16x1xi1>
    %459 = vector.broadcast %447 : i32 to vector<16x1xi32>
    %460 = arith.addi %449, %459 : vector<16x1xi32>
    %461 = arith.select %458, %460, %449 : vector<16x1xi1>, vector<16x1xi32>
    %c0_i32_290 = arith.constant 0 : i32
    %462 = vector.broadcast %c0_i32_290 : i32 to vector<16x1xi32>
    %463 = arith.cmpi ne, %461, %462 : vector<16x1xi32>
    %c8_i32_291 = arith.constant 8 : i32
    %c0_i32_292 = arith.constant 0 : i32
    %464 = arith.cmpi eq, %c8_i32_291, %c0_i32_292 : i32
    %c1_i32_293 = arith.constant 1 : i32
    %465 = arith.select %464, %c1_i32_293, %c8_i32_291 : i32
    %466 = vector.broadcast %465 : i32 to vector<16x1xi32>
    %467 = arith.remsi %445, %466 : vector<16x1xi32>
    %c0_i32_294 = arith.constant 0 : i32
    %468 = vector.broadcast %c0_i32_294 : i32 to vector<16x1xi32>
    %469 = arith.cmpi ne, %467, %468 : vector<16x1xi32>
    %c0_i32_295 = arith.constant 0 : i32
    %470 = vector.broadcast %c0_i32_295 : i32 to vector<16x1xi32>
    %471 = arith.cmpi slt, %467, %470 : vector<16x1xi32>
    %c0_i32_296 = arith.constant 0 : i32
    %472 = arith.cmpi slt, %465, %c0_i32_296 : i32
    %473 = vector.broadcast %472 : i1 to vector<16x1xi1>
    %474 = vector.broadcast %473 : vector<16x1xi1> to vector<16x1xi1>
    %475 = arith.xori %471, %474 : vector<16x1xi1>
    %476 = arith.andi %475, %469 : vector<16x1xi1>
    %477 = vector.broadcast %465 : i32 to vector<16x1xi32>
    %478 = arith.addi %467, %477 : vector<16x1xi32>
    %479 = arith.select %476, %478, %467 : vector<16x1xi1>, vector<16x1xi32>
    %c7_i32_297 = arith.constant 7 : i32
    %480 = vector.broadcast %c7_i32_297 : i32 to vector<16x1xi32>
    %481 = arith.cmpi ne, %479, %480 : vector<16x1xi32>
    %c0_298 = arith.constant 0 : index
    %c0_299 = arith.constant 0 : index
    %482 = vector.load %arg65[%c0_298, %c0_299] : memref<18x128xbf16, #tpu.memory_space<vmem>>, vector<16x128xbf16>
    %cst_300 = arith.constant 0.000000e+00 : bf16
    %483 = vector.broadcast %cst_300 : bf16 to vector<16x128xbf16>
    %484 = vector.shape_cast %463 : vector<16x1xi1> to vector<16x1xi1>
    %485 = vector.broadcast %484 : vector<16x1xi1> to vector<16x128xi1>
    %486 = arith.select %485, %482, %483 : vector<16x128xi1>, vector<16x128xbf16>
    %c1_301 = arith.constant 1 : index
    %c0_302 = arith.constant 0 : index
    %487 = vector.load %arg65[%c1_301, %c0_302] : memref<18x128xbf16, #tpu.memory_space<vmem>>, vector<16x128xbf16>
    %c2_303 = arith.constant 2 : index
    %c0_304 = arith.constant 0 : index
    %488 = vector.load %arg65[%c2_303, %c0_304] : memref<18x128xbf16, #tpu.memory_space<vmem>>, vector<16x128xbf16>
    %cst_305 = arith.constant 0.000000e+00 : bf16
    %489 = vector.broadcast %cst_305 : bf16 to vector<16x128xbf16>
    %490 = vector.shape_cast %481 : vector<16x1xi1> to vector<16x1xi1>
    %491 = vector.broadcast %490 : vector<16x1xi1> to vector<16x128xi1>
    %492 = arith.select %491, %488, %489 : vector<16x128xi1>, vector<16x128xbf16>
    %c0_306 = arith.constant 0 : index
    %c0_307 = arith.constant 0 : index
    %c0_308 = arith.constant 0 : index
    %493 = vector.load %arg29[%c0_306, %c0_307, %c0_308] : memref<3x128x128xbf16, #tpu.memory_space<vmem>>, vector<1x128x128xbf16>
    %494 = vector.shape_cast %493 : vector<1x128x128xbf16> to vector<128x128xbf16>
    %cst_309 = arith.constant dense<0.000000e+00> : vector<16x128xf32>
    %495 = tpu.matmul %486, %494, %cst_309 {dimension_numbers = #tpu.dot_dimension_numbers<[1], [0], [0], [1], [0, 0, 1, 1], [], []>} : vector<16x128xbf16>, vector<128x128xbf16>, vector<16x128xf32> -> vector<16x128xf32>
    %c1_310 = arith.constant 1 : index
    %c0_311 = arith.constant 0 : index
    %c0_312 = arith.constant 0 : index
    %496 = vector.load %arg29[%c1_310, %c0_311, %c0_312] : memref<3x128x128xbf16, #tpu.memory_space<vmem>>, vector<1x128x128xbf16>
    %497 = vector.shape_cast %496 : vector<1x128x128xbf16> to vector<128x128xbf16>
    %cst_313 = arith.constant dense<0.000000e+00> : vector<16x128xf32>
    %498 = tpu.matmul %487, %497, %cst_313 {dimension_numbers = #tpu.dot_dimension_numbers<[1], [0], [0], [1], [0, 0, 1, 1], [], []>} : vector<16x128xbf16>, vector<128x128xbf16>, vector<16x128xf32> -> vector<16x128xf32>
    %499 = arith.addf %495, %498 : vector<16x128xf32>
    %c2_314 = arith.constant 2 : index
    %c0_315 = arith.constant 0 : index
    %c0_316 = arith.constant 0 : index
    %500 = vector.load %arg29[%c2_314, %c0_315, %c0_316] : memref<3x128x128xbf16, #tpu.memory_space<vmem>>, vector<1x128x128xbf16>
    %501 = vector.shape_cast %500 : vector<1x128x128xbf16> to vector<128x128xbf16>
    %cst_317 = arith.constant dense<0.000000e+00> : vector<16x128xf32>
    %502 = tpu.matmul %492, %501, %cst_317 {dimension_numbers = #tpu.dot_dimension_numbers<[1], [0], [0], [1], [0, 0, 1, 1], [], []>} : vector<16x128xbf16>, vector<128x128xbf16>, vector<16x128xf32> -> vector<16x128xf32>
    %503 = arith.addf %499, %502 : vector<16x128xf32>
    %c0_318 = arith.constant 0 : index
    %c0_319 = arith.constant 0 : index
    %504 = vector.load %arg28[%c0_318, %c0_319] : memref<1x128xf32, #tpu.memory_space<vmem>>, vector<1x128xf32>
    %505 = vector.broadcast %504 : vector<1x128xf32> to vector<16x128xf32>
    %506 = arith.addf %503, %505 : vector<16x128xf32>
    %cst_320 = arith.constant 0.000000e+00 : f32
    %507 = vector.broadcast %cst_320 : f32 to vector<16x128xf32>
    %508 = arith.maximumf %506, %507 : vector<16x128xf32>
    %509 = arith.truncf %508 : vector<16x128xf32> to vector<16x128xbf16>
    %c0_321 = arith.constant 0 : index
    %c0_322 = arith.constant 0 : index
    %510 = vector.load %arg26[%c0_321, %c0_322] : memref<8x16xbf16, #tpu.memory_space<vmem>>, vector<8x16xbf16>
    %c0_323 = arith.constant 0 : index
    %c0_324 = arith.constant 0 : index
    %511 = vector.load %arg27[%c0_323, %c0_324] : memref<8x16xbf16, #tpu.memory_space<vmem>>, vector<8x16xbf16>
    %c0_325 = arith.constant 0 : index
    %c0_326 = arith.constant 0 : index
    %512 = vector.load %arg22[%c0_325, %c0_326] : memref<128x64xbf16, #tpu.memory_space<vmem>>, vector<128x64xbf16>
    %c0_327 = arith.constant 0 : index
    %c0_328 = arith.constant 0 : index
    %513 = vector.load %arg23[%c0_327, %c0_328] : memref<128x64xbf16, #tpu.memory_space<vmem>>, vector<128x64xbf16>
    %cst_329 = arith.constant dense<0.000000e+00> : vector<8x128xf32>
    %514 = tpu.matmul %510, %509, %cst_329 {dimension_numbers = #tpu.dot_dimension_numbers<[1], [0], [0], [1], [0, 0, 1, 1], [], []>} : vector<8x16xbf16>, vector<16x128xbf16>, vector<8x128xf32> -> vector<8x128xf32>
    %cst_330 = arith.constant dense<0.000000e+00> : vector<8x128xf32>
    %515 = tpu.matmul %511, %509, %cst_330 {dimension_numbers = #tpu.dot_dimension_numbers<[1], [0], [0], [1], [0, 0, 1, 1], [], []>} : vector<8x16xbf16>, vector<16x128xbf16>, vector<8x128xf32> -> vector<8x128xf32>
    %516 = arith.maximumf %514, %515 : vector<8x128xf32>
    %517 = arith.truncf %516 : vector<8x128xf32> to vector<8x128xbf16>
    %cst_331 = arith.constant dense<0.000000e+00> : vector<8x64xf32>
    %518 = tpu.matmul %517, %512, %cst_331 {dimension_numbers = #tpu.dot_dimension_numbers<[1], [0], [0], [1], [0, 0, 1, 1], [], []>} : vector<8x128xbf16>, vector<128x64xbf16>, vector<8x64xf32> -> vector<8x64xf32>
    %cst_332 = arith.constant dense<0.000000e+00> : vector<8x64xf32>
    %519 = tpu.matmul %517, %513, %cst_332 {dimension_numbers = #tpu.dot_dimension_numbers<[1], [0], [0], [1], [0, 0, 1, 1], [], []>} : vector<8x128xbf16>, vector<128x64xbf16>, vector<8x64xf32> -> vector<8x64xf32>
    %520 = arith.maximumf %518, %519 : vector<8x64xf32>
    %c0_333 = arith.constant 0 : index
    %521 = memref.load %arg49[%c0_333] : memref<2xf32, #tpu.memory_space<smem>>
    %522 = arith.extf %249 : vector<8x64xbf16> to vector<8x64xf32>
    %523 = vector.broadcast %521 : f32 to vector<8x64xf32>
    %524 = arith.mulf %523, %522 : vector<8x64xf32>
    %c1_334 = arith.constant 1 : index
    %525 = memref.load %arg49[%c1_334] : memref<2xf32, #tpu.memory_space<smem>>
    %526 = vector.broadcast %525 : f32 to vector<8x64xf32>
    %527 = arith.mulf %526, %520 : vector<8x64xf32>
    %528 = arith.addf %524, %527 : vector<8x64xf32>
    %529 = arith.truncf %528 : vector<8x64xf32> to vector<8x64xbf16>
    %cst_335 = arith.constant 0.000000e+00 : bf16
    %530 = vector.broadcast %cst_335 : bf16 to vector<1x64xbf16>
    %c0_336 = arith.constant 0 : index
    %c0_337 = arith.constant 0 : index
    %531 = vector.load %arg66[%c0_336, %c0_337] : memref<10x64xbf16, #tpu.memory_space<vmem>>, vector<1x64xbf16>
    tpu.vector_store %arg66[%c0_336, %c0_337], %530 {strides = array<i32>} : memref<10x64xbf16, #tpu.memory_space<vmem>>, vector<1x64xbf16>,
    %c9_338 = arith.constant 9 : index
    %c0_339 = arith.constant 0 : index
    %532 = vector.load %arg66[%c9_338, %c0_339] : memref<10x64xbf16, #tpu.memory_space<vmem>>, vector<1x64xbf16>
    tpu.vector_store %arg66[%c9_338, %c0_339], %530 {strides = array<i32>} : memref<10x64xbf16, #tpu.memory_space<vmem>>, vector<1x64xbf16>,
    %c1_340 = arith.constant 1 : index
    %c0_341 = arith.constant 0 : index
    %533 = vector.load %arg66[%c1_340, %c0_341] : memref<10x64xbf16, #tpu.memory_space<vmem>>, vector<8x64xbf16>
    tpu.vector_store %arg66[%c1_340, %c0_341], %529 {strides = array<i32>} : memref<10x64xbf16, #tpu.memory_space<vmem>>, vector<8x64xbf16>,
    %534 = tpu.iota {dimensions = array<i32: 0>} : vector<8x1xi32>
    %c4_i32_342 = arith.constant 4 : i32
    %c0_i32_343 = arith.constant 0 : i32
    %535 = arith.cmpi eq, %c4_i32_342, %c0_i32_343 : i32
    %c1_i32_344 = arith.constant 1 : i32
    %536 = arith.select %535, %c1_i32_344, %c4_i32_342 : i32
    %537 = vector.broadcast %536 : i32 to vector<8x1xi32>
    %538 = arith.remsi %534, %537 : vector<8x1xi32>
    %c0_i32_345 = arith.constant 0 : i32
    %539 = vector.broadcast %c0_i32_345 : i32 to vector<8x1xi32>
    %540 = arith.cmpi ne, %538, %539 : vector<8x1xi32>
    %c0_i32_346 = arith.constant 0 : i32
    %541 = vector.broadcast %c0_i32_346 : i32 to vector<8x1xi32>
    %542 = arith.cmpi slt, %538, %541 : vector<8x1xi32>
    %c0_i32_347 = arith.constant 0 : i32
    %543 = arith.cmpi slt, %536, %c0_i32_347 : i32
    %544 = vector.broadcast %543 : i1 to vector<8x1xi1>
    %545 = vector.broadcast %544 : vector<8x1xi1> to vector<8x1xi1>
    %546 = arith.xori %542, %545 : vector<8x1xi1>
    %547 = arith.andi %546, %540 : vector<8x1xi1>
    %548 = vector.broadcast %536 : i32 to vector<8x1xi32>
    %549 = arith.addi %538, %548 : vector<8x1xi32>
    %550 = arith.select %547, %549, %538 : vector<8x1xi1>, vector<8x1xi32>
    %c0_i32_348 = arith.constant 0 : i32
    %551 = vector.broadcast %c0_i32_348 : i32 to vector<8x1xi32>
    %552 = arith.cmpi ne, %550, %551 : vector<8x1xi32>
    %c4_i32_349 = arith.constant 4 : i32
    %c0_i32_350 = arith.constant 0 : i32
    %553 = arith.cmpi eq, %c4_i32_349, %c0_i32_350 : i32
    %c1_i32_351 = arith.constant 1 : i32
    %554 = arith.select %553, %c1_i32_351, %c4_i32_349 : i32
    %555 = vector.broadcast %554 : i32 to vector<8x1xi32>
    %556 = arith.remsi %534, %555 : vector<8x1xi32>
    %c0_i32_352 = arith.constant 0 : i32
    %557 = vector.broadcast %c0_i32_352 : i32 to vector<8x1xi32>
    %558 = arith.cmpi ne, %556, %557 : vector<8x1xi32>
    %c0_i32_353 = arith.constant 0 : i32
    %559 = vector.broadcast %c0_i32_353 : i32 to vector<8x1xi32>
    %560 = arith.cmpi slt, %556, %559 : vector<8x1xi32>
    %c0_i32_354 = arith.constant 0 : i32
    %561 = arith.cmpi slt, %554, %c0_i32_354 : i32
    %562 = vector.broadcast %561 : i1 to vector<8x1xi1>
    %563 = vector.broadcast %562 : vector<8x1xi1> to vector<8x1xi1>
    %564 = arith.xori %560, %563 : vector<8x1xi1>
    %565 = arith.andi %564, %558 : vector<8x1xi1>
    %566 = vector.broadcast %554 : i32 to vector<8x1xi32>
    %567 = arith.addi %556, %566 : vector<8x1xi32>
    %568 = arith.select %565, %567, %556 : vector<8x1xi1>, vector<8x1xi32>
    %c3_i32_355 = arith.constant 3 : i32
    %569 = vector.broadcast %c3_i32_355 : i32 to vector<8x1xi32>
    %570 = arith.cmpi ne, %568, %569 : vector<8x1xi32>
    %c0_356 = arith.constant 0 : index
    %c0_357 = arith.constant 0 : index
    %571 = vector.load %arg66[%c0_356, %c0_357] : memref<10x64xbf16, #tpu.memory_space<vmem>>, vector<8x64xbf16>
    %cst_358 = arith.constant 0.000000e+00 : bf16
    %572 = vector.broadcast %cst_358 : bf16 to vector<8x64xbf16>
    %573 = vector.shape_cast %552 : vector<8x1xi1> to vector<8x1xi1>
    %574 = vector.broadcast %573 : vector<8x1xi1> to vector<8x64xi1>
    %575 = arith.select %574, %571, %572 : vector<8x64xi1>, vector<8x64xbf16>
    %c1_359 = arith.constant 1 : index
    %c0_360 = arith.constant 0 : index
    %576 = vector.load %arg66[%c1_359, %c0_360] : memref<10x64xbf16, #tpu.memory_space<vmem>>, vector<8x64xbf16>
    %c2_361 = arith.constant 2 : index
    %c0_362 = arith.constant 0 : index
    %577 = vector.load %arg66[%c2_361, %c0_362] : memref<10x64xbf16, #tpu.memory_space<vmem>>, vector<8x64xbf16>
    %cst_363 = arith.constant 0.000000e+00 : bf16
    %578 = vector.broadcast %cst_363 : bf16 to vector<8x64xbf16>
    %579 = vector.shape_cast %570 : vector<8x1xi1> to vector<8x1xi1>
    %580 = vector.broadcast %579 : vector<8x1xi1> to vector<8x64xi1>
    %581 = arith.select %580, %577, %578 : vector<8x64xi1>, vector<8x64xbf16>
    %c0_364 = arith.constant 0 : index
    %c0_365 = arith.constant 0 : index
    %c0_366 = arith.constant 0 : index
    %582 = vector.load %arg31[%c0_364, %c0_365, %c0_366] : memref<3x64x64xbf16, #tpu.memory_space<vmem>>, vector<1x64x64xbf16>
    %583 = vector.shape_cast %582 : vector<1x64x64xbf16> to vector<64x64xbf16>
    %cst_367 = arith.constant dense<0.000000e+00> : vector<8x64xf32>
    %584 = tpu.matmul %575, %583, %cst_367 {dimension_numbers = #tpu.dot_dimension_numbers<[1], [0], [0], [1], [0, 0, 1, 1], [], []>} : vector<8x64xbf16>, vector<64x64xbf16>, vector<8x64xf32> -> vector<8x64xf32>
    %c1_368 = arith.constant 1 : index
    %c0_369 = arith.constant 0 : index
    %c0_370 = arith.constant 0 : index
    %585 = vector.load %arg31[%c1_368, %c0_369, %c0_370] : memref<3x64x64xbf16, #tpu.memory_space<vmem>>, vector<1x64x64xbf16>
    %586 = vector.shape_cast %585 : vector<1x64x64xbf16> to vector<64x64xbf16>
    %cst_371 = arith.constant dense<0.000000e+00> : vector<8x64xf32>
    %587 = tpu.matmul %576, %586, %cst_371 {dimension_numbers = #tpu.dot_dimension_numbers<[1], [0], [0], [1], [0, 0, 1, 1], [], []>} : vector<8x64xbf16>, vector<64x64xbf16>, vector<8x64xf32> -> vector<8x64xf32>
    %588 = arith.addf %584, %587 : vector<8x64xf32>
    %c2_372 = arith.constant 2 : index
    %c0_373 = arith.constant 0 : index
    %c0_374 = arith.constant 0 : index
    %589 = vector.load %arg31[%c2_372, %c0_373, %c0_374] : memref<3x64x64xbf16, #tpu.memory_space<vmem>>, vector<1x64x64xbf16>
    %590 = vector.shape_cast %589 : vector<1x64x64xbf16> to vector<64x64xbf16>
    %cst_375 = arith.constant dense<0.000000e+00> : vector<8x64xf32>
    %591 = tpu.matmul %581, %590, %cst_375 {dimension_numbers = #tpu.dot_dimension_numbers<[1], [0], [0], [1], [0, 0, 1, 1], [], []>} : vector<8x64xbf16>, vector<64x64xbf16>, vector<8x64xf32> -> vector<8x64xf32>
    %592 = arith.addf %588, %591 : vector<8x64xf32>
    %c0_376 = arith.constant 0 : index
    %c0_377 = arith.constant 0 : index
    %593 = vector.load %arg30[%c0_376, %c0_377] : memref<1x64xf32, #tpu.memory_space<vmem>>, vector<1x64xf32>
    %594 = vector.broadcast %593 : vector<1x64xf32> to vector<8x64xf32>
    %595 = arith.addf %592, %594 : vector<8x64xf32>
    %cst_378 = arith.constant 0.000000e+00 : f32
    %596 = vector.broadcast %cst_378 : f32 to vector<8x64xf32>
    %597 = arith.maximumf %595, %596 : vector<8x64xf32>
    %598 = arith.truncf %597 : vector<8x64xf32> to vector<8x64xbf16>
    %c0_379 = arith.constant 0 : index
    %c0_380 = arith.constant 0 : index
    %599 = vector.load %arg47[%c0_379, %c0_380] : memref<16x8xbf16, #tpu.memory_space<vmem>>, vector<16x8xbf16>
    %c0_381 = arith.constant 0 : index
    %c0_382 = arith.constant 0 : index
    %600 = vector.load %arg46[%c0_381, %c0_382] : memref<64x128xbf16, #tpu.memory_space<vmem>>, vector<64x128xbf16>
    %cst_383 = arith.constant dense<0.000000e+00> : vector<8x128xf32>
    %601 = tpu.matmul %598, %600, %cst_383 {dimension_numbers = #tpu.dot_dimension_numbers<[1], [0], [0], [1], [0, 0, 1, 1], [], []>} : vector<8x64xbf16>, vector<64x128xbf16>, vector<8x128xf32> -> vector<8x128xf32>
    %602 = arith.truncf %601 : vector<8x128xf32> to vector<8x128xbf16>
    %cst_384 = arith.constant dense<0.000000e+00> : vector<16x128xf32>
    %603 = tpu.matmul %599, %602, %cst_384 {dimension_numbers = #tpu.dot_dimension_numbers<[1], [0], [0], [1], [0, 0, 1, 1], [], []>} : vector<16x8xbf16>, vector<8x128xbf16>, vector<16x128xf32> -> vector<16x128xf32>
    %c0_385 = arith.constant 0 : index
    %604 = memref.load %arg55[%c0_385] : memref<2xf32, #tpu.memory_space<smem>>
    %605 = arith.extf %509 : vector<16x128xbf16> to vector<16x128xf32>
    %606 = vector.broadcast %604 : f32 to vector<16x128xf32>
    %607 = arith.mulf %606, %605 : vector<16x128xf32>
    %c1_386 = arith.constant 1 : index
    %608 = memref.load %arg55[%c1_386] : memref<2xf32, #tpu.memory_space<smem>>
    %609 = vector.broadcast %608 : f32 to vector<16x128xf32>
    %610 = arith.mulf %609, %603 : vector<16x128xf32>
    %611 = arith.addf %607, %610 : vector<16x128xf32>
    %612 = arith.truncf %611 : vector<16x128xf32> to vector<16x128xbf16>
    %cst_387 = arith.constant 0.000000e+00 : bf16
    %613 = vector.broadcast %cst_387 : bf16 to vector<1x128xbf16>
    %c0_388 = arith.constant 0 : index
    %c0_389 = arith.constant 0 : index
    %614 = vector.load %arg65[%c0_388, %c0_389] : memref<18x128xbf16, #tpu.memory_space<vmem>>, vector<1x128xbf16>
    tpu.vector_store %arg65[%c0_388, %c0_389], %613 {strides = array<i32>} : memref<18x128xbf16, #tpu.memory_space<vmem>>, vector<1x128xbf16>,
    %c17_390 = arith.constant 17 : index
    %c0_391 = arith.constant 0 : index
    %615 = vector.load %arg65[%c17_390, %c0_391] : memref<18x128xbf16, #tpu.memory_space<vmem>>, vector<1x128xbf16>
    tpu.vector_store %arg65[%c17_390, %c0_391], %613 {strides = array<i32>} : memref<18x128xbf16, #tpu.memory_space<vmem>>, vector<1x128xbf16>,
    %c1_392 = arith.constant 1 : index
    %c0_393 = arith.constant 0 : index
    %616 = vector.load %arg65[%c1_392, %c0_393] : memref<18x128xbf16, #tpu.memory_space<vmem>>, vector<16x128xbf16>
    tpu.vector_store %arg65[%c1_392, %c0_393], %612 {strides = array<i32>} : memref<18x128xbf16, #tpu.memory_space<vmem>>, vector<16x128xbf16>,
    %617 = tpu.iota {dimensions = array<i32: 0>} : vector<16x1xi32>
    %c8_i32_394 = arith.constant 8 : i32
    %c0_i32_395 = arith.constant 0 : i32
    %618 = arith.cmpi eq, %c8_i32_394, %c0_i32_395 : i32
    %c1_i32_396 = arith.constant 1 : i32
    %619 = arith.select %618, %c1_i32_396, %c8_i32_394 : i32
    %620 = vector.broadcast %619 : i32 to vector<16x1xi32>
    %621 = arith.remsi %617, %620 : vector<16x1xi32>
    %c0_i32_397 = arith.constant 0 : i32
    %622 = vector.broadcast %c0_i32_397 : i32 to vector<16x1xi32>
    %623 = arith.cmpi ne, %621, %622 : vector<16x1xi32>
    %c0_i32_398 = arith.constant 0 : i32
    %624 = vector.broadcast %c0_i32_398 : i32 to vector<16x1xi32>
    %625 = arith.cmpi slt, %621, %624 : vector<16x1xi32>
    %c0_i32_399 = arith.constant 0 : i32
    %626 = arith.cmpi slt, %619, %c0_i32_399 : i32
    %627 = vector.broadcast %626 : i1 to vector<16x1xi1>
    %628 = vector.broadcast %627 : vector<16x1xi1> to vector<16x1xi1>
    %629 = arith.xori %625, %628 : vector<16x1xi1>
    %630 = arith.andi %629, %623 : vector<16x1xi1>
    %631 = vector.broadcast %619 : i32 to vector<16x1xi32>
    %632 = arith.addi %621, %631 : vector<16x1xi32>
    %633 = arith.select %630, %632, %621 : vector<16x1xi1>, vector<16x1xi32>
    %c0_i32_400 = arith.constant 0 : i32
    %634 = vector.broadcast %c0_i32_400 : i32 to vector<16x1xi32>
    %635 = arith.cmpi ne, %633, %634 : vector<16x1xi32>
    %c8_i32_401 = arith.constant 8 : i32
    %c0_i32_402 = arith.constant 0 : i32
    %636 = arith.cmpi eq, %c8_i32_401, %c0_i32_402 : i32
    %c1_i32_403 = arith.constant 1 : i32
    %637 = arith.select %636, %c1_i32_403, %c8_i32_401 : i32
    %638 = vector.broadcast %637 : i32 to vector<16x1xi32>
    %639 = arith.remsi %617, %638 : vector<16x1xi32>
    %c0_i32_404 = arith.constant 0 : i32
    %640 = vector.broadcast %c0_i32_404 : i32 to vector<16x1xi32>
    %641 = arith.cmpi ne, %639, %640 : vector<16x1xi32>
    %c0_i32_405 = arith.constant 0 : i32
    %642 = vector.broadcast %c0_i32_405 : i32 to vector<16x1xi32>
    %643 = arith.cmpi slt, %639, %642 : vector<16x1xi32>
    %c0_i32_406 = arith.constant 0 : i32
    %644 = arith.cmpi slt, %637, %c0_i32_406 : i32
    %645 = vector.broadcast %644 : i1 to vector<16x1xi1>
    %646 = vector.broadcast %645 : vector<16x1xi1> to vector<16x1xi1>
    %647 = arith.xori %643, %646 : vector<16x1xi1>
    %648 = arith.andi %647, %641 : vector<16x1xi1>
    %649 = vector.broadcast %637 : i32 to vector<16x1xi32>
    %650 = arith.addi %639, %649 : vector<16x1xi32>
    %651 = arith.select %648, %650, %639 : vector<16x1xi1>, vector<16x1xi32>
    %c7_i32_407 = arith.constant 7 : i32
    %652 = vector.broadcast %c7_i32_407 : i32 to vector<16x1xi32>
    %653 = arith.cmpi ne, %651, %652 : vector<16x1xi32>
    %c0_408 = arith.constant 0 : index
    %c0_409 = arith.constant 0 : index
    %654 = vector.load %arg65[%c0_408, %c0_409] : memref<18x128xbf16, #tpu.memory_space<vmem>>, vector<16x128xbf16>
    %cst_410 = arith.constant 0.000000e+00 : bf16
    %655 = vector.broadcast %cst_410 : bf16 to vector<16x128xbf16>
    %656 = vector.shape_cast %635 : vector<16x1xi1> to vector<16x1xi1>
    %657 = vector.broadcast %656 : vector<16x1xi1> to vector<16x128xi1>
    %658 = arith.select %657, %654, %655 : vector<16x128xi1>, vector<16x128xbf16>
    %c1_411 = arith.constant 1 : index
    %c0_412 = arith.constant 0 : index
    %659 = vector.load %arg65[%c1_411, %c0_412] : memref<18x128xbf16, #tpu.memory_space<vmem>>, vector<16x128xbf16>
    %c2_413 = arith.constant 2 : index
    %c0_414 = arith.constant 0 : index
    %660 = vector.load %arg65[%c2_413, %c0_414] : memref<18x128xbf16, #tpu.memory_space<vmem>>, vector<16x128xbf16>
    %cst_415 = arith.constant 0.000000e+00 : bf16
    %661 = vector.broadcast %cst_415 : bf16 to vector<16x128xbf16>
    %662 = vector.shape_cast %653 : vector<16x1xi1> to vector<16x1xi1>
    %663 = vector.broadcast %662 : vector<16x1xi1> to vector<16x128xi1>
    %664 = arith.select %663, %660, %661 : vector<16x128xi1>, vector<16x128xbf16>
    %c0_416 = arith.constant 0 : index
    %c0_417 = arith.constant 0 : index
    %c0_418 = arith.constant 0 : index
    %665 = vector.load %arg43[%c0_416, %c0_417, %c0_418] : memref<3x128x128xbf16, #tpu.memory_space<vmem>>, vector<1x128x128xbf16>
    %666 = vector.shape_cast %665 : vector<1x128x128xbf16> to vector<128x128xbf16>
    %cst_419 = arith.constant dense<0.000000e+00> : vector<16x128xf32>
    %667 = tpu.matmul %658, %666, %cst_419 {dimension_numbers = #tpu.dot_dimension_numbers<[1], [0], [0], [1], [0, 0, 1, 1], [], []>} : vector<16x128xbf16>, vector<128x128xbf16>, vector<16x128xf32> -> vector<16x128xf32>
    %c1_420 = arith.constant 1 : index
    %c0_421 = arith.constant 0 : index
    %c0_422 = arith.constant 0 : index
    %668 = vector.load %arg43[%c1_420, %c0_421, %c0_422] : memref<3x128x128xbf16, #tpu.memory_space<vmem>>, vector<1x128x128xbf16>
    %669 = vector.shape_cast %668 : vector<1x128x128xbf16> to vector<128x128xbf16>
    %cst_423 = arith.constant dense<0.000000e+00> : vector<16x128xf32>
    %670 = tpu.matmul %659, %669, %cst_423 {dimension_numbers = #tpu.dot_dimension_numbers<[1], [0], [0], [1], [0, 0, 1, 1], [], []>} : vector<16x128xbf16>, vector<128x128xbf16>, vector<16x128xf32> -> vector<16x128xf32>
    %671 = arith.addf %667, %670 : vector<16x128xf32>
    %c2_424 = arith.constant 2 : index
    %c0_425 = arith.constant 0 : index
    %c0_426 = arith.constant 0 : index
    %672 = vector.load %arg43[%c2_424, %c0_425, %c0_426] : memref<3x128x128xbf16, #tpu.memory_space<vmem>>, vector<1x128x128xbf16>
    %673 = vector.shape_cast %672 : vector<1x128x128xbf16> to vector<128x128xbf16>
    %cst_427 = arith.constant dense<0.000000e+00> : vector<16x128xf32>
    %674 = tpu.matmul %664, %673, %cst_427 {dimension_numbers = #tpu.dot_dimension_numbers<[1], [0], [0], [1], [0, 0, 1, 1], [], []>} : vector<16x128xbf16>, vector<128x128xbf16>, vector<16x128xf32> -> vector<16x128xf32>
    %675 = arith.addf %671, %674 : vector<16x128xf32>
    %c0_428 = arith.constant 0 : index
    %c0_429 = arith.constant 0 : index
    %676 = vector.load %arg42[%c0_428, %c0_429] : memref<1x128xf32, #tpu.memory_space<vmem>>, vector<1x128xf32>
    %677 = vector.broadcast %676 : vector<1x128xf32> to vector<16x128xf32>
    %678 = arith.addf %675, %677 : vector<16x128xf32>
    %cst_430 = arith.constant 0.000000e+00 : f32
    %679 = vector.broadcast %cst_430 : f32 to vector<16x128xf32>
    %680 = arith.maximumf %678, %679 : vector<16x128xf32>
    %681 = arith.truncf %680 : vector<16x128xf32> to vector<16x128xbf16>
    %c0_431 = arith.constant 0 : index
    %c0_432 = arith.constant 0 : index
    %682 = vector.load %arg45[%c0_431, %c0_432] : memref<32x16xbf16, #tpu.memory_space<vmem>>, vector<32x16xbf16>
    %c0_433 = arith.constant 0 : index
    %c0_434 = arith.constant 0 : index
    %683 = vector.load %arg44[%c0_433, %c0_434] : memref<128x256xbf16, #tpu.memory_space<vmem>>, vector<128x256xbf16>
    %cst_435 = arith.constant dense<0.000000e+00> : vector<16x256xf32>
    %684 = tpu.matmul %681, %683, %cst_435 {dimension_numbers = #tpu.dot_dimension_numbers<[1], [0], [0], [1], [0, 0, 1, 1], [], []>} : vector<16x128xbf16>, vector<128x256xbf16>, vector<16x256xf32> -> vector<16x256xf32>
    %685 = arith.truncf %684 : vector<16x256xf32> to vector<16x256xbf16>
    %cst_436 = arith.constant dense<0.000000e+00> : vector<32x256xf32>
    %686 = tpu.matmul %682, %685, %cst_436 {dimension_numbers = #tpu.dot_dimension_numbers<[1], [0], [0], [1], [0, 0, 1, 1], [], []>} : vector<32x16xbf16>, vector<16x256xbf16>, vector<32x256xf32> -> vector<32x256xf32>
    %c0_437 = arith.constant 0 : index
    %687 = memref.load %arg54[%c0_437] : memref<2xf32, #tpu.memory_space<smem>>
    %688 = arith.extf %415 : vector<32x256xbf16> to vector<32x256xf32>
    %689 = vector.broadcast %687 : f32 to vector<32x256xf32>
    %690 = arith.mulf %689, %688 : vector<32x256xf32>
    %c1_438 = arith.constant 1 : index
    %691 = memref.load %arg54[%c1_438] : memref<2xf32, #tpu.memory_space<smem>>
    %692 = vector.broadcast %691 : f32 to vector<32x256xf32>
    %693 = arith.mulf %692, %686 : vector<32x256xf32>
    %694 = arith.addf %690, %693 : vector<32x256xf32>
    %695 = arith.truncf %694 : vector<32x256xf32> to vector<32x256xbf16>
    %cst_439 = arith.constant 0.000000e+00 : bf16
    %696 = vector.broadcast %cst_439 : bf16 to vector<1x256xbf16>
    %c0_440 = arith.constant 0 : index
    %c0_441 = arith.constant 0 : index
    %697 = vector.load %arg64[%c0_440, %c0_441] : memref<34x256xbf16, #tpu.memory_space<vmem>>, vector<1x256xbf16>
    tpu.vector_store %arg64[%c0_440, %c0_441], %696 {strides = array<i32>} : memref<34x256xbf16, #tpu.memory_space<vmem>>, vector<1x256xbf16>,
    %c33_442 = arith.constant 33 : index
    %c0_443 = arith.constant 0 : index
    %698 = vector.load %arg64[%c33_442, %c0_443] : memref<34x256xbf16, #tpu.memory_space<vmem>>, vector<1x256xbf16>
    tpu.vector_store %arg64[%c33_442, %c0_443], %696 {strides = array<i32>} : memref<34x256xbf16, #tpu.memory_space<vmem>>, vector<1x256xbf16>,
    %c1_444 = arith.constant 1 : index
    %c0_445 = arith.constant 0 : index
    %699 = vector.load %arg64[%c1_444, %c0_445] : memref<34x256xbf16, #tpu.memory_space<vmem>>, vector<32x256xbf16>
    tpu.vector_store %arg64[%c1_444, %c0_445], %695 {strides = array<i32>} : memref<34x256xbf16, #tpu.memory_space<vmem>>, vector<32x256xbf16>,
    %700 = tpu.iota {dimensions = array<i32: 0>} : vector<32x1xi32>
    %c16_i32_446 = arith.constant 16 : i32
    %c0_i32_447 = arith.constant 0 : i32
    %701 = arith.cmpi eq, %c16_i32_446, %c0_i32_447 : i32
    %c1_i32_448 = arith.constant 1 : i32
    %702 = arith.select %701, %c1_i32_448, %c16_i32_446 : i32
    %703 = vector.broadcast %702 : i32 to vector<32x1xi32>
    %704 = arith.remsi %700, %703 : vector<32x1xi32>
    %c0_i32_449 = arith.constant 0 : i32
    %705 = vector.broadcast %c0_i32_449 : i32 to vector<32x1xi32>
    %706 = arith.cmpi ne, %704, %705 : vector<32x1xi32>
    %c0_i32_450 = arith.constant 0 : i32
    %707 = vector.broadcast %c0_i32_450 : i32 to vector<32x1xi32>
    %708 = arith.cmpi slt, %704, %707 : vector<32x1xi32>
    %c0_i32_451 = arith.constant 0 : i32
    %709 = arith.cmpi slt, %702, %c0_i32_451 : i32
    %710 = vector.broadcast %709 : i1 to vector<32x1xi1>
    %711 = vector.broadcast %710 : vector<32x1xi1> to vector<32x1xi1>
    %712 = arith.xori %708, %711 : vector<32x1xi1>
    %713 = arith.andi %712, %706 : vector<32x1xi1>
    %714 = vector.broadcast %702 : i32 to vector<32x1xi32>
    %715 = arith.addi %704, %714 : vector<32x1xi32>
    %716 = arith.select %713, %715, %704 : vector<32x1xi1>, vector<32x1xi32>
    %c0_i32_452 = arith.constant 0 : i32
    %717 = vector.broadcast %c0_i32_452 : i32 to vector<32x1xi32>
    %718 = arith.cmpi ne, %716, %717 : vector<32x1xi32>
    %c16_i32_453 = arith.constant 16 : i32
    %c0_i32_454 = arith.constant 0 : i32
    %719 = arith.cmpi eq, %c16_i32_453, %c0_i32_454 : i32
    %c1_i32_455 = arith.constant 1 : i32
    %720 = arith.select %719, %c1_i32_455, %c16_i32_453 : i32
    %721 = vector.broadcast %720 : i32 to vector<32x1xi32>
    %722 = arith.remsi %700, %721 : vector<32x1xi32>
    %c0_i32_456 = arith.constant 0 : i32
    %723 = vector.broadcast %c0_i32_456 : i32 to vector<32x1xi32>
    %724 = arith.cmpi ne, %722, %723 : vector<32x1xi32>
    %c0_i32_457 = arith.constant 0 : i32
    %725 = vector.broadcast %c0_i32_457 : i32 to vector<32x1xi32>
    %726 = arith.cmpi slt, %722, %725 : vector<32x1xi32>
    %c0_i32_458 = arith.constant 0 : i32
    %727 = arith.cmpi slt, %720, %c0_i32_458 : i32
    %728 = vector.broadcast %727 : i1 to vector<32x1xi1>
    %729 = vector.broadcast %728 : vector<32x1xi1> to vector<32x1xi1>
    %730 = arith.xori %726, %729 : vector<32x1xi1>
    %731 = arith.andi %730, %724 : vector<32x1xi1>
    %732 = vector.broadcast %720 : i32 to vector<32x1xi32>
    %733 = arith.addi %722, %732 : vector<32x1xi32>
    %734 = arith.select %731, %733, %722 : vector<32x1xi1>, vector<32x1xi32>
    %c15_i32_459 = arith.constant 15 : i32
    %735 = vector.broadcast %c15_i32_459 : i32 to vector<32x1xi32>
    %736 = arith.cmpi ne, %734, %735 : vector<32x1xi32>
    %c0_460 = arith.constant 0 : index
    %c0_461 = arith.constant 0 : index
    %737 = vector.load %arg64[%c0_460, %c0_461] : memref<34x256xbf16, #tpu.memory_space<vmem>>, vector<32x256xbf16>
    %cst_462 = arith.constant 0.000000e+00 : bf16
    %738 = vector.broadcast %cst_462 : bf16 to vector<32x256xbf16>
    %739 = vector.shape_cast %718 : vector<32x1xi1> to vector<32x1xi1>
    %740 = vector.broadcast %739 : vector<32x1xi1> to vector<32x256xi1>
    %741 = arith.select %740, %737, %738 : vector<32x256xi1>, vector<32x256xbf16>
    %c1_463 = arith.constant 1 : index
    %c0_464 = arith.constant 0 : index
    %742 = vector.load %arg64[%c1_463, %c0_464] : memref<34x256xbf16, #tpu.memory_space<vmem>>, vector<32x256xbf16>
    %c2_465 = arith.constant 2 : index
    %c0_466 = arith.constant 0 : index
    %743 = vector.load %arg64[%c2_465, %c0_466] : memref<34x256xbf16, #tpu.memory_space<vmem>>, vector<32x256xbf16>
    %cst_467 = arith.constant 0.000000e+00 : bf16
    %744 = vector.broadcast %cst_467 : bf16 to vector<32x256xbf16>
    %745 = vector.shape_cast %736 : vector<32x1xi1> to vector<32x1xi1>
    %746 = vector.broadcast %745 : vector<32x1xi1> to vector<32x256xi1>
    %747 = arith.select %746, %743, %744 : vector<32x256xi1>, vector<32x256xbf16>
    %c0_468 = arith.constant 0 : index
    %c0_469 = arith.constant 0 : index
    %c0_470 = arith.constant 0 : index
    %748 = vector.load %arg41[%c0_468, %c0_469, %c0_470] : memref<3x256x256xbf16, #tpu.memory_space<vmem>>, vector<1x256x256xbf16>
    %749 = vector.shape_cast %748 : vector<1x256x256xbf16> to vector<256x256xbf16>
    %cst_471 = arith.constant dense<0.000000e+00> : vector<32x256xf32>
    %750 = tpu.matmul %741, %749, %cst_471 {dimension_numbers = #tpu.dot_dimension_numbers<[1], [0], [0], [1], [0, 0, 1, 1], [], []>} : vector<32x256xbf16>, vector<256x256xbf16>, vector<32x256xf32> -> vector<32x256xf32>
    %c1_472 = arith.constant 1 : index
    %c0_473 = arith.constant 0 : index
    %c0_474 = arith.constant 0 : index
    %751 = vector.load %arg41[%c1_472, %c0_473, %c0_474] : memref<3x256x256xbf16, #tpu.memory_space<vmem>>, vector<1x256x256xbf16>
    %752 = vector.shape_cast %751 : vector<1x256x256xbf16> to vector<256x256xbf16>
    %cst_475 = arith.constant dense<0.000000e+00> : vector<32x256xf32>
    %753 = tpu.matmul %742, %752, %cst_475 {dimension_numbers = #tpu.dot_dimension_numbers<[1], [0], [0], [1], [0, 0, 1, 1], [], []>} : vector<32x256xbf16>, vector<256x256xbf16>, vector<32x256xf32> -> vector<32x256xf32>
    %754 = arith.addf %750, %753 : vector<32x256xf32>
    %c2_476 = arith.constant 2 : index
    %c0_477 = arith.constant 0 : index
    %c0_478 = arith.constant 0 : index
    %755 = vector.load %arg41[%c2_476, %c0_477, %c0_478] : memref<3x256x256xbf16, #tpu.memory_space<vmem>>, vector<1x256x256xbf16>
    %756 = vector.shape_cast %755 : vector<1x256x256xbf16> to vector<256x256xbf16>
    %cst_479 = arith.constant dense<0.000000e+00> : vector<32x256xf32>
    %757 = tpu.matmul %747, %756, %cst_479 {dimension_numbers = #tpu.dot_dimension_numbers<[1], [0], [0], [1], [0, 0, 1, 1], [], []>} : vector<32x256xbf16>, vector<256x256xbf16>, vector<32x256xf32> -> vector<32x256xf32>
    %758 = arith.addf %754, %757 : vector<32x256xf32>
    %c0_480 = arith.constant 0 : index
    %c0_481 = arith.constant 0 : index
    %759 = vector.load %arg40[%c0_480, %c0_481] : memref<1x256xf32, #tpu.memory_space<vmem>>, vector<1x256xf32>
    %760 = vector.broadcast %759 : vector<1x256xf32> to vector<32x256xf32>
    %761 = arith.addf %758, %760 : vector<32x256xf32>
    %cst_482 = arith.constant 0.000000e+00 : f32
    %762 = vector.broadcast %cst_482 : f32 to vector<32x256xf32>
    %763 = arith.maximumf %761, %762 : vector<32x256xf32>
    %764 = arith.truncf %763 : vector<32x256xf32> to vector<32x256xbf16>
    %c0_483 = arith.constant 0 : index
    %c0_484 = arith.constant 0 : index
    %765 = vector.load %arg24[%c0_483, %c0_484] : memref<16x32xbf16, #tpu.memory_space<vmem>>, vector<16x32xbf16>
    %c0_485 = arith.constant 0 : index
    %c0_486 = arith.constant 0 : index
    %766 = vector.load %arg25[%c0_485, %c0_486] : memref<16x32xbf16, #tpu.memory_space<vmem>>, vector<16x32xbf16>
    %c0_487 = arith.constant 0 : index
    %c0_488 = arith.constant 0 : index
    %767 = vector.load %arg20[%c0_487, %c0_488] : memref<256x128xbf16, #tpu.memory_space<vmem>>, vector<256x128xbf16>
    %c0_489 = arith.constant 0 : index
    %c0_490 = arith.constant 0 : index
    %768 = vector.load %arg21[%c0_489, %c0_490] : memref<256x128xbf16, #tpu.memory_space<vmem>>, vector<256x128xbf16>
    %cst_491 = arith.constant dense<0.000000e+00> : vector<16x256xf32>
    %769 = tpu.matmul %765, %764, %cst_491 {dimension_numbers = #tpu.dot_dimension_numbers<[1], [0], [0], [1], [0, 0, 1, 1], [], []>} : vector<16x32xbf16>, vector<32x256xbf16>, vector<16x256xf32> -> vector<16x256xf32>
    %cst_492 = arith.constant dense<0.000000e+00> : vector<16x256xf32>
    %770 = tpu.matmul %766, %764, %cst_492 {dimension_numbers = #tpu.dot_dimension_numbers<[1], [0], [0], [1], [0, 0, 1, 1], [], []>} : vector<16x32xbf16>, vector<32x256xbf16>, vector<16x256xf32> -> vector<16x256xf32>
    %771 = arith.maximumf %769, %770 : vector<16x256xf32>
    %772 = arith.truncf %771 : vector<16x256xf32> to vector<16x256xbf16>
    %cst_493 = arith.constant dense<0.000000e+00> : vector<16x128xf32>
    %773 = tpu.matmul %772, %767, %cst_493 {dimension_numbers = #tpu.dot_dimension_numbers<[1], [0], [0], [1], [0, 0, 1, 1], [], []>} : vector<16x256xbf16>, vector<256x128xbf16>, vector<16x128xf32> -> vector<16x128xf32>
    %cst_494 = arith.constant dense<0.000000e+00> : vector<16x128xf32>
    %774 = tpu.matmul %772, %768, %cst_494 {dimension_numbers = #tpu.dot_dimension_numbers<[1], [0], [0], [1], [0, 0, 1, 1], [], []>} : vector<16x256xbf16>, vector<256x128xbf16>, vector<16x128xf32> -> vector<16x128xf32>
    %775 = arith.maximumf %773, %774 : vector<16x128xf32>
    %c0_495 = arith.constant 0 : index
    %776 = memref.load %arg52[%c0_495] : memref<3xf32, #tpu.memory_space<smem>>
    %777 = arith.extf %509 : vector<16x128xbf16> to vector<16x128xf32>
    %778 = vector.broadcast %776 : f32 to vector<16x128xf32>
    %779 = arith.mulf %778, %777 : vector<16x128xf32>
    %c1_496 = arith.constant 1 : index
    %780 = memref.load %arg52[%c1_496] : memref<3xf32, #tpu.memory_space<smem>>
    %781 = arith.extf %681 : vector<16x128xbf16> to vector<16x128xf32>
    %782 = vector.broadcast %780 : f32 to vector<16x128xf32>
    %783 = arith.mulf %782, %781 : vector<16x128xf32>
    %784 = arith.addf %779, %783 : vector<16x128xf32>
    %c2_497 = arith.constant 2 : index
    %785 = memref.load %arg52[%c2_497] : memref<3xf32, #tpu.memory_space<smem>>
    %786 = vector.broadcast %785 : f32 to vector<16x128xf32>
    %787 = arith.mulf %786, %775 : vector<16x128xf32>
    %788 = arith.addf %784, %787 : vector<16x128xf32>
    %789 = arith.truncf %788 : vector<16x128xf32> to vector<16x128xbf16>
    %cst_498 = arith.constant 0.000000e+00 : bf16
    %790 = vector.broadcast %cst_498 : bf16 to vector<1x128xbf16>
    %c0_499 = arith.constant 0 : index
    %c0_500 = arith.constant 0 : index
    %791 = vector.load %arg65[%c0_499, %c0_500] : memref<18x128xbf16, #tpu.memory_space<vmem>>, vector<1x128xbf16>
    tpu.vector_store %arg65[%c0_499, %c0_500], %790 {strides = array<i32>} : memref<18x128xbf16, #tpu.memory_space<vmem>>, vector<1x128xbf16>,
    %c17_501 = arith.constant 17 : index
    %c0_502 = arith.constant 0 : index
    %792 = vector.load %arg65[%c17_501, %c0_502] : memref<18x128xbf16, #tpu.memory_space<vmem>>, vector<1x128xbf16>
    tpu.vector_store %arg65[%c17_501, %c0_502], %790 {strides = array<i32>} : memref<18x128xbf16, #tpu.memory_space<vmem>>, vector<1x128xbf16>,
    %c1_503 = arith.constant 1 : index
    %c0_504 = arith.constant 0 : index
    %793 = vector.load %arg65[%c1_503, %c0_504] : memref<18x128xbf16, #tpu.memory_space<vmem>>, vector<16x128xbf16>
    tpu.vector_store %arg65[%c1_503, %c0_504], %789 {strides = array<i32>} : memref<18x128xbf16, #tpu.memory_space<vmem>>, vector<16x128xbf16>,
    %794 = tpu.iota {dimensions = array<i32: 0>} : vector<16x1xi32>
    %c8_i32_505 = arith.constant 8 : i32
    %c0_i32_506 = arith.constant 0 : i32
    %795 = arith.cmpi eq, %c8_i32_505, %c0_i32_506 : i32
    %c1_i32_507 = arith.constant 1 : i32
    %796 = arith.select %795, %c1_i32_507, %c8_i32_505 : i32
    %797 = vector.broadcast %796 : i32 to vector<16x1xi32>
    %798 = arith.remsi %794, %797 : vector<16x1xi32>
    %c0_i32_508 = arith.constant 0 : i32
    %799 = vector.broadcast %c0_i32_508 : i32 to vector<16x1xi32>
    %800 = arith.cmpi ne, %798, %799 : vector<16x1xi32>
    %c0_i32_509 = arith.constant 0 : i32
    %801 = vector.broadcast %c0_i32_509 : i32 to vector<16x1xi32>
    %802 = arith.cmpi slt, %798, %801 : vector<16x1xi32>
    %c0_i32_510 = arith.constant 0 : i32
    %803 = arith.cmpi slt, %796, %c0_i32_510 : i32
    %804 = vector.broadcast %803 : i1 to vector<16x1xi1>
    %805 = vector.broadcast %804 : vector<16x1xi1> to vector<16x1xi1>
    %806 = arith.xori %802, %805 : vector<16x1xi1>
    %807 = arith.andi %806, %800 : vector<16x1xi1>
    %808 = vector.broadcast %796 : i32 to vector<16x1xi32>
    %809 = arith.addi %798, %808 : vector<16x1xi32>
    %810 = arith.select %807, %809, %798 : vector<16x1xi1>, vector<16x1xi32>
    %c0_i32_511 = arith.constant 0 : i32
    %811 = vector.broadcast %c0_i32_511 : i32 to vector<16x1xi32>
    %812 = arith.cmpi ne, %810, %811 : vector<16x1xi32>
    %c8_i32_512 = arith.constant 8 : i32
    %c0_i32_513 = arith.constant 0 : i32
    %813 = arith.cmpi eq, %c8_i32_512, %c0_i32_513 : i32
    %c1_i32_514 = arith.constant 1 : i32
    %814 = arith.select %813, %c1_i32_514, %c8_i32_512 : i32
    %815 = vector.broadcast %814 : i32 to vector<16x1xi32>
    %816 = arith.remsi %794, %815 : vector<16x1xi32>
    %c0_i32_515 = arith.constant 0 : i32
    %817 = vector.broadcast %c0_i32_515 : i32 to vector<16x1xi32>
    %818 = arith.cmpi ne, %816, %817 : vector<16x1xi32>
    %c0_i32_516 = arith.constant 0 : i32
    %819 = vector.broadcast %c0_i32_516 : i32 to vector<16x1xi32>
    %820 = arith.cmpi slt, %816, %819 : vector<16x1xi32>
    %c0_i32_517 = arith.constant 0 : i32
    %821 = arith.cmpi slt, %814, %c0_i32_517 : i32
    %822 = vector.broadcast %821 : i1 to vector<16x1xi1>
    %823 = vector.broadcast %822 : vector<16x1xi1> to vector<16x1xi1>
    %824 = arith.xori %820, %823 : vector<16x1xi1>
    %825 = arith.andi %824, %818 : vector<16x1xi1>
    %826 = vector.broadcast %814 : i32 to vector<16x1xi32>
    %827 = arith.addi %816, %826 : vector<16x1xi32>
    %828 = arith.select %825, %827, %816 : vector<16x1xi1>, vector<16x1xi32>
    %c7_i32_518 = arith.constant 7 : i32
    %829 = vector.broadcast %c7_i32_518 : i32 to vector<16x1xi32>
    %830 = arith.cmpi ne, %828, %829 : vector<16x1xi32>
    %c0_519 = arith.constant 0 : index
    %c0_520 = arith.constant 0 : index
    %831 = vector.load %arg65[%c0_519, %c0_520] : memref<18x128xbf16, #tpu.memory_space<vmem>>, vector<16x128xbf16>
    %cst_521 = arith.constant 0.000000e+00 : bf16
    %832 = vector.broadcast %cst_521 : bf16 to vector<16x128xbf16>
    %833 = vector.shape_cast %812 : vector<16x1xi1> to vector<16x1xi1>
    %834 = vector.broadcast %833 : vector<16x1xi1> to vector<16x128xi1>
    %835 = arith.select %834, %831, %832 : vector<16x128xi1>, vector<16x128xbf16>
    %c1_522 = arith.constant 1 : index
    %c0_523 = arith.constant 0 : index
    %836 = vector.load %arg65[%c1_522, %c0_523] : memref<18x128xbf16, #tpu.memory_space<vmem>>, vector<16x128xbf16>
    %c2_524 = arith.constant 2 : index
    %c0_525 = arith.constant 0 : index
    %837 = vector.load %arg65[%c2_524, %c0_525] : memref<18x128xbf16, #tpu.memory_space<vmem>>, vector<16x128xbf16>
    %cst_526 = arith.constant 0.000000e+00 : bf16
    %838 = vector.broadcast %cst_526 : bf16 to vector<16x128xbf16>
    %839 = vector.shape_cast %830 : vector<16x1xi1> to vector<16x1xi1>
    %840 = vector.broadcast %839 : vector<16x1xi1> to vector<16x128xi1>
    %841 = arith.select %840, %837, %838 : vector<16x128xi1>, vector<16x128xbf16>
    %c0_527 = arith.constant 0 : index
    %c0_528 = arith.constant 0 : index
    %c0_529 = arith.constant 0 : index
    %842 = vector.load %arg37[%c0_527, %c0_528, %c0_529] : memref<3x128x128xbf16, #tpu.memory_space<vmem>>, vector<1x128x128xbf16>
    %843 = vector.shape_cast %842 : vector<1x128x128xbf16> to vector<128x128xbf16>
    %cst_530 = arith.constant dense<0.000000e+00> : vector<16x128xf32>
    %844 = tpu.matmul %835, %843, %cst_530 {dimension_numbers = #tpu.dot_dimension_numbers<[1], [0], [0], [1], [0, 0, 1, 1], [], []>} : vector<16x128xbf16>, vector<128x128xbf16>, vector<16x128xf32> -> vector<16x128xf32>
    %c1_531 = arith.constant 1 : index
    %c0_532 = arith.constant 0 : index
    %c0_533 = arith.constant 0 : index
    %845 = vector.load %arg37[%c1_531, %c0_532, %c0_533] : memref<3x128x128xbf16, #tpu.memory_space<vmem>>, vector<1x128x128xbf16>
    %846 = vector.shape_cast %845 : vector<1x128x128xbf16> to vector<128x128xbf16>
    %cst_534 = arith.constant dense<0.000000e+00> : vector<16x128xf32>
    %847 = tpu.matmul %836, %846, %cst_534 {dimension_numbers = #tpu.dot_dimension_numbers<[1], [0], [0], [1], [0, 0, 1, 1], [], []>} : vector<16x128xbf16>, vector<128x128xbf16>, vector<16x128xf32> -> vector<16x128xf32>
    %848 = arith.addf %844, %847 : vector<16x128xf32>
    %c2_535 = arith.constant 2 : index
    %c0_536 = arith.constant 0 : index
    %c0_537 = arith.constant 0 : index
    %849 = vector.load %arg37[%c2_535, %c0_536, %c0_537] : memref<3x128x128xbf16, #tpu.memory_space<vmem>>, vector<1x128x128xbf16>
    %850 = vector.shape_cast %849 : vector<1x128x128xbf16> to vector<128x128xbf16>
    %cst_538 = arith.constant dense<0.000000e+00> : vector<16x128xf32>
    %851 = tpu.matmul %841, %850, %cst_538 {dimension_numbers = #tpu.dot_dimension_numbers<[1], [0], [0], [1], [0, 0, 1, 1], [], []>} : vector<16x128xbf16>, vector<128x128xbf16>, vector<16x128xf32> -> vector<16x128xf32>
    %852 = arith.addf %848, %851 : vector<16x128xf32>
    %c0_539 = arith.constant 0 : index
    %c0_540 = arith.constant 0 : index
    %853 = vector.load %arg36[%c0_539, %c0_540] : memref<1x128xf32, #tpu.memory_space<vmem>>, vector<1x128xf32>
    %854 = vector.broadcast %853 : vector<1x128xf32> to vector<16x128xf32>
    %855 = arith.addf %852, %854 : vector<16x128xf32>
    %cst_541 = arith.constant 0.000000e+00 : f32
    %856 = vector.broadcast %cst_541 : f32 to vector<16x128xf32>
    %857 = arith.maximumf %855, %856 : vector<16x128xf32>
    %858 = arith.truncf %857 : vector<16x128xf32> to vector<16x128xbf16>
    %c0_542 = arith.constant 0 : index
    %c0_543 = arith.constant 0 : index
    %859 = vector.load %arg26[%c0_542, %c0_543] : memref<8x16xbf16, #tpu.memory_space<vmem>>, vector<8x16xbf16>
    %c0_544 = arith.constant 0 : index
    %c0_545 = arith.constant 0 : index
    %860 = vector.load %arg27[%c0_544, %c0_545] : memref<8x16xbf16, #tpu.memory_space<vmem>>, vector<8x16xbf16>
    %c0_546 = arith.constant 0 : index
    %c0_547 = arith.constant 0 : index
    %861 = vector.load %arg22[%c0_546, %c0_547] : memref<128x64xbf16, #tpu.memory_space<vmem>>, vector<128x64xbf16>
    %c0_548 = arith.constant 0 : index
    %c0_549 = arith.constant 0 : index
    %862 = vector.load %arg23[%c0_548, %c0_549] : memref<128x64xbf16, #tpu.memory_space<vmem>>, vector<128x64xbf16>
    %cst_550 = arith.constant dense<0.000000e+00> : vector<8x128xf32>
    %863 = tpu.matmul %859, %858, %cst_550 {dimension_numbers = #tpu.dot_dimension_numbers<[1], [0], [0], [1], [0, 0, 1, 1], [], []>} : vector<8x16xbf16>, vector<16x128xbf16>, vector<8x128xf32> -> vector<8x128xf32>
    %cst_551 = arith.constant dense<0.000000e+00> : vector<8x128xf32>
    %864 = tpu.matmul %860, %858, %cst_551 {dimension_numbers = #tpu.dot_dimension_numbers<[1], [0], [0], [1], [0, 0, 1, 1], [], []>} : vector<8x16xbf16>, vector<16x128xbf16>, vector<8x128xf32> -> vector<8x128xf32>
    %865 = arith.maximumf %863, %864 : vector<8x128xf32>
    %866 = arith.truncf %865 : vector<8x128xf32> to vector<8x128xbf16>
    %cst_552 = arith.constant dense<0.000000e+00> : vector<8x64xf32>
    %867 = tpu.matmul %866, %861, %cst_552 {dimension_numbers = #tpu.dot_dimension_numbers<[1], [0], [0], [1], [0, 0, 1, 1], [], []>} : vector<8x128xbf16>, vector<128x64xbf16>, vector<8x64xf32> -> vector<8x64xf32>
    %cst_553 = arith.constant dense<0.000000e+00> : vector<8x64xf32>
    %868 = tpu.matmul %866, %862, %cst_553 {dimension_numbers = #tpu.dot_dimension_numbers<[1], [0], [0], [1], [0, 0, 1, 1], [], []>} : vector<8x128xbf16>, vector<128x64xbf16>, vector<8x64xf32> -> vector<8x64xf32>
    %869 = arith.maximumf %867, %868 : vector<8x64xf32>
    %c0_554 = arith.constant 0 : index
    %870 = memref.load %arg53[%c0_554] : memref<2xf32, #tpu.memory_space<smem>>
    %871 = arith.extf %598 : vector<8x64xbf16> to vector<8x64xf32>
    %872 = vector.broadcast %870 : f32 to vector<8x64xf32>
    %873 = arith.mulf %872, %871 : vector<8x64xf32>
    %c1_555 = arith.constant 1 : index
    %874 = memref.load %arg53[%c1_555] : memref<2xf32, #tpu.memory_space<smem>>
    %875 = vector.broadcast %874 : f32 to vector<8x64xf32>
    %876 = arith.mulf %875, %869 : vector<8x64xf32>
    %877 = arith.addf %873, %876 : vector<8x64xf32>
    %878 = arith.truncf %877 : vector<8x64xf32> to vector<8x64xbf16>
    %cst_556 = arith.constant 0.000000e+00 : bf16
    %879 = vector.broadcast %cst_556 : bf16 to vector<1x64xbf16>
    %c0_557 = arith.constant 0 : index
    %c0_558 = arith.constant 0 : index
    %880 = vector.load %arg66[%c0_557, %c0_558] : memref<10x64xbf16, #tpu.memory_space<vmem>>, vector<1x64xbf16>
    tpu.vector_store %arg66[%c0_557, %c0_558], %879 {strides = array<i32>} : memref<10x64xbf16, #tpu.memory_space<vmem>>, vector<1x64xbf16>,
    %c9_559 = arith.constant 9 : index
    %c0_560 = arith.constant 0 : index
    %881 = vector.load %arg66[%c9_559, %c0_560] : memref<10x64xbf16, #tpu.memory_space<vmem>>, vector<1x64xbf16>
    tpu.vector_store %arg66[%c9_559, %c0_560], %879 {strides = array<i32>} : memref<10x64xbf16, #tpu.memory_space<vmem>>, vector<1x64xbf16>,
    %c1_561 = arith.constant 1 : index
    %c0_562 = arith.constant 0 : index
    %882 = vector.load %arg66[%c1_561, %c0_562] : memref<10x64xbf16, #tpu.memory_space<vmem>>, vector<8x64xbf16>
    tpu.vector_store %arg66[%c1_561, %c0_562], %878 {strides = array<i32>} : memref<10x64xbf16, #tpu.memory_space<vmem>>, vector<8x64xbf16>,
    %883 = tpu.iota {dimensions = array<i32: 0>} : vector<8x1xi32>
    %c4_i32_563 = arith.constant 4 : i32
    %c0_i32_564 = arith.constant 0 : i32
    %884 = arith.cmpi eq, %c4_i32_563, %c0_i32_564 : i32
    %c1_i32_565 = arith.constant 1 : i32
    %885 = arith.select %884, %c1_i32_565, %c4_i32_563 : i32
    %886 = vector.broadcast %885 : i32 to vector<8x1xi32>
    %887 = arith.remsi %883, %886 : vector<8x1xi32>
    %c0_i32_566 = arith.constant 0 : i32
    %888 = vector.broadcast %c0_i32_566 : i32 to vector<8x1xi32>
    %889 = arith.cmpi ne, %887, %888 : vector<8x1xi32>
    %c0_i32_567 = arith.constant 0 : i32
    %890 = vector.broadcast %c0_i32_567 : i32 to vector<8x1xi32>
    %891 = arith.cmpi slt, %887, %890 : vector<8x1xi32>
    %c0_i32_568 = arith.constant 0 : i32
    %892 = arith.cmpi slt, %885, %c0_i32_568 : i32
    %893 = vector.broadcast %892 : i1 to vector<8x1xi1>
    %894 = vector.broadcast %893 : vector<8x1xi1> to vector<8x1xi1>
    %895 = arith.xori %891, %894 : vector<8x1xi1>
    %896 = arith.andi %895, %889 : vector<8x1xi1>
    %897 = vector.broadcast %885 : i32 to vector<8x1xi32>
    %898 = arith.addi %887, %897 : vector<8x1xi32>
    %899 = arith.select %896, %898, %887 : vector<8x1xi1>, vector<8x1xi32>
    %c0_i32_569 = arith.constant 0 : i32
    %900 = vector.broadcast %c0_i32_569 : i32 to vector<8x1xi32>
    %901 = arith.cmpi ne, %899, %900 : vector<8x1xi32>
    %c4_i32_570 = arith.constant 4 : i32
    %c0_i32_571 = arith.constant 0 : i32
    %902 = arith.cmpi eq, %c4_i32_570, %c0_i32_571 : i32
    %c1_i32_572 = arith.constant 1 : i32
    %903 = arith.select %902, %c1_i32_572, %c4_i32_570 : i32
    %904 = vector.broadcast %903 : i32 to vector<8x1xi32>
    %905 = arith.remsi %883, %904 : vector<8x1xi32>
    %c0_i32_573 = arith.constant 0 : i32
    %906 = vector.broadcast %c0_i32_573 : i32 to vector<8x1xi32>
    %907 = arith.cmpi ne, %905, %906 : vector<8x1xi32>
    %c0_i32_574 = arith.constant 0 : i32
    %908 = vector.broadcast %c0_i32_574 : i32 to vector<8x1xi32>
    %909 = arith.cmpi slt, %905, %908 : vector<8x1xi32>
    %c0_i32_575 = arith.constant 0 : i32
    %910 = arith.cmpi slt, %903, %c0_i32_575 : i32
    %911 = vector.broadcast %910 : i1 to vector<8x1xi1>
    %912 = vector.broadcast %911 : vector<8x1xi1> to vector<8x1xi1>
    %913 = arith.xori %909, %912 : vector<8x1xi1>
    %914 = arith.andi %913, %907 : vector<8x1xi1>
    %915 = vector.broadcast %903 : i32 to vector<8x1xi32>
    %916 = arith.addi %905, %915 : vector<8x1xi32>
    %917 = arith.select %914, %916, %905 : vector<8x1xi1>, vector<8x1xi32>
    %c3_i32_576 = arith.constant 3 : i32
    %918 = vector.broadcast %c3_i32_576 : i32 to vector<8x1xi32>
    %919 = arith.cmpi ne, %917, %918 : vector<8x1xi32>
    %c0_577 = arith.constant 0 : index
    %c0_578 = arith.constant 0 : index
    %920 = vector.load %arg66[%c0_577, %c0_578] : memref<10x64xbf16, #tpu.memory_space<vmem>>, vector<8x64xbf16>
    %cst_579 = arith.constant 0.000000e+00 : bf16
    %921 = vector.broadcast %cst_579 : bf16 to vector<8x64xbf16>
    %922 = vector.shape_cast %901 : vector<8x1xi1> to vector<8x1xi1>
    %923 = vector.broadcast %922 : vector<8x1xi1> to vector<8x64xi1>
    %924 = arith.select %923, %920, %921 : vector<8x64xi1>, vector<8x64xbf16>
    %c1_580 = arith.constant 1 : index
    %c0_581 = arith.constant 0 : index
    %925 = vector.load %arg66[%c1_580, %c0_581] : memref<10x64xbf16, #tpu.memory_space<vmem>>, vector<8x64xbf16>
    %c2_582 = arith.constant 2 : index
    %c0_583 = arith.constant 0 : index
    %926 = vector.load %arg66[%c2_582, %c0_583] : memref<10x64xbf16, #tpu.memory_space<vmem>>, vector<8x64xbf16>
    %cst_584 = arith.constant 0.000000e+00 : bf16
    %927 = vector.broadcast %cst_584 : bf16 to vector<8x64xbf16>
    %928 = vector.shape_cast %919 : vector<8x1xi1> to vector<8x1xi1>
    %929 = vector.broadcast %928 : vector<8x1xi1> to vector<8x64xi1>
    %930 = arith.select %929, %926, %927 : vector<8x64xi1>, vector<8x64xbf16>
    %c0_585 = arith.constant 0 : index
    %c0_586 = arith.constant 0 : index
    %c0_587 = arith.constant 0 : index
    %931 = vector.load %arg39[%c0_585, %c0_586, %c0_587] : memref<3x64x64xbf16, #tpu.memory_space<vmem>>, vector<1x64x64xbf16>
    %932 = vector.shape_cast %931 : vector<1x64x64xbf16> to vector<64x64xbf16>
    %cst_588 = arith.constant dense<0.000000e+00> : vector<8x64xf32>
    %933 = tpu.matmul %924, %932, %cst_588 {dimension_numbers = #tpu.dot_dimension_numbers<[1], [0], [0], [1], [0, 0, 1, 1], [], []>} : vector<8x64xbf16>, vector<64x64xbf16>, vector<8x64xf32> -> vector<8x64xf32>
    %c1_589 = arith.constant 1 : index
    %c0_590 = arith.constant 0 : index
    %c0_591 = arith.constant 0 : index
    %934 = vector.load %arg39[%c1_589, %c0_590, %c0_591] : memref<3x64x64xbf16, #tpu.memory_space<vmem>>, vector<1x64x64xbf16>
    %935 = vector.shape_cast %934 : vector<1x64x64xbf16> to vector<64x64xbf16>
    %cst_592 = arith.constant dense<0.000000e+00> : vector<8x64xf32>
    %936 = tpu.matmul %925, %935, %cst_592 {dimension_numbers = #tpu.dot_dimension_numbers<[1], [0], [0], [1], [0, 0, 1, 1], [], []>} : vector<8x64xbf16>, vector<64x64xbf16>, vector<8x64xf32> -> vector<8x64xf32>
    %937 = arith.addf %933, %936 : vector<8x64xf32>
    %c2_593 = arith.constant 2 : index
    %c0_594 = arith.constant 0 : index
    %c0_595 = arith.constant 0 : index
    %938 = vector.load %arg39[%c2_593, %c0_594, %c0_595] : memref<3x64x64xbf16, #tpu.memory_space<vmem>>, vector<1x64x64xbf16>
    %939 = vector.shape_cast %938 : vector<1x64x64xbf16> to vector<64x64xbf16>
    %cst_596 = arith.constant dense<0.000000e+00> : vector<8x64xf32>
    %940 = tpu.matmul %930, %939, %cst_596 {dimension_numbers = #tpu.dot_dimension_numbers<[1], [0], [0], [1], [0, 0, 1, 1], [], []>} : vector<8x64xbf16>, vector<64x64xbf16>, vector<8x64xf32> -> vector<8x64xf32>
    %941 = arith.addf %937, %940 : vector<8x64xf32>
    %c0_597 = arith.constant 0 : index
    %c0_598 = arith.constant 0 : index
    %942 = vector.load %arg38[%c0_597, %c0_598] : memref<1x64xf32, #tpu.memory_space<vmem>>, vector<1x64xf32>
    %943 = vector.broadcast %942 : vector<1x64xf32> to vector<8x64xf32>
    %944 = arith.addf %941, %943 : vector<8x64xf32>
    %cst_599 = arith.constant 0.000000e+00 : f32
    %945 = vector.broadcast %cst_599 : f32 to vector<8x64xf32>
    %946 = arith.maximumf %944, %945 : vector<8x64xf32>
    %947 = arith.truncf %946 : vector<8x64xf32> to vector<8x64xbf16>
    %948 = arith.extf %947 : vector<8x64xbf16> to vector<8x64xf32>
    %c0_600 = arith.constant 0 : index
    %c0_601 = arith.constant 0 : index
    %949 = vector.load %arg12[%c0_600, %c0_601] : memref<2x8xf32, #tpu.memory_space<vmem>>, vector<2x8xf32>
    %cst_602 = arith.constant dense<0.000000e+00> : vector<2x64xf32>
    %950 = tpu.matmul %949, %948, %cst_602 {dimension_numbers = #tpu.dot_dimension_numbers<[1], [0], [0], [1], [0, 0, 1, 1], [], []>} : vector<2x8xf32>, vector<8x64xf32>, vector<2x64xf32> -> vector<2x64xf32>
    %c0_603 = arith.constant 0 : index
    %c0_604 = arith.constant 0 : index
    %951 = vector.load %arg15[%c0_603, %c0_604] : memref<64x16xf32, #tpu.memory_space<vmem>>, vector<64x16xf32>
    %cst_605 = arith.constant dense<0.000000e+00> : vector<2x16xf32>
    %952 = tpu.matmul %950, %951, %cst_605 {dimension_numbers = #tpu.dot_dimension_numbers<[1], [0], [0], [1], [0, 0, 1, 1], [], []>} : vector<2x64xf32>, vector<64x16xf32>, vector<2x16xf32> -> vector<2x16xf32>
    %cst_606 = arith.constant 6.250000e-02 : f32
    %953 = vector.broadcast %cst_606 : f32 to vector<2x16xf32>
    %954 = arith.mulf %952, %953 : vector<2x16xf32>
    %c0_607 = arith.constant 0 : index
    %c0_608 = arith.constant 0 : index
    %955 = vector.load %arg14[%c0_607, %c0_608] : memref<16x10xf32, #tpu.memory_space<vmem>>, vector<16x10xf32>
    %cst_609 = arith.constant dense<0.000000e+00> : vector<2x10xf32>
    %956 = tpu.matmul %954, %955, %cst_609 {dimension_numbers = #tpu.dot_dimension_numbers<[1], [0], [0], [1], [0, 0, 1, 1], [], []>} : vector<2x16xf32>, vector<16x10xf32>, vector<2x10xf32> -> vector<2x10xf32>
    %c0_610 = arith.constant 0 : index
    %c0_611 = arith.constant 0 : index
    %957 = vector.load %arg13[%c0_610, %c0_611] : memref<1x10xf32, #tpu.memory_space<vmem>>, vector<1x10xf32>
    %958 = vector.broadcast %957 : vector<1x10xf32> to vector<2x10xf32>
    %959 = arith.addf %956, %958 : vector<2x10xf32>
    %c0_612 = arith.constant 0 : index
    %c0_613 = arith.constant 0 : index
    %960 = vector.load %arg57[%c0_612, %c0_613] : memref<2x10xf32, #tpu.memory_space<vmem>>, vector<2x10xf32>
    tpu.vector_store %arg57[%c0_612, %c0_613], %959 {strides = array<i32>} : memref<2x10xf32, #tpu.memory_space<vmem>>, vector<2x10xf32>,
    %961 = arith.extf %764 : vector<32x256xbf16> to vector<32x256xf32>
    %c0_614 = arith.constant 0 : index
    %c0_615 = arith.constant 0 : index
    %962 = vector.load %arg58[%c0_614, %c0_615] : memref<32x256xf32, #tpu.memory_space<vmem>>, vector<32x256xf32>
    tpu.vector_store %arg58[%c0_614, %c0_615], %961 {strides = array<i32>} : memref<32x256xf32, #tpu.memory_space<vmem>>, vector<32x256xf32>,
    %963 = arith.extf %858 : vector<16x128xbf16> to vector<16x128xf32>
    %c0_616 = arith.constant 0 : index
    %c0_617 = arith.constant 0 : index
    %964 = vector.load %arg59[%c0_616, %c0_617] : memref<16x128xf32, #tpu.memory_space<vmem>>, vector<16x128xf32>
    tpu.vector_store %arg59[%c0_616, %c0_617], %963 {strides = array<i32>} : memref<16x128xf32, #tpu.memory_space<vmem>>, vector<16x128xf32>,
    %965 = arith.extf %947 : vector<8x64xbf16> to vector<8x64xf32>
    %c0_618 = arith.constant 0 : index
    %c0_619 = arith.constant 0 : index
    %966 = vector.load %arg60[%c0_618, %c0_619] : memref<8x64xf32, #tpu.memory_space<vmem>>, vector<8x64xf32>
    tpu.vector_store %arg60[%c0_618, %c0_619], %965 {strides = array<i32>} : memref<8x64xf32, #tpu.memory_space<vmem>>, vector<8x64xf32>,
    return
  }
}

</mosaic_0001>

<bundles_post_ra>
// kernel: model_forward.1
= control target key start
LH: loop header
LB: loop body
LE: loop exit
PB: predicated region body
PF: predicated region fallthrough
CT: control target
= control target key end

     0   :  { %s13550_s6 = smov 1   ;;  %s13551_s10 = smov 2   ;;  %s15556_s0 = inlined_call_operand.smem [shape: u32[61], index: -1, kind: input, shape index: {}] }
   0x1   :  { %s13664_s5 = sld [smem:[%s15556_s0]]   ;;  %s13552_s14 = smov 3  }
   0x2   :  { %s13669_s9 = sld [smem:[%s15556_s0 + %s13550_s6]]   ;;  %s13553_s18 = smov 4  }
   0x3   :  { %s13674_s13 = sld [smem:[%s15556_s0 + %s13551_s10]]   ;;  %s13554_s22 = smov 5  }
   0x4   :  { %s13679_s17 = sld [smem:[%s15556_s0 + %s13552_s14]]   ;;  %s13555_s26 = smov 6  }
   0x5   :  { %s13684_s21 = sld [smem:[%s15556_s0 + %s13553_s18]]   ;;  %s13556_s30 = smov 7  }
   0x6   :  { %s13689_s25 = sld [smem:[%s15556_s0 + %s13554_s22]]   ;;  %s13557_s4 = smov 8  }
   0x7   :  { %15633 = sst [smem:[#allocation87_spill]] %s13664_s5  ;;  %s13558_s10 = smov 9  }
   0x8   :  { %15634 = sst [smem:[#allocation88_spill]] %s13669_s9  ;;  %s13559_s15 = smov 10  }
   0x9   :  { %15635 = sst [smem:[#allocation89_spill]] %s13674_s13  ;;  %s13560_s20 = smov 11  }
   0xa   :  { %15636 = sst [smem:[#allocation90_spill]] %s13679_s17  ;;  %s13562_s1 = smov 13  }
   0xb   :  { %15637 = sst [smem:[#allocation91_spill]] %s13684_s21  ;;  %s13563_s7 = smov 14  }
   0xc   :  { %15638 = sst [smem:[#allocation92_spill]] %s13689_s25  ;;  %s13565_s22 = smov 16  }
   0xd   :  { %s13694_s29 = sld [smem:[%s15556_s0 + %s13555_s26]]   ;;  %s13561_s26 = smov 12  }
   0xe   :  { %s13699_s3 = sld [smem:[%s15556_s0 + %s13556_s30]]   ;;  %s13566_s28 = smov 17  }
   0xf   :  { %s13704_s8 = sld [smem:[%s15556_s0 + %s13557_s4]]  }
  0x10   :  { %s13709_s14 = sld [smem:[%s15556_s0 + %s13558_s10]]  }
  0x11   :  { %s13714_s19 = sld [smem:[%s15556_s0 + %s13559_s15]]   ;;  %s13564_s15 = smov 15  }
  0x12   :  { %s13719_s24 = sld [smem:[%s15556_s0 + %s13560_s20]]  }
  0x13   :  { %15639 = sst [smem:[#allocation93_spill]] %s13694_s29 }
  0x14   :  { %s13724_s30 = sld [smem:[%s15556_s0 + %s13561_s26]]  }
  0x15   :  { %15640 = sst [smem:[#allocation94_spill]] %s13704_s8 }
  0x16   :  { %s13729_s6 = sld [smem:[%s15556_s0 + %s13562_s1]]  }
  0x17   :  { %15641 = sst [smem:[#allocation95_spill]] %s13714_s19 }
  0x18   :  { %15642 = sst [smem:[#allocation96_spill]] %s13719_s24 }
  0x19   :  { %s13734_s12 = sld [smem:[%s15556_s0 + %s13563_s7]]   ;;  %s13567_s7 = smov 18  }
  0x1a   :  { %s13739_s20 = sld [smem:[%s15556_s0 + %s13564_s15]]   ;;  %s13568_s15 = smov 19  }
  0x1b   :  { %s13744_s27 = sld [smem:[%s15556_s0 + %s13565_s22]]   ;;  %s13569_s22 = smov 20  }
  0x1c   :  { %15643 = sst [smem:[#allocation97_spill]] %s13729_s6 }
  0x1d   :  { %s13749_s4 = sld [smem:[%s15556_s0 + %s13566_s28]]   ;;  %s13570_s28 = smov 21  }
  0x1e   :  { %s13754_s19 = sld [smem:[%s15556_s0 + %s13567_s7]]   ;;  %s13571_s7 = smov 22  }
  0x1f   :  { %s13764_s25 = sld [smem:[%s15556_s0 + %s13569_s22]]   ;;  %s13573_s22 = smov 24  }
  0x20   :  { %15644 = sst [smem:[#allocation98_spill]] %s13739_s20 }
  0x21   :  { %15645 = sst [smem:[#allocation99_spill]] %s13744_s27 }
  0x22   :  { %s13759_s20 = sld [smem:[%s15556_s0 + %s13568_s15]]   ;;  %s13572_s15 = smov 23  }
  0x23   :  { %15646 = sst [smem:[#allocation100_spill]] %s13749_s4 }
  0x24   :  { %15647 = sst [smem:[#allocation101_spill]] %s13754_s19 }
  0x25   :  { %15649 = sst [smem:[#allocation103_spill]] %s13764_s25 }
  0x26   :  { %s13769_s21 = sld [smem:[%s15556_s0 + %s13570_s28]]   ;;  %s13574_s28 = smov 25  }
  0x27   :  { %s13774_s19 = sld [smem:[%s15556_s0 + %s13571_s7]]   ;;  %s13575_s7 = smov 26  }
  0x28   :  { %15648 = sst [smem:[#allocation102_spill]] %s13759_s20 }
  0x29   :  { %s13779_s20 = sld [smem:[%s15556_s0 + %s13572_s15]]   ;;  %s13576_s15 = smov 27  }
  0x2a   :  { %s13784_s29 = sld [smem:[%s15556_s0 + %s13573_s22]]   ;;  %s13577_s22 = smov 28  }
  0x2b   :  { %s13789_s9 = sld [smem:[%s15556_s0 + %s13574_s28]]   ;;  %s13578_s28 = smov 29  }
  0x2c   :  { %s13804_s4 = sld [smem:[%s15556_s0 + %s13577_s22]]   ;;  %s13581_s22 = smov 32  }
  0x2d   :  { %15650 = sst [smem:[#allocation104_spill]] %s13774_s19 }
  0x2e   :  { %s13794_s19 = sld [smem:[%s15556_s0 + %s13575_s7]]   ;;  %s13579_s7 = smov 30  }
  0x2f   :  { %15651 = sst [smem:[#allocation105_spill]] %s13779_s20 }
  0x30   :  { %15652 = sst [smem:[#allocation106_spill]] %s13784_s29 }
  0x31   :  { %s13799_s20 = sld [smem:[%s15556_s0 + %s13576_s15]]   ;;  %s13580_s15 = smov 31  }
  0x32   :  { %15654 = sst [smem:[#allocation108_spill]] %s13804_s4 }
  0x33   :  { %s13809_s27 = sld [smem:[%s15556_s0 + %s13578_s28]]   ;;  %s13582_s28 = smov 33  }
  0x34   :  { %15653 = sst [smem:[#allocation107_spill]] %s13794_s19 }
  0x35   :  { %s13814_s5 = sld [smem:[%s15556_s0 + %s13579_s7]]   ;;  %s13583_s7 = smov 34  }
  0x36   :  { %s13819_s13 = sld [smem:[%s15556_s0 + %s13580_s15]]   ;;  %s13584_s15 = smov 35  }
  0x37   :  { %s13824_s4 = sld [smem:[%s15556_s0 + %s13581_s22]]   ;;  %s13585_s22 = smov 36  }
  0x38   :  { %s13834_s19 = sld [smem:[%s15556_s0 + %s13583_s7]]   ;;  %s13587_s7 = smov 38  }
  0x39   :  { %15655 = sst [smem:[#allocation109_spill]] %s13809_s27 }
  0x3a   :  { %s13829_s27 = sld [smem:[%s15556_s0 + %s13582_s28]]   ;;  %s13586_s28 = smov 37  }
  0x3b   :  { %s13844_s29 = sld [smem:[%s15556_s0 + %s13585_s22]]   ;;  %s13589_s22 = smov 40  }
  0x3c   :  { %15656 = sst [smem:[#allocation110_spill]] %s13819_s13 }
  0x3d   :  { %s13839_s13 = sld [smem:[%s15556_s0 + %s13584_s15]]   ;;  %s13588_s15 = smov 39  }
  0x3e   :  { %15658 = sst [smem:[#allocation112_spill]] %s13834_s19 }
  0x3f   :  { %s13854_s19 = sld [smem:[%s15556_s0 + %s13587_s7]]   ;;  %s13591_s7 = smov 42  }
  0x40   :  { %15657 = sst [smem:[#allocation111_spill]] %s13829_s27 }
  0x41   :  { %s13849_s27 = sld [smem:[%s15556_s0 + %s13586_s28]]   ;;  %s13590_s28 = smov 41  }
  0x42   :  { %s13864_s25 = sld [smem:[%s15556_s0 + %s13589_s22]]   ;;  %s13593_s22 = smov 44  }
  0x43   :  { %15659 = sst [smem:[#allocation113_spill]] %s13839_s13 }
  0x44   :  { %s13859_s13 = sld [smem:[%s15556_s0 + %s13588_s15]]   ;;  %s13592_s15 = smov 43  }
  0x45   :  { %15661 = sst [smem:[#allocation115_spill]] %s13854_s19 }
  0x46   :  { %s13874_s19 = sld [smem:[%s15556_s0 + %s13591_s7]]   ;;  %s13595_s7 = smov 46  }
  0x47   :  { %15660 = sst [smem:[#allocation114_spill]] %s13849_s27 }
  0x48   :  { %15662 = sst [smem:[#allocation116_spill]] %s13864_s25 }
  0x49   :  { %s13869_s27 = sld [smem:[%s15556_s0 + %s13590_s28]]   ;;  %s13594_s28 = smov 45  }
  0x4a   :  { %s13879_s6 = sld [smem:[%s15556_s0 + %s13592_s15]]   ;;  %s13596_s15 = smov 47  }
  0x4b   :  { %s13884_s25 = sld [smem:[%s15556_s0 + %s13593_s22]]   ;;  %s13597_s22 = smov 48  }
  0x4c   :  { %15663 = sst [smem:[#allocation117_spill]] %s13874_s19 }
  0x4d   :  { %s13889_s24 = sld [smem:[%s15556_s0 + %s13594_s28]]   ;;  %s13598_s28 = smov 49  }
  0x4e   :  { %s13894_s19 = sld [smem:[%s15556_s0 + %s13595_s7]]   ;;  %s13599_s7 = smov 50  }
  0x4f   :  { %s13899_s8 = sld [smem:[%s15556_s0 + %s13596_s15]]   ;;  %s13600_s15 = smov 51  }
  0x51   :  { %15664 = sst [smem:[#allocation118_spill]] %s13884_s25 }
  0x52   :  { %s13904_s25 = sld [smem:[%s15556_s0 + %s13597_s22]]   ;;  %s13601_s22 = smov 52  }
  0x53   :  { %15665 = sst [smem:[#allocation119_spill]] %s13889_s24 }
  0x54   :  { %15666 = sst [smem:[#allocation120_spill]] %s13894_s19 }
  0x55   :  { %15667 = sst [smem:[#allocation121_spill]] %s13899_s8 }
  0x56   :  { %s13909_s24 = sld [smem:[%s15556_s0 + %s13598_s28]]   ;;  %s13602_s28 = smov 53  }
  0x57   :  { %s13914_s19 = sld [smem:[%s15556_s0 + %s13599_s7]]   ;;  %s13603_s7 = smov 54  }
  0x58   :  { %15668 = sst [smem:[#allocation122_spill]] %s13904_s25 }
  0x59   :  { %s13919_s8 = sld [smem:[%s15556_s0 + %s13600_s15]]   ;;  %s13604_s15 = smov 55  }
  0x5a   :  { %s13924_s25 = sld [smem:[%s15556_s0 + %s13601_s22]]   ;;  %s13605_s22 = smov 56  }
  0x5b   :  { %s13929_s17 = sld [smem:[%s15556_s0 + %s13602_s28]]   ;;  %s13606_s28 = smov 57  }
  0x5d   :  { %15669 = sst [smem:[#allocation123_spill]] %s13914_s19 }
  0x5e   :  { %s13934_s19 = sld [smem:[%s15556_s0 + %s13603_s7]]   ;;  %s13607_s7 = smov 58  }
  0x5f   :  { %15670 = sst [smem:[#allocation124_spill]] %s13919_s8 }
  0x60   :  { %15671 = sst [smem:[#allocation125_spill]] %s13924_s25 }
  0x61   :  { %15672 = sst [smem:[#allocation126_spill]] %s13929_s17 }
  0x62   :  { %s13939_s8 = sld [smem:[%s15556_s0 + %s13604_s15]]   ;;  %s13608_s15 = smov 59  }
  0x63   :  { %s13944_s25 = sld [smem:[%s15556_s0 + %s13605_s22]]   ;;  %s13609_s22 = smov 60  }
  0x64   :  { %15673 = sst [smem:[#allocation127_spill]] %s13934_s19 }
  0x65   :  { %s13949_s17 = sld [smem:[%s15556_s0 + %s13606_s28]]  }
  0x66   :  { %s13954_s19 = sld [smem:[%s15556_s0 + %s13607_s7]]  }
  0x68   :  { %15674 = sst [smem:[#allocation128_spill]] %s13939_s8 }
  0x69   :  { %15675 = sst [smem:[#allocation129_spill]] %s13944_s25 }
  0x6a   :  { %s13959_s8 = sld [smem:[%s15556_s0 + %s13608_s15]]  }
  0x6b   :  { %s13964_s25 = sld [smem:[%s15556_s0 + %s13609_s22]]  }
  0x6c   :  { %127 = vsyncpa [#allocation9], 0 }
  0x6d   :  { %128 = vsyncpa [#allocation13], 0 }
  0x6e   :  { %129 = vsyncpa [#allocation16], 0 }
  0x6f   :  { %130 = vsyncpa [#allocation19], 0 }
  0x70   :  { %131 = vsyncpa [#allocation22], 0 }
  0x71   :  { %132 = vsyncpa [#allocation25], 0 }
  0x72   :  { %133 = vsyncpa [#allocation28], 0 }
  0x73   :  { %134 = vsyncpa [#allocation31], 0 }
  0x74   :  { %135 = vsyncpa [#allocation34], 0 }
  0x75   :  { %136 = vsyncpa [#allocation37], 0 }
  0x76   :  { %137 = vsyncpa [#allocation40], 0 }
  0x77   :  { %138 = vsyncpa [#allocation43], 0 }
  0x78   :  { %139 = vsyncpa [#allocation46], 0 }
  0x79   :  { %140 = vsyncpa [#allocation49], 0 }
  0x7a   :  { %141 = vsyncpa [#allocation52], 0 }
  0x7b   :  { %142 = vsyncpa [#allocation11], 0 }
  0x7c   :  { %143 = vsyncpa [#allocation55], 0 }
  0x7d   :  { %144 = vsyncpa [#allocation58], 0 }
  0x7e   :  { %145 = vsyncpa [#allocation61], 0 }
  0x7f   :  { %146 = vsyncpa [#allocation64], 0 }
  0x80   :  { %147 = vsyncpa [#allocation10], 0  ;;  %s13610_s0 = smov [#allocation12]   ;;  %s13611_s1 = smov [#allocation15]  }
  0x81   :  { %s177_s28 = sshll.u32 %s13610_s0, 4  ;;  %s200_s2 = sshll.u32 %s13611_s1, 4  ;;  %s178_s28 = int_to_ptr.vmem [resolvable:$true] %s177_s28  ;;  %s13966_s2 = int_to_ptr.vmem [resolvable:$true] %s200_s2 }
  0x82   :  { %s12774_s7 = scalar_lea.hbm %s13699_s3, 1536 }
  0x83   :  { %p12775_p0 = scmp.ne.s32.totalorder %s13699_s3, %s12774_s7  ;;  %p12778_p1 = scmp.lt.u32.totalorder %s12774_s7, %s13699_s3 }
  0x85   :  { %p12780_p2 = pnand %p12778_p1, %p12775_p0 }
  0x87   :  { %12783 = shalt.err (!%p12780_p2)
}
  0x88   :  { %s12784_s10 = scalar_lea.vmem %s178_s28, 1536  ;;  %p12789_p4 = scmp.lt.s32.totalorder %s178_s28, %s178_s28 }
  0x89   :  { %p12785_p3 = scmp.ne.s32.totalorder %s178_s28, %s12784_s10  ;;  %p12790_p5 = scmp.lt.s32.totalorder %s12784_s10, %s12784_s10 }
  0x8b   :  { %p12791_p6 = por %p12790_p5, %p12789_p4 }
  0x8d   :  { %p12792_p7 = pnand %p12791_p6, %p12785_p3 }
  0x8f   :  { %12795 = shalt.err (!%p12792_p7)
}
  0x90   :  { %s13612_s11 = smov 64   ;;  %s13613_s15 = smov 4  }
  0x91   :  { %183 = dma.hbm_to_vmem [thread:$0]  %s13699_s3, 1536, %s178_s28, [#allocation13], %s13612_s11, %s13612_s11, %s13613_s15  }
  0x92   :  { %s12796_s16 = scalar_lea.hbm %s13709_s14, 16 }
  0x93   :  { %p12797_p8 = scmp.ne.s32.totalorder %s13709_s14, %s12796_s16  ;;  %p12800_p9 = scmp.lt.u32.totalorder %s12796_s16, %s13709_s14 }
  0x95   :  { %p12802_p10 = pnand %p12800_p9, %p12797_p8 }
  0x97   :  { %12805 = shalt.err (!%p12802_p10)
}
  0x98   :  { %s12806_s18 = scalar_lea.vmem %s13966_s2, 16  ;;  %s12810_s22 = scalar_lea.vmem %s13966_s2, 32 }
  0x99   :  { %p12807_p11 = scmp.ne.s32.totalorder %s13966_s2, %s12806_s18  ;;  %p12811_p12 = scmp.lt.s32.totalorder %s13966_s2, %s13966_s2 }
  0x9a   :  { %p12812_p13 = scmp.lt.s32.totalorder %s12810_s22, %s12806_s18 }
  0x9c   :  { %p12813_p0 = por %p12812_p13, %p12811_p12 }
  0x9e   :  { %p12814_p1 = pnand %p12813_p0, %p12807_p11 }
  0xa0   :  { %12817 = shalt.err (!%p12814_p1)
}
  0xa1   :  { %203 = dma.hbm_to_vmem [thread:$0]  %s13709_s14, 16, %s13966_s2, [#allocation16]  }
  0xa2   :  { %s13614_s3 = smov [#allocation18]   ;;  %s13615_s26 = smov [#allocation21]  }
  0xa3   :  { %s224_s23 = sshll.u32 %s13614_s3, 4  ;;  %s243_s0 = sshll.u32 %s13615_s26, 4  ;;  %s225_s23 = int_to_ptr.vmem [resolvable:$true] %s224_s23  ;;  %s13985_s0 = int_to_ptr.vmem [resolvable:$true] %s243_s0 }
  0xa4   :  { %s12818_s28 = scalar_lea.hbm %s13724_s30, 32 }
  0xa5   :  { %p12819_p2 = scmp.ne.s32.totalorder %s13724_s30, %s12818_s28  ;;  %p12822_p3 = scmp.lt.u32.totalorder %s12818_s28, %s13724_s30 }
  0xa7   :  { %p12824_p4 = pnand %p12822_p3, %p12819_p2 }
  0xa9   :  { %12827 = shalt.err (!%p12824_p4)
}
  0xaa   :  { %s12828_s1 = scalar_lea.vmem %s225_s23, 32  ;;  %p12833_p6 = scmp.lt.s32.totalorder %s225_s23, %s225_s23 }
  0xab   :  { %p12829_p5 = scmp.ne.s32.totalorder %s225_s23, %s12828_s1  ;;  %p12834_p7 = scmp.lt.s32.totalorder %s12828_s1, %s12828_s1 }
  0xad   :  { %p12835_p8 = por %p12834_p7, %p12833_p6 }
  0xaf   :  { %p12836_p9 = pnand %p12835_p8, %p12829_p5 }
  0xb1   :  { %12839 = shalt.err (!%p12836_p9)
}
  0xb2   :  { %227 = dma.hbm_to_vmem [thread:$0]  %s13724_s30, 32, %s225_s23, [#allocation19]  }
  0xb3   :  { %s12840_s14 = scalar_lea.hbm %s13734_s12, 256 }
  0xb4   :  { %p12841_p10 = scmp.ne.s32.totalorder %s13734_s12, %s12840_s14  ;;  %p12844_p11 = scmp.lt.u32.totalorder %s12840_s14, %s13734_s12 }
  0xb6   :  { %p12846_p12 = pnand %p12844_p11, %p12841_p10 }
  0xb8   :  { %12849 = shalt.err (!%p12846_p12)
}
  0xb9   :  { %s12850_s2 = scalar_lea.vmem %s13985_s0, 256  ;;  %p12855_p0 = scmp.lt.s32.totalorder %s13985_s0, %s13985_s0 }
  0xba   :  { %p12851_p13 = scmp.ne.s32.totalorder %s13985_s0, %s12850_s2  ;;  %p12856_p1 = scmp.lt.s32.totalorder %s12850_s2, %s12850_s2 }
  0xbc   :  { %p12857_p2 = por %p12856_p1, %p12855_p0 }
  0xbe   :  { %p12858_p3 = pnand %p12857_p2, %p12851_p13 }
  0xc0   :  { %12861 = shalt.err (!%p12858_p3)
}
  0xc1   :  { %s13616_s7 = smov 128   ;;  %s13617_s30 = smov 8  }
  0xc2   :  { %249 = dma.hbm_to_vmem [thread:$0]  %s13734_s12, 256, %s13985_s0, [#allocation22], %s13616_s7, %s13616_s7, %s13617_s30  }
  0xc3   :  { %s13618_s10 = smov [#allocation24]   ;;  %s13619_s18 = smov [#allocation27]  }
  0xc4   :  { %s277_s16 = sshll.u32 %s13618_s10, 4  ;;  %s305_s22 = sshll.u32 %s13619_s18, 4  ;;  %s278_s16 = int_to_ptr.vmem [resolvable:$true] %s277_s16  ;;  %s14003_s22 = int_to_ptr.vmem [resolvable:$true] %s305_s22 }
  0xc5   :  { %s12862_s3 = scalar_lea.hbm %s13769_s21, 2048 }
  0xc6   :  { %p12863_p4 = scmp.ne.s32.totalorder %s13769_s21, %s12862_s3  ;;  %p12866_p5 = scmp.lt.u32.totalorder %s12862_s3, %s13769_s21 }
  0xc8   :  { %p12868_p6 = pnand %p12866_p5, %p12863_p4 }
  0xca   :  { %12871 = shalt.err (!%p12868_p6)
}
  0xcb   :  { %s12872_s23 = scalar_lea.vmem %s278_s16, 2048  ;;  %p12877_p8 = scmp.lt.s32.totalorder %s278_s16, %s278_s16 }
  0xcc   :  { %p12873_p7 = scmp.ne.s32.totalorder %s278_s16, %s12872_s23  ;;  %p12878_p9 = scmp.lt.s32.totalorder %s12872_s23, %s12872_s23 }
  0xce   :  { %p12879_p10 = por %p12878_p9, %p12877_p8 }
  0xd0   :  { %p12880_p11 = pnand %p12879_p10, %p12873_p7 }
  0xd2   :  { %12883 = shalt.err (!%p12880_p11)
}
  0xd3   :  { %283 = dma.hbm_to_vmem [thread:$0]  %s13769_s21, 2048, %s278_s16, [#allocation25], %s13612_s11, %s13612_s11, %s13613_s15  }
  0xd4   :  { %s12884_s12 = scalar_lea.hbm %s13789_s9, 128 }
  0xd5   :  { %p12885_p12 = scmp.ne.s32.totalorder %s13789_s9, %s12884_s12  ;;  %p12888_p13 = scmp.lt.u32.totalorder %s12884_s12, %s13789_s9 }
  0xd7   :  { %p12890_p0 = pnand %p12888_p13, %p12885_p12 }
  0xd9   :  { %12893 = shalt.err (!%p12890_p0)
}
  0xda   :  { %s12894_s26 = scalar_lea.vmem %s14003_s22, 128  ;;  %p12899_p2 = scmp.lt.s32.totalorder %s14003_s22, %s14003_s22 }
  0xdb   :  { %p12895_p1 = scmp.ne.s32.totalorder %s14003_s22, %s12894_s26  ;;  %p12900_p3 = scmp.lt.s32.totalorder %s12894_s26, %s12894_s26 }
  0xdd   :  { %p12901_p4 = por %p12900_p3, %p12899_p2 }
  0xdf   :  { %p12902_p5 = pnand %p12901_p4, %p12895_p1 }
  0xe1   :  { %12905 = shalt.err (!%p12902_p5)
}
  0xe2   :  { %311 = dma.hbm_to_vmem [thread:$0]  %s13789_s9, 128, %s14003_s22, [#allocation28], %s13612_s11, %s13612_s11, %s13613_s15  }
  0xe3   :  { %s13620_s21 = smov [#allocation30]   ;;  %s13621_s28 = smov [#allocation33]  }
  0xe4   :  { %s328_s0 = sshll.u32 %s13620_s21, 4  ;;  %s350_s1 = sshll.u32 %s13621_s28, 4  ;;  %s329_s0 = int_to_ptr.vmem [resolvable:$true] %s328_s0  ;;  %s351_s1 = int_to_ptr.vmem [resolvable:$true] %s350_s1 }
  0xe5   :  { %s12906_s14 = scalar_lea.hbm %s13799_s20, 64 }
  0xe6   :  { %p12907_p6 = scmp.ne.s32.totalorder %s13799_s20, %s12906_s14  ;;  %p12910_p7 = scmp.lt.u32.totalorder %s12906_s14, %s13799_s20 }
  0xe8   :  { %p12912_p8 = pnand %p12910_p7, %p12907_p6 }
  0xea   :  { %12915 = shalt.err (!%p12912_p8)
}
  0xeb   :  { %s12916_s2 = scalar_lea.vmem %s329_s0, 64  ;;  %p12921_p10 = scmp.lt.s32.totalorder %s329_s0, %s329_s0 }
  0xec   :  { %p12917_p9 = scmp.ne.s32.totalorder %s329_s0, %s12916_s2  ;;  %p12922_p11 = scmp.lt.s32.totalorder %s12916_s2, %s12916_s2 }
  0xee   :  { %p12923_p12 = por %p12922_p11, %p12921_p10 }
  0xf0   :  { %p12924_p13 = pnand %p12923_p12, %p12917_p9 }
  0xf2   :  { %12927 = shalt.err (!%p12924_p13)
}
  0xf3   :  { %331 = dma.hbm_to_vmem [thread:$0]  %s13799_s20, 64, %s329_s0, [#allocation31]  }
  0xf4   :  { %s12928_s9 = scalar_lea.hbm %s13814_s5, 16 }
  0xf5   :  { %p12929_p0 = scmp.ne.s32.totalorder %s13814_s5, %s12928_s9  ;;  %p12932_p1 = scmp.lt.u32.totalorder %s12928_s9, %s13814_s5 }
  0xf7   :  { %p12934_p2 = pnand %p12932_p1, %p12929_p0 }
  0xf9   :  { %12937 = shalt.err (!%p12934_p2)
}
  0xfa   :  { %s12938_s10 = scalar_lea.vmem %s351_s1, 16  ;;  %s12942_s16 = scalar_lea.vmem %s351_s1, 32 }
  0xfb   :  { %p12939_p3 = scmp.ne.s32.totalorder %s351_s1, %s12938_s10  ;;  %p12943_p4 = scmp.lt.s32.totalorder %s351_s1, %s351_s1 }
  0xfc   :  { %p12944_p5 = scmp.lt.s32.totalorder %s12942_s16, %s12938_s10 }
  0xfe   :  { %p12945_p6 = por %p12944_p5, %p12943_p4 }
 0x100   :  { %p12946_p7 = pnand %p12945_p6, %p12939_p3 }
 0x102   :  { %12949 = shalt.err (!%p12946_p7)
}
 0x103   :  { %353 = dma.hbm_to_vmem [thread:$0]  %s13814_s5, 16, %s351_s1, [#allocation34]  }
 0x104   :  { %s13622_s18 = smov [#allocation36]   ;;  %s13623_s22 = smov [#allocation39]  }
 0x105   :  { %s372_s20 = sshll.u32 %s13622_s18, 4  ;;  %s396_s3 = sshll.u32 %s13623_s22, 4  ;;  %s373_s20 = int_to_ptr.vmem [resolvable:$true] %s372_s20  ;;  %s397_s3 = int_to_ptr.vmem [resolvable:$true] %s396_s3 }
 0x106   :  { %s12950_s23 = scalar_lea.hbm %s13824_s4, 32 }
 0x107   :  { %p12951_p8 = scmp.ne.s32.totalorder %s13824_s4, %s12950_s23  ;;  %p12954_p9 = scmp.lt.u32.totalorder %s12950_s23, %s13824_s4 }
 0x109   :  { %p12956_p10 = pnand %p12954_p9, %p12951_p8 }
 0x10b   :  { %12959 = shalt.err (!%p12956_p10)
}
 0x10c   :  { %s12960_s12 = scalar_lea.vmem %s373_s20, 32  ;;  %p12965_p12 = scmp.lt.s32.totalorder %s373_s20, %s373_s20 }
 0x10d   :  { %p12961_p11 = scmp.ne.s32.totalorder %s373_s20, %s12960_s12  ;;  %p12966_p13 = scmp.lt.s32.totalorder %s12960_s12, %s12960_s12 }
 0x10f   :  { %p12967_p0 = por %p12966_p13, %p12965_p12 }
 0x111   :  { %p12968_p1 = pnand %p12967_p0, %p12961_p11 }
 0x113   :  { %12971 = shalt.err (!%p12968_p1)
}
 0x114   :  { %375 = dma.hbm_to_vmem [thread:$0]  %s13824_s4, 32, %s373_s20, [#allocation37]  }
 0x115   :  { %s12972_s5 = scalar_lea.hbm %s13844_s29, 16 }
 0x116   :  { %p12973_p2 = scmp.ne.s32.totalorder %s13844_s29, %s12972_s5  ;;  %p12976_p3 = scmp.lt.u32.totalorder %s12972_s5, %s13844_s29 }
 0x118   :  { %p12978_p4 = pnand %p12976_p3, %p12973_p2 }
 0x11a   :  { %12981 = shalt.err (!%p12978_p4)
}
 0x11b   :  { %s12982_s26 = scalar_lea.vmem %s397_s3, 16  ;;  %s12986_s21 = scalar_lea.vmem %s397_s3, 32 }
 0x11c   :  { %p12983_p5 = scmp.ne.s32.totalorder %s397_s3, %s12982_s26  ;;  %p12987_p6 = scmp.lt.s32.totalorder %s397_s3, %s397_s3 }
 0x11d   :  { %p12988_p7 = scmp.lt.s32.totalorder %s12986_s21, %s12982_s26 }
 0x11f   :  { %p12989_p8 = por %p12988_p7, %p12987_p6 }
 0x121   :  { %p12990_p9 = pnand %p12989_p8, %p12983_p5 }
 0x123   :  { %12993 = shalt.err (!%p12990_p9)
}
 0x124   :  { %399 = dma.hbm_to_vmem [thread:$0]  %s13844_s29, 16, %s397_s3, [#allocation40]  }
 0x125   :  { %s13624_s0 = smov [#allocation42]   ;;  %s13625_s28 = smov [#allocation45]  }
 0x126   :  { %s417_s4 = sshll.u32 %s13624_s0, 4  ;;  %s439_s1 = sshll.u32 %s13625_s28, 4  ;;  %s418_s4 = int_to_ptr.vmem [resolvable:$true] %s417_s4  ;;  %s14040_s1 = int_to_ptr.vmem [resolvable:$true] %s439_s1 }
 0x127   :  { %s12994_s14 = scalar_lea.hbm %s13859_s13, 1536 }
 0x128   :  { %p12995_p10 = scmp.ne.s32.totalorder %s13859_s13, %s12994_s14  ;;  %p12998_p11 = scmp.lt.u32.totalorder %s12994_s14, %s13859_s13 }
 0x12a   :  { %p13000_p12 = pnand %p12998_p11, %p12995_p10 }
 0x12c   :  { %13003 = shalt.err (!%p13000_p12)
}
 0x12d   :  { %s13004_s2 = scalar_lea.vmem %s418_s4, 1536  ;;  %p13009_p0 = scmp.lt.s32.totalorder %s418_s4, %s418_s4 }
 0x12e   :  { %p13005_p13 = scmp.ne.s32.totalorder %s418_s4, %s13004_s2  ;;  %p13010_p1 = scmp.lt.s32.totalorder %s13004_s2, %s13004_s2 }
 0x130   :  { %p13011_p2 = por %p13010_p1, %p13009_p0 }
 0x132   :  { %p13012_p3 = pnand %p13011_p2, %p13005_p13 }
 0x134   :  { %13015 = shalt.err (!%p13012_p3)
}
 0x135   :  { %423 = dma.hbm_to_vmem [thread:$0]  %s13859_s13, 1536, %s418_s4, [#allocation43], %s13612_s11, %s13612_s11, %s13613_s15  }
 0x136   :  { %s13016_s29 = scalar_lea.hbm %s13869_s27, 12288 }
 0x137   :  { %p13017_p4 = scmp.ne.s32.totalorder %s13869_s27, %s13016_s29  ;;  %p13020_p5 = scmp.lt.u32.totalorder %s13016_s29, %s13869_s27 }
 0x139   :  { %p13022_p6 = pnand %p13020_p5, %p13017_p4 }
 0x13b   :  { %13025 = shalt.err (!%p13022_p6)
}
 0x13c   :  { %s13026_s9 = scalar_lea.vmem %s14040_s1, 12288  ;;  %p13031_p8 = scmp.lt.s32.totalorder %s14040_s1, %s14040_s1 }
 0x13d   :  { %p13027_p7 = scmp.ne.s32.totalorder %s14040_s1, %s13026_s9  ;;  %p13032_p9 = scmp.lt.s32.totalorder %s13026_s9, %s13026_s9 }
 0x13f   :  { %p13033_p10 = por %p13032_p9, %p13031_p8 }
 0x141   :  { %p13034_p11 = pnand %p13033_p10, %p13027_p7 }
 0x143   :  { %13037 = shalt.err (!%p13034_p11)
}
 0x144   :  { %445 = dma.hbm_to_vmem [thread:$0]  %s13869_s27, 12288, %s14040_s1, [#allocation46], %s13616_s7, %s13616_s7, %s13617_s30  }
 0x145   :  { %s512_s13 = sshll.u32 %s13909_s24, 4  ;;  %s13626_s10 = smov [#allocation48]   ;;  %s513_s13 = int_to_ptr.vmem [resolvable:$true] %s512_s13 }
 0x146   :  { %s461_s16 = sshll.u32 %s13626_s10, 4  ;;  %s13038_s18 = scalar_lea.hbm %s13879_s6, 3072  ;;  %s462_s16 = int_to_ptr.vmem [resolvable:$true] %s461_s16 }
 0x147   :  { %p13039_p12 = scmp.ne.s32.totalorder %s13879_s6, %s13038_s18  ;;  %p13042_p13 = scmp.lt.u32.totalorder %s13038_s18, %s13879_s6 }
 0x149   :  { %p13044_p0 = pnand %p13042_p13, %p13039_p12 }
 0x14b   :  { %13047 = shalt.err (!%p13044_p0)
}
 0x14c   :  { %s13048_s20 = scalar_lea.vmem %s462_s16, 3072  ;;  %p13053_p2 = scmp.lt.s32.totalorder %s462_s16, %s462_s16 }
 0x14d   :  { %p13049_p1 = scmp.ne.s32.totalorder %s462_s16, %s13048_s20  ;;  %p13054_p3 = scmp.lt.s32.totalorder %s13048_s20, %s13048_s20 }
 0x14f   :  { %p13055_p4 = por %p13054_p3, %p13053_p2 }
 0x151   :  { %p13056_p5 = pnand %p13055_p4, %p13049_p1 }
 0x153   :  { %13059 = shalt.err (!%p13056_p5)
}
 0x154   :  { %467 = dma.hbm_to_vmem [thread:$0]  %s13879_s6, 3072, %s462_s16, [#allocation49], %s13612_s11, %s13612_s11, %s13613_s15  }
 0x155   :  { %s13060_s24 = scalar_lea.vmem %s513_s13, 16  ;;  %p13065_p7 = scmp.lt.s32.totalorder %s513_s13, %s513_s13 }
 0x156   :  { %p13061_p6 = scmp.ne.s32.totalorder %s513_s13, %s13060_s24  ;;  %p13066_p8 = scmp.lt.s32.totalorder %s13060_s24, %s13060_s24 }
 0x158   :  { %p13067_p9 = por %p13066_p8, %p13065_p7 }
 0x15a   :  { %p13068_p10 = pnand %p13067_p9, %p13061_p6 }
 0x15c   :  { %13071 = shalt.err (!%p13068_p10)
}
 0x15d   :  { %s13627_s27 = smov [#allocation54]   ;;  %s15676_s22 = sld [smem:[#allocation124_spill]] }
 0x15e   :  { %s15677_s3 = sld [smem:[#allocation126_spill]] }
 0x15f   :  { %515 = dma.vmem_to_smem %s513_s13, 16, %s13627_s27, [#allocation55]  }
 0x163   :  { %s532_s23 = sshll.u32 %s15676_s22, 4  ;;  %s533_s23 = int_to_ptr.vmem [resolvable:$true] %s532_s23 }
 0x164   :  { %s552_s12 = sshll.u32 %s15677_s3, 4  ;;  %s13072_s5 = scalar_lea.vmem %s533_s23, 16  ;;  %s553_s12 = int_to_ptr.vmem [resolvable:$true] %s552_s12 }
 0x165   :  { %p13073_p11 = scmp.ne.s32.totalorder %s533_s23, %s13072_s5  ;;  %p13077_p12 = scmp.lt.s32.totalorder %s533_s23, %s533_s23 }
 0x166   :  { %p13078_p13 = scmp.lt.s32.totalorder %s13072_s5, %s13072_s5 }
 0x168   :  { %p13079_p0 = por %p13078_p13, %p13077_p12 }
 0x16a   :  { %p13080_p1 = pnand %p13079_p0, %p13073_p11 }
 0x16c   :  { %13083 = shalt.err (!%p13080_p1)
}
 0x16d   :  { %s13628_s6 = smov [#allocation57]   ;;  %s13084_s26 = scalar_lea.vmem %s553_s12, 16 }
 0x16e   :  { %535 = dma.vmem_to_smem %s533_s23, 16, %s13628_s6, [#allocation58]  }
 0x16f   :  { %p13085_p2 = scmp.ne.s32.totalorder %s553_s12, %s13084_s26  ;;  %p13089_p3 = scmp.lt.s32.totalorder %s553_s12, %s553_s12 }
 0x170   :  { %p13090_p4 = scmp.lt.s32.totalorder %s13084_s26, %s13084_s26 }
 0x172   :  { %p13091_p5 = por %p13090_p4, %p13089_p3 }
 0x174   :  { %p13092_p6 = pnand %p13091_p5, %p13085_p2 }
 0x176   :  { %13095 = shalt.err (!%p13092_p6)
}
 0x177   :  { %s13629_s21 = smov [#allocation60]   ;;  %s15678_s0 = sld [smem:[#allocation90_spill]] }
 0x178   :  { %555 = dma.vmem_to_smem %s553_s12, 16, %s13629_s21, [#allocation61]  }
 0x179   :  { %s13630_s4 = smov [#allocation8]   ;;  %s13631_s1 = smov [#allocation14]  }
 0x17a   :  { %s159_s28 = sshll.u32 %s13630_s4, 4  ;;  %s190_s14 = sshll.u32 %s13631_s1, 4  ;;  %s160_s28 = int_to_ptr.vmem [resolvable:$true] %s159_s28  ;;  %s191_s14 = int_to_ptr.vmem [resolvable:$true] %s190_s14 }
 0x17d   :  { %s13096_s2 = scalar_lea.hbm %s15678_s0, 1536 }
 0x17e   :  { %p13097_p7 = scmp.ne.s32.totalorder %s15678_s0, %s13096_s2  ;;  %p13100_p8 = scmp.lt.u32.totalorder %s13096_s2, %s15678_s0 }
 0x180   :  { %p13102_p9 = pnand %p13100_p8, %p13097_p7 }
 0x182   :  { %13105 = shalt.err (!%p13102_p9)
}
 0x183   :  { %s13106_s29 = scalar_lea.vmem %s160_s28, 1536  ;;  %p13111_p11 = scmp.lt.s32.totalorder %s160_s28, %s160_s28 }
 0x184   :  { %p13107_p10 = scmp.ne.s32.totalorder %s160_s28, %s13106_s29  ;;  %p13112_p12 = scmp.lt.s32.totalorder %s13106_s29, %s13106_s29 }
 0x186   :  { %p13113_p13 = por %p13112_p12, %p13111_p11 }
 0x188   :  { %p13114_p0 = pnand %p13113_p13, %p13107_p10 }
 0x18a   :  { %13117 = shalt.err (!%p13114_p0)
}
 0x18b   :  { %s15679_s9 = sld [smem:[#allocation94_spill]] }
 0x18c   :  { %165 = dma.hbm_to_vmem [thread:$0]  %s15678_s0, 1536, %s160_s28, [#allocation9], %s13612_s11, %s13612_s11, %s13613_s15  }
 0x191   :  { %s13118_s13 = scalar_lea.hbm %s15679_s9, 16 }
 0x192   :  { %p13119_p1 = scmp.ne.s32.totalorder %s15679_s9, %s13118_s13  ;;  %p13122_p2 = scmp.lt.u32.totalorder %s13118_s13, %s15679_s9 }
 0x194   :  { %p13124_p3 = pnand %p13122_p2, %p13119_p1 }
 0x196   :  { %13127 = shalt.err (!%p13124_p3)
}
 0x197   :  { %s13128_s10 = scalar_lea.vmem %s191_s14, 16  ;;  %s13132_s16 = scalar_lea.vmem %s191_s14, 32 }
 0x198   :  { %p13129_p4 = scmp.ne.s32.totalorder %s191_s14, %s13128_s10  ;;  %p13133_p5 = scmp.lt.s32.totalorder %s191_s14, %s191_s14 }
 0x199   :  { %p13134_p6 = scmp.lt.s32.totalorder %s13132_s16, %s13128_s10 }
 0x19b   :  { %p13135_p7 = por %p13134_p6, %p13133_p5 }
 0x19d   :  { %p13136_p8 = pnand %p13135_p7, %p13129_p4 }
 0x19f   :  { %13139 = shalt.err (!%p13136_p8)
}
 0x1a0   :  { %s15680_s18 = sld [smem:[#allocation96_spill]]  ;;  %s13632_s20 = smov [#allocation17]  }
 0x1a1   :  { %193 = dma.hbm_to_vmem [thread:$0]  %s15679_s9, 16, %s191_s14, [#allocation13]  }
 0x1a2   :  { %s211_s24 = sshll.u32 %s13632_s20, 4  ;;  %s13633_s27 = smov [#allocation20]   ;;  %s212_s24 = int_to_ptr.vmem [resolvable:$true] %s211_s24 }
 0x1a3   :  { %s234_s22 = sshll.u32 %s13633_s27, 4  ;;  %s235_s22 = int_to_ptr.vmem [resolvable:$true] %s234_s22 }
 0x1a6   :  { %s13140_s3 = scalar_lea.hbm %s15680_s18, 1536 }
 0x1a7   :  { %p13141_p9 = scmp.ne.s32.totalorder %s15680_s18, %s13140_s3  ;;  %p13144_p10 = scmp.lt.u32.totalorder %s13140_s3, %s15680_s18 }
 0x1a9   :  { %p13146_p11 = pnand %p13144_p10, %p13141_p9 }
 0x1ab   :  { %13149 = shalt.err (!%p13146_p11)
}
 0x1ac   :  { %s13150_s23 = scalar_lea.vmem %s212_s24, 1536  ;;  %p13155_p13 = scmp.lt.s32.totalorder %s212_s24, %s212_s24 }
 0x1ad   :  { %p13151_p12 = scmp.ne.s32.totalorder %s212_s24, %s13150_s23  ;;  %p13156_p0 = scmp.lt.s32.totalorder %s13150_s23, %s13150_s23 }
 0x1af   :  { %p13157_p1 = por %p13156_p0, %p13155_p13 }
 0x1b1   :  { %p13158_p2 = pnand %p13157_p1, %p13151_p12 }
 0x1b3   :  { %13161 = shalt.err (!%p13158_p2)
}
 0x1b4   :  { %s15681_s12 = sld [smem:[#allocation97_spill]] }
 0x1b5   :  { %217 = dma.hbm_to_vmem [thread:$0]  %s15680_s18, 1536, %s212_s24, [#allocation16], %s13612_s11, %s13612_s11, %s13613_s15  }
 0x1ba   :  { %s13162_s5 = scalar_lea.hbm %s15681_s12, 16 }
 0x1bb   :  { %p13163_p3 = scmp.ne.s32.totalorder %s15681_s12, %s13162_s5  ;;  %p13166_p4 = scmp.lt.u32.totalorder %s13162_s5, %s15681_s12 }
 0x1bd   :  { %p13168_p5 = pnand %p13166_p4, %p13163_p3 }
 0x1bf   :  { %13171 = shalt.err (!%p13168_p5)
}
 0x1c0   :  { %s13172_s6 = scalar_lea.vmem %s235_s22, 16  ;;  %s13176_s26 = scalar_lea.vmem %s235_s22, 32 }
 0x1c1   :  { %p13173_p6 = scmp.ne.s32.totalorder %s235_s22, %s13172_s6  ;;  %p13177_p7 = scmp.lt.s32.totalorder %s235_s22, %s235_s22 }
 0x1c2   :  { %p13178_p8 = scmp.lt.s32.totalorder %s13176_s26, %s13172_s6 }
 0x1c4   :  { %p13179_p9 = por %p13178_p8, %p13177_p7 }
 0x1c6   :  { %p13180_p10 = pnand %p13179_p9, %p13173_p6 }
 0x1c8   :  { %13183 = shalt.err (!%p13180_p10)
}
 0x1c9   :  { %s15682_s21 = sld [smem:[#allocation103_spill]]  ;;  %s13634_s0 = smov [#allocation23]  }
 0x1ca   :  { %237 = dma.hbm_to_vmem [thread:$0]  %s15681_s12, 16, %s235_s22, [#allocation19]  }
 0x1cb   :  { %s265_s4 = sshll.u32 %s13634_s0, 4  ;;  %s13635_s28 = smov [#allocation26]   ;;  %s266_s4 = int_to_ptr.vmem [resolvable:$true] %s265_s4 }
 0x1cc   :  { %s293_s1 = sshll.u32 %s13635_s28, 4  ;;  %s14093_s1 = int_to_ptr.vmem [resolvable:$true] %s293_s1 }
 0x1cf   :  { %s13184_s14 = scalar_lea.hbm %s15682_s21, 2048 }
 0x1d0   :  { %p13185_p11 = scmp.ne.s32.totalorder %s15682_s21, %s13184_s14  ;;  %p13188_p12 = scmp.lt.u32.totalorder %s13184_s14, %s15682_s21 }
 0x1d2   :  { %p13190_p13 = pnand %p13188_p12, %p13185_p11 }
 0x1d4   :  { %13193 = shalt.err (!%p13190_p13)
}
 0x1d5   :  { %s13194_s2 = scalar_lea.vmem %s266_s4, 2048  ;;  %p13199_p1 = scmp.lt.s32.totalorder %s266_s4, %s266_s4 }
 0x1d6   :  { %p13195_p0 = scmp.ne.s32.totalorder %s266_s4, %s13194_s2  ;;  %p13200_p2 = scmp.lt.s32.totalorder %s13194_s2, %s13194_s2 }
 0x1d8   :  { %p13201_p3 = por %p13200_p2, %p13199_p1 }
 0x1da   :  { %p13202_p4 = pnand %p13201_p3, %p13195_p0 }
 0x1dc   :  { %13205 = shalt.err (!%p13202_p4)
}
 0x1dd   :  { %s15683_s29 = sld [smem:[#allocation106_spill]] }
 0x1de   :  { %271 = dma.hbm_to_vmem [thread:$0]  %s15682_s21, 2048, %s266_s4, [#allocation22], %s13612_s11, %s13612_s11, %s13613_s15  }
 0x1e3   :  { %s13206_s9 = scalar_lea.hbm %s15683_s29, 128 }
 0x1e4   :  { %p13207_p5 = scmp.ne.s32.totalorder %s15683_s29, %s13206_s9  ;;  %p13210_p6 = scmp.lt.u32.totalorder %s13206_s9, %s15683_s29 }
 0x1e6   :  { %p13212_p7 = pnand %p13210_p6, %p13207_p5 }
 0x1e8   :  { %13215 = shalt.err (!%p13212_p7)
}
 0x1e9   :  { %s13216_s13 = scalar_lea.vmem %s14093_s1, 128  ;;  %p13221_p9 = scmp.lt.s32.totalorder %s14093_s1, %s14093_s1 }
 0x1ea   :  { %p13217_p8 = scmp.ne.s32.totalorder %s14093_s1, %s13216_s13  ;;  %p13222_p10 = scmp.lt.s32.totalorder %s13216_s13, %s13216_s13 }
 0x1ec   :  { %p13223_p11 = por %p13222_p10, %p13221_p9 }
 0x1ee   :  { %p13224_p12 = pnand %p13223_p11, %p13217_p8 }
 0x1f0   :  { %13227 = shalt.err (!%p13224_p12)
}
 0x1f1   :  { %s15684_s10 = sld [smem:[#allocation107_spill]]  ;;  %s13636_s16 = smov [#allocation29]  }
 0x1f2   :  { %299 = dma.hbm_to_vmem [thread:$0]  %s15683_s29, 128, %s14093_s1, [#allocation25], %s13612_s11, %s13612_s11, %s13613_s15  }
 0x1f3   :  { %s318_s18 = sshll.u32 %s13636_s16, 4  ;;  %s13637_s20 = smov [#allocation32]   ;;  %s319_s18 = int_to_ptr.vmem [resolvable:$true] %s318_s18 }
 0x1f4   :  { %s338_s24 = sshll.u32 %s13637_s20, 4  ;;  %s339_s24 = int_to_ptr.vmem [resolvable:$true] %s338_s24 }
 0x1f7   :  { %s13228_s27 = scalar_lea.hbm %s15684_s10, 64 }
 0x1f8   :  { %p13229_p13 = scmp.ne.s32.totalorder %s15684_s10, %s13228_s27  ;;  %p13232_p0 = scmp.lt.u32.totalorder %s13228_s27, %s15684_s10 }
 0x1fa   :  { %p13234_p1 = pnand %p13232_p0, %p13229_p13 }
 0x1fc   :  { %13237 = shalt.err (!%p13234_p1)
}
 0x1fd   :  { %s13238_s22 = scalar_lea.vmem %s319_s18, 64  ;;  %p13243_p3 = scmp.lt.s32.totalorder %s319_s18, %s319_s18 }
 0x1fe   :  { %p13239_p2 = scmp.ne.s32.totalorder %s319_s18, %s13238_s22  ;;  %p13244_p4 = scmp.lt.s32.totalorder %s13238_s22, %s13238_s22 }
 0x200   :  { %p13245_p5 = por %p13244_p4, %p13243_p3 }
 0x202   :  { %p13246_p6 = pnand %p13245_p5, %p13239_p2 }
 0x204   :  { %13249 = shalt.err (!%p13246_p6)
}
 0x205   :  { %s15685_s3 = sld [smem:[#allocation108_spill]] }
 0x206   :  { %321 = dma.hbm_to_vmem [thread:$0]  %s15684_s10, 64, %s319_s18, [#allocation28]  }
 0x20b   :  { %s13250_s23 = scalar_lea.hbm %s15685_s3, 16 }
 0x20c   :  { %p13251_p7 = scmp.ne.s32.totalorder %s15685_s3, %s13250_s23  ;;  %p13254_p8 = scmp.lt.u32.totalorder %s13250_s23, %s15685_s3 }
 0x20e   :  { %p13256_p9 = pnand %p13254_p8, %p13251_p7 }
 0x210   :  { %13259 = shalt.err (!%p13256_p9)
}
 0x211   :  { %s13260_s12 = scalar_lea.vmem %s339_s24, 16  ;;  %s13264_s5 = scalar_lea.vmem %s339_s24, 32 }
 0x212   :  { %p13261_p10 = scmp.ne.s32.totalorder %s339_s24, %s13260_s12  ;;  %p13265_p11 = scmp.lt.s32.totalorder %s339_s24, %s339_s24 }
 0x213   :  { %p13266_p12 = scmp.lt.s32.totalorder %s13264_s5, %s13260_s12 }
 0x215   :  { %p13267_p13 = por %p13266_p12, %p13265_p11 }
 0x217   :  { %p13268_p0 = pnand %p13267_p13, %p13261_p10 }
 0x219   :  { %13271 = shalt.err (!%p13268_p0)
}
 0x21a   :  { %s15686_s6 = sld [smem:[#allocation110_spill]]  ;;  %s13638_s26 = smov [#allocation35]  }
 0x21b   :  { %341 = dma.hbm_to_vmem [thread:$0]  %s15685_s3, 16, %s339_s24, [#allocation31]  }
 0x21c   :  { %s359_s21 = sshll.u32 %s13638_s26, 4  ;;  %s13639_s0 = smov [#allocation38]   ;;  %s360_s21 = int_to_ptr.vmem [resolvable:$true] %s359_s21 }
 0x21d   :  { %s384_s4 = sshll.u32 %s13639_s0, 4  ;;  %s385_s4 = int_to_ptr.vmem [resolvable:$true] %s384_s4 }
 0x220   :  { %s13272_s28 = scalar_lea.hbm %s15686_s6, 1536 }
 0x221   :  { %p13273_p1 = scmp.ne.s32.totalorder %s15686_s6, %s13272_s28  ;;  %p13276_p2 = scmp.lt.u32.totalorder %s13272_s28, %s15686_s6 }
 0x223   :  { %p13278_p3 = pnand %p13276_p2, %p13273_p1 }
 0x225   :  { %13281 = shalt.err (!%p13278_p3)
}
 0x226   :  { %s13282_s1 = scalar_lea.vmem %s360_s21, 1536  ;;  %p13287_p5 = scmp.lt.s32.totalorder %s360_s21, %s360_s21 }
 0x227   :  { %p13283_p4 = scmp.ne.s32.totalorder %s360_s21, %s13282_s1  ;;  %p13288_p6 = scmp.lt.s32.totalorder %s13282_s1, %s13282_s1 }
 0x229   :  { %p13289_p7 = por %p13288_p6, %p13287_p5 }
 0x22b   :  { %p13290_p8 = pnand %p13289_p7, %p13283_p4 }
 0x22d   :  { %13293 = shalt.err (!%p13290_p8)
}
 0x22e   :  { %s15687_s14 = sld [smem:[#allocation112_spill]] }
 0x22f   :  { %365 = dma.hbm_to_vmem [thread:$0]  %s15686_s6, 1536, %s360_s21, [#allocation34], %s13612_s11, %s13612_s11, %s13613_s15  }
 0x234   :  { %s13294_s2 = scalar_lea.hbm %s15687_s14, 16 }
 0x235   :  { %p13295_p9 = scmp.ne.s32.totalorder %s15687_s14, %s13294_s2  ;;  %p13298_p10 = scmp.lt.u32.totalorder %s13294_s2, %s15687_s14 }
 0x237   :  { %p13300_p11 = pnand %p13298_p10, %p13295_p9 }
 0x239   :  { %13303 = shalt.err (!%p13300_p11)
}
 0x23a   :  { %s13304_s29 = scalar_lea.vmem %s385_s4, 16  ;;  %s13308_s9 = scalar_lea.vmem %s385_s4, 32 }
 0x23b   :  { %p13305_p12 = scmp.ne.s32.totalorder %s385_s4, %s13304_s29  ;;  %p13309_p13 = scmp.lt.s32.totalorder %s385_s4, %s385_s4 }
 0x23c   :  { %p13310_p0 = scmp.lt.s32.totalorder %s13308_s9, %s13304_s29 }
 0x23e   :  { %p13311_p1 = por %p13310_p0, %p13309_p13 }
 0x240   :  { %p13312_p2 = pnand %p13311_p1, %p13305_p12 }
 0x242   :  { %13315 = shalt.err (!%p13312_p2)
}
 0x243   :  { %s15688_s13 = sld [smem:[#allocation115_spill]]  ;;  %s13640_s10 = smov [#allocation41]  }
 0x244   :  { %387 = dma.hbm_to_vmem [thread:$0]  %s15687_s14, 16, %s385_s4, [#allocation37]  }
 0x245   :  { %s408_s16 = sshll.u32 %s13640_s10, 4  ;;  %s13641_s18 = smov [#allocation44]   ;;  %s409_s16 = int_to_ptr.vmem [resolvable:$true] %s408_s16 }
 0x246   :  { %s430_s20 = sshll.u32 %s13641_s18, 4  ;;  %s431_s20 = int_to_ptr.vmem [resolvable:$true] %s430_s20 }
 0x249   :  { %s13316_s24 = scalar_lea.hbm %s15688_s13, 16 }
 0x24a   :  { %p13317_p3 = scmp.ne.s32.totalorder %s15688_s13, %s13316_s24  ;;  %p13320_p4 = scmp.lt.u32.totalorder %s13316_s24, %s15688_s13 }
 0x24c   :  { %p13322_p5 = pnand %p13320_p4, %p13317_p3 }
 0x24e   :  { %13325 = shalt.err (!%p13322_p5)
}
 0x24f   :  { %s13326_s27 = scalar_lea.vmem %s409_s16, 16  ;;  %s13330_s22 = scalar_lea.vmem %s409_s16, 32 }
 0x250   :  { %p13327_p6 = scmp.ne.s32.totalorder %s409_s16, %s13326_s27  ;;  %p13331_p7 = scmp.lt.s32.totalorder %s409_s16, %s409_s16 }
 0x251   :  { %p13332_p8 = scmp.lt.s32.totalorder %s13330_s22, %s13326_s27 }
 0x253   :  { %p13333_p9 = por %p13332_p8, %p13331_p7 }
 0x255   :  { %p13334_p10 = pnand %p13333_p9, %p13327_p6 }
 0x257   :  { %13337 = shalt.err (!%p13334_p10)
}
 0x258   :  { %s15689_s3 = sld [smem:[#allocation116_spill]] }
 0x259   :  { %411 = dma.hbm_to_vmem [thread:$0]  %s15688_s13, 16, %s409_s16, [#allocation40]  }
 0x25e   :  { %s13338_s23 = scalar_lea.hbm %s15689_s3, 32 }
 0x25f   :  { %p13339_p11 = scmp.ne.s32.totalorder %s15689_s3, %s13338_s23  ;;  %p13342_p12 = scmp.lt.u32.totalorder %s13338_s23, %s15689_s3 }
 0x261   :  { %p13344_p13 = pnand %p13342_p12, %p13339_p11 }
 0x263   :  { %13347 = shalt.err (!%p13344_p13)
}
 0x264   :  { %s13348_s12 = scalar_lea.vmem %s431_s20, 32  ;;  %p13353_p1 = scmp.lt.s32.totalorder %s431_s20, %s431_s20 }
 0x265   :  { %p13349_p0 = scmp.ne.s32.totalorder %s431_s20, %s13348_s12  ;;  %p13354_p2 = scmp.lt.s32.totalorder %s13348_s12, %s13348_s12 }
 0x267   :  { %p13355_p3 = por %p13354_p2, %p13353_p1 }
 0x269   :  { %p13356_p4 = pnand %p13355_p3, %p13349_p0 }
 0x26b   :  { %13359 = shalt.err (!%p13356_p4)
}
 0x26c   :  { %s15690_s5 = sld [smem:[#allocation117_spill]]  ;;  %s13642_s6 = smov [#allocation47]  }
 0x26d   :  { %433 = dma.hbm_to_vmem [thread:$0]  %s15689_s3, 32, %s431_s20, [#allocation43]  }
 0x26e   :  { %s452_s26 = sshll.u32 %s13642_s6, 4  ;;  %s13643_s21 = smov [#allocation50]   ;;  %s453_s26 = int_to_ptr.vmem [resolvable:$true] %s452_s26 }
 0x26f   :  { %s473_s0 = sshll.u32 %s13643_s21, 4  ;;  %s14141_s0 = int_to_ptr.vmem [resolvable:$true] %s473_s0 }
 0x272   :  { %s13360_s4 = scalar_lea.hbm %s15690_s5, 16 }
 0x273   :  { %p13361_p5 = scmp.ne.s32.totalorder %s15690_s5, %s13360_s4  ;;  %p13364_p6 = scmp.lt.u32.totalorder %s13360_s4, %s15690_s5 }
 0x275   :  { %p13366_p7 = pnand %p13364_p6, %p13361_p5 }
 0x277   :  { %13369 = shalt.err (!%p13366_p7)
}
 0x278   :  { %s13370_s28 = scalar_lea.vmem %s453_s26, 16  ;;  %s13374_s1 = scalar_lea.vmem %s453_s26, 32 }
 0x279   :  { %p13371_p8 = scmp.ne.s32.totalorder %s453_s26, %s13370_s28  ;;  %p13375_p9 = scmp.lt.s32.totalorder %s453_s26, %s453_s26 }
 0x27a   :  { %p13376_p10 = scmp.lt.s32.totalorder %s13374_s1, %s13370_s28 }
 0x27c   :  { %p13377_p11 = por %p13376_p10, %p13375_p9 }
 0x27e   :  { %p13378_p12 = pnand %p13377_p11, %p13371_p8 }
 0x280   :  { %13381 = shalt.err (!%p13378_p12)
}
 0x281   :  { %s15691_s14 = sld [smem:[#allocation118_spill]] }
 0x282   :  { %455 = dma.hbm_to_vmem [thread:$0]  %s15690_s5, 16, %s453_s26, [#allocation46]  }
 0x287   :  { %s13382_s2 = scalar_lea.hbm %s15691_s14, 2048 }
 0x288   :  { %p13383_p13 = scmp.ne.s32.totalorder %s15691_s14, %s13382_s2  ;;  %p13386_p0 = scmp.lt.u32.totalorder %s13382_s2, %s15691_s14 }
 0x28a   :  { %p13388_p1 = pnand %p13386_p0, %p13383_p13 }
 0x28c   :  { %13391 = shalt.err (!%p13388_p1)
}
 0x28d   :  { %s13392_s29 = scalar_lea.vmem %s14141_s0, 2048  ;;  %p13397_p3 = scmp.lt.s32.totalorder %s14141_s0, %s14141_s0 }
 0x28e   :  { %p13393_p2 = scmp.ne.s32.totalorder %s14141_s0, %s13392_s29  ;;  %p13398_p4 = scmp.lt.s32.totalorder %s13392_s29, %s13392_s29 }
 0x290   :  { %p13399_p5 = por %p13398_p4, %p13397_p3 }
 0x292   :  { %p13400_p6 = pnand %p13399_p5, %p13393_p2 }
 0x294   :  { %13403 = shalt.err (!%p13400_p6)
}
 0x295   :  { %s15692_s9 = sld [smem:[#allocation122_spill]]  ;;  %s15693_s13 = sld [smem:[#allocation120_spill]] }
 0x296   :  { %479 = dma.hbm_to_vmem [thread:$0]  %s15691_s14, 2048, %s14141_s0, [#allocation49], %s13616_s7, %s13616_s7, %s13617_s30  }
 0x297   :  { %s13644_s16 = smov [#allocation51]  }
 0x298   :  { %s487_s18 = sshll.u32 %s13644_s16, 4  ;;  %s488_s18 = int_to_ptr.vmem [resolvable:$true] %s487_s18 }
 0x29b   :  { %s502_s10 = sshll.u32 %s15692_s9, 4  ;;  %s13404_s20 = scalar_lea.hbm %s15693_s13, 512  ;;  %s503_s10 = int_to_ptr.vmem [resolvable:$true] %s502_s10 }
 0x29c   :  { %p13405_p7 = scmp.ne.s32.totalorder %s15693_s13, %s13404_s20  ;;  %p13408_p8 = scmp.lt.u32.totalorder %s13404_s20, %s15693_s13 }
 0x29e   :  { %p13410_p9 = pnand %p13408_p8, %p13405_p7 }
 0x2a0   :  { %13413 = shalt.err (!%p13410_p9)
}
 0x2a1   :  { %s13414_s24 = scalar_lea.vmem %s488_s18, 512  ;;  %p13419_p11 = scmp.lt.s32.totalorder %s488_s18, %s488_s18 }
 0x2a2   :  { %p13415_p10 = scmp.ne.s32.totalorder %s488_s18, %s13414_s24  ;;  %p13420_p12 = scmp.lt.s32.totalorder %s13414_s24, %s13414_s24 }
 0x2a4   :  { %p13421_p13 = por %p13420_p12, %p13419_p11 }
 0x2a6   :  { %p13422_p0 = pnand %p13421_p13, %p13415_p10 }
 0x2a8   :  { %13425 = shalt.err (!%p13422_p0)
}
 0x2a9   :  { %493 = dma.hbm_to_vmem [thread:$0]  %s15693_s13, 512, %s488_s18, [#allocation52], %s13612_s11, %s13612_s11, %s13613_s15  }
 0x2aa   :  { %s13426_s7 = scalar_lea.vmem %s503_s10, 16  ;;  %p13431_p2 = scmp.lt.s32.totalorder %s503_s10, %s503_s10 }
 0x2ab   :  { %p13427_p1 = scmp.ne.s32.totalorder %s503_s10, %s13426_s7  ;;  %p13432_p3 = scmp.lt.s32.totalorder %s13426_s7, %s13426_s7 }
 0x2ad   :  { %p13433_p4 = por %p13432_p3, %p13431_p2 }
 0x2af   :  { %p13434_p5 = pnand %p13433_p4, %p13427_p1 }
 0x2b1   :  { %13437 = shalt.err (!%p13434_p5)
}
 0x2b2   :  { %s13645_s30 = smov [#allocation53]   ;;  %s15694_s27 = sld [smem:[#allocation123_spill]] }
 0x2b3   :  { %s15695_s22 = sld [smem:[#allocation125_spill]] }
 0x2b4   :  { %505 = dma.vmem_to_smem %s503_s10, 16, %s13645_s30, [#allocation11]  }
 0x2b8   :  { %s522_s3 = sshll.u32 %s15694_s27, 4  ;;  %s523_s3 = int_to_ptr.vmem [resolvable:$true] %s522_s3 }
 0x2b9   :  { %s542_s23 = sshll.u32 %s15695_s22, 4  ;;  %s13438_s12 = scalar_lea.vmem %s523_s3, 16  ;;  %s543_s23 = int_to_ptr.vmem [resolvable:$true] %s542_s23 }
 0x2ba   :  { %p13439_p6 = scmp.ne.s32.totalorder %s523_s3, %s13438_s12  ;;  %p13443_p7 = scmp.lt.s32.totalorder %s523_s3, %s523_s3 }
 0x2bb   :  { %p13444_p8 = scmp.lt.s32.totalorder %s13438_s12, %s13438_s12 }
 0x2bd   :  { %p13445_p9 = por %p13444_p8, %p13443_p7 }
 0x2bf   :  { %p13446_p10 = pnand %p13445_p9, %p13439_p6 }
 0x2c1   :  { %13449 = shalt.err (!%p13446_p10)
}
 0x2c2   :  { %s13646_s11 = smov [#allocation56]   ;;  %s13450_s15 = scalar_lea.vmem %s543_s23, 16 }
 0x2c3   :  { %525 = dma.vmem_to_smem %s523_s3, 16, %s13646_s11, [#allocation55]  }
 0x2c4   :  { %p13451_p11 = scmp.ne.s32.totalorder %s543_s23, %s13450_s15  ;;  %p13455_p12 = scmp.lt.s32.totalorder %s543_s23, %s543_s23 }
 0x2c5   :  { %p13456_p13 = scmp.lt.s32.totalorder %s13450_s15, %s13450_s15 }
 0x2c7   :  { %p13457_p0 = por %p13456_p13, %p13455_p12 }
 0x2c9   :  { %p13458_p1 = pnand %p13457_p0, %p13451_p11 }
 0x2cb   :  { %13461 = shalt.err (!%p13458_p1)
}
 0x2cc   :  { %s13647_s5 = smov [#allocation59]   ;;  %s15696_s6 = sld [smem:[#allocation127_spill]] }
 0x2cd   :  { %s15697_s26 = sld [smem:[#allocation128_spill]] }
 0x2ce   :  { %545 = dma.vmem_to_smem %s543_s23, 16, %s13647_s5, [#allocation58]  }
 0x2d2   :  { %s562_s21 = sshll.u32 %s15696_s6, 4  ;;  %s563_s21 = int_to_ptr.vmem [resolvable:$true] %s562_s21 }
 0x2d3   :  { %s572_s0 = sshll.u32 %s15697_s26, 4  ;;  %s13462_s4 = scalar_lea.vmem %s563_s21, 16  ;;  %s573_s0 = int_to_ptr.vmem [resolvable:$true] %s572_s0 }
 0x2d4   :  { %p13463_p2 = scmp.ne.s32.totalorder %s563_s21, %s13462_s4  ;;  %p13467_p3 = scmp.lt.s32.totalorder %s563_s21, %s563_s21 }
 0x2d5   :  { %p13468_p4 = scmp.lt.s32.totalorder %s13462_s4, %s13462_s4 }
 0x2d7   :  { %p13469_p5 = por %p13468_p4, %p13467_p3 }
 0x2d9   :  { %p13470_p6 = pnand %p13469_p5, %p13463_p2 }
 0x2db   :  { %13473 = shalt.err (!%p13470_p6)
}
 0x2dc   :  { %s13648_s28 = smov [#allocation62]   ;;  %s13474_s1 = scalar_lea.vmem %s573_s0, 16 }
 0x2dd   :  { %565 = dma.vmem_to_smem %s563_s21, 16, %s13648_s28, [#allocation61]  }
 0x2de   :  { %p13475_p7 = scmp.ne.s32.totalorder %s573_s0, %s13474_s1  ;;  %p13479_p8 = scmp.lt.s32.totalorder %s573_s0, %s573_s0 }
 0x2df   :  { %p13480_p9 = scmp.lt.s32.totalorder %s13474_s1, %s13474_s1 }
 0x2e1   :  { %p13481_p10 = por %p13480_p9, %p13479_p8 }
 0x2e3   :  { %p13482_p11 = pnand %p13481_p10, %p13475_p7 }
 0x2e5   :  { %13485 = shalt.err (!%p13482_p11)
}
 0x2e6   :  { %s13649_s14 = smov [#allocation63]  }
 0x2e7   :  { %575 = dma.vmem_to_smem %s573_s0, 16, %s13649_s14, [#allocation64]  }
 0x2e8   :  { %13508 = dma.done.wait [#allocation9], 1536  }
 0x2e9   :  { %13509 = vsyncadd [#allocation9], 4294965760 }
 0x2ea   :  { %13510 = dma.done.wait [#allocation13], 1552  }
 0x2eb   :  { %13511 = vsyncadd [#allocation13], 4294965744 }
 0x2ec   :  { %13512 = dma.done.wait [#allocation16], 1552  }
 0x2ed   :  { %13513 = vsyncadd [#allocation16], 4294965744 }
 0x2ee   :  { %13514 = dma.done.wait [#allocation19], 48  }
 0x2ef   :  { %13515 = vsyncadd [#allocation19], 4294967248 }
 0x2f0   :  { %13516 = dma.done.wait [#allocation22], 2304  }
 0x2f1   :  { %13517 = vsyncadd [#allocation22], 4294964992 }
 0x2f2   :  { %13518 = dma.done.wait [#allocation25], 2176  }
 0x2f3   :  { %13519 = vsyncadd [#allocation25], 4294965120 }
 0x2f4   :  { %13520 = dma.done.wait [#allocation28], 192  }
 0x2f5   :  { %13521 = vsyncadd [#allocation28], 4294967104 }
 0x2f6   :  { %13522 = dma.done.wait [#allocation31], 80  }
 0x2f7   :  { %13523 = vsyncadd [#allocation31], 4294967216 }
 0x2f8   :  { %13524 = dma.done.wait [#allocation34], 1552  }
 0x2f9   :  { %13525 = vsyncadd [#allocation34], 4294965744 }
 0x2fa   :  { %13526 = dma.done.wait [#allocation37], 48  }
 0x2fb   :  { %13527 = vsyncadd [#allocation37], 4294967248 }
 0x2fc   :  { %13528 = dma.done.wait [#allocation40], 32  }
 0x2fd   :  { %13529 = vsyncadd [#allocation40], 4294967264 }
 0x2fe   :  { %13530 = dma.done.wait [#allocation43], 1568  }
 0x2ff   :  { %13531 = vsyncadd [#allocation43], 4294965728 }
 0x300   :  { %13532 = dma.done.wait [#allocation46], 12304  }
 0x301   :  { %13533 = vsyncadd [#allocation46], 4294954992 }
 0x302   :  { %13534 = dma.done.wait [#allocation49], 5120  }
 0x303   :  { %13535 = vsyncadd [#allocation49], 4294962176 }
 0x304   :  { %13536 = dma.done.wait [#allocation52], 512  }
 0x305   :  { %13537 = vsyncadd [#allocation52], 4294966784 }
 0x306   :  { %13538 = dma.done.wait [#allocation11], 16  }
 0x307   :  { %13539 = vsyncadd [#allocation11], 4294967280 }
 0x308   :  { %13540 = dma.done.wait [#allocation55], 32  }
 0x309   :  { %13541 = vsyncadd [#allocation55], 4294967264 }
 0x30a   :  { %13542 = dma.done.wait [#allocation58], 32  }
 0x30b   :  { %13543 = vsyncadd [#allocation58], 4294967264 }
 0x30c   :  { %13544 = dma.done.wait [#allocation61], 32  }
 0x30d   :  { %13545 = vsyncadd [#allocation61], 4294967264 }
 0x30e   :  { %13546 = dma.done.wait [#allocation64], 16  }
 0x30f   :  { %13547 = vsyncadd [#allocation64], 4294967280 }
 0x310   :  { %686 = sfence }
 0x311   :  { %v12078_v0 = vld [vmem:[#allocation8 + $0x20] sm:$0xff]   ;;  %s15698_s2 = sld [smem:[#allocation129_spill]]  ;;  %v12079_v1 = vld [vmem:[#allocation8 + $0x28] sm:$0xff]   ;;  %v12080_v2 = vld [vmem:[#allocation8 + $0x30] sm:$0xff]   ;;  %vm694_vm0 = vcmask 516096   ;;  %v759_v8 = vlaneseq  ;;  %vm15592_vm5 = vcmask 519168  }
 0x312   :  { %11178 = vmatprep.subr.bf16.mxu0 %v12078_v0  ;;  %vm695_vm1 = vsmask.f32 256  ;;  %v697_v7 = vld [vmem:[#allocation2] sm:$0x1]  ;;  %vm15591_vm3 = vsmask.f32 7938 }
 0x313   :  { %11179 = vmatpush3.bf16.msra.mxu0 %v12078_v0  ;;  %v12081_v9 = vld [vmem:[#allocation8 + $0x38] sm:$0xff]   ;;  %vm14177_vm2 = vmand %vm694_vm0, %vm695_vm1  ;;  %vm705_vm4 = vsmask.f32 4368  ;;  %v15701_v23 = vmov 0  ;;  %v14195_v27 = vshrl.u32 %v759_v8, 7  ;;  %v15705_v35 = vmov 0 }
 0x314   :  { %11180 = vmatprep.subr.bf16.mxu0 %v12079_v1  ;;  %v698_v13 = vsel %vm14177_vm2, 0, %v697_v7  ;;  %vm14185_vm6 = vmand %vm694_vm0, %vm15591_vm3  ;;  %v702_v28 = vld [vmem:[#allocation2 + $0x10] sm:$0x1]  ;;  %v14203_v36 = vld [vmem:[#allocation8] sm:$0xff]   ;;  %vm13650_vm9 = vmmov 1   ;;  %v15707_v50 = vmov 0 }
 0x315   :  { %699 = vst [vmem:[#allocation2] sm:$0x1] %v698_v13  ;;  %v15702_v23 = vsel %vm14185_vm6, 4294967295, %v15701_v23  ;;  %vm14191_vm7 = vmor %vm695_vm1, %vm705_vm4  ;;  %v703_v37 = vsel %vm14185_vm6, 0, %v702_v28  ;;  %v762_v41 = vadd.s32 16, %v14195_v27  ;;  %v14218_v43 = vadd.s32 8, %v14195_v27 }
 0x316   :  { %vm14199_vm8 = vmand %vm15592_vm5, %vm15591_vm3  ;;  %704 = vst [vmem:[#allocation2 + $0x10] sm:$0x1] %v703_v37  ;;  %v763_v44 = vadd.s32 24, %v14195_v27  ;;  %v15628_v52 = vmov 0   ;;  %vm15590_vm13 = vcmask 1040384   ;;  %v768_v55 = vand.u32 15, %v14195_v27 }
 0x317   :  { %v690_v3 = vld [vmem:[%s15698_s2] sm:$0xf]  ;;  %v691_v4 = vld [vmem:[%s15698_s2 + $0x4] sm:$0xf]  ;;  %v692_v5 = vld [vmem:[%s15698_s2 + $0x8] sm:$0xf]  ;;  %11181 = vmatpush3.bf16.msra.mxu0 %v12079_v1  ;;  %1370 = vmatprep.mubr.bf16.mxu1 %v15628_v52 }
 0x318   :  { %v693_v6 = vld [vmem:[%s15698_s2 + $0xc] sm:$0xf]  ;;  %v708_v11 = vshrl.u32 %v690_v3, 16  ;;  %v711_v12 = vshll.u32 %v690_v3, 16  ;;  %v716_v14 = vshrl.u32 %v691_v4, 16  ;;  %v719_v15 = vshll.u32 %v691_v4, 16  ;;  %11182 = vmatprep.subr.bf16.mxu0 %v12080_v2  ;;  %vm14225_vm10 = vmpackc.low %vm13650_vm9, %vm13650_vm9 }
 0x319   :  { %v725_v16 = vshrl.u32 %v692_v5, 16  ;;  %v728_v18 = vshll.u32 %v692_v5, 16  ;;  %v734_v19 = vshrl.u32 %v693_v6, 16  ;;  %v737_v20 = vshll.u32 %v693_v6, 16  ;;  %s15711_s29 = sld [smem:[#allocation89_spill]]  ;;  %s15726_s9 = sld [smem:[#allocation87_spill]] }
 0x31a   :  { %v710_v17 = vrot.slane %v708_v11, 7  ;;  %v718_v21 = vrot.slane %v716_v14, 7  ;;  %v15706_v35 = vsel %vm14199_vm8, 4294967295, %v15705_v35  ;;  %v775_v47 = vand.u32 15, %v14218_v43  ;;  %s15727_s13 = sld [smem:[#allocation99_spill]]  ;;  %s15728_s10 = sld [smem:[#allocation100_spill]] }
 0x31b   :  { %v727_v22 = vrot.slane %v725_v16, 7  ;;  %v736_v26 = vrot.slane %v734_v19, 7  ;;  %11183 = vmatpush3.bf16.msra.mxu0 %v12080_v2  ;;  %v789_v48 = vand.u32 15, %v763_v44  ;;  %v782_v49 = vand.u32 15, %v762_v41  ;;  %s15729_s16 = sld [smem:[#allocation88_spill]]  ;;  %s15741_s18 = sld [smem:[#allocation93_spill]] }
 0x31c   :  { %v714_v25 = vrot.slane %v710_v17, 4  ;;  %v721_v29 = vor.u32 %v719_v15, %v718_v21  ;;  %v723_v30 = vrot.slane %v718_v21, 4  ;;  %11184 = vmatprep.subr.bf16.mxu0 %v12081_v9  ;;  %v713_v33 = vor.u32 %v711_v12, %v710_v17  ;;  %v749_v42 = vld [vmem:[#allocation2] sm:$0xf]  ;;  %s15743_s20 = sld [smem:[#allocation91_spill]]  ;;  %s15744_s24 = sld [smem:[#allocation102_spill]] }
 0x31d   :  { %v730_v31 = vor.u32 %v728_v18, %v727_v22  ;;  %v732_v32 = vrot.slane %v727_v22, 4  ;;  %v739_v34 = vor.u32 %v737_v20, %v736_v26  ;;  %v741_v46 = vrot.slane %v736_v26, 4  ;;  %v756_v54 = vld [vmem:[#allocation2 + $0x10] sm:$0x1]  ;;  %s15745_s7 = sld [smem:[#allocation101_spill]]  ;;  %s15746_s30 = sld [smem:[#allocation92_spill]] }
 0x31e   :  { %v722_v38 = vsel %vm14191_vm7, %v714_v25, %v721_v29  ;;  %v750_v45 = vsel %vm14199_vm8, %v713_v33, %v749_v42  ;;  %v15708_v50 = vsel %vm14225_vm10, 4294967295, %v15707_v50  ;;  %vm817_vm11 = vcmp.ne.s32.totalorder %v775_v47, 15  ;;  %s15753_s27 = sld [smem:[#allocation95_spill]]  ;;  %s15755_s22 = sld [smem:[#allocation121_spill]]  ;;  %v12771_v10 = vld [vmem:[#allocation42 + $0x48] sm:$0xff]  }
 0x31f   :  { %v731_v39 = vsel %vm14191_vm7, %v723_v30, %v730_v31  ;;  %v740_v40 = vsel %vm14191_vm7, %v732_v32, %v739_v34  ;;  %753 = vst.msk [vmem:[#allocation2 + $0x4] sm:$0xf] %vm15592_vm5, %v722_v38  ;;  %11185 = vmatpush3.bf16.msra.mxu0 %v12081_v9  ;;  %751 = vst [vmem:[#allocation2] sm:$0xf] %v750_v45  ;;  %vm14229_vm12 = vcmp.ne.s32.totalorder %v789_v48, 15  ;;  %v854_v53 = vsel %vm14225_vm10, 65537, %v15628_v52 }
 0x320   :  { %754 = vst.msk [vmem:[#allocation2 + $0x8] sm:$0xf] %vm15592_vm5, %v731_v39  ;;  %755 = vst.msk [vmem:[#allocation2 + $0xc] sm:$0xf] %vm15592_vm5, %v740_v40  ;;  %11190 = vmatprep.subr.bf16.mxu0 %v14203_v36  ;;  %vm15589_vm15 = vcmask 1044484   ;;  %v14238_v56 = vrot.slane %v854_v53, 7  ;;  %v757_v58 = vsel %vm14177_vm2, %v741_v46, %v756_v54 }
 0x321   :  { %vm851_vm14 = vmpackc.low %vm817_vm11, %vm817_vm11  ;;  %vm15599_vm4 = vsmask.f32 7424  ;;  %758 = vst [vmem:[#allocation2 + $0x10] sm:$0x1] %v757_v58  ;;  %vm15602_vm11 = vcmask 523264   ;;  %v15720_v25 = vmov 0 }
 0x322   :  { %vm853_vm0 = vmpackc.low %vm14229_vm12, %vm14229_vm12  ;;  %v855_v59 = vsel %vm851_vm14, 65537, %v15628_v52  ;;  %v862_v0 = vrot.slane %v14238_v56, 4  ;;  %v12093_v5 = vld [vmem:[%s15711_s29 + $0x4] ss:$8 sps:$4 sm:$0xff]   ;;  %vm14269_vm14 = vcmp.ne.s32.totalorder %v782_v49, 0  ;;  %v15722_v31 = vmov 0 }
 0x323   :  { %v857_v62 = vsel %vm853_vm0, 65537, %v15628_v52  ;;  %vm14255_vm9 = vmor %vm15590_vm13, %vm15589_vm15  ;;  %v863_v2 = vrot.slane %v855_v59, 7  ;;  %vm14273_vm0 = vcmp.ne.s32.totalorder %v768_v55, 0  ;;  %1338 = vmatprep.subr.bf16.mxu1 %v12093_v5  ;;  %v12095_v14 = vld [vmem:[%s15711_s29] ss:$8 sps:$4 sm:$0xff]   ;;  %v15724_v34 = vmov 0 }
 0x324   :  { %v869_v3 = vrot.slane %v857_v62, 7  ;;  %vm14264_vm12 = vmand %vm15590_vm13, %vm695_vm1  ;;  %vm15595_vm1 = vcmp.ne.s16.totalorder %v14238_v56, 0  ;;  %v12096_v18 = vld [vmem:[%s15711_s29 + $0x14] ss:$8 sps:$4 sm:$0xff]   ;;  %v12098_v19 = vld [vmem:[%s15711_s29 + $0x10] ss:$8 sps:$4 sm:$0xff]   ;;  %1339 = vmatpush1.bf16.msra.mxu1 %v12095_v14 }
 0x325   :  { %v14282_v15 = vsel %vm14255_vm9, %v862_v0, %v863_v2  ;;  %v865_v16 = vrot.slane %v863_v2, 4  ;;  %vm14293_vm15 = vmpackc.low %vm14273_vm0, %vm14273_vm0  ;;  %1340 = vmatprep.subr.bf16.mxu1 %v12096_v18  ;;  %v12099_v30 = vld [vmem:[%s15711_s29 + $0x24] ss:$8 sps:$4 sm:$0xff]   ;;  %v12101_v47 = vld [vmem:[%s15711_s29 + $0x20] ss:$8 sps:$4 sm:$0xff]   ;;  %s15760_s3 = sld [smem:[#allocation113_spill]] }
 0x326   :  { %v14248_v60 = vld [vmem:[#allocation2 + $0x4] sm:$0xf]  ;;  %v820_v7 = vld [vmem:[#allocation2] sm:$0xf]  ;;  %v14286_v17 = vsel %vm14255_vm9, %v862_v0, %v869_v3  ;;  %v15721_v25 = vsel %vm14293_vm15, 4294967295, %v15720_v25  ;;  %vm15597_vm13 = vcmp.ne.s16.totalorder %v14282_v15, 0  ;;  %vm14311_vm0 = vmpackc.low %vm14269_vm14, %vm14269_vm14 }
 0x327   :  { %v14240_v57 = vld [vmem:[#allocation2 + $0x8] sm:$0xf]  ;;  %v14250_v61 = vld [vmem:[#allocation2 + $0xc] sm:$0xf]  ;;  %v841_v9 = vld [vmem:[#allocation2] sm:$0xe]  ;;  %v9872_v11 = vcombine.low %v820_v7, %v14248_v60  ;;  %v867_v26 = vsel %vm14255_vm9, %v865_v16, %v14238_v56 }
 0x328   :  { %v9873_v1 = vcombine.low %v14240_v57, %v14250_v61  ;;  %vm15594_vm3 = vcmp.ne.s16.totalorder %v14286_v17, 0  ;;  %v877_v28 = vsel %vm15595_vm1, %v841_v9, 0  ;;  %v878_v29 = vsel %vm15597_vm13, %v14248_v60, 0  ;;  %v840_v33 = vld [vmem:[#allocation2 + $0x10] sm:$0x1]  ;;  %1341 = vmatpush1.bf16.msra.mxu1 %v12098_v19  ;;  %v12087_v5 = vld [vmem:[#allocation8 + $0x10] sm:$0xff]  }
 0x329   :  { %v914_v20 = vshrl.u32 %v9872_v11, 16  ;;  %v916_v21 = vshll.u32 %v9872_v11, 16  ;;  %v15723_v31 = vsel %vm14311_vm0, 4294967295, %v15722_v31  ;;  %vm14315_vm5 = vcmp.ne.s16.totalorder %v867_v26, 0  ;;  %1342 = vmatprep.subr.bf16.mxu1 %v12099_v30  ;;  %v12102_v53 = vld [vmem:[%s15711_s29 + $0x34] ss:$8 sps:$4 sm:$0xff]  }
 0x32a   :  { %v921_v12 = vshll.u32 %v9873_v1, 16  ;;  %v925_v13 = vshrl.u32 %v9873_v1, 16  ;;  %v15725_v34 = vsel %vm14315_vm5, 4294967295, %v15724_v34  ;;  %v880_v37 = vsel %vm15594_vm3, %v14250_v61, 0  ;;  %v12086_v58 = vld [vmem:[#allocation8 + $0x8] sm:$0xff]   ;;  %v12088_v9 = vld [vmem:[#allocation8 + $0x18] sm:$0xff]  }
 0x32b   :  { %v918_v32 = vrot.slane %v916_v21, 1  ;;  %v9874_v38 = vcombine.low %v840_v33, %v840_v33  ;;  %v836_v39 = vsel %vm14293_vm15, %v820_v7, 0  ;;  %v837_v40 = vsel %vm14225_vm10, %v14248_v60, 0  ;;  %v12104_v59 = vld [vmem:[%s15711_s29 + $0x30] ss:$8 sps:$4 sm:$0xff]   ;;  %v12092_v18 = vld [vmem:[#allocation8 + $0x58] sm:$0xff]  }
 0x32c   :  { %v923_v22 = vrot.slane %v921_v12, 1  ;;  %v879_v41 = vsel %vm14315_vm5, %v14240_v57, 0  ;;  %v9889_v44 = vcombine.low %v877_v28, %v878_v29  ;;  %v14332_v46 = vrot.slane %v869_v3, 4  ;;  %v12105_v0 = vld [vmem:[%s15711_s29 + $0x44] ss:$8 sps:$4 sm:$0xff]   ;;  %1343 = vmatpush1.bf16.msra.mxu1 %v12101_v47  ;;  %v12091_v16 = vld [vmem:[#allocation8 + $0x50] sm:$0xff]  }
 0x32d   :  { %v919_v42 = vor.u32 %v918_v32, %v914_v20  ;;  %v14330_v45 = vcombine.low %v879_v41, %v880_v37  ;;  %v838_v48 = vsel %vm14311_vm0, %v14240_v57, 0  ;;  %v929_v51 = vshll.u32 %v9874_v38, 16  ;;  %1344 = vmatprep.subr.bf16.mxu1 %v12102_v53  ;;  %v12107_v7 = vld [vmem:[%s15711_s29 + $0x40] ss:$8 sps:$4 sm:$0xff]   ;;  %v12108_v8 = vld [vmem:[%s15711_s29 + $0x54] ss:$8 sps:$4 sm:$0xff]  }
 0x32e   :  { %v927_v49 = vor.u32 %v925_v13, %v923_v22  ;;  %v839_v54 = vsel %vm14225_vm10, %v14250_v61, 0  ;;  %vm15593_vm14 = vcmp.ne.s16.totalorder %v14332_v46, 0  ;;  %v9881_v57 = vcombine.low %v836_v39, %v837_v40  ;;  %v12110_v11 = vld [vmem:[%s15711_s29 + $0x50] ss:$8 sps:$4 sm:$0xff]   ;;  %v12089_v12 = vld [vmem:[#allocation8 + $0x40] sm:$0xff]   ;;  %s3061_s23 = sld [smem:[#allocation57]] }
 0x32f   :  { %v924_v55 = vsel %vm15599_vm4, %v919_v42, %v923_v22  ;;  %v931_v60 = vrot.slane %v929_v51, 1  ;;  %v881_v62 = vsel %vm15593_vm14, %v840_v33, 0  ;;  %v1125_v1 = vrot.slane %v9889_v44, 1  ;;  %v12090_v14 = vld [vmem:[#allocation8 + $0x48] sm:$0xff]   ;;  %v12113_v21 = vld [vmem:[%s15711_s29 + $0x60] ss:$8 sps:$4 sm:$0xff]  }
 0x330   :  { %11186 = vmatprep.mubr.msk.bf16.mxu0 %vm15602_vm11, %v924_v55  ;;  %v1126_v2 = vrot.slane %v14330_v45, 1  ;;  %v9891_v61 = vcombine.low %v881_v62, %v881_v62  ;;  %1345 = vmatpush1.bf16.msra.mxu1 %v12104_v59  ;;  %vm15598_vm14 = vcmask 1046528   ;;  %v9882_v13 = vcombine.low %v838_v48, %v839_v54  ;;  %v12111_v20 = vld [vmem:[%s15711_s29 + $0x64] ss:$8 sps:$4 sm:$0xff]   ;;  %v12114_v22 = vld [vmem:[%s15711_s29 + $0x74] ss:$8 sps:$4 sm:$0xff]  }
 0x331   :  { %v932_v3 = vsel %vm15599_vm4, %v927_v49, %v931_v60  ;;  %1346 = vmatprep.subr.bf16.mxu1 %v12105_v0  ;;  %v12116_v26 = vld [vmem:[%s15711_s29 + $0x70] ss:$8 sps:$4 sm:$0xff]   ;;  %v15630_v28 = vmov 0.0   ;;  %vm15600_vm3 = vmmov 0   ;;  %v9898_v29 = vld [vmem:[%s15726_s9] ss:$0 sm:$0xff] }
 0x332   :  { %11187 = vmatmul.mubr.msk.bf16.vlgmr.msra.gmra.mrb[0].mxu0 %vm15602_vm11, %v932_v3  ;;  %v1128_v6 = vrot.slane %v9891_v61, 1  ;;  %vm15596_vm1 = vcmask 261120   ;;  %v12117_v51 = vld [vmem:[#allocation26] sm:$0xff]   ;;  %v12118_v53 = vld [vmem:[#allocation27] sm:$0xff]   ;;  %v12123_v60 = vld [vmem:[%s15727_s13 + $0x10] sm:$0xff]   ;;  %vm15730_vm13 = vcmask 519168  }
 0x333   :  { %11191 = vmatpush3.bf16.msra.mxu0 %v14203_v36  ;;  %11198 = vmatprep.mubr.msk.bf16.mxu0 %vm15602_vm11, %v9881_v57  ;;  %v1127_v36 = vsel %vm15598_vm14, %v1125_v1, %v1126_v2  ;;  %v12119_v54 = vld [vmem:[%s15727_s13] sm:$0xff]   ;;  %v12122_v59 = vld [vmem:[%s15728_s10 + $0x8] sm:$0xff]   ;;  %v12124_v57 = vld [vmem:[%s15728_s10 + $0x10] sm:$0xff]   ;;  %s10020_s12 = sld [smem:[#allocation57 + $0x1]]  ;;  %s5193_s11 = sld [smem:[#allocation53]] }
 0x334   :  { %11192 = vmatprep.subr.bf16.mxu0 %v12086_v58  ;;  %1347 = vmatpush1.bf16.msra.mxu1 %v12107_v7  ;;  %v1129_v19 = vsel %vm15598_vm14, %v1126_v2, %v1128_v6  ;;  %v12120_v55 = vld [vmem:[%s15728_s10] sm:$0xff]   ;;  %v12125_v62 = vld [vmem:[%s15727_s13 + $0x18] sm:$0xff]   ;;  %v12129_v61 = vld [vmem:[%s15727_s13 + $0x28] sm:$0xff]   ;;  %s10322_s15 = sld [smem:[#allocation53 + $0x1]]  ;;  %s15770_s5 = sld [smem:[#allocation111_spill]] }
 0x335   :  { %1348 = vmatprep.subr.bf16.mxu1 %v12108_v8  ;;  %v12126_v0 = vld [vmem:[%s15728_s10 + $0x18] sm:$0xff]   ;;  %v12127_v1 = vld [vmem:[%s15727_s13 + $0x20] sm:$0xff]   ;;  %v12130_v3 = vld [vmem:[%s15728_s10 + $0x28] sm:$0xff]   ;;  %s15771_s6 = sld [smem:[#allocation119_spill]]  ;;  %s3709_s26 = sld [smem:[#allocation56]] }
 0x336   :  { %v12128_v2 = vld [vmem:[%s15728_s10 + $0x20] sm:$0xff]   ;;  %v12132_v6 = vld [vmem:[%s15728_s10 + $0x30] sm:$0xff]   ;;  %v12133_v7 = vld [vmem:[%s15727_s13 + $0x38] sm:$0xff]   ;;  %s10105_s21 = sld [smem:[#allocation56 + $0x1]]  ;;  %s15798_s0 = sld [smem:[#allocation109_spill]] }
 0x337   :  { %11193 = vmatpush3.bf16.msra.mxu0 %v12086_v58  ;;  %v12121_v58 = vld [vmem:[%s15727_s13 + $0x8] sm:$0xff]   ;;  %v12134_v8 = vld [vmem:[%s15728_s10 + $0x38] sm:$0xff]   ;;  %s10323_s4 = sld [smem:[#allocation53 + $0x2]]  ;;  %s15802_s28 = sld [smem:[#allocation104_spill]] }
 0x338   :  { %11194 = vmatprep.subr.bf16.mxu0 %v12087_v5  ;;  %1349 = vmatpush1.bf16.msra.mxu1 %v12110_v11  ;;  %v1246_v11 = vld [vmem:[%s15729_s16] sm:$0x3]  ;;  %s15804_s1 = sld [smem:[#allocation105_spill]]  ;;  %s5928_s14 = sld [smem:[#allocation54]] }
 0x339   :  { %1350 = vmatprep.subr.bf16.mxu1 %v12111_v20  ;;  %s10406_s2 = sld [smem:[#allocation54 + $0x1]]  ;;  %s6354_s29 = sld [smem:[#allocation63]] }
 0x33a   :  { %s10433_s9 = sld [smem:[#allocation63 + $0x1]]  ;;  %s6998_s16 = sld [smem:[#allocation62]] }
 0x33b   :  { %11195 = vmatpush3.bf16.msra.mxu0 %v12087_v5  ;;  %v12131_v5 = vld [vmem:[%s15727_s13 + $0x30] sm:$0xff]   ;;  %s8473_s13 = sld [smem:[#allocation59]]  ;;  %s10639_s10 = sld [smem:[#allocation59 + $0x1]] }
 0x33c   :  { %11196 = vmatprep.subr.bf16.mxu0 %v12088_v9  ;;  %1351 = vmatpush1.bf16.msra.mxu1 %v12113_v21 }
 0x33d   :  { %1352 = vmatprep.subr.bf16.mxu1 %v12114_v22 }
 0x33f   :  { %11197 = vmatpush3.bf16.msra.mxu0 %v12088_v9  ;;  %v14417_v9 = vsub.s32 0, %v14195_v27 }
 0x340   :  { %11202 = vmatprep.subr.bf16.mxu0 %v12089_v12  ;;  %1353 = vmatpush1.bf16.msra.mxu1 %v12116_v26 }
 0x341   :  { %11214 = vmatprep.subr.bf16.mxu1 %v15630_v28 }
 0x342   :  { %11199 = vmatmul.mubr.msk.bf16.vlgmr.msra.gmra.mrb[0].mxu0 %vm15602_vm11, %v9882_v13  ;;  %v1251_v13 = vrot.slane %v1246_v11, %v14417_v9 }
 0x343   :  { %11203 = vmatpush3.bf16.msra.mxu0 %v12089_v12  ;;  %11210 = vmatprep.mubr.msk.bf16.mxu0 %vm15602_vm11, %v1127_v36  ;;  %v14421_v12 = vsub.s32 1, %v14195_v27 }
 0x344   :  { %11204 = vmatprep.subr.bf16.mxu0 %v12090_v14 }
 0x345   :  { %v1255_v36 = vrot.slane %v1246_v11, %v14421_v12  ;;  %v12141_v11 = vld [vmem:[#allocation12 + $0x30] sm:$0xff]  }
 0x347   :  { %11205 = vmatpush3.bf16.msra.mxu0 %v12090_v14 }
 0x348   :  { %11206 = vmatprep.subr.bf16.mxu0 %v12091_v16 }
 0x34b   :  { %11207 = vmatpush3.bf16.msra.mxu0 %v12091_v16 }
 0x34c   :  { %11208 = vmatprep.subr.bf16.mxu0 %v12092_v18 }
 0x34f   :  { %11209 = vmatpush3.bf16.msra.mxu0 %v12092_v18 }
 0x350   :  { %11250 = vmatprep.subr.bf16.mxu0 %v15630_v28 }
 0x352   :  { %11211 = vmatmul.mubr.msk.bf16.vlgmr.msra.gmra.mrb[0].mxu0 %vm15602_vm11, %v1129_v19 }
 0x353   :  { %11266 = vmatprep.mubr.msk.bf16.mxu0 %vm15600_vm3, %v15630_v28  ;;  %11251 = vmatpush3.bf16.msra.mxu0 %v12120_v55 }
 0x354   :  { %11252 = vmatprep.subr.bf16.mxu0 %v15630_v28 }
 0x357   :  { %11253 = vmatpush3.bf16.msra.mxu0 %v12122_v59 }
 0x358   :  { %11254 = vmatprep.subr.bf16.mxu0 %v15630_v28 }
 0x35b   :  { %11255 = vmatpush3.bf16.msra.mxu0 %v12124_v57 }
 0x35c   :  { %11256 = vmatprep.subr.bf16.mxu0 %v15630_v28 }
 0x35f   :  { %11257 = vmatpush3.bf16.msra.mxu0 %v12126_v0 }
 0x360   :  { %11258 = vmatprep.subr.bf16.mxu0 %v15630_v28 }
 0x363   :  { %11259 = vmatpush3.bf16.msra.mxu0 %v12128_v2 }
 0x364   :  { %11260 = vmatprep.subr.bf16.mxu0 %v15630_v28 }
 0x367   :  { %11261 = vmatpush3.bf16.msra.mxu0 %v12130_v3  ;;  %v12136_v3 = vld [vmem:[#allocation12 + $0x8] sm:$0xff]  }
 0x368   :  { %11262 = vmatprep.subr.bf16.mxu0 %v15630_v28 }
 0x36b   :  { %11263 = vmatpush3.bf16.msra.mxu0 %v12132_v6  ;;  %v12138_v6 = vld [vmem:[#allocation12 + $0x10] sm:$0xff]  }
 0x36c   :  { %11264 = vmatprep.subr.bf16.mxu0 %v15630_v28 }
 0x36f   :  { %11265 = vmatpush3.bf16.msra.mxu0 %v12134_v8  ;;  %v12140_v8 = vld [vmem:[#allocation12 + $0x18] sm:$0xff]  }
 0x370   :  { %11282 = vmatprep.subr.bf16.mxu0 %v15630_v28 }
 0x425   :  { %v11212_v30 = vpop.f32.mrb[0].mxu0 }
 0x426   :  { %v1222_v32 = vadd.f32 %v11212_v30, %v9898_v29  ;;  %v1194_v33 = vpop.f32.mrb[1].mxu0 }
 0x427   :  { %v1220_v37 = vadd.f32 %v9898_v29, %v1194_v33  ;;  %v11213_v38 = vpop.f32.mrb[2].mxu0 }
 0x428   :  { %v1223_v39 = vadd.f32 %v11213_v38, %v9898_v29  ;;  %v1197_v40 = vpop.f32.mrb[3].mxu0  ;;  %v1226_v42 = vmax.f32 %v1222_v32, 0.0 }
 0x429   :  { %v1221_v41 = vadd.f32 %v9898_v29, %v1197_v40  ;;  %v1224_v45 = vmax.f32 %v1220_v37, 0.0 }
 0x42a   :  { %v1227_v44 = vmax.f32 %v1223_v39, 0.0 }
 0x42b   :  { %v1225_v47 = vmax.f32 %v1221_v41, 0.0 }
 0x42c   :  { %v1229_v48 = vpack.c.bf16 %v1227_v44, %v1226_v42 }
 0x42d   :  { %v1228_v49 = vpack.c.bf16 %v1225_v47, %v1224_v45 }
 0x42f   :  { %1371 = vmatmul.mubr.bf16.vlgmr.msra.gmra.mrb[0].mxu1 %v1228_v49 }
 0x430   :  { %11215 = vmatpush3.bf16.msra.mxu1 %v1228_v49  ;;  %1380 = vmatprep.mubr.bf16.mxu1 %v15628_v52 }
 0x431   :  { %11216 = vmatprep.subr.bf16.mxu1 %v15630_v28 }
 0x434   :  { %11217 = vmatpush3.bf16.msra.mxu1 %v1229_v48 }
 0x435   :  { %11222 = vmatprep.subr.bf16.mxu1 %v15630_v28 }
 0x437   :  { %1381 = vmatmul.mubr.bf16.gmra.mrb[4].mxu1 %v1229_v48 }
 0x438   :  { %11218 = vmatprep.mubr.msk.bf16.mxu1 %vm15600_vm3, %v15630_v28 }
 0x43f   :  { %11219 = vmatmul.mubr.msk.bf16.vlgmr.msra.gmra.mrb[8].mxu1 %vm15596_vm1, %v12117_v51 }
 0x440   :  { %11223 = vmatpush3.bf16.msra.mxu1 %v1228_v49  ;;  %11226 = vmatprep.mubr.msk.bf16.mxu1 %vm15600_vm3, %v15630_v28 }
 0x441   :  { %11224 = vmatprep.subr.bf16.mxu1 %v15630_v28 }
 0x444   :  { %11225 = vmatpush3.bf16.msra.mxu1 %v1229_v48 }
 0x445   :  { %11230 = vmatprep.subr.bf16.mxu1 %v15630_v28 }
 0x447   :  { %11227 = vmatmul.mubr.msk.bf16.vlgmr.msra.gmra.mrb[12].mxu1 %vm15596_vm1, %v12118_v53 }
 0x448   :  { %11246 = vmatprep.mubr.msk.bf16.mxu1 %vm15600_vm3, %v15630_v28  ;;  %11231 = vmatpush3.bf16.msra.mxu1 %v12119_v54 }
 0x449   :  { %11232 = vmatprep.subr.bf16.mxu1 %v15630_v28 }
 0x44c   :  { %11233 = vmatpush3.bf16.msra.mxu1 %v12121_v58 }
 0x44d   :  { %11234 = vmatprep.subr.bf16.mxu1 %v15630_v28 }
 0x450   :  { %11235 = vmatpush3.bf16.msra.mxu1 %v12123_v60 }
 0x451   :  { %11236 = vmatprep.subr.bf16.mxu1 %v15630_v28 }
 0x454   :  { %11237 = vmatpush3.bf16.msra.mxu1 %v12125_v62  ;;  %v1714_v62 = vld [vmem:[#allocation3] sm:$0x1] }
 0x455   :  { %11238 = vmatprep.subr.bf16.mxu1 %v15630_v28  ;;  %v1715_v0 = vsel %vm14177_vm2, 0, %v1714_v62 }
 0x456   :  { %1716 = vst [vmem:[#allocation3] sm:$0x1] %v1715_v0 }
 0x458   :  { %11239 = vmatpush3.bf16.msra.mxu1 %v12127_v1  ;;  %v1717_v1 = vld [vmem:[#allocation3 + $0x8] sm:$0x1] }
 0x459   :  { %11240 = vmatprep.subr.bf16.mxu1 %v15630_v28  ;;  %v1718_v2 = vsel %vm14185_vm6, 0, %v1717_v1 }
 0x45a   :  { %1719 = vst [vmem:[#allocation3 + $0x8] sm:$0x1] %v1718_v2 }
 0x45c   :  { %11241 = vmatpush3.bf16.msra.mxu1 %v12129_v61  ;;  %v12135_v61 = vld [vmem:[#allocation12] sm:$0xff]  }
 0x45d   :  { %11242 = vmatprep.subr.bf16.mxu1 %v15630_v28 }
 0x460   :  { %11243 = vmatpush3.bf16.msra.mxu1 %v12131_v5  ;;  %v12137_v5 = vld [vmem:[#allocation12 + $0x20] sm:$0xff]  }
 0x461   :  { %11244 = vmatprep.subr.bf16.mxu1 %v15630_v28 }
 0x464   :  { %11245 = vmatpush3.bf16.msra.mxu1 %v12133_v7  ;;  %v12139_v7 = vld [vmem:[#allocation12 + $0x28] sm:$0xff]  }
 0x465   :  { %11270 = vmatprep.subr.bf16.mxu1 %v15630_v28 }
 0x502   :  { %v1372_v14 = vpop.f32.mrb[0].mxu1 }
 0x503   :  { %v1374_v16 = vpop.f32.mrb[1].mxu1  ;;  %v1373_v19 = vadd.f32 %v1372_v14, %v1251_v13 }
 0x504   :  { %v1376_v18 = vpop.f32.mrb[2].mxu1  ;;  %v1375_v22 = vadd.f32 %v1374_v16, %v1255_v36 }
 0x505   :  { %v1377_v20 = vadd.f32 %v1376_v18, %v1251_v13  ;;  %v1378_v21 = vpop.f32.mrb[3].mxu1 }
 0x506   :  { %v1379_v26 = vadd.f32 %v1378_v21, %v1255_v36 }
 0x507   :  { %v14425_v29 = vpack.c.bf16 %v1377_v20, %v1373_v19 }
 0x508   :  { %v14427_v30 = vpack.c.bf16 %v1379_v26, %v1375_v22 }
 0x50a   :  { %v1382_v32 = vpop.f32.mrb[4].mxu1 }
 0x50b   :  { %v1384_v33 = vpop.f32.mrb[5].mxu1  ;;  %v1383_v38 = vadd.f32 %v1382_v32, %v1251_v13 }
 0x50c   :  { %v1386_v37 = vpop.f32.mrb[6].mxu1  ;;  %v1385_v41 = vadd.f32 %v1384_v33, %v1255_v36 }
 0x50d   :  { %v1387_v39 = vadd.f32 %v1386_v37, %v1251_v13  ;;  %v1388_v40 = vpop.f32.mrb[7].mxu1  ;;  %v12142_v13 = vld [vmem:[#allocation12 + $0x38] sm:$0xff]  }
 0x50e   :  { %v1389_v42 = vadd.f32 %v1388_v40, %v1255_v36 }
 0x50f   :  { %v14429_v44 = vpack.c.bf16 %v1387_v39, %v1383_v38 }
 0x510   :  { %v14431_v45 = vpack.c.bf16 %v1389_v42, %v1385_v41  ;;  %v1745_v42 = vld [vmem:[#allocation3] sm:$0xf] }
 0x512   :  { %v1474_v47 = vpop.f32.mrb[8].mxu1 }
 0x513   :  { %v11220_v48 = vpop.f32.mrb[9].mxu1 }
 0x514   :  { %v1477_v49 = vpop.f32.mrb[10].mxu1 }
 0x515   :  { %v11221_v51 = vpop.f32.mrb[11].mxu1 }
 0x51a   :  { %v1523_v53 = vpop.f32.mrb[12].mxu1 }
 0x51b   :  { %v1530_v54 = vmax.f32 %v1474_v47, %v1523_v53  ;;  %v11228_v55 = vpop.f32.mrb[13].mxu1  ;;  %v1756_v47 = vand.u32 7, %v14195_v27  ;;  %v1749_v53 = vld [vmem:[#allocation3 + $0x8] sm:$0x1] }
 0x51c   :  { %v1526_v58 = vpop.f32.mrb[14].mxu1 }
 0x51d   :  { %v1531_v59 = vmax.f32 %v1477_v49, %v1526_v58  ;;  %v11229_v60 = vpop.f32.mrb[15].mxu1  ;;  %vm1778_vm1 = vcmp.ne.s32.totalorder %v1756_v47, 7  ;;  %vm1776_vm4 = vcmp.ne.s32.totalorder %v1756_v47, 0  ;;  %v12147_v47 = vld [vmem:[#allocation12 + $0x50] sm:$0xff]  }
 0x51e   :  { %vm14458_vm0 = vmpackc.low %vm1776_vm4, %vm1776_vm4 }
 0x51f   :  { %v1532_v57 = vpack.c.bf16 %v1531_v59, %v1530_v54  ;;  %v1763_v54 = vand.u32 7, %v14218_v43 }
 0x521   :  { %11247 = vmatmul.mubr.bf16.vlgmr.msra.gmra.mrb[16].mxu1 %v1532_v57  ;;  %11267 = vmatmul.mubr.bf16.vlgmr.msra.gmra.mrb[4].mxu0 %v1532_v57  ;;  %vm1779_vm14 = vcmp.ne.s32.totalorder %v1763_v54, 7  ;;  %vm1777_vm11 = vcmp.ne.s32.totalorder %v1763_v54, 0 }
 0x522   :  { %11290 = vmatprep.mubr.msk.bf16.mxu0 %vm15600_vm3, %v15630_v28  ;;  %11278 = vmatprep.mubr.msk.bf16.mxu1 %vm15600_vm3, %v15630_v28  ;;  %vm1796_vm3 = vmpackc.low %vm1778_vm1, %vm1778_vm1 }
 0x523   :  { %11283 = vmatpush3.bf16.msra.mxu0 %v12135_v61  ;;  %11271 = vmatpush3.bf16.msra.mxu1 %v12137_v5  ;;  %vm1797_vm5 = vmpackc.low %vm1779_vm14, %vm1779_vm14  ;;  %v1798_v0 = vsel %vm1796_vm3, 65537, %v15628_v52  ;;  %vm15735_vm3 = vcmask 523264  }
 0x524   :  { %11284 = vmatprep.subr.bf16.mxu0 %v15630_v28  ;;  %11272 = vmatprep.subr.bf16.mxu1 %v15630_v28  ;;  %vm14463_vm10 = vmpackc.low %vm1777_vm11, %vm1777_vm11  ;;  %v1799_v5 = vsel %vm1797_vm5, 65537, %v15628_v52  ;;  %vm15736_vm5 = vmmov 0  }
 0x525   :  { %vm15738_vm4 = vmmov %vm15735_vm3 }
 0x527   :  { %11285 = vmatpush3.bf16.msra.mxu0 %v12136_v3  ;;  %11273 = vmatpush3.bf16.msra.mxu1 %v12139_v7 }
 0x528   :  { %11286 = vmatprep.subr.bf16.mxu0 %v15630_v28  ;;  %11274 = vmatprep.subr.bf16.mxu1 %v15630_v28 }
 0x52b   :  { %11287 = vmatpush3.bf16.msra.mxu0 %v12138_v6  ;;  %11275 = vmatpush3.bf16.msra.mxu1 %v12141_v11  ;;  %v1800_v6 = vrot.slane %v1798_v0, 7  ;;  %v12153_v0 = vld [vmem:[%s15741_s18 + $0x20] sm:$0xff]  }
 0x52c   :  { %11288 = vmatprep.subr.bf16.mxu0 %v15630_v28  ;;  %11276 = vmatprep.subr.bf16.mxu1 %v15630_v28 }
 0x52d   :  { %vm14488_vm14 = vcmp.ne.s16.totalorder %v1800_v6, 0 }
 0x52f   :  { %11289 = vmatpush3.bf16.msra.mxu0 %v12140_v8  ;;  %11277 = vmatpush3.bf16.msra.mxu1 %v12142_v13 }
 0x530   :  { %11306 = vmatprep.subr.bf16.mxu0 %v15630_v28  ;;  %11294 = vmatprep.subr.bf16.mxu1 %v15630_v28 }
 0x5f4   :  { %v1615_v14 = vpop.f32.mrb[16].mxu1  ;;  %v1704_v36 = vpop.f32.mrb[4].mxu0 }
 0x5f5   :  { %v1711_v16 = vmax.f32 %v1615_v14, %v1704_v36  ;;  %v11248_v18 = vpop.f32.mrb[17].mxu1  ;;  %v11268_v19 = vpop.f32.mrb[5].mxu0 }
 0x5f6   :  { %v1618_v20 = vpop.f32.mrb[18].mxu1  ;;  %v1707_v21 = vpop.f32.mrb[6].mxu0  ;;  %v1802_v18 = vrot.slane %v1799_v5, 7  ;;  %v1801_v19 = vrot.slane %v1800_v6, 4 }
 0x5f7   :  { %v10747_v22 = vpack.c.bf16 %v1711_v16, %v1711_v16  ;;  %v1712_v26 = vmax.f32 %v1618_v20, %v1707_v21  ;;  %v11249_v32 = vpop.f32.mrb[19].mxu1  ;;  %v11269_v33 = vpop.f32.mrb[7].mxu0 }
 0x5f8   :  { %v12145_v32 = vld [vmem:[#allocation12 + $0x40] sm:$0xff]   ;;  %v14475_v33 = vrot.slane %v1802_v18, 4 }
 0x5f9   :  { %v1726_v37 = vshrl.u32 %v10747_v22, 16  ;;  %v10748_v38 = vpack.c.bf16 %v1712_v26, %v1712_v26  ;;  %v1729_v40 = vshll.u32 %v10747_v22, 16 }
 0x5fa   :  { %vm15610_vm1 = vcmp.ne.s16.totalorder %v14475_v33, 0 }
 0x5fb   :  { %v1728_v39 = vrot.slane %v1726_v37, 7  ;;  %v1734_v41 = vshrl.u32 %v10748_v38, 16  ;;  %v1737_v51 = vshll.u32 %v10748_v38, 16  ;;  %v14479_v37 = vsel %vm14255_vm9, %v1801_v19, %v1802_v18 }
 0x5fc   :  { %vm15612_vm11 = vcmp.ne.s16.totalorder %v14479_v37, 0  ;;  %vm15742_vm9 = vcmask 1046528  }
 0x5fd   :  { %v1731_v48 = vor.u32 %v1729_v40, %v1728_v39  ;;  %v1736_v49 = vrot.slane %v1734_v41, 7  ;;  %v1732_v55 = vrot.slane %v1728_v39, 4  ;;  %v12146_v39 = vld [vmem:[#allocation12 + $0x48] sm:$0xff]  }
 0x5ff   :  { %v1746_v58 = vsel %vm14199_vm8, %v1731_v48, %v1745_v42  ;;  %v1739_v59 = vor.u32 %v1737_v51, %v1736_v49  ;;  %v1741_v60 = vrot.slane %v1736_v49, 4 }
 0x600   :  { %1747 = vst [vmem:[#allocation3] sm:$0xf] %v1746_v58 }
 0x601   :  { %v1740_v57 = vsel %vm14191_vm7, %v1732_v55, %v1739_v59  ;;  %v1750_v62 = vsel %vm14177_vm2, %v1741_v60, %v1749_v53  ;;  %v12148_v53 = vld [vmem:[#allocation12 + $0x58] sm:$0xff]   ;;  %v12150_v60 = vld [vmem:[%s15741_s18 + $0x8] sm:$0xff]  }
 0x602   :  { %1748 = vst.msk [vmem:[#allocation3 + $0x4] sm:$0xf] %vm15730_vm13, %v1740_v57  ;;  %1751 = vst [vmem:[#allocation3 + $0x8] sm:$0x1] %v1750_v62  ;;  %vm15737_vm13 = vsmask.f32 7424 }
 0x603   :  { %v12149_v59 = vld [vmem:[%s15741_s18] sm:$0xff]   ;;  %v12151_v57 = vld [vmem:[%s15741_s18 + $0x10] sm:$0xff]   ;;  %v12152_v62 = vld [vmem:[%s15741_s18 + $0x18] sm:$0xff]  }
 0x607   :  { %v1780_v1 = vld [vmem:[#allocation3] sm:$0xf] }
 0x608   :  { %v1788_v7 = vsel %vm14458_vm0, %v1780_v1, 0  ;;  %v1791_v40 = vld [vmem:[#allocation3] sm:$0xe] }
 0x609   :  { %v1781_v61 = vld [vmem:[#allocation3 + $0x4] sm:$0xf]  ;;  %v1790_v3 = vld [vmem:[#allocation3 + $0x8] sm:$0x1]  ;;  %v1808_v48 = vsel %vm14488_vm14, %v1791_v40, 0 }
 0x60a   :  { %v1789_v8 = vsel %vm14463_vm10, %v1781_v61, 0  ;;  %v9937_v11 = vcombine.low %v1780_v1, %v1781_v61  ;;  %v9938_v13 = vcombine.low %v1790_v3, %v1790_v3  ;;  %v1809_v41 = vsel %vm15612_vm11, %v1781_v61, 0  ;;  %v12154_v1 = vld [vmem:[%s15741_s18 + $0x28] sm:$0xff]   ;;  %v12155_v61 = vld [vmem:[%s15741_s18 + $0x30] sm:$0xff]  }
 0x60b   :  { %v9944_v14 = vcombine.low %v1788_v7, %v1789_v8  ;;  %v1810_v42 = vsel %vm15610_vm1, %v1790_v3, 0  ;;  %v9950_v49 = vcombine.low %v1808_v48, %v1809_v41  ;;  %v12156_v3 = vld [vmem:[%s15741_s18 + $0x38] sm:$0xff]   ;;  %vm15749_vm1 = vcmask 523264   ;;  %s10486_s18 = sld [smem:[#allocation62 + $0x1]] }
 0x60c   :  { %v1839_v36 = vshll.u32 %v9937_v11, 16  ;;  %v1844_v16 = vshll.u32 %v9938_v13, 16  ;;  %v1837_v20 = vshrl.u32 %v9937_v11, 16  ;;  %v9951_v51 = vcombine.low %v1810_v42, %v1810_v42 }
 0x60d   :  { %11291 = vmatmul.mubr.msk.bf16.vlgmr.msra.gmra.mrb[8].mxu0 %vm15735_vm3, %v9944_v14  ;;  %v2006_v54 = vrot.slane %v9950_v49, 1  ;;  %v2204_v49 = vld [vmem:[#allocation29] sm:$0xf] }
 0x60e   :  { %v1841_v21 = vrot.slane %v1839_v36, 1  ;;  %11322 = vmatprep.mubr.msk.bf16.mxu0 %vm15736_vm5, %v15630_v28  ;;  %v1846_v26 = vrot.slane %v1844_v16, 1  ;;  %v2007_v55 = vrot.slane %v9951_v51, 1  ;;  %11307 = vmatpush3.bf16.msra.mxu0 %v12149_v59  ;;  %v12160_v51 = vld [vmem:[%s15744_s24 + $0x8] sm:$0xff]  }
 0x60f   :  { %11308 = vmatprep.subr.bf16.mxu0 %v15630_v28  ;;  %v12159_v59 = vld [vmem:[%s15745_s7 + $0x8] sm:$0xff]  }
 0x610   :  { %v1842_v22 = vor.u32 %v1841_v21, %v1837_v20  ;;  %v2008_v58 = vsel %vm15742_vm9, %v2006_v54, %v2007_v55  ;;  %v9957_v20 = vld [vmem:[%s15743_s20] ss:$0 sm:$0xff]  ;;  %v2205_v54 = vld [vmem:[#allocation30] sm:$0xf]  ;;  %s10640_s20 = sld [smem:[#allocation59 + $0x2]] }
 0x611   :  { %v12157_v55 = vld [vmem:[%s15745_s7] sm:$0xff]  }
 0x612   :  { %v1847_v38 = vsel %vm15737_vm13, %v1842_v22, %v1846_v26  ;;  %11309 = vmatpush3.bf16.msra.mxu0 %v12150_v60  ;;  %vm15609_vm13 = vcmask 130048   ;;  %v12161_v60 = vld [vmem:[%s15745_s7 + $0x10] sm:$0xff]  }
 0x613   :  { %11279 = vmatmul.mubr.msk.bf16.vlgmr.msra.gmra.mrb[20].mxu1 %vm15738_vm4, %v1847_v38  ;;  %11310 = vmatprep.subr.bf16.mxu0 %v15630_v28 }
 0x614   :  { %11295 = vmatpush3.bf16.msra.mxu1 %v12145_v32  ;;  %11302 = vmatprep.mubr.msk.bf16.mxu1 %vm15736_vm5, %v15630_v28 }
 0x615   :  { %11296 = vmatprep.subr.bf16.mxu1 %v15630_v28 }
 0x616   :  { %11311 = vmatpush3.bf16.msra.mxu0 %v12151_v57  ;;  %v12163_v57 = vld [vmem:[%s15745_s7 + $0x18] sm:$0xff]  }
 0x617   :  { %11312 = vmatprep.subr.bf16.mxu0 %v15630_v28 }
 0x618   :  { %11297 = vmatpush3.bf16.msra.mxu1 %v12146_v39 }
 0x619   :  { %11298 = vmatprep.subr.bf16.mxu1 %v15630_v28 }
 0x61a   :  { %11313 = vmatpush3.bf16.msra.mxu0 %v12152_v62  ;;  %v12165_v62 = vld [vmem:[%s15745_s7 + $0x20] sm:$0xff]  }
 0x61b   :  { %11314 = vmatprep.subr.bf16.mxu0 %v15630_v28 }
 0x61c   :  { %11299 = vmatpush3.bf16.msra.mxu1 %v12147_v47  ;;  %v12158_v47 = vld [vmem:[%s15744_s24] sm:$0xff]  }
 0x61d   :  { %11300 = vmatprep.subr.bf16.mxu1 %v15630_v28 }
 0x61e   :  { %11315 = vmatpush3.bf16.msra.mxu0 %v12153_v0  ;;  %v12166_v0 = vld [vmem:[%s15744_s24 + $0x20] sm:$0xff]  }
 0x61f   :  { %11316 = vmatprep.subr.bf16.mxu0 %v15630_v28 }
 0x620   :  { %11301 = vmatpush3.bf16.msra.mxu1 %v12148_v53  ;;  %v12162_v53 = vld [vmem:[%s15744_s24 + $0x10] sm:$0xff]  }
 0x621   :  { %11326 = vmatprep.subr.bf16.mxu1 %v15630_v28 }
 0x622   :  { %11317 = vmatpush3.bf16.msra.mxu0 %v12154_v1  ;;  %v12167_v1 = vld [vmem:[%s15745_s7 + $0x28] sm:$0xff]  }
 0x623   :  { %11303 = vmatmul.mubr.msk.bf16.vlgmr.msra.gmra.mrb[24].mxu1 %vm15735_vm3, %v2008_v58  ;;  %11318 = vmatprep.subr.bf16.mxu0 %v15630_v28  ;;  %v12164_v58 = vld [vmem:[%s15744_s24 + $0x18] sm:$0xff]  }
 0x624   :  { %11328 = vmatprep.mubr.msk.bf16.mxu1 %vm15736_vm5, %v15630_v28 }
 0x626   :  { %11319 = vmatpush3.bf16.msra.mxu0 %v12155_v61  ;;  %v12168_v61 = vld [vmem:[%s15744_s24 + $0x28] sm:$0xff]  }
 0x627   :  { %11320 = vmatprep.subr.bf16.mxu0 %v15630_v28 }
 0x62a   :  { %11321 = vmatpush3.bf16.msra.mxu0 %v12156_v3  ;;  %v12169_v3 = vld [vmem:[%s15745_s7 + $0x30] sm:$0xff]  }
 0x62b   :  { %11358 = vmatprep.subr.bf16.mxu0 %v15630_v28 }
 0x6e0   :  { %v1982_v5 = vpop.f32.mrb[8].mxu0 }
 0x6e1   :  { %v11292_v6 = vpop.f32.mrb[9].mxu0 }
 0x6e2   :  { %v1985_v7 = vpop.f32.mrb[10].mxu0  ;;  %v12171_v6 = vld [vmem:[%s15745_s7 + $0x38] sm:$0xff]   ;;  %s15849_s7 = sld [smem:[#allocation98_spill]] }
 0x6e3   :  { %v11293_v8 = vpop.f32.mrb[11].mxu0 }
 0x6e4   :  { %v9958_v8 = vld [vmem:[%s15746_s30] ss:$0 sm:$0xff] }
 0x6e6   :  { %v1909_v11 = vpop.f32.mrb[20].mxu1 }
 0x6e7   :  { %v1983_v13 = vadd.f32 %v1982_v5, %v1909_v11  ;;  %v11280_v14 = vpop.f32.mrb[21].mxu1  ;;  %v12170_v5 = vld [vmem:[%s15744_s24 + $0x30] sm:$0xff]  }
 0x6e8   :  { %v1912_v36 = vpop.f32.mrb[22].mxu1 }
 0x6e9   :  { %v1986_v16 = vadd.f32 %v1985_v7, %v1912_v36  ;;  %v11281_v18 = vpop.f32.mrb[23].mxu1  ;;  %v12172_v7 = vld [vmem:[%s15744_s24 + $0x38] sm:$0xff]   ;;  %s10723_s24 = sld [smem:[#allocation60 + $0x1]] }
 0x6f6   :  { %v2070_v19 = vpop.f32.mrb[24].mxu1 }
 0x6f7   :  { %v2077_v21 = vadd.f32 %v2070_v19, %v1983_v13  ;;  %v11304_v22 = vpop.f32.mrb[25].mxu1 }
 0x6f8   :  { %v2073_v26 = vpop.f32.mrb[26].mxu1 }
 0x6f9   :  { %v2086_v32 = vadd.f32 %v9957_v20, %v2077_v21  ;;  %v2078_v38 = vadd.f32 %v2073_v26, %v1986_v16  ;;  %v11305_v39 = vpop.f32.mrb[27].mxu1 }
 0x6fb   :  { %v2087_v40 = vadd.f32 %v9957_v20, %v2078_v38  ;;  %v2088_v41 = vmax.f32 %v2086_v32, 0.0 }
 0x6fd   :  { %v2089_v42 = vmax.f32 %v2087_v40, 0.0 }
 0x6ff   :  { %v2090_v48 = vpack.c.bf16 %v2089_v42, %v2088_v41 }
 0x701   :  { %11323 = vmatmul.mubr.bf16.vlgmr.msra.gmra.mrb[12].mxu0 %v2090_v48  ;;  %11327 = vmatpush3.bf16.msra.mxu1 %v2090_v48 }
 0x702   :  { %11332 = vmatprep.subr.bf16.mxu1 %v15630_v28  ;;  %11359 = vmatpush3.bf16.msra.mxu0 %v12158_v47  ;;  %v2505_v47 = vld [vmem:[#allocation4] sm:$0x1] }
 0x703   :  { %11360 = vmatprep.subr.bf16.mxu0 %v15630_v28  ;;  %11374 = vmatprep.mubr.msk.bf16.mxu0 %vm15736_vm5, %v15630_v28 }
 0x704   :  { %11329 = vmatmul.mubr.msk.bf16.vlgmr.msra.gmra.mrb[28].mxu1 %vm15609_vm13, %v2204_v49  ;;  %v2506_v49 = vsel %vm14177_vm2, 0, %v2505_v47 }
 0x705   :  { %11333 = vmatpush3.bf16.msra.mxu1 %v2090_v48  ;;  %11334 = vmatprep.mubr.msk.bf16.mxu1 %vm15736_vm5, %v15630_v28  ;;  %v2508_v48 = vld [vmem:[#allocation4 + $0x4] sm:$0x1]  ;;  %2507 = vst [vmem:[#allocation4] sm:$0x1] %v2506_v49 }
 0x706   :  { %11338 = vmatprep.subr.bf16.mxu1 %v15630_v28  ;;  %11361 = vmatpush3.bf16.msra.mxu0 %v12160_v51  ;;  %v2509_v51 = vsel %vm14185_vm6, 0, %v2508_v48  ;;  %vm15784_vm6 = vnez %v15725_v34 }
 0x707   :  { %11362 = vmatprep.subr.bf16.mxu0 %v15630_v28  ;;  %2510 = vst [vmem:[#allocation4 + $0x4] sm:$0x1] %v2509_v51 }
 0x70a   :  { %11363 = vmatpush3.bf16.msra.mxu0 %v12162_v53  ;;  %v12173_v53 = vld [vmem:[#allocation17] sm:$0xff]  }
 0x70b   :  { %11364 = vmatprep.subr.bf16.mxu0 %v15630_v28 }
 0x70c   :  { %11335 = vmatmul.mubr.msk.bf16.vlgmr.msra.gmra.mrb[32].mxu1 %vm15609_vm13, %v2205_v54  ;;  %v12174_v54 = vld [vmem:[#allocation17 + $0x8] sm:$0xff]  }
 0x70d   :  { %11339 = vmatpush3.bf16.msra.mxu1 %v12157_v55  ;;  %11354 = vmatprep.mubr.msk.bf16.mxu1 %vm15736_vm5, %v15630_v28  ;;  %v12175_v55 = vld [vmem:[#allocation17 + $0x20] sm:$0xff]  }
 0x70e   :  { %11340 = vmatprep.subr.bf16.mxu1 %v15630_v28  ;;  %11365 = vmatpush3.bf16.msra.mxu0 %v12164_v58  ;;  %v12176_v58 = vld [vmem:[#allocation17 + $0x10] sm:$0xff]  }
 0x70f   :  { %11366 = vmatprep.subr.bf16.mxu0 %v15630_v28 }
 0x711   :  { %11341 = vmatpush3.bf16.msra.mxu1 %v12159_v59  ;;  %v12177_v59 = vld [vmem:[#allocation17 + $0x28] sm:$0xff]  }
 0x712   :  { %11342 = vmatprep.subr.bf16.mxu1 %v15630_v28  ;;  %11367 = vmatpush3.bf16.msra.mxu0 %v12166_v0 }
 0x713   :  { %11368 = vmatprep.subr.bf16.mxu0 %v15630_v28 }
 0x715   :  { %11343 = vmatpush3.bf16.msra.mxu1 %v12161_v60  ;;  %v12178_v60 = vld [vmem:[#allocation17 + $0x18] sm:$0xff]  }
 0x716   :  { %11344 = vmatprep.subr.bf16.mxu1 %v15630_v28  ;;  %11369 = vmatpush3.bf16.msra.mxu0 %v12168_v61 }
 0x717   :  { %11370 = vmatprep.subr.bf16.mxu0 %v15630_v28 }
 0x719   :  { %11345 = vmatpush3.bf16.msra.mxu1 %v12163_v57  ;;  %v12179_v57 = vld [vmem:[#allocation17 + $0x30] sm:$0xff]  }
 0x71a   :  { %11346 = vmatprep.subr.bf16.mxu1 %v15630_v28  ;;  %11371 = vmatpush3.bf16.msra.mxu0 %v12170_v5 }
 0x71b   :  { %11372 = vmatprep.subr.bf16.mxu0 %v15630_v28 }
 0x71d   :  { %11347 = vmatpush3.bf16.msra.mxu1 %v12165_v62  ;;  %v12181_v62 = vld [vmem:[#allocation17 + $0x38] sm:$0xff]  }
 0x71e   :  { %11348 = vmatprep.subr.bf16.mxu1 %v15630_v28  ;;  %11373 = vmatpush3.bf16.msra.mxu0 %v12172_v7 }
 0x71f   :  { %11390 = vmatprep.subr.bf16.mxu0 %v15630_v28 }
 0x721   :  { %11349 = vmatpush3.bf16.msra.mxu1 %v12167_v1 }
 0x722   :  { %11350 = vmatprep.subr.bf16.mxu1 %v15630_v28 }
 0x725   :  { %11351 = vmatpush3.bf16.msra.mxu1 %v12169_v3 }
 0x726   :  { %11352 = vmatprep.subr.bf16.mxu1 %v15630_v28 }
 0x729   :  { %11353 = vmatpush3.bf16.msra.mxu1 %v12171_v6 }
 0x72a   :  { %11378 = vmatprep.subr.bf16.mxu1 %v15630_v28 }
 0x7d4   :  { %v2196_v11 = vpop.f32.mrb[12].mxu0 }
 0x7d5   :  { %v11324_v13 = vpop.f32.mrb[13].mxu0  ;;  %v2197_v36 = vadd.f32 %v9958_v8, %v2196_v11 }
 0x7d6   :  { %v2199_v14 = vpop.f32.mrb[14].mxu0 }
 0x7d7   :  { %v2200_v16 = vadd.f32 %v9958_v8, %v2199_v14  ;;  %v11325_v18 = vpop.f32.mrb[15].mxu0  ;;  %v2276_v19 = vpop.f32.mrb[28].mxu1 }
 0x7d8   :  { %v11330_v20 = vpop.f32.mrb[29].mxu1  ;;  %v2524_v18 = vld [vmem:[#allocation4] sm:$0xf] }
 0x7d9   :  { %v14565_v21 = vpack.c.bf16 %v2200_v16, %v2197_v36  ;;  %v2279_v22 = vpop.f32.mrb[30].mxu1 }
 0x7da   :  { %v11331_v26 = vpop.f32.mrb[31].mxu1 }
 0x7df   :  { %v2319_v32 = vpop.f32.mrb[32].mxu1 }
 0x7e0   :  { %v2325_v38 = vmax.f32 %v2276_v19, %v2319_v32  ;;  %v11336_v39 = vpop.f32.mrb[33].mxu1  ;;  %v2527_v19 = vld [vmem:[#allocation4 + $0x4] sm:$0x1] }
 0x7e1   :  { %v2322_v40 = vpop.f32.mrb[34].mxu1  ;;  %v15747_v39 = vmov 0 }
 0x7e2   :  { %v2326_v41 = vpack.c.bf16 %v2325_v38, %v2325_v38  ;;  %v11337_v42 = vpop.f32.mrb[35].mxu1  ;;  %v2534_v38 = vand.u32 3, %v14195_v27 }
 0x7e4   :  { %11355 = vmatmul.mubr.bf16.vlgmr.msra.gmra.mrb[36].mxu1 %v2326_v41  ;;  %11375 = vmatmul.mubr.bf16.vlgmr.msra.gmra.mrb[16].mxu0 %v2326_v41  ;;  %vm2542_vm4 = vcmp.ne.s32.totalorder %v2534_v38, 0  ;;  %vm2543_vm9 = vcmp.ne.s32.totalorder %v2534_v38, 3 }
 0x7e5   :  { %11398 = vmatprep.mubr.msk.bf16.mxu0 %vm15736_vm5, %v15630_v28  ;;  %11386 = vmatprep.mubr.msk.bf16.mxu1 %vm15736_vm5, %v15630_v28  ;;  %vm14588_vm3 = vmpackc.low %vm2542_vm4, %vm2542_vm4 }
 0x7e6   :  { %11391 = vmatpush3.bf16.msra.mxu0 %v12173_v53  ;;  %11379 = vmatpush3.bf16.msra.mxu1 %v12175_v55  ;;  %v15748_v39 = vsel %vm14588_vm3, 4294967295, %v15747_v39  ;;  %vm2553_vm13 = vmpackc.low %vm2543_vm9, %vm2543_vm9 }
 0x7e7   :  { %11392 = vmatprep.subr.bf16.mxu0 %v15630_v28  ;;  %11380 = vmatprep.subr.bf16.mxu1 %v15630_v28  ;;  %v2554_v48 = vsel %vm2553_vm13, 65537, %v15628_v52  ;;  %vm15750_vm4 = vmmov %vm15749_vm1 }
 0x7e8   :  { %v2555_v49 = vrot.slane %v2554_v48, 7  ;;  %vm15754_vm9 = vmmov %vm15750_vm4 }
 0x7ea   :  { %11393 = vmatpush3.bf16.msra.mxu0 %v12174_v54  ;;  %11381 = vmatpush3.bf16.msra.mxu1 %v12177_v59  ;;  %v12182_v54 = vld [vmem:[#allocation17 + $0x40] sm:$0xff]   ;;  %v12183_v59 = vld [vmem:[#allocation17 + $0x48] sm:$0xff]  }
 0x7eb   :  { %11394 = vmatprep.subr.bf16.mxu0 %v15630_v28  ;;  %11382 = vmatprep.subr.bf16.mxu1 %v15630_v28 }
 0x7ee   :  { %11395 = vmatpush3.bf16.msra.mxu0 %v12176_v58  ;;  %11383 = vmatpush3.bf16.msra.mxu1 %v12179_v57  ;;  %v14598_v58 = vrot.slane %v2555_v49, 4  ;;  %v15751_v57 = vmov 0 }
 0x7ef   :  { %11396 = vmatprep.subr.bf16.mxu0 %v15630_v28  ;;  %11384 = vmatprep.subr.bf16.mxu1 %v15630_v28 }
 0x7f0   :  { %vm15611_vm13 = vcmp.ne.s16.totalorder %v14598_v58, 0 }
 0x7f2   :  { %11397 = vmatpush3.bf16.msra.mxu0 %v12178_v60  ;;  %11385 = vmatpush3.bf16.msra.mxu1 %v12181_v62  ;;  %v12184_v62 = vld [vmem:[#allocation17 + $0x50] sm:$0xff]  }
 0x7f3   :  { %11414 = vmatprep.subr.bf16.mxu0 %v15630_v28  ;;  %11402 = vmatprep.subr.bf16.mxu1 %v15630_v28 }
 0x8b7   :  { %v2409_v0 = vpop.f32.mrb[36].mxu1  ;;  %v2497_v1 = vpop.f32.mrb[16].mxu0 }
 0x8b8   :  { %v2503_v61 = vmax.f32 %v2409_v0, %v2497_v1  ;;  %v11356_v3 = vpop.f32.mrb[37].mxu1  ;;  %v11376_v5 = vpop.f32.mrb[17].mxu0 }
 0x8b9   :  { %v2412_v6 = vpop.f32.mrb[38].mxu1  ;;  %v2500_v7 = vpop.f32.mrb[18].mxu0 }
 0x8ba   :  { %v10749_v8 = vpack.c.bf16 %v2503_v61, %v2503_v61  ;;  %v11357_v11 = vpop.f32.mrb[39].mxu1  ;;  %v11377_v13 = vpop.f32.mrb[19].mxu0  ;;  %v12185_v61 = vld [vmem:[#allocation17 + $0x58] sm:$0xff]   ;;  %v12187_v7 = vld [vmem:[%s15753_s27 + $0x8] sm:$0xff]  }
 0x8bb   :  { %v12186_v6 = vld [vmem:[%s15753_s27] sm:$0xff]   ;;  %v12189_v11 = vld [vmem:[%s15753_s27 + $0x18] sm:$0xff]  }
 0x8bc   :  { %v2515_v14 = vshrl.u32 %v10749_v8, 16  ;;  %v2518_v16 = vshll.u32 %v10749_v8, 16  ;;  %v12188_v8 = vld [vmem:[%s15753_s27 + $0x10] sm:$0xff]   ;;  %v12190_v13 = vld [vmem:[%s15753_s27 + $0x20] sm:$0xff]  }
 0x8be   :  { %v2517_v36 = vrot.slane %v2515_v14, 7  ;;  %v12191_v14 = vld [vmem:[%s15753_s27 + $0x28] sm:$0xff]  }
 0x8c0   :  { %v2520_v20 = vor.u32 %v2518_v16, %v2517_v36  ;;  %v2521_v22 = vrot.slane %v2517_v36, 4  ;;  %v12192_v36 = vld [vmem:[%s15753_s27 + $0x30] sm:$0xff]   ;;  %v12193_v16 = vld [vmem:[%s15753_s27 + $0x38] sm:$0xff]  }
 0x8c2   :  { %v2525_v26 = vsel %vm14199_vm8, %v2520_v20, %v2524_v18  ;;  %v2528_v32 = vsel %vm14177_vm2, %v2521_v22, %v2527_v19  ;;  %v12194_v18 = vld [vmem:[#allocation51] sm:$0xff]   ;;  %v12195_v19 = vld [vmem:[#allocation51 + $0x8] sm:$0xff]   ;;  %v12196_v20 = vld [vmem:[#allocation51 + $0x10] sm:$0xff]  }
 0x8c3   :  { %2526 = vst [vmem:[#allocation4] sm:$0xf] %v2525_v26  ;;  %2529 = vst [vmem:[#allocation4 + $0x4] sm:$0x1] %v2528_v32 }
 0x8ca   :  { %v2544_v40 = vld [vmem:[#allocation4] sm:$0xf]  ;;  %v2549_v41 = vld [vmem:[#allocation4 + $0x4] sm:$0x1] }
 0x8cb   :  { %v2548_v42 = vsel %vm14588_vm3, %v2544_v40, 0  ;;  %v9986_v47 = vcombine.low %v2544_v40, %v2549_v41  ;;  %v2550_v60 = vld [vmem:[#allocation4] sm:$0xe]  ;;  %v2560_v1 = vsel %vm15611_vm13, %v2549_v41, 0  ;;  %vm15757_vm13 = vcmask 1040384  }
 0x8cc   :  { %11399 = vmatmul.mubr.msk.bf16.vlgmr.msra.gmra.mrb[20].mxu0 %vm15749_vm1, %v2548_v42  ;;  %vm14604_vm1 = vcmp.ne.s16.totalorder %v2555_v49, 0  ;;  %v10003_v49 = vld [vmem:[#allocation14] ss:$0 sm:$0xff]  ;;  %vm15761_vm3 = vcmask 1044484  }
 0x8cd   :  { %v2586_v27 = vshll.u32 %v9986_v47, 16  ;;  %11430 = vmatprep.mubr.msk.bf16.mxu0 %vm15736_vm5, %v15630_v28  ;;  %v2584_v51 = vshrl.u32 %v9986_v47, 16  ;;  %v15752_v57 = vsel %vm14604_vm1, 4294967295, %v15751_v57  ;;  %v2559_v0 = vsel %vm14604_vm1, %v2550_v60, 0  ;;  %11415 = vmatpush3.bf16.msra.mxu0 %v12186_v6 }
 0x8ce   :  { %v9997_v3 = vcombine.low %v2559_v0, %v2560_v1  ;;  %11416 = vmatprep.subr.bf16.mxu0 %v15630_v28  ;;  %v12197_v0 = vld [vmem:[#allocation51 + $0x18] sm:$0xff]   ;;  %v10004_v1 = vld [vmem:[#allocation15] ss:$0 sm:$0xff]  ;;  %vm15622_vm1 = vsmask.f32 7954 }
 0x8cf   :  { %v2588_v53 = vrot.slane %v2586_v27, 1  ;;  %vm14655_vm8 = vmand %vm15761_vm3, %vm15622_vm1  ;;  %vm15619_vm3 = vcmask 64512  }
 0x8d0   :  { %v2738_v5 = vrot.slane %v9997_v3, 1 }
 0x8d1   :  { %v2589_v55 = vor.u32 %v2588_v53, %v2584_v51  ;;  %11417 = vmatpush3.bf16.msra.mxu0 %v12187_v7 }
 0x8d2   :  { %11418 = vmatprep.subr.bf16.mxu0 %v15630_v28 }
 0x8d3   :  { %11387 = vmatmul.mubr.msk.bf16.vlgmr.msra.gmra.mrb[40].mxu1 %vm15750_vm4, %v2589_v55 }
 0x8d4   :  { %11403 = vmatpush3.bf16.msra.mxu1 %v12182_v54  ;;  %11410 = vmatprep.mubr.msk.bf16.mxu1 %vm15736_vm5, %v15630_v28 }
 0x8d5   :  { %11404 = vmatprep.subr.bf16.mxu1 %v15630_v28  ;;  %11419 = vmatpush3.bf16.msra.mxu0 %v12188_v8 }
 0x8d6   :  { %11420 = vmatprep.subr.bf16.mxu0 %v15630_v28 }
 0x8d8   :  { %11405 = vmatpush3.bf16.msra.mxu1 %v12183_v59 }
 0x8d9   :  { %11406 = vmatprep.subr.bf16.mxu1 %v15630_v28  ;;  %11421 = vmatpush3.bf16.msra.mxu0 %v12189_v11 }
 0x8da   :  { %11422 = vmatprep.subr.bf16.mxu0 %v15630_v28 }
 0x8dc   :  { %11407 = vmatpush3.bf16.msra.mxu1 %v12184_v62 }
 0x8dd   :  { %11408 = vmatprep.subr.bf16.mxu1 %v15630_v28  ;;  %11423 = vmatpush3.bf16.msra.mxu0 %v12190_v13  ;;  %v3758_v13 = vld [vmem:[#allocation5 + $0x20] sm:$0x11] }
 0x8de   :  { %11424 = vmatprep.subr.bf16.mxu0 %v15630_v28 }
 0x8e0   :  { %11409 = vmatpush3.bf16.msra.mxu1 %v12185_v61 }
 0x8e1   :  { %11434 = vmatprep.subr.bf16.mxu1 %v15630_v28  ;;  %11425 = vmatpush3.bf16.msra.mxu0 %v12191_v14 }
 0x8e2   :  { %11426 = vmatprep.subr.bf16.mxu0 %v15630_v28 }
 0x8e3   :  { %11411 = vmatmul.mubr.msk.bf16.vlgmr.msra.gmra.mrb[44].mxu1 %vm15754_vm9, %v2738_v5  ;;  %vm15756_vm9 = vsmask.f32 7938 }
 0x8e4   :  { %11442 = vmatprep.mubr.msk.bf16.mxu1 %vm15736_vm5, %v15630_v28  ;;  %11435 = vmatpush3.bf16.msra.mxu1 %v12194_v18  ;;  %vm14649_vm11 = vmand %vm15757_vm13, %vm15756_vm9  ;;  %vm15620_vm13 = vcmask 1043456  }
 0x8e5   :  { %11427 = vmatpush3.bf16.msra.mxu0 %v12192_v36  ;;  %11436 = vmatprep.subr.bf16.mxu1 %v15630_v28 }
 0x8e6   :  { %11428 = vmatprep.subr.bf16.mxu0 %v15630_v28 }
 0x8e8   :  { %11437 = vmatpush3.bf16.msra.mxu1 %v12195_v19 }
 0x8e9   :  { %11429 = vmatpush3.bf16.msra.mxu0 %v12193_v16  ;;  %11438 = vmatprep.subr.bf16.mxu1 %v15630_v28 }
 0x8ea   :  { %11452 = vmatprep.subr.bf16.mxu0 %v15630_v28 }
 0x8ec   :  { %11439 = vmatpush3.bf16.msra.mxu1 %v12196_v20 }
 0x8ed   :  { %11440 = vmatprep.subr.bf16.mxu1 %v15630_v28 }
 0x8f0   :  { %11441 = vmatpush3.bf16.msra.mxu1 %v12197_v0  ;;  %v12210_v0 = vld [vmem:[%s15760_s3 + $0x30] sm:$0xff]  }
 0x8f1   :  { %11446 = vmatprep.subr.bf16.mxu1 %v15630_v28 }
 0x99f   :  { %v2718_v22 = vpop.f32.mrb[20].mxu0 }
 0x9a0   :  { %v11400_v26 = vpop.f32.mrb[21].mxu0 }
 0x9a1   :  { %v2721_v32 = vpop.f32.mrb[22].mxu0 }
 0x9a2   :  { %v11401_v38 = vpop.f32.mrb[23].mxu0  ;;  %v12198_v32 = vld [vmem:[%s15755_s22] sm:$0xff]  }
 0x9a3   :  { %v12199_v38 = vld [vmem:[%s15760_s3] sm:$0xff]  }
 0x9a6   :  { %v2651_v40 = vpop.f32.mrb[40].mxu1 }
 0x9a7   :  { %v2719_v41 = vadd.f32 %v2718_v22, %v2651_v40  ;;  %v11388_v42 = vpop.f32.mrb[41].mxu1  ;;  %v12200_v40 = vld [vmem:[%s15760_s3 + $0x8] sm:$0xff]  }
 0x9a8   :  { %v2654_v47 = vpop.f32.mrb[42].mxu1  ;;  %v12202_v42 = vld [vmem:[%s15760_s3 + $0x10] sm:$0xff]  }
 0x9a9   :  { %v11389_v48 = vpop.f32.mrb[43].mxu1  ;;  %v3075_v47 = vld [vmem:[#allocation6] sm:$0x1] }
 0x9aa   :  { %v12203_v48 = vld [vmem:[%s15760_s3 + $0x48] sm:$0xff]  }
 0x9b6   :  { %v2800_v27 = vpop.f32.mrb[44].mxu1 }
 0x9b7   :  { %v2806_v51 = vadd.f32 %v2800_v27, %v2719_v41  ;;  %v11412_v53 = vpop.f32.mrb[45].mxu1  ;;  %v12201_v41 = vld [vmem:[%s15760_s3 + $0x40] sm:$0xff]   ;;  %v3076_v27 = vsel %vm14264_vm12, 0, %v3075_v47 }
 0x9b8   :  { %v2803_v54 = vpop.f32.mrb[46].mxu1  ;;  %3077 = vst [vmem:[#allocation6] sm:$0x1] %v3076_v27  ;;  %v12204_v53 = vld [vmem:[%s15760_s3 + $0x18] sm:$0xff]  }
 0x9b9   :  { %v2814_v55 = vadd.f32 %v10003_v49, %v2806_v51  ;;  %v11413_v59 = vpop.f32.mrb[47].mxu1  ;;  %v3079_v49 = vld [vmem:[#allocation6 + $0x8] sm:$0x1]  ;;  %v12205_v54 = vld [vmem:[%s15760_s3 + $0x50] sm:$0xff]  }
 0x9ba   :  { %v3080_v51 = vsel %vm14649_vm11, 0, %v3079_v49  ;;  %v12207_v59 = vld [vmem:[%s15760_s3 + $0x58] sm:$0xff]  }
 0x9bb   :  { %v2815_v60 = vmax.f32 %v2814_v55, 0.0  ;;  %3081 = vst [vmem:[#allocation6 + $0x8] sm:$0x1] %v3080_v51  ;;  %v12206_v55 = vld [vmem:[%s15760_s3 + $0x20] sm:$0xff]  }
 0x9bd   :  { %v2816_v62 = vpack.c.bf16 %v2815_v60, %v2815_v60  ;;  %v12208_v60 = vld [vmem:[%s15760_s3 + $0x28] sm:$0xff]  }
 0x9bf   :  { %11431 = vmatmul.mubr.bf16.vlgmr.msra.gmra.mrb[24].mxu0 %v2816_v62  ;;  %v12209_v62 = vld [vmem:[%s15760_s3 + $0x60] sm:$0xff]  }
 0x9c0   :  { %11468 = vmatprep.mubr.msk.bf16.mxu0 %vm15736_vm5, %v15630_v28  ;;  %11453 = vmatpush3.bf16.msra.mxu0 %v12201_v41 }
 0x9c1   :  { %11454 = vmatprep.subr.bf16.mxu0 %v15630_v28 }
 0x9c4   :  { %11455 = vmatpush3.bf16.msra.mxu0 %v12203_v48 }
 0x9c5   :  { %11456 = vmatprep.subr.bf16.mxu0 %v15630_v28 }
 0x9c8   :  { %11457 = vmatpush3.bf16.msra.mxu0 %v12205_v54  ;;  %v3109_v54 = vld [vmem:[#allocation6] sm:$0xf] }
 0x9c9   :  { %11458 = vmatprep.subr.bf16.mxu0 %v15630_v28 }
 0x9cc   :  { %11459 = vmatpush3.bf16.msra.mxu0 %v12207_v59 }
 0x9cd   :  { %11460 = vmatprep.subr.bf16.mxu0 %v15630_v28 }
 0x9d0   :  { %11461 = vmatpush3.bf16.msra.mxu0 %v12209_v62  ;;  %v3113_v62 = vld [vmem:[#allocation6 + $0x8] sm:$0x1] }
 0x9d1   :  { %11462 = vmatprep.subr.bf16.mxu0 %v15630_v28 }
 0xa92   :  { %v2922_v61 = vpop.f32.mrb[24].mxu0 }
 0xa93   :  { %v2923_v3 = vadd.f32 %v10004_v1, %v2922_v61  ;;  %v11432_v5 = vpop.f32.mrb[25].mxu0  ;;  %v12211_v1 = vld [vmem:[%s15760_s3 + $0x68] sm:$0xff]   ;;  %v12212_v61 = vld [vmem:[%s15760_s3 + $0x38] sm:$0xff]  }
 0xa94   :  { %v2925_v6 = vpop.f32.mrb[26].mxu0  ;;  %11463 = vmatpush3.bf16.msra.mxu0 %v12211_v1  ;;  %v12214_v5 = vld [vmem:[%s15760_s3 + $0x78] sm:$0xff]  }
 0xa95   :  { %v14641_v7 = vpack.c.bf16 %v2923_v3, %v2923_v3  ;;  %v11433_v8 = vpop.f32.mrb[27].mxu0  ;;  %11464 = vmatprep.subr.bf16.mxu0 %v15630_v28  ;;  %v12213_v3 = vld [vmem:[%s15760_s3 + $0x70] sm:$0xff]   ;;  %v3062_v6 = vunpack.c.l.bf16 %v14565_v21 }
 0xa96   :  { %v3064_v8 = vstv %s3061_s23 }
 0xa97   :  { %11443 = vmatmul.mubr.msk.bf16.vlgmr.msra.gmra.mrb[48].mxu1 %vm15750_vm4, %v14641_v7  ;;  %vm15621_vm4 = vmor %vm14655_vm8, %vm14649_vm11 }
 0xa98   :  { %11448 = vmatprep.mubr.msk.bf16.mxu1 %vm15736_vm5, %v15630_v28  ;;  %v3759_v36 = vsel %vm15621_vm4, 0, %v3758_v13  ;;  %11465 = vmatpush3.bf16.msra.mxu0 %v12213_v3  ;;  %v3068_v13 = vstv %s10020_s12  ;;  %vm3749_vm4 = vsmask.f32 4352 }
 0xa99   :  { %3760 = vst [vmem:[#allocation5 + $0x20] sm:$0x11] %v3759_v36  ;;  %11466 = vmatprep.subr.bf16.mxu0 %v15630_v28  ;;  %v3063_v36 = vunpack.c.h.bf16 %v14565_v21  ;;  %v12257_v21 = vld [vmem:[%s15770_s5 + $0x124] ss:$8 sps:$4 sm:$0xff]  }
 0xa9c   :  { %11467 = vmatpush3.bf16.msra.mxu0 %v12214_v5 }
 0xa9d   :  { %11492 = vmatprep.subr.bf16.mxu0 %v15630_v28 }
 0xb6a   :  { %v3000_v16 = vpop.f32.mrb[48].mxu1 }
 0xb6b   :  { %v3006_v18 = vpack.c.bf16 %v3000_v16, %v3000_v16  ;;  %v11444_v19 = vpop.f32.mrb[49].mxu1 }
 0xb6c   :  { %v3003_v20 = vpop.f32.mrb[50].mxu1 }
 0xb6d   :  { %v3018_v22 = vsel %vm15620_vm13, %v3006_v18, 0  ;;  %v11445_v26 = vpop.f32.mrb[51].mxu1  ;;  %v3065_v18 = vmul.f32 %v3064_v8, %v3062_v6 }
 0xb6e   :  { %11447 = vmatpush3.bf16.msra.mxu1 %v3018_v22 }
 0xb6f   :  { %11472 = vmatprep.subr.bf16.mxu1 %v15630_v28 }
 0xb71   :  { %11449 = vmatmul.mubr.msk.bf16.vlgmr.msra.gmra.mrb[52].mxu1 %vm15619_vm3, %v12198_v32  ;;  %v3066_v32 = vmul.f32 %v3064_v8, %v3063_v36  ;;  %vm14717_vm3 = vmand %vm15620_vm13, %vm15756_vm9  ;;  %vm15766_vm9 = vsmask.f32 7424  ;;  %vm15768_vm13 = vcmp.ne.s16.totalorder %v14475_v33, 0 }
 0xb72   :  { %11473 = vmatpush3.bf16.msra.mxu1 %v12199_v38  ;;  %11488 = vmatprep.mubr.msk.bf16.mxu1 %vm15736_vm5, %v15630_v28 }
 0xb73   :  { %11474 = vmatprep.subr.bf16.mxu1 %v15630_v28 }
 0xb76   :  { %11475 = vmatpush3.bf16.msra.mxu1 %v12200_v40 }
 0xb77   :  { %11476 = vmatprep.subr.bf16.mxu1 %v15630_v28 }
 0xb7a   :  { %11477 = vmatpush3.bf16.msra.mxu1 %v12202_v42 }
 0xb7b   :  { %11478 = vmatprep.subr.bf16.mxu1 %v15630_v28 }
 0xb7e   :  { %11479 = vmatpush3.bf16.msra.mxu1 %v12204_v53 }
 0xb7f   :  { %11480 = vmatprep.subr.bf16.mxu1 %v15630_v28 }
 0xb82   :  { %11481 = vmatpush3.bf16.msra.mxu1 %v12206_v55 }
 0xb83   :  { %11482 = vmatprep.subr.bf16.mxu1 %v15630_v28 }
 0xb86   :  { %11483 = vmatpush3.bf16.msra.mxu1 %v12208_v60 }
 0xb87   :  { %11484 = vmatprep.subr.bf16.mxu1 %v15630_v28 }
 0xb8a   :  { %11485 = vmatpush3.bf16.msra.mxu1 %v12210_v0 }
 0xb8b   :  { %11486 = vmatprep.subr.bf16.mxu1 %v15630_v28 }
 0xb8e   :  { %11487 = vmatpush3.bf16.msra.mxu1 %v12212_v61 }
 0xc44   :  { %v3054_v16 = vpop.f32.mrb[52].mxu1 }
 0xc45   :  { %v3069_v19 = vmul.f32 %v3068_v13, %v3054_v16  ;;  %v11450_v20 = vpop.f32.mrb[53].mxu1 }
 0xc46   :  { %v3057_v22 = vpop.f32.mrb[54].mxu1 }
 0xc47   :  { %v3071_v26 = vadd.f32 %v3069_v19, %v3065_v18  ;;  %v3070_v38 = vmul.f32 %v3068_v13, %v3057_v22  ;;  %v11451_v40 = vpop.f32.mrb[55].mxu1 }
 0xc49   :  { %v10750_v41 = vpack.c.bf16 %v3071_v26, %v3071_v26  ;;  %v3072_v42 = vadd.f32 %v3070_v38, %v3066_v32 }
 0xc4b   :  { %v3088_v47 = vshrl.u32 %v10750_v41, 16  ;;  %v10751_v48 = vpack.c.bf16 %v3072_v42, %v3072_v42  ;;  %v3091_v49 = vshll.u32 %v10750_v41, 16 }
 0xc4d   :  { %v3090_v27 = vrot.slane %v3088_v47, 7  ;;  %v3096_v51 = vshrl.u32 %v10751_v48, 16  ;;  %v3099_v60 = vshll.u32 %v10751_v48, 16 }
 0xc4f   :  { %v3093_v55 = vor.u32 %v3091_v49, %v3090_v27  ;;  %v3098_v59 = vrot.slane %v3096_v51, 7  ;;  %v3094_v0 = vrot.slane %v3090_v27, 4 }
 0xc51   :  { %v3110_v1 = vsel %vm14717_vm3, %v3093_v55, %v3109_v54  ;;  %v3101_v61 = vor.u32 %v3099_v60, %v3098_v59  ;;  %v3103_v3 = vrot.slane %v3098_v59, 4  ;;  %v12215_v55 = vld [vmem:[%s15760_s3 + $0x80] sm:$0xff]   ;;  %v12216_v60 = vld [vmem:[%s15760_s3 + $0x88] sm:$0xff]  }
 0xc52   :  { %3111 = vst [vmem:[#allocation6] sm:$0xf] %v3110_v1  ;;  %v12219_v1 = vld [vmem:[%s15760_s3 + $0xa0] sm:$0xff]  }
 0xc53   :  { %v3102_v5 = vsel %vm14191_vm7, %v3094_v0, %v3101_v61  ;;  %v3114_v8 = vsel %vm14264_vm12, %v3103_v3, %v3113_v62  ;;  %v12217_v62 = vld [vmem:[%s15760_s3 + $0x90] sm:$0xff]   ;;  %v12218_v0 = vld [vmem:[%s15760_s3 + $0x98] sm:$0xff]   ;;  %v12220_v61 = vld [vmem:[%s15760_s3 + $0xa8] sm:$0xff]  }
 0xc54   :  { %3112 = vst [vmem:[#allocation6 + $0x4] sm:$0xf] %v3102_v5  ;;  %3115 = vst [vmem:[#allocation6 + $0x8] sm:$0x1] %v3114_v8 }
 0xc59   :  { %v3116_v13 = vld [vmem:[#allocation6] sm:$0xf] }
 0xc5a   :  { %v5212_v16 = vld [vmem:[#allocation6] sm:$0x1]  ;;  %v3118_v19 = vsel %vm14458_vm0, %v3116_v13, 0  ;;  %v3121_v3 = vld [vmem:[#allocation6] sm:$0xe] }
 0xc5b   :  { %v5213_v18 = vsel %vm14264_vm12, 0, %v5212_v16  ;;  %v3120_v20 = vld [vmem:[#allocation6 + $0x8] sm:$0x1]  ;;  %v3117_v26 = vld [vmem:[#allocation6 + $0x4] sm:$0xf]  ;;  %v3122_v16 = vsel %vm14488_vm14, %v3121_v3, 0 }
 0xc5c   :  { %5214 = vst [vmem:[#allocation6] sm:$0x1] %v5213_v18  ;;  %v5215_v22 = vld [vmem:[#allocation6 + $0x8] sm:$0x1]  ;;  %v3119_v38 = vsel %vm14463_vm10, %v3117_v26, 0  ;;  %v10039_v40 = vcombine.low %v3116_v13, %v3117_v26  ;;  %v10040_v41 = vcombine.low %v3120_v20, %v3120_v20  ;;  %v3124_v8 = vsel %vm15768_vm13, %v3120_v20, 0 }
 0xc5d   :  { %v5216_v32 = vsel %vm14649_vm11, 0, %v5215_v22  ;;  %v10049_v42 = vcombine.low %v3118_v19, %v3119_v38  ;;  %v12221_v13 = vld [vmem:[%s15760_s3 + $0xb0] sm:$0xff]   ;;  %v10075_v19 = vcombine.low %v3124_v8, %v3124_v8  ;;  %v12222_v22 = vld [vmem:[%s15760_s3 + $0xb8] sm:$0xff]   ;;  %v12223_v20 = vld [vmem:[#allocation50] ss:$8 sps:$4 sm:$0xff]   ;;  %vm15772_vm13 = vcmask 130048  }
 0xc5e   :  { %5217 = vst [vmem:[#allocation6 + $0x8] sm:$0x1] %v5216_v32  ;;  %v3169_v47 = vshll.u32 %v10039_v40, 16  ;;  %v3174_v48 = vshll.u32 %v10040_v41, 16  ;;  %v3167_v27 = vshrl.u32 %v10039_v40, 16 }
 0xc5f   :  { %11489 = vmatmul.mubr.bf16.vlgmr.msra.gmra.mrb[56].mxu1 %v10049_v42  ;;  %v3389_v38 = vrot.slane %v10075_v19, 1  ;;  %v12225_v40 = vld [vmem:[#allocation50 + $0x4] ss:$8 sps:$4 sm:$0xff]   ;;  %v12228_v41 = vld [vmem:[#allocation50 + $0x14] ss:$8 sps:$4 sm:$0xff]  }
 0xc60   :  { %v3171_v49 = vrot.slane %v3169_v47, 1  ;;  %3627 = vmatprep.mubr.bf16.mxu1 %v15628_v52  ;;  %v3176_v54 = vrot.slane %v3174_v48, 1  ;;  %3595 = vmatprep.subr.bf16.mxu1 %v12225_v40  ;;  %v12226_v42 = vld [vmem:[#allocation50 + $0x10] ss:$8 sps:$4 sm:$0xff]   ;;  %v12231_v47 = vld [vmem:[#allocation50 + $0x24] ss:$8 sps:$4 sm:$0xff]  }
 0xc61   :  { %3596 = vmatpush1.bf16.msra.mxu1 %v12223_v20  ;;  %v12229_v48 = vld [vmem:[#allocation50 + $0x20] ss:$8 sps:$4 sm:$0xff]  }
 0xc62   :  { %v3172_v51 = vor.u32 %v3171_v49, %v3167_v27  ;;  %3597 = vmatprep.subr.bf16.mxu1 %v12228_v41  ;;  %v12234_v27 = vld [vmem:[#allocation50 + $0x34] ss:$8 sps:$4 sm:$0xff]   ;;  %v12232_v49 = vld [vmem:[#allocation50 + $0x30] ss:$8 sps:$4 sm:$0xff]  }
 0xc64   :  { %v3177_v59 = vsel %vm15766_vm9, %v3172_v51, %v3176_v54  ;;  %vm15767_vm9 = vcmp.ne.s16.totalorder %v14479_v37, 0  ;;  %v12237_v51 = vld [vmem:[#allocation50 + $0x44] ss:$8 sps:$4 sm:$0xff]   ;;  %v12235_v54 = vld [vmem:[#allocation50 + $0x40] ss:$8 sps:$4 sm:$0xff]  }
 0xc65   :  { %11469 = vmatmul.mubr.bf16.vlgmr.msra.gmra.mrb[28].mxu0 %v3177_v59  ;;  %v3123_v5 = vsel %vm15767_vm9, %v3117_v26, 0  ;;  %vm15769_vm9 = vcmask 1046528   ;;  %3598 = vmatpush1.bf16.msra.mxu1 %v12226_v42  ;;  %v12238_v59 = vld [vmem:[#allocation50 + $0x50] ss:$8 sps:$4 sm:$0xff]  }
 0xc66   :  { %11493 = vmatpush3.bf16.msra.mxu0 %v12215_v55  ;;  %11508 = vmatprep.mubr.msk.bf16.mxu0 %vm15736_vm5, %v15630_v28  ;;  %v10074_v18 = vcombine.low %v3122_v16, %v3123_v5  ;;  %v12240_v55 = vld [vmem:[#allocation50 + $0x54] ss:$8 sps:$4 sm:$0xff]  }
 0xc67   :  { %11494 = vmatprep.subr.bf16.mxu0 %v15630_v28  ;;  %3599 = vmatprep.subr.bf16.mxu1 %v12231_v47 }
 0xc68   :  { %v3388_v32 = vrot.slane %v10074_v18, 1 }
 0xc69   :  { %3600 = vmatpush1.bf16.msra.mxu1 %v12229_v48 }
 0xc6a   :  { %11495 = vmatpush3.bf16.msra.mxu0 %v12216_v60  ;;  %v3390_v26 = vsel %vm15769_vm9, %v3388_v32, %v3389_v38  ;;  %3601 = vmatprep.subr.bf16.mxu1 %v12234_v27  ;;  %v12243_v60 = vld [vmem:[#allocation50 + $0x64] ss:$8 sps:$4 sm:$0xff]   ;;  %vm15773_vm9 = vmmov %vm15772_vm13 }
 0xc6b   :  { %11496 = vmatprep.subr.bf16.mxu0 %v15630_v28 }
 0xc6d   :  { %3602 = vmatpush1.bf16.msra.mxu1 %v12232_v49 }
 0xc6e   :  { %11497 = vmatpush3.bf16.msra.mxu0 %v12217_v62  ;;  %3603 = vmatprep.subr.bf16.mxu1 %v12237_v51  ;;  %v12241_v62 = vld [vmem:[#allocation50 + $0x60] ss:$8 sps:$4 sm:$0xff]  }
 0xc6f   :  { %11498 = vmatprep.subr.bf16.mxu0 %v15630_v28 }
 0xc71   :  { %3604 = vmatpush1.bf16.msra.mxu1 %v12235_v54 }
 0xc72   :  { %11499 = vmatpush3.bf16.msra.mxu0 %v12218_v0  ;;  %3605 = vmatprep.subr.bf16.mxu1 %v12240_v55  ;;  %v12246_v0 = vld [vmem:[#allocation50 + $0x74] ss:$8 sps:$4 sm:$0xff]   ;;  %v5194_v55 = vstv %s5193_s11 }
 0xc73   :  { %11500 = vmatprep.subr.bf16.mxu0 %v15630_v28 }
 0xc75   :  { %3606 = vmatpush1.bf16.msra.mxu1 %v12238_v59  ;;  %v5200_v59 = vstv %s10322_s15 }
 0xc76   :  { %11501 = vmatpush3.bf16.msra.mxu0 %v12219_v1  ;;  %3607 = vmatprep.subr.bf16.mxu1 %v12243_v60  ;;  %v12244_v1 = vld [vmem:[#allocation50 + $0x70] ss:$8 sps:$4 sm:$0xff]  }
 0xc77   :  { %11502 = vmatprep.subr.bf16.mxu0 %v15630_v28 }
 0xc79   :  { %3608 = vmatpush1.bf16.msra.mxu1 %v12241_v62 }
 0xc7a   :  { %11503 = vmatpush3.bf16.msra.mxu0 %v12220_v61  ;;  %3609 = vmatprep.subr.bf16.mxu1 %v12246_v0  ;;  %v5195_v0 = vmul.f32 %v5194_v55, %v3062_v6  ;;  %v12252_v6 = vld [vmem:[%s15770_s5 + $0x110] ss:$8 sps:$4 sm:$0xff]  }
 0xc7b   :  { %11504 = vmatprep.subr.bf16.mxu0 %v15630_v28 }
 0xc7d   :  { %3610 = vmatpush1.bf16.msra.mxu1 %v12244_v1  ;;  %v5196_v1 = vmul.f32 %v5194_v55, %v3063_v36  ;;  %v12255_v36 = vld [vmem:[%s15770_s5 + $0x120] ss:$8 sps:$4 sm:$0xff]  }
 0xc7e   :  { %11505 = vmatpush3.bf16.msra.mxu0 %v12221_v13  ;;  %v12267_v55 = vld [vmem:[%s15770_s5 + $0x160] ss:$8 sps:$4 sm:$0xff]  }
 0xc7f   :  { %11506 = vmatprep.subr.bf16.mxu0 %v15630_v28  ;;  %v12297_v28 = vld [vmem:[%s15770_s5] ss:$8 sps:$4 sm:$0xff]  }
 0xc82   :  { %11507 = vmatpush3.bf16.msra.mxu0 %v12222_v22 }
 0xc85   :  { %11509 = vmatmul.mubr.bf16.vlgmr.msra.gmra.mrb[32].mxu0 %v3390_v26  ;;  %v10084_v26 = vld [vmem:[#allocation38] ss:$0 sm:$0xff] }
 0xc86   :  { %3688 = vmatprep.mubr.bf16.mxu0 %v15628_v52 }
 0xd32   :  { %v3356_v61 = vpop.f32.mrb[56].mxu1 }
 0xd33   :  { %v11490_v3 = vpop.f32.mrb[57].mxu1 }
 0xd34   :  { %v3359_v5 = vpop.f32.mrb[58].mxu1 }
 0xd35   :  { %v11491_v8 = vpop.f32.mrb[59].mxu1 }
 0xd38   :  { %v3261_v13 = vpop.f32.mrb[28].mxu0 }
 0xd39   :  { %v3357_v16 = vadd.f32 %v3356_v61, %v3261_v13  ;;  %v11470_v18 = vpop.f32.mrb[29].mxu0  ;;  %v12249_v13 = vld [vmem:[%s15770_s5 + $0x100] ss:$8 sps:$4 sm:$0xff]  }
 0xd3a   :  { %v3264_v19 = vpop.f32.mrb[30].mxu0  ;;  %v12254_v18 = vld [vmem:[%s15770_s5 + $0x114] ss:$8 sps:$4 sm:$0xff]  }
 0xd3b   :  { %v3360_v22 = vadd.f32 %v3359_v5, %v3264_v19  ;;  %v11471_v32 = vpop.f32.mrb[31].mxu0  ;;  %v12260_v19 = vld [vmem:[%s15770_s5 + $0x134] ss:$8 sps:$4 sm:$0xff]  }
 0xd3c   :  { %v12263_v32 = vld [vmem:[%s15770_s5 + $0x144] ss:$8 sps:$4 sm:$0xff]  }
 0xd58   :  { %v3474_v38 = vpop.f32.mrb[32].mxu0 }
 0xd59   :  { %v3481_v20 = vadd.f32 %v3474_v38, %v3357_v16  ;;  %v11510_v40 = vpop.f32.mrb[33].mxu0  ;;  %v12251_v16 = vld [vmem:[%s15770_s5 + $0x104] ss:$8 sps:$4 sm:$0xff]   ;;  %v12261_v38 = vld [vmem:[%s15770_s5 + $0x140] ss:$8 sps:$4 sm:$0xff]  }
 0xd5a   :  { %v3477_v41 = vpop.f32.mrb[34].mxu0  ;;  %4134 = vmatprep.subr.bf16.mxu1 %v12251_v16 }
 0xd5b   :  { %v3490_v42 = vadd.f32 %v10084_v26, %v3481_v20  ;;  %v3482_v47 = vadd.f32 %v3477_v41, %v3360_v22  ;;  %v11511_v48 = vpop.f32.mrb[35].mxu0  ;;  %v12258_v22 = vld [vmem:[%s15770_s5 + $0x130] ss:$8 sps:$4 sm:$0xff]  }
 0xd5c   :  { %v12264_v20 = vld [vmem:[%s15770_s5 + $0x150] ss:$8 sps:$4 sm:$0xff]  }
 0xd5d   :  { %v3491_v27 = vadd.f32 %v10084_v26, %v3482_v47  ;;  %v3492_v49 = vmax.f32 %v3490_v42, 0.0  ;;  %v12266_v26 = vld [vmem:[%s15770_s5 + $0x154] ss:$8 sps:$4 sm:$0xff]  }
 0xd5f   :  { %v3493_v51 = vmax.f32 %v3491_v27, 0.0 }
 0xd61   :  { %v3494_v54 = vpack.c.bf16 %v3493_v51, %v3492_v49  ;;  %v12247_v49 = vld [vmem:[%s15771_s6] sm:$0xff]   ;;  %v12248_v51 = vld [vmem:[%s15771_s6 + $0x8] sm:$0xff]  }
 0xd63   :  { %v5198_v60 = vunpack.c.l.bf16 %v3494_v54  ;;  %v5199_v62 = vunpack.c.h.bf16 %v3494_v54  ;;  %3628 = vmatmul.mubr.bf16.vlgmr.msra.gmra.mrb[60].mxu1 %v3494_v54  ;;  %v12269_v54 = vld [vmem:[%s15770_s5 + $0x164] ss:$8 sps:$4 sm:$0xff]  }
 0xd64   :  { %4135 = vmatpush1.bf16.msra.mxu1 %v12249_v13  ;;  %v12276_v13 = vld [vmem:[%s15770_s5 + $0x190] ss:$8 sps:$4 sm:$0xff]  }
 0xd65   :  { %v5201_v61 = vmul.f32 %v5200_v59, %v5198_v60  ;;  %v5202_v3 = vmul.f32 %v5200_v59, %v5199_v62  ;;  %4136 = vmatprep.subr.bf16.mxu1 %v12254_v18  ;;  %v12272_v59 = vld [vmem:[%s15770_s5 + $0x174] ss:$8 sps:$4 sm:$0xff]   ;;  %v12270_v60 = vld [vmem:[%s15770_s5 + $0x170] ss:$8 sps:$4 sm:$0xff]   ;;  %v12275_v62 = vld [vmem:[%s15770_s5 + $0x184] ss:$8 sps:$4 sm:$0xff]  }
 0xd66   :  { %v12281_v18 = vld [vmem:[%s15770_s5 + $0x1a4] ss:$8 sps:$4 sm:$0xff]  }
 0xd67   :  { %v14766_v5 = vadd.f32 %v5201_v61, %v5195_v0  ;;  %v14768_v8 = vadd.f32 %v5202_v3, %v5196_v1  ;;  %v12273_v0 = vld [vmem:[%s15770_s5 + $0x180] ss:$8 sps:$4 sm:$0xff]   ;;  %v15775_v1 = vmov 0  ;;  %v12278_v61 = vld [vmem:[%s15770_s5 + $0x194] ss:$8 sps:$4 sm:$0xff]  }
 0xd68   :  { %4137 = vmatpush1.bf16.msra.mxu1 %v12252_v6  ;;  %v3752_v3 = vld [vmem:[#allocation5] sm:$0x11] }
 0xd69   :  { %4138 = vmatprep.subr.bf16.mxu1 %v12257_v21  ;;  %v12279_v6 = vld [vmem:[%s15770_s5 + $0x1a0] ss:$8 sps:$4 sm:$0xff]   ;;  %v12284_v21 = vld [vmem:[%s15770_s5 + $0x1b4] ss:$8 sps:$4 sm:$0xff]  }
 0xd6c   :  { %4139 = vmatpush1.bf16.msra.mxu1 %v12255_v36  ;;  %v12282_v36 = vld [vmem:[%s15770_s5 + $0x1b0] ss:$8 sps:$4 sm:$0xff]  }
 0xd6d   :  { %4140 = vmatprep.subr.bf16.mxu1 %v12260_v19  ;;  %v12287_v19 = vld [vmem:[%s15770_s5 + $0x1c4] ss:$8 sps:$4 sm:$0xff]  }
 0xd70   :  { %4141 = vmatpush1.bf16.msra.mxu1 %v12258_v22  ;;  %v12285_v22 = vld [vmem:[%s15770_s5 + $0x1c0] ss:$8 sps:$4 sm:$0xff]  }
 0xd71   :  { %4142 = vmatprep.subr.bf16.mxu1 %v12263_v32  ;;  %v12290_v32 = vld [vmem:[%s15770_s5 + $0x1d4] ss:$8 sps:$4 sm:$0xff]  }
 0xd74   :  { %4143 = vmatpush1.bf16.msra.mxu1 %v12261_v38  ;;  %v12288_v38 = vld [vmem:[%s15770_s5 + $0x1d0] ss:$8 sps:$4 sm:$0xff]  }
 0xd75   :  { %4144 = vmatprep.subr.bf16.mxu1 %v12266_v26  ;;  %v12293_v26 = vld [vmem:[%s15770_s5 + $0x1e4] ss:$8 sps:$4 sm:$0xff]  }
 0xd78   :  { %4145 = vmatpush1.bf16.msra.mxu1 %v12264_v20  ;;  %v12291_v20 = vld [vmem:[%s15770_s5 + $0x1e0] ss:$8 sps:$4 sm:$0xff]  }
 0xd79   :  { %4146 = vmatprep.subr.bf16.mxu1 %v12269_v54  ;;  %v3713_v54 = vunpack.c.h.bf16 %v14427_v30 }
 0xd7c   :  { %4147 = vmatpush1.bf16.msra.mxu1 %v12267_v55 }
 0xd7d   :  { %4148 = vmatprep.subr.bf16.mxu1 %v12272_v59 }
 0xd80   :  { %4149 = vmatpush1.bf16.msra.mxu1 %v12270_v60 }
 0xd81   :  { %4150 = vmatprep.subr.bf16.mxu1 %v12275_v62 }
 0xd84   :  { %4151 = vmatpush1.bf16.msra.mxu1 %v12273_v0 }
 0xd85   :  { %4152 = vmatprep.subr.bf16.mxu1 %v12278_v61 }
 0xd88   :  { %4153 = vmatpush1.bf16.msra.mxu1 %v12276_v13 }
 0xd89   :  { %4154 = vmatprep.subr.bf16.mxu1 %v12281_v18 }
 0xd8c   :  { %4155 = vmatpush1.bf16.msra.mxu1 %v12279_v6 }
 0xd8d   :  { %4156 = vmatprep.subr.bf16.mxu1 %v12284_v21 }
 0xd90   :  { %4157 = vmatpush1.bf16.msra.mxu1 %v12282_v36 }
 0xd91   :  { %4158 = vmatprep.subr.bf16.mxu1 %v12287_v19 }
 0xd94   :  { %4159 = vmatpush1.bf16.msra.mxu1 %v12285_v22  ;;  %v3714_v22 = vunpack.c.l.bf16 %v14429_v44 }
 0xd95   :  { %4160 = vmatprep.subr.bf16.mxu1 %v12290_v32 }
 0xd98   :  { %4161 = vmatpush1.bf16.msra.mxu1 %v12288_v38 }
 0xd99   :  { %4162 = vmatprep.subr.bf16.mxu1 %v12293_v26  ;;  %v3716_v26 = vunpack.c.h.bf16 %v14429_v44 }
 0xd9c   :  { %4163 = vmatpush1.bf16.msra.mxu1 %v12291_v20  ;;  %v15778_v20 = vmov 0 }
 0xe36   :  { %v3629_v40 = vpop.f32.mrb[60].mxu1 }
 0xe37   :  { %v3631_v41 = vpop.f32.mrb[61].mxu1 }
 0xe38   :  { %v3633_v42 = vpop.f32.mrb[62].mxu1 }
 0xe39   :  { %v3638_v47 = vpack.c.bf16 %v3633_v42, %v3629_v40  ;;  %v3635_v48 = vpop.f32.mrb[63].mxu1  ;;  %v12294_v40 = vld [vmem:[%s15770_s5 + $0x1f0] ss:$8 sps:$4 sm:$0xff]   ;;  %v12299_v42 = vld [vmem:[%s15770_s5 + $0x4] ss:$8 sps:$4 sm:$0xff]  }
 0xe3a   :  { %v3639_v27 = vpack.c.bf16 %v3635_v48, %v3631_v41  ;;  %v12296_v41 = vld [vmem:[%s15770_s5 + $0x1f4] ss:$8 sps:$4 sm:$0xff]   ;;  %v3711_v48 = vunpack.c.l.bf16 %v14427_v30 }
 0xe3b   :  { %4164 = vmatprep.subr.bf16.mxu1 %v12296_v41 }
 0xe3c   :  { %3656 = vmatprep.subr.bf16.mxu0 %v3639_v27  ;;  %4165 = vmatpush1.bf16.msra.mxu1 %v12294_v40  ;;  %v3718_v27 = vstv %s3709_s26 }
 0xe3d   :  { %3657 = vmatpush1.bf16.msra.mxu0 %v3638_v47  ;;  %4367 = vmatprep.subr.bf16.mxu1 %v12299_v42  ;;  %v3710_v47 = vunpack.c.l.bf16 %v14425_v29  ;;  %v3720_v0 = vmul.f32 %v3718_v27, %v3711_v48  ;;  %v3722_v36 = vmul.f32 %v3718_v27, %v3713_v54  ;;  %v3723_v48 = vmul.f32 %v3718_v27, %v3714_v22 }
 0xe3f   :  { %v3719_v59 = vmul.f32 %v3718_v27, %v3710_v47  ;;  %v3717_v47 = vunpack.c.h.bf16 %v14431_v45 }
 0xe40   :  { %10103 = vmatmul.mubr.msk.bf16.vlgmr.msra.gmra.mrb[36].mxu0 %vm15772_vm13, %v12247_v49  ;;  %vm15774_vm13 = vcmask 1044484   ;;  %v3728_v49 = vstv %s10105_s21 }
 0xe41   :  { %3698 = vmatprep.mubr.bf16.mxu0 %v15628_v52  ;;  %vm3750_vm1 = vmand %vm15774_vm13, %vm3749_vm4  ;;  %vm15777_vm4 = vsmask.f32 7954  ;;  %v3726_v22 = vmul.f32 %v3718_v27, %v3717_v47 }
 0xe48   :  { %10104 = vmatmul.mubr.msk.bf16.gmra.mrb[40].mxu0 %vm15773_vm9, %v12248_v51  ;;  %vm14797_vm9 = vmor %vm3750_vm1, %vm14264_vm12  ;;  %v3712_v51 = vunpack.c.h.bf16 %v14425_v29  ;;  %v3715_v29 = vunpack.c.l.bf16 %v14431_v45  ;;  %vm3817_vm1 = vcmask 1047556  }
 0xe49   :  { %4849 = vmatprep.mubr.bf16.mxu0 %v15628_v52  ;;  %v15776_v1 = vsel %vm14797_vm9, 4294967295, %v15775_v1  ;;  %v3753_v16 = vsel %vm14797_vm9, 0, %v3752_v3  ;;  %vm14826_vm13 = vmand %vm3817_vm1, %vm15777_vm4  ;;  %vm15780_vm4 = vnez %v15708_v50 }
 0xe4a   :  { %3754 = vst [vmem:[#allocation5] sm:$0x11] %v3753_v16  ;;  %v3721_v16 = vmul.f32 %v3718_v27, %v3712_v51  ;;  %v15779_v20 = vsel %vm14826_vm13, 4294967295, %v15778_v20  ;;  %vm15623_vm1 = vmor %vm14826_vm13, %vm14717_vm3  ;;  %vm15783_vm13 = vcmp.ne.s16.totalorder %v14238_v56, 0 }
 0xe51   :  { %v3820_v44 = vld [vmem:[#allocation5] sm:$0xff] }
 0xf13   :  { %v3690_v55 = vpop.f32.mrb[36].mxu0 }
 0xf14   :  { %v3729_v60 = vmul.f32 %v3728_v49, %v3690_v55  ;;  %v3692_v62 = vpop.f32.mrb[37].mxu0  ;;  %v3724_v55 = vmul.f32 %v3718_v27, %v3715_v29 }
 0xf15   :  { %v3730_v61 = vmul.f32 %v3728_v49, %v3692_v62  ;;  %v3694_v3 = vpop.f32.mrb[38].mxu0 }
 0xf16   :  { %v3737_v13 = vadd.f32 %v3729_v60, %v3719_v59  ;;  %v3731_v18 = vmul.f32 %v3728_v49, %v3694_v3  ;;  %v3696_v6 = vpop.f32.mrb[39].mxu0 }
 0xf17   :  { %v3738_v21 = vadd.f32 %v3730_v61, %v3720_v0  ;;  %v3732_v19 = vmul.f32 %v3728_v49, %v3696_v6 }
 0xf18   :  { %v3739_v30 = vadd.f32 %v3731_v18, %v3721_v16 }
 0xf19   :  { %v10752_v32 = vpack.c.bf16 %v3738_v21, %v3737_v13  ;;  %v3740_v38 = vadd.f32 %v3732_v19, %v3722_v36  ;;  %v3725_v13 = vmul.f32 %v3718_v27, %v3716_v26 }
 0xf1b   :  { %v3778_v40 = vshrl.u32 %v10752_v32, 16  ;;  %v10753_v41 = vpack.c.bf16 %v3740_v38, %v3739_v30  ;;  %v3700_v42 = vpop.f32.mrb[40].mxu0  ;;  %v3781_v60 = vshll.u32 %v10752_v32, 16 }
 0xf1c   :  { %v3733_v51 = vmul.f32 %v3728_v49, %v3700_v42  ;;  %v3702_v54 = vpop.f32.mrb[41].mxu0 }
 0xf1d   :  { %v3780_v59 = vrot.slane %v3778_v40, 7  ;;  %v3786_v62 = vshrl.u32 %v10753_v41, 16  ;;  %v3734_v0 = vmul.f32 %v3728_v49, %v3702_v54  ;;  %v3704_v61 = vpop.f32.mrb[42].mxu0  ;;  %v3789_v21 = vshll.u32 %v10753_v41, 16 }
 0xf1e   :  { %v3741_v3 = vadd.f32 %v3733_v51, %v3723_v48  ;;  %v3735_v16 = vmul.f32 %v3728_v49, %v3704_v61  ;;  %v3706_v18 = vpop.f32.mrb[43].mxu0 }
 0xf1f   :  { %v3783_v45 = vor.u32 %v3781_v60, %v3780_v59  ;;  %v3788_v6 = vrot.slane %v3786_v62, 7  ;;  %v3742_v36 = vadd.f32 %v3734_v0, %v3724_v55  ;;  %v3736_v29 = vmul.f32 %v3728_v49, %v3706_v18  ;;  %v3826_v18 = vld [vmem:[#allocation5 + $0x20] sm:$0x11] }
 0xf20   :  { %v3743_v19 = vadd.f32 %v3735_v16, %v3725_v13  ;;  %v3784_v30 = vrot.slane %v3780_v59, 4 }
 0xf21   :  { %v3821_v32 = vsel %vm15623_vm1, %v3783_v45, %v3820_v44  ;;  %v3791_v38 = vor.u32 %v3789_v21, %v3788_v6  ;;  %v10754_v40 = vpack.c.bf16 %v3742_v36, %v3741_v3  ;;  %v3744_v26 = vadd.f32 %v3736_v29, %v3726_v22 }
 0xf22   :  { %3822 = vst [vmem:[#allocation5] sm:$0xff] %v3821_v32  ;;  %v14844_v41 = vsel %vm14293_vm15, %v3821_v32, 0  ;;  %v3793_v61 = vrot.slane %v3788_v6, 4  ;;  %vm15781_vm1 = vcmp.ne.s16.totalorder %v14282_v15, 0  ;;  %vm15782_vm15 = vnez %v15723_v31 }
 0xf23   :  { %v3792_v42 = vsel %vm14191_vm7, %v3784_v30, %v3791_v38  ;;  %v3795_v48 = vshrl.u32 %v10754_v40, 16  ;;  %v10755_v27 = vpack.c.bf16 %v3744_v26, %v3743_v19  ;;  %v3798_v55 = vshll.u32 %v10754_v40, 16 }
 0xf24   :  { %v10143_v49 = vcombine.high %v3821_v32, %v3792_v42  ;;  %v10142_v47 = vcombine.low %v3821_v32, %v3792_v42  ;;  %v14848_v51 = vsel %vm15780_vm4, %v3792_v42, 0  ;;  %v3840_v22 = vsel %vm15781_vm1, %v3792_v42, 0 }
 0xf25   :  { %v3797_v54 = vrot.slane %v3795_v48, 7  ;;  %v10180_v59 = vcombine.low %v14844_v41, %v14848_v51  ;;  %v10181_v60 = vcombine.high %v14844_v41, %v14848_v51  ;;  %v3804_v62 = vshrl.u32 %v10755_v27, 16  ;;  %v12355_v41 = vld [vmem:[%s15770_s5 + $0x230] ss:$8 sps:$4 sm:$0xff]   ;;  %v12360_v51 = vld [vmem:[%s15770_s5 + $0x244] ss:$8 sps:$4 sm:$0xff]  }
 0xf26   :  { %v3945_v0 = vshll.u32 %v10143_v49, 16  ;;  %v3933_v3 = vshll.u32 %v10142_v47, 16  ;;  %v3807_v16 = vshll.u32 %v10755_v27, 16  ;;  %vm15786_vm1 = vcmask 1046528  }
 0xf27   :  { %v3800_v44 = vor.u32 %v3798_v55, %v3797_v54  ;;  %v3806_v13 = vrot.slane %v3804_v62, 7  ;;  %v3802_v21 = vrot.slane %v3797_v54, 4 }
 0xf28   :  { %v3947_v32 = vrot.slane %v3945_v0, 1  ;;  %v3935_v38 = vrot.slane %v3933_v3, 1 }
 0xf29   :  { %v3801_v45 = vsel %vm14191_vm7, %v3793_v61, %v3800_v44  ;;  %v7038_v36 = vld [vmem:[#allocation5] sm:$0x11]  ;;  %v3838_v19 = vld [vmem:[#allocation5] sm:$0xee]  ;;  %v3809_v29 = vor.u32 %v3807_v16, %v3806_v13  ;;  %v3811_v30 = vrot.slane %v3806_v13, 4 }
 0xf2a   :  { %v7039_v6 = vsel %vm14797_vm9, 0, %v7038_v36  ;;  %v14862_v40 = vsel %vm15782_vm15, %v3801_v45, 0  ;;  %v3839_v26 = vsel %vm15783_vm13, %v3838_v19, 0  ;;  %v3841_v48 = vsel %vm15784_vm6, %v3801_v45, 0 }
 0xf2b   :  { %7040 = vst [vmem:[#allocation5] sm:$0x11] %v7039_v6  ;;  %v3810_v42 = vsel %vm14191_vm7, %v3802_v21, %v3809_v29  ;;  %v3827_v27 = vsel %vm14797_vm9, %v3811_v30, %v3826_v18  ;;  %v10248_v54 = vcombine.low %v3839_v26, %v3840_v22  ;;  %v10249_v55 = vcombine.high %v3839_v26, %v3840_v22 }
 0xf2c   :  { %3828 = vst [vmem:[#allocation5 + $0x20] sm:$0x11] %v3827_v27  ;;  %v10145_v62 = vcombine.high %v3801_v45, %v3810_v42  ;;  %v10144_v0 = vcombine.low %v3801_v45, %v3810_v42  ;;  %v14874_v61 = vsel %vm15780_vm4, %v3810_v42, 0  ;;  %vm15785_vm13 = vcmp.ne.s16.totalorder %v14286_v17, 0 }
 0xf2d   :  { %v3842_v44 = vsel %vm15785_vm13, %v3810_v42, 0  ;;  %v10183_v3 = vcombine.high %v14862_v40, %v14874_v61  ;;  %v10182_v13 = vcombine.low %v14862_v40, %v14874_v61  ;;  %v3943_v21 = vshrl.u32 %v10143_v49, 16  ;;  %vm15787_vm13 = vmmov %vm15786_vm1  ;;  %v12366_v40 = vld [vmem:[%s15770_s5 + $0x264] ss:$8 sps:$4 sm:$0xff]   ;;  %v12364_v61 = vld [vmem:[%s15770_s5 + $0x260] ss:$8 sps:$4 sm:$0xff]  }
 0xf2e   :  { %v10250_v16 = vcombine.low %v3841_v48, %v3842_v44  ;;  %v10251_v18 = vcombine.high %v3841_v48, %v3842_v44  ;;  %v3950_v36 = vshll.u32 %v10145_v62, 16  ;;  %v3931_v45 = vshrl.u32 %v10142_v47, 16 }
 0xf2f   :  { %v3938_v19 = vshll.u32 %v10144_v0, 16  ;;  %v4474_v22 = vrot.slane %v10248_v54, 1  ;;  %v4477_v30 = vrot.slane %v10249_v55, 1  ;;  %v3948_v26 = vor.u32 %v3947_v32, %v3943_v21  ;;  %v12303_v55 = vld [vmem:[%s15770_s5 + $0x14] ss:$8 sps:$4 sm:$0xff]  }
 0xf30   :  { %v14882_v29 = vrot.slane %v10250_v16, 1  ;;  %v14884_v6 = vrot.slane %v10251_v18, 1  ;;  %v3952_v42 = vrot.slane %v3950_v36, 1  ;;  %v3936_v27 = vor.u32 %v3935_v38, %v3931_v45  ;;  %v12301_v21 = vld [vmem:[%s15770_s5 + $0x10] ss:$8 sps:$4 sm:$0xff]  }
 0xf31   :  { %v3940_v52 = vrot.slane %v3938_v19, 1  ;;  %vm15788_vm9 = vsmask.f32 7424  ;;  %v3962_v36 = vshrl.u32 %v10145_v62, 16  ;;  %v12306_v19 = vld [vmem:[%s15770_s5 + $0x24] ss:$8 sps:$4 sm:$0xff]  }
 0xf32   :  { %v14889_v48 = vsel %vm15786_vm1, %v4477_v30, %v14884_v6  ;;  %v14893_v49 = vsel %vm15787_vm13, %v4474_v22, %v14882_v29  ;;  %v3953_v47 = vsel %vm15788_vm9, %v3948_v26, %v3952_v42  ;;  %vm15789_vm6 = vmmov %vm15788_vm9  ;;  %v3954_v22 = vshrl.u32 %v10144_v0, 16  ;;  %v12312_v0 = vld [vmem:[%s15770_s5 + $0x44] ss:$8 sps:$4 sm:$0xff]  }
 0xf33   :  { %v3941_v54 = vsel %vm15789_vm6, %v3936_v27, %v3940_v52  ;;  %4166 = vmatprep.mubr.bf16.mxu1 %v3953_v47  ;;  %v14898_v32 = vld [vmem:[#allocation5 + $0x20] sm:$0x11]  ;;  %vm15790_vm1 = vmor %vm14655_vm8, %vm14649_vm11  ;;  %v3964_v14 = vor.u32 %v3962_v36, %v3952_v42  ;;  %vm15792_vm9 = vcmp.ne.s16.totalorder %v14332_v46, 0 }
 0xf34   :  { %v7041_v38 = vld [vmem:[#allocation5 + $0x20] sm:$0x11]  ;;  %4167 = vmatmul.mubr.bf16.vlgmr.msra.gmra.mrb[64].mxu1 %v3941_v54  ;;  %v10147_v44 = vcombine.high %v14898_v32, %v14898_v32  ;;  %v10146_v18 = vcombine.low %v14898_v32, %v14898_v32  ;;  %v3956_v27 = vor.u32 %v3954_v22, %v3940_v52  ;;  %vm15791_vm8 = vmmov %vm15789_vm6  ;;  %v12307_v52 = vld [vmem:[%s15770_s5 + $0x30] ss:$8 sps:$4 sm:$0xff]  }
 0xf35   :  { %v7042_v16 = vsel %vm15790_vm1, 0, %v7041_v38  ;;  %4368 = vmatpush1.bf16.msra.mxu1 %v12297_v28  ;;  %v12304_v54 = vld [vmem:[%s15770_s5 + $0x20] ss:$8 sps:$4 sm:$0xff]   ;;  %v12315_v38 = vld [vmem:[%s15770_s5 + $0x54] ss:$8 sps:$4 sm:$0xff]   ;;  %vm15794_vm1 = vmmov %vm15787_vm13 }
 0xf36   :  { %7043 = vst [vmem:[#allocation5 + $0x20] sm:$0x11] %v7042_v16  ;;  %v3966_v45 = vshll.u32 %v10147_v44, 16  ;;  %4369 = vmatprep.subr.bf16.mxu1 %v12303_v55  ;;  %v3958_v30 = vshll.u32 %v10146_v18, 16  ;;  %v12309_v55 = vld [vmem:[%s15770_s5 + $0x34] ss:$8 sps:$4 sm:$0xff]  }
 0xf37   :  { %v12310_v42 = vld [vmem:[%s15770_s5 + $0x40] ss:$8 sps:$4 sm:$0xff]   ;;  %v12313_v44 = vld [vmem:[%s15770_s5 + $0x50] ss:$8 sps:$4 sm:$0xff]   ;;  %v12318_v16 = vld [vmem:[%s15770_s5 + $0x64] ss:$8 sps:$4 sm:$0xff]  }
 0xf38   :  { %v3968_v26 = vrot.slane %v3966_v45, 1  ;;  %v3960_v47 = vrot.slane %v3958_v30, 1  ;;  %v12316_v18 = vld [vmem:[%s15770_s5 + $0x60] ss:$8 sps:$4 sm:$0xff]   ;;  %v12324_v36 = vld [vmem:[%s15770_s5 + $0x84] ss:$8 sps:$4 sm:$0xff]  }
 0xf39   :  { %4370 = vmatpush1.bf16.msra.mxu1 %v12301_v21  ;;  %v12319_v21 = vld [vmem:[%s15770_s5 + $0x70] ss:$8 sps:$4 sm:$0xff]   ;;  %v12322_v45 = vld [vmem:[%s15770_s5 + $0x80] ss:$8 sps:$4 sm:$0xff]   ;;  %v12330_v30 = vld [vmem:[%s15770_s5 + $0xa4] ss:$8 sps:$4 sm:$0xff]  }
 0xf3a   :  { %v3969_v28 = vsel %vm15789_vm6, %v3964_v14, %v3968_v26  ;;  %4371 = vmatprep.subr.bf16.mxu1 %v12306_v19  ;;  %v3961_v62 = vsel %vm15791_vm8, %v3956_v27, %v3960_v47  ;;  %v12327_v19 = vld [vmem:[%s15770_s5 + $0x94] ss:$8 sps:$4 sm:$0xff]   ;;  %v12325_v22 = vld [vmem:[%s15770_s5 + $0x90] ss:$8 sps:$4 sm:$0xff]   ;;  %v12328_v14 = vld [vmem:[%s15770_s5 + $0xa0] ss:$8 sps:$4 sm:$0xff]  }
 0xf3b   :  { %4176 = vmatprep.mubr.bf16.mxu1 %v3969_v28  ;;  %v12333_v26 = vld [vmem:[%s15770_s5 + $0xb4] ss:$8 sps:$4 sm:$0xff]   ;;  %v12331_v27 = vld [vmem:[%s15770_s5 + $0xb0] ss:$8 sps:$4 sm:$0xff]   ;;  %v12336_v47 = vld [vmem:[%s15770_s5 + $0xc4] ss:$8 sps:$4 sm:$0xff]  }
 0xf3c   :  { %4177 = vmatmul.mubr.bf16.gmra.mrb[68].mxu1 %v3961_v62  ;;  %v12339_v28 = vld [vmem:[%s15770_s5 + $0xd4] ss:$8 sps:$4 sm:$0xff]   ;;  %v12337_v62 = vld [vmem:[%s15770_s5 + $0xd0] ss:$8 sps:$4 sm:$0xff]   ;;  %vm15795_vm6 = vcmask 261120  }
 0xf3d   :  { %4372 = vmatpush1.bf16.msra.mxu1 %v12304_v54  ;;  %4399 = vmatprep.mubr.bf16.mxu1 %v10181_v60  ;;  %v12321_v60 = vld [vmem:[%s15770_s5 + $0x74] ss:$8 sps:$4 sm:$0xff]   ;;  %v12334_v54 = vld [vmem:[%s15770_s5 + $0xc0] ss:$8 sps:$4 sm:$0xff]   ;;  %vm15797_vm8 = vmmov %vm15795_vm6 }
 0xf3e   :  { %4373 = vmatprep.subr.bf16.mxu1 %v12309_v55  ;;  %v12342_v55 = vld [vmem:[%s15770_s5 + $0xe4] ss:$8 sps:$4 sm:$0xff]  }
 0xf41   :  { %4374 = vmatpush1.bf16.msra.mxu1 %v12307_v52  ;;  %v12340_v52 = vld [vmem:[%s15770_s5 + $0xe0] ss:$8 sps:$4 sm:$0xff]  }
 0xf42   :  { %4375 = vmatprep.subr.bf16.mxu1 %v12312_v0  ;;  %v12345_v0 = vld [vmem:[%s15770_s5 + $0xf4] ss:$8 sps:$4 sm:$0xff]  }
 0xf45   :  { %4376 = vmatpush1.bf16.msra.mxu1 %v12310_v42  ;;  %v12343_v42 = vld [vmem:[%s15770_s5 + $0xf0] ss:$8 sps:$4 sm:$0xff]  }
 0xf46   :  { %4377 = vmatprep.subr.bf16.mxu1 %v12315_v38  ;;  %v12348_v38 = vld [vmem:[%s15770_s5 + $0x204] ss:$8 sps:$4 sm:$0xff]  }
 0xf49   :  { %4378 = vmatpush1.bf16.msra.mxu1 %v12313_v44  ;;  %v12346_v44 = vld [vmem:[%s15770_s5 + $0x200] ss:$8 sps:$4 sm:$0xff]  }
 0xf4a   :  { %4379 = vmatprep.subr.bf16.mxu1 %v12318_v16  ;;  %v12351_v16 = vld [vmem:[%s15770_s5 + $0x214] ss:$8 sps:$4 sm:$0xff]  }
 0xf4d   :  { %4380 = vmatpush1.bf16.msra.mxu1 %v12316_v18  ;;  %v12349_v18 = vld [vmem:[%s15770_s5 + $0x210] ss:$8 sps:$4 sm:$0xff]  }
 0xf4e   :  { %4381 = vmatprep.subr.bf16.mxu1 %v12321_v60  ;;  %v12354_v60 = vld [vmem:[%s15770_s5 + $0x224] ss:$8 sps:$4 sm:$0xff]  }
 0xf51   :  { %4382 = vmatpush1.bf16.msra.mxu1 %v12319_v21  ;;  %v12352_v21 = vld [vmem:[%s15770_s5 + $0x220] ss:$8 sps:$4 sm:$0xff]  }
 0xf52   :  { %4383 = vmatprep.subr.bf16.mxu1 %v12324_v36  ;;  %v12357_v36 = vld [vmem:[%s15770_s5 + $0x234] ss:$8 sps:$4 sm:$0xff]  }
 0xf55   :  { %4384 = vmatpush1.bf16.msra.mxu1 %v12322_v45  ;;  %v12361_v45 = vld [vmem:[%s15770_s5 + $0x250] ss:$8 sps:$4 sm:$0xff]  }
 0xf56   :  { %4385 = vmatprep.subr.bf16.mxu1 %v12327_v19  ;;  %v12372_v19 = vld [vmem:[%s15770_s5 + $0x284] ss:$8 sps:$4 sm:$0xff]  }
 0xf59   :  { %4386 = vmatpush1.bf16.msra.mxu1 %v12325_v22  ;;  %v12370_v22 = vld [vmem:[%s15770_s5 + $0x280] ss:$8 sps:$4 sm:$0xff]  }
 0xf5a   :  { %4387 = vmatprep.subr.bf16.mxu1 %v12330_v30  ;;  %v12375_v30 = vld [vmem:[%s15770_s5 + $0x294] ss:$8 sps:$4 sm:$0xff]  }
 0xf5d   :  { %4388 = vmatpush1.bf16.msra.mxu1 %v12328_v14  ;;  %v12373_v14 = vld [vmem:[%s15770_s5 + $0x290] ss:$8 sps:$4 sm:$0xff]  }
 0xf5e   :  { %4389 = vmatprep.subr.bf16.mxu1 %v12333_v26  ;;  %v12378_v26 = vld [vmem:[%s15770_s5 + $0x2a4] ss:$8 sps:$4 sm:$0xff]  }
 0xf61   :  { %4390 = vmatpush1.bf16.msra.mxu1 %v12331_v27  ;;  %v12376_v27 = vld [vmem:[%s15770_s5 + $0x2a0] ss:$8 sps:$4 sm:$0xff]  }
 0xf62   :  { %4391 = vmatprep.subr.bf16.mxu1 %v12336_v47  ;;  %v12381_v47 = vld [vmem:[%s15770_s5 + $0x2b4] ss:$8 sps:$4 sm:$0xff]  }
 0xf65   :  { %4392 = vmatpush1.bf16.msra.mxu1 %v12334_v54  ;;  %v12379_v54 = vld [vmem:[%s15770_s5 + $0x2b0] ss:$8 sps:$4 sm:$0xff]  }
 0xf66   :  { %4393 = vmatprep.subr.bf16.mxu1 %v12339_v28  ;;  %v12384_v28 = vld [vmem:[%s15770_s5 + $0x2c4] ss:$8 sps:$4 sm:$0xff]  }
 0xf69   :  { %4394 = vmatpush1.bf16.msra.mxu1 %v12337_v62  ;;  %v12382_v62 = vld [vmem:[%s15770_s5 + $0x2c0] ss:$8 sps:$4 sm:$0xff]  }
 0xf6a   :  { %4395 = vmatprep.subr.bf16.mxu1 %v12342_v55  ;;  %v12387_v55 = vld [vmem:[%s15770_s5 + $0x2d4] ss:$8 sps:$4 sm:$0xff]  }
 0xf6d   :  { %4396 = vmatpush1.bf16.msra.mxu1 %v12340_v52  ;;  %v12385_v52 = vld [vmem:[%s15770_s5 + $0x2d0] ss:$8 sps:$4 sm:$0xff]  }
 0xf6e   :  { %4397 = vmatprep.subr.bf16.mxu1 %v12345_v0  ;;  %v12390_v0 = vld [vmem:[%s15770_s5 + $0x2e4] ss:$8 sps:$4 sm:$0xff]  }
 0xf71   :  { %4398 = vmatpush1.bf16.msra.mxu1 %v12343_v42  ;;  %v12388_v42 = vld [vmem:[%s15770_s5 + $0x2e0] ss:$8 sps:$4 sm:$0xff]  }
 0xf72   :  { %4648 = vmatprep.subr.bf16.mxu1 %v12348_v38  ;;  %v3843_v38 = vsel %vm15792_vm9, %v14898_v32, 0  ;;  %vm15799_vm9 = vsmask.f32 7424 }
 0xf74   :  { %4400 = vmatmul.mubr.bf16.vlgmr.msra.gmra.mrb[64].mxu1 %v10180_v59  ;;  %v12358_v59 = vld [vmem:[%s15770_s5 + $0x240] ss:$8 sps:$4 sm:$0xff]  }
 0xf75   :  { %4409 = vmatprep.mubr.bf16.mxu1 %v10183_v3  ;;  %4649 = vmatpush1.bf16.msra.mxu1 %v12346_v44  ;;  %v12363_v3 = vld [vmem:[%s15770_s5 + $0x254] ss:$8 sps:$4 sm:$0xff]  }
 0xf76   :  { %4650 = vmatprep.subr.bf16.mxu1 %v12351_v16  ;;  %v12393_v44 = vld [vmem:[%s15770_s5 + $0x2f4] ss:$8 sps:$4 sm:$0xff]   ;;  %v10253_v16 = vcombine.high %v3843_v38, %v3843_v38 }
 0xf79   :  { %4651 = vmatpush1.bf16.msra.mxu1 %v12349_v18  ;;  %v12391_v18 = vld [vmem:[%s15770_s5 + $0x2f0] ss:$8 sps:$4 sm:$0xff]  }
 0xf7a   :  { %4652 = vmatprep.subr.bf16.mxu1 %v12354_v60  ;;  %v4482_v60 = vrot.slane %v10253_v16, 1 }
 0xf7c   :  { %4410 = vmatmul.mubr.bf16.gmra.mrb[68].mxu1 %v10182_v13  ;;  %v12369_v13 = vld [vmem:[%s15770_s5 + $0x274] ss:$8 sps:$4 sm:$0xff]  }
 0xf7d   :  { %4653 = vmatpush1.bf16.msra.mxu1 %v12352_v21  ;;  %4680 = vmatprep.mubr.bf16.mxu1 %v14889_v48  ;;  %v12367_v48 = vld [vmem:[%s15770_s5 + $0x270] ss:$8 sps:$4 sm:$0xff]   ;;  %v15793_v21 = vmov 0.0  }
 0xf7e   :  { %4654 = vmatprep.subr.bf16.mxu1 %v12357_v36  ;;  %v10252_v36 = vcombine.low %v3843_v38, %v3843_v38 }
 0xf81   :  { %4655 = vmatpush1.bf16.msra.mxu1 %v12355_v41  ;;  %v4483_v41 = vsel %vm15787_vm13, %v14884_v6, %v4482_v60  ;;  %vm15800_vm13 = vcmp.ne.s16.totalorder %v14479_v37, 0 }
 0xf82   :  { %4656 = vmatprep.subr.bf16.mxu1 %v12360_v51  ;;  %v4480_v51 = vrot.slane %v10252_v36, 1 }
 0xf84   :  { %v4481_v32 = vsel %vm15794_vm1, %v14882_v29, %v4480_v51  ;;  %v12394_v51 = vld [vmem:[#allocation26] sm:$0xff]   ;;  %vm15801_vm1 = vcmp.ne.s16.totalorder %v14475_v33, 0 }
 0xf85   :  { %4657 = vmatpush1.bf16.msra.mxu1 %v12358_v59  ;;  %v4709_v59 = vld [vmem:[#allocation36] sm:$0x3] }
 0xf86   :  { %4658 = vmatprep.subr.bf16.mxu1 %v12363_v3  ;;  %v4714_v3 = vrot.slane %v4709_v59, %v14417_v9 }
 0xf89   :  { %4659 = vmatpush1.bf16.msra.mxu1 %v12361_v45  ;;  %v4718_v45 = vrot.slane %v4709_v59, %v14421_v12  ;;  %v12396_v59 = vld [vmem:[#allocation23 + $0x40] sm:$0xff]  }
 0xf8a   :  { %4660 = vmatprep.subr.bf16.mxu1 %v12366_v40 }
 0xf8d   :  { %4661 = vmatpush1.bf16.msra.mxu1 %v12364_v61 }
 0xf8e   :  { %4662 = vmatprep.subr.bf16.mxu1 %v12369_v13 }
 0xf91   :  { %4663 = vmatpush1.bf16.msra.mxu1 %v12367_v48 }
 0xf92   :  { %4664 = vmatprep.subr.bf16.mxu1 %v12372_v19 }
 0xf95   :  { %4665 = vmatpush1.bf16.msra.mxu1 %v12370_v22 }
 0xf96   :  { %4666 = vmatprep.subr.bf16.mxu1 %v12375_v30 }
 0xf99   :  { %4667 = vmatpush1.bf16.msra.mxu1 %v12373_v14 }
 0xf9a   :  { %4668 = vmatprep.subr.bf16.mxu1 %v12378_v26 }
 0xf9d   :  { %4669 = vmatpush1.bf16.msra.mxu1 %v12376_v27 }
 0xf9e   :  { %4670 = vmatprep.subr.bf16.mxu1 %v12381_v47 }
 0xfa1   :  { %4671 = vmatpush1.bf16.msra.mxu1 %v12379_v54 }
 0xfa2   :  { %4672 = vmatprep.subr.bf16.mxu1 %v12384_v28 }
 0xfa5   :  { %4673 = vmatpush1.bf16.msra.mxu1 %v12382_v62 }
 0xfa6   :  { %4674 = vmatprep.subr.bf16.mxu1 %v12387_v55 }
 0xfa9   :  { %4675 = vmatpush1.bf16.msra.mxu1 %v12385_v52 }
 0xfaa   :  { %4676 = vmatprep.subr.bf16.mxu1 %v12390_v0 }
 0xfad   :  { %4677 = vmatpush1.bf16.msra.mxu1 %v12388_v42 }
 0xfae   :  { %4678 = vmatprep.subr.bf16.mxu1 %v12393_v44 }
 0xfb1   :  { %4679 = vmatpush1.bf16.msra.mxu1 %v12391_v18 }
 0xfb2   :  { %11584 = vmatprep.subr.bf16.mxu1 %v15793_v21 }
 0xfb4   :  { %4681 = vmatmul.mubr.bf16.vlgmr.msra.gmra.mrb[64].mxu1 %v14893_v49 }
 0xfb5   :  { %4690 = vmatprep.mubr.bf16.mxu1 %v4483_v41 }
 0xfbc   :  { %4691 = vmatmul.mubr.bf16.gmra.mrb[68].mxu1 %v4481_v32  ;;  %v15796_v32 = vmov 0  }
 0xfbd   :  { %11600 = vmatprep.mubr.msk.bf16.mxu1 %vm15736_vm5, %v15793_v21 }
0x1087   :  { %v4682_v40 = vpop.f32.mrb[64].mxu1 }
0x1088   :  { %v4721_v61 = vadd.f32 %v4714_v3, %v4682_v40  ;;  %v4684_v49 = vpop.f32.mrb[65].mxu1  ;;  %v12398_v40 = vld [vmem:[#allocation23 + $0x48] sm:$0xff]  }
0x1089   :  { %v4722_v13 = vadd.f32 %v4718_v45, %v4684_v49  ;;  %v4686_v48 = vpop.f32.mrb[66].mxu1  ;;  %v12400_v49 = vld [vmem:[#allocation23 + $0x50] sm:$0xff]  }
0x108a   :  { %v4723_v6 = vadd.f32 %v4714_v3, %v4686_v48  ;;  %v4688_v19 = vpop.f32.mrb[67].mxu1  ;;  %v4729_v30 = vmax.f32 %v4721_v61, 0.0  ;;  %v12399_v61 = vld [vmem:[#allocation23 + $0x8] sm:$0xff]   ;;  %v12402_v48 = vld [vmem:[#allocation23 + $0x58] sm:$0xff]  }
0x108b   :  { %v4724_v22 = vadd.f32 %v4718_v45, %v4688_v19  ;;  %v4730_v29 = vmax.f32 %v4722_v13, 0.0  ;;  %v12401_v13 = vld [vmem:[#allocation23 + $0x10] sm:$0xff]   ;;  %v12404_v19 = vld [vmem:[#allocation23 + $0x60] sm:$0xff]  }
0x108c   :  { %v4731_v14 = vmax.f32 %v4723_v6, 0.0  ;;  %v12403_v6 = vld [vmem:[#allocation23 + $0x18] sm:$0xff]  }
0x108d   :  { %v4732_v26 = vmax.f32 %v4724_v22, 0.0  ;;  %v12405_v22 = vld [vmem:[#allocation23 + $0x20] sm:$0xff]  }
0x108e   :  { %v14998_v27 = vpack.c.bf16 %v4731_v14, %v4729_v30  ;;  %v12406_v30 = vld [vmem:[#allocation23 + $0x68] sm:$0xff]  }
0x108f   :  { %v15000_v47 = vpack.c.bf16 %v4732_v26, %v4730_v29  ;;  %v4692_v54 = vpop.f32.mrb[68].mxu1  ;;  %v12407_v14 = vld [vmem:[#allocation23 + $0x28] sm:$0xff]   ;;  %v12408_v29 = vld [vmem:[#allocation23 + $0x70] sm:$0xff]  }
0x1090   :  { %v4725_v28 = vadd.f32 %v4714_v3, %v4692_v54  ;;  %v4694_v62 = vpop.f32.mrb[69].mxu1  ;;  %v12409_v26 = vld [vmem:[#allocation23 + $0x30] sm:$0xff]   ;;  %v12410_v54 = vld [vmem:[#allocation23 + $0x78] sm:$0xff]  }
0x1091   :  { %v4726_v55 = vadd.f32 %v4718_v45, %v4694_v62  ;;  %v4696_v52 = vpop.f32.mrb[70].mxu1  ;;  %4817 = vmatprep.subr.bf16.mxu0 %v15000_v47  ;;  %v12412_v62 = vld [vmem:[#allocation24 + $0x40] sm:$0xff]  }
0x1092   :  { %v4727_v0 = vadd.f32 %v4714_v3, %v4696_v52  ;;  %v4698_v42 = vpop.f32.mrb[71].mxu1  ;;  %4818 = vmatpush1.bf16.msra.mxu0 %v14998_v27  ;;  %v4733_v44 = vmax.f32 %v4725_v28, 0.0  ;;  %v12395_v3 = vld [vmem:[#allocation27] sm:$0xff]   ;;  %v12411_v28 = vld [vmem:[#allocation23 + $0x38] sm:$0xff]  }
0x1093   :  { %v4728_v38 = vadd.f32 %v4718_v45, %v4698_v42  ;;  %v4734_v18 = vmax.f32 %v4726_v55, 0.0  ;;  %v12397_v45 = vld [vmem:[#allocation23] sm:$0xff]  }
0x1094   :  { %v4735_v16 = vmax.f32 %v4727_v0, 0.0 }
0x1095   :  { %v4736_v60 = vmax.f32 %v4728_v38, 0.0 }
0x1096   :  { %v15004_v36 = vpack.c.bf16 %v4735_v16, %v4733_v44 }
0x1097   :  { %v15006_v41 = vpack.c.bf16 %v4736_v60, %v4734_v18 }
0x1099   :  { %4819 = vmatprep.subr.bf16.mxu0 %v15006_v41 }
0x109a   :  { %4820 = vmatpush1.bf16.msra.mxu0 %v15004_v36 }
0x109b   :  { %4868 = vmatprep.subr.bf16.mxu0 %v15000_v47 }
0x109d   :  { %10287 = vmatmul.mubr.msk.bf16.vlgmr.msra.gmra.mrb[44].mxu0 %vm15795_vm6, %v12394_v51  ;;  %vm15803_vm6 = vcmask 1046528  }
0x109e   :  { %4869 = vmatpush1.bf16.msra.mxu0 %v14998_v27  ;;  %4900 = vmatprep.mubr.bf16.mxu0 %v15796_v32 }
0x109f   :  { %4870 = vmatprep.subr.bf16.mxu0 %v15006_v41 }
0x10a2   :  { %4871 = vmatpush1.bf16.msra.mxu0 %v15004_v36 }
0x10a3   :  { %10914 = vmatprep.subr.bf16.mxu0 %v12396_v59 }
0x10a5   :  { %10289 = vmatmul.mubr.msk.bf16.vlgmr.msra.gmra.mrb[48].mxu0 %vm15797_vm8, %v12395_v3  ;;  %vm15805_vm8 = vcmask 130048  }
0x10a6   :  { %10915 = vmatpush3.bf16.msra.mxu0 %v12397_v45 }
0x10a7   :  { %10916 = vmatprep.subr.bf16.mxu0 %v12398_v40 }
0x10aa   :  { %10917 = vmatpush3.bf16.msra.mxu0 %v12399_v61  ;;  %v12413_v61 = vld [vmem:[#allocation24] sm:$0xff]  }
0x10ab   :  { %10918 = vmatprep.subr.bf16.mxu0 %v12400_v49  ;;  %v12414_v49 = vld [vmem:[#allocation24 + $0x48] sm:$0xff]  }
0x10ae   :  { %10919 = vmatpush3.bf16.msra.mxu0 %v12401_v13  ;;  %v12415_v13 = vld [vmem:[#allocation24 + $0x8] sm:$0xff]  }
0x10af   :  { %10920 = vmatprep.subr.bf16.mxu0 %v12402_v48  ;;  %v12416_v48 = vld [vmem:[#allocation24 + $0x50] sm:$0xff]  }
0x10b2   :  { %10921 = vmatpush3.bf16.msra.mxu0 %v12403_v6  ;;  %v12417_v6 = vld [vmem:[#allocation24 + $0x10] sm:$0xff]  }
0x10b3   :  { %10922 = vmatprep.subr.bf16.mxu0 %v12404_v19  ;;  %v12418_v19 = vld [vmem:[#allocation24 + $0x58] sm:$0xff]  }
0x10b6   :  { %10923 = vmatpush3.bf16.msra.mxu0 %v12405_v22  ;;  %v12419_v22 = vld [vmem:[#allocation24 + $0x18] sm:$0xff]  }
0x10b7   :  { %10924 = vmatprep.subr.bf16.mxu0 %v12406_v30  ;;  %v12420_v30 = vld [vmem:[#allocation24 + $0x60] sm:$0xff]  }
0x10ba   :  { %10925 = vmatpush3.bf16.msra.mxu0 %v12407_v14  ;;  %v12421_v14 = vld [vmem:[#allocation24 + $0x20] sm:$0xff]  }
0x10bb   :  { %10926 = vmatprep.subr.bf16.mxu0 %v12408_v29  ;;  %v12422_v29 = vld [vmem:[#allocation24 + $0x68] sm:$0xff]  }
0x10be   :  { %10927 = vmatpush3.bf16.msra.mxu0 %v12409_v26  ;;  %v12423_v26 = vld [vmem:[#allocation24 + $0x28] sm:$0xff]  }
0x10bf   :  { %10928 = vmatprep.subr.bf16.mxu0 %v12410_v54  ;;  %v12424_v54 = vld [vmem:[#allocation24 + $0x70] sm:$0xff]  }
0x10c2   :  { %10929 = vmatpush3.bf16.msra.mxu0 %v12411_v28  ;;  %v12425_v28 = vld [vmem:[#allocation24 + $0x30] sm:$0xff]  }
0x10c3   :  { %10936 = vmatprep.subr.bf16.mxu0 %v12412_v62  ;;  %v12426_v62 = vld [vmem:[#allocation24 + $0x78] sm:$0xff]  }
0x1170   :  { %v4851_v55 = vpop.f32.mrb[44].mxu0 }
0x1171   :  { %v4853_v52 = vpop.f32.mrb[45].mxu0 }
0x1172   :  { %v4855_v0 = vpop.f32.mrb[46].mxu0 }
0x1173   :  { %v4857_v42 = vpop.f32.mrb[47].mxu0 }
0x1178   :  { %v4902_v38 = vpop.f32.mrb[48].mxu0 }
0x1179   :  { %v4911_v44 = vmax.f32 %v4851_v55, %v4902_v38  ;;  %v4904_v16 = vpop.f32.mrb[49].mxu0  ;;  %v12427_v55 = vld [vmem:[#allocation24 + $0x38] sm:$0xff]  }
0x117a   :  { %v4912_v18 = vmax.f32 %v4853_v52, %v4904_v16  ;;  %v4906_v60 = vpop.f32.mrb[50].mxu0  ;;  %v12428_v52 = vld [vmem:[%s15798_s0 + $0x40] sm:$0xff]   ;;  %v12431_v38 = vld [vmem:[%s15798_s0 + $0x58] sm:$0xff]   ;;  %v12433_v16 = vld [vmem:[%s15798_s0 + $0x68] sm:$0xff]  }
0x117b   :  { %v4913_v51 = vmax.f32 %v4855_v0, %v4906_v60  ;;  %v4908_v59 = vpop.f32.mrb[51].mxu0  ;;  %v12429_v0 = vld [vmem:[%s15798_s0 + $0x48] sm:$0xff]   ;;  %v12435_v60 = vld [vmem:[%s15798_s0 + $0x78] sm:$0xff]  }
0x117c   :  { %v4914_v3 = vmax.f32 %v4857_v42, %v4908_v59  ;;  %v12430_v42 = vld [vmem:[%s15798_s0 + $0x50] sm:$0xff]  }
0x117d   :  { %v4915_v45 = vpack.c.bf16 %v4913_v51, %v4911_v44  ;;  %v12432_v44 = vld [vmem:[%s15798_s0 + $0x60] sm:$0xff]  }
0x117e   :  { %v4916_v40 = vpack.c.bf16 %v4914_v3, %v4912_v18  ;;  %v12434_v18 = vld [vmem:[%s15798_s0 + $0x70] sm:$0xff]  }
0x1180   :  { %5045 = vmatprep.mubr.bf16.mxu0 %v4916_v40 }
0x1181   :  { %5046 = vmatmul.mubr.bf16.vlgmr.msra.gmra.mrb[52].mxu0 %v4915_v45 }
0x1182   :  { %10937 = vmatpush3.bf16.msra.mxu0 %v12413_v61  ;;  %5182 = vmatprep.mubr.bf16.mxu0 %v4916_v40 }
0x1183   :  { %10938 = vmatprep.subr.bf16.mxu0 %v12414_v49 }
0x1186   :  { %10939 = vmatpush3.bf16.msra.mxu0 %v12415_v13 }
0x1187   :  { %10940 = vmatprep.subr.bf16.mxu0 %v12416_v48 }
0x118a   :  { %10941 = vmatpush3.bf16.msra.mxu0 %v12417_v6 }
0x118b   :  { %10942 = vmatprep.subr.bf16.mxu0 %v12418_v19  ;;  %v5206_v19 = vstv %s10323_s4 }
0x118e   :  { %10943 = vmatpush3.bf16.msra.mxu0 %v12419_v22 }
0x118f   :  { %10944 = vmatprep.subr.bf16.mxu0 %v12420_v30 }
0x1192   :  { %10945 = vmatpush3.bf16.msra.mxu0 %v12421_v14 }
0x1193   :  { %10946 = vmatprep.subr.bf16.mxu0 %v12422_v29 }
0x1196   :  { %10947 = vmatpush3.bf16.msra.mxu0 %v12423_v26 }
0x1197   :  { %10948 = vmatprep.subr.bf16.mxu0 %v12424_v54 }
0x119a   :  { %10949 = vmatpush3.bf16.msra.mxu0 %v12425_v28 }
0x119b   :  { %10950 = vmatprep.subr.bf16.mxu0 %v12426_v62 }
0x119e   :  { %10951 = vmatpush3.bf16.msra.mxu0 %v12427_v55 }
0x119f   :  { %11512 = vmatprep.subr.bf16.mxu0 %v15793_v21 }
0x11a1   :  { %5183 = vmatmul.mubr.bf16.vlgmr.msra.gmra.mrb[56].mxu0 %v4915_v45 }
0x11a2   :  { %11528 = vmatprep.mubr.msk.bf16.mxu0 %vm15736_vm5, %v15793_v21  ;;  %11513 = vmatpush3.bf16.msra.mxu0 %v12428_v52 }
0x11a3   :  { %11514 = vmatprep.subr.bf16.mxu0 %v15793_v21 }
0x11a6   :  { %11515 = vmatpush3.bf16.msra.mxu0 %v12429_v0 }
0x11a7   :  { %11516 = vmatprep.subr.bf16.mxu0 %v15793_v21 }
0x11aa   :  { %11517 = vmatpush3.bf16.msra.mxu0 %v12430_v42 }
0x11ab   :  { %11518 = vmatprep.subr.bf16.mxu0 %v15793_v21 }
0x11ae   :  { %11519 = vmatpush3.bf16.msra.mxu0 %v12431_v38 }
0x11af   :  { %11520 = vmatprep.subr.bf16.mxu0 %v15793_v21 }
0x11b2   :  { %11521 = vmatpush3.bf16.msra.mxu0 %v12432_v44 }
0x11b3   :  { %11522 = vmatprep.subr.bf16.mxu0 %v15793_v21 }
0x11b6   :  { %11523 = vmatpush3.bf16.msra.mxu0 %v12433_v16 }
0x11b7   :  { %11524 = vmatprep.subr.bf16.mxu0 %v15793_v21 }
0x11ba   :  { %11525 = vmatpush3.bf16.msra.mxu0 %v12434_v18 }
0x11bb   :  { %11526 = vmatprep.subr.bf16.mxu0 %v15793_v21 }
0x11be   :  { %11527 = vmatpush3.bf16.msra.mxu0 %v12435_v60 }
0x11bf   :  { %11532 = vmatprep.subr.bf16.mxu0 %v15793_v21 }
0x1254   :  { %v10930_v51 = vpop.f32.mrb[52].mxu0 }
0x1255   :  { %v10931_v59 = vpop.f32.mrb[53].mxu0 }
0x1256   :  { %v10932_v3 = vadd.f32 %v10931_v59, %v10930_v51  ;;  %v10933_v45 = vpop.f32.mrb[54].mxu0  ;;  %v5243_v51 = vld [vmem:[#allocation6] sm:$0xf] }
0x1257   :  { %v10934_v40 = vpop.f32.mrb[55].mxu0 }
0x1258   :  { %v10935_v61 = vadd.f32 %v10934_v40, %v10933_v45 }
0x1274   :  { %v10952_v49 = vpop.f32.mrb[56].mxu0 }
0x1275   :  { %v10953_v13 = vpop.f32.mrb[57].mxu0 }
0x1276   :  { %v10954_v48 = vadd.f32 %v10953_v13, %v10952_v49  ;;  %v10955_v6 = vpop.f32.mrb[58].mxu0 }
0x1277   :  { %v10956_v22 = vpop.f32.mrb[59].mxu0 }
0x1278   :  { %v5191_v30 = vmax.f32 %v10932_v3, %v10954_v48  ;;  %v10957_v14 = vadd.f32 %v10956_v22, %v10955_v6 }
0x127a   :  { %v5207_v29 = vmul.f32 %v5206_v19, %v5191_v30  ;;  %v5192_v26 = vmax.f32 %v10935_v61, %v10957_v14 }
0x127c   :  { %v5209_v54 = vadd.f32 %v5207_v29, %v14766_v5  ;;  %v5208_v28 = vmul.f32 %v5206_v19, %v5192_v26  ;;  %v5247_v5 = vld [vmem:[#allocation6 + $0x8] sm:$0x1] }
0x127e   :  { %v10756_v62 = vpack.c.bf16 %v5209_v54, %v5209_v54  ;;  %v5210_v55 = vadd.f32 %v5208_v28, %v14768_v8 }
0x1280   :  { %v5224_v52 = vshrl.u32 %v10756_v62, 16  ;;  %v10757_v0 = vpack.c.bf16 %v5210_v55, %v5210_v55  ;;  %v5227_v38 = vshll.u32 %v10756_v62, 16 }
0x1282   :  { %v5226_v42 = vrot.slane %v5224_v52, 7  ;;  %v5232_v44 = vshrl.u32 %v10757_v0, 16  ;;  %v5235_v60 = vshll.u32 %v10757_v0, 16  ;;  %v12438_v0 = vld [vmem:[%s15798_s0] sm:$0xff]  }
0x1284   :  { %v5229_v16 = vor.u32 %v5227_v38, %v5226_v42  ;;  %v5234_v18 = vrot.slane %v5232_v44, 7  ;;  %v5230_v59 = vrot.slane %v5226_v42, 4  ;;  %v12439_v38 = vld [vmem:[%s15798_s0 + $0x8] sm:$0xff]   ;;  %v12440_v44 = vld [vmem:[%s15798_s0 + $0x10] sm:$0xff]  }
0x1286   :  { %v5244_v3 = vsel %vm14717_vm3, %v5229_v16, %v5243_v51  ;;  %v5237_v45 = vor.u32 %v5235_v60, %v5234_v18  ;;  %v5239_v40 = vrot.slane %v5234_v18, 4  ;;  %v12441_v16 = vld [vmem:[%s15798_s0 + $0x18] sm:$0xff]   ;;  %v12442_v18 = vld [vmem:[%s15798_s0 + $0x20] sm:$0xff]   ;;  %v12443_v60 = vld [vmem:[%s15798_s0 + $0x28] sm:$0xff]  }
0x1287   :  { %5245 = vst [vmem:[#allocation6] sm:$0xf] %v5244_v3  ;;  %v12444_v51 = vld [vmem:[%s15798_s0 + $0x30] sm:$0xff]  }
0x1288   :  { %v5238_v8 = vsel %vm14191_vm7, %v5230_v59, %v5237_v45  ;;  %v5248_v61 = vsel %vm14264_vm12, %v5239_v40, %v5247_v5  ;;  %v12445_v59 = vld [vmem:[%s15798_s0 + $0x38] sm:$0xff]   ;;  %v12446_v40 = vld [vmem:[%s15798_s0 + $0x80] sm:$0xff]  }
0x1289   :  { %5246 = vst [vmem:[#allocation6 + $0x4] sm:$0xf] %v5238_v8  ;;  %5249 = vst [vmem:[#allocation6 + $0x8] sm:$0x1] %v5248_v61  ;;  %v12447_v8 = vld [vmem:[%s15798_s0 + $0x88] sm:$0xff]   ;;  %v12448_v61 = vld [vmem:[%s15798_s0 + $0x90] sm:$0xff]  }
0x128e   :  { %v5250_v49 = vld [vmem:[#allocation6] sm:$0xf] }
0x128f   :  { %v6367_v13 = vld [vmem:[#allocation6] sm:$0x1]  ;;  %v5252_v45 = vsel %vm14458_vm0, %v5250_v49, 0 }
0x1290   :  { %v6368_v48 = vsel %vm14264_vm12, 0, %v6367_v13  ;;  %v15046_v6 = vld [vmem:[#allocation6 + $0x4] sm:$0xf]  ;;  %v15048_v19 = vld [vmem:[#allocation6 + $0x8] sm:$0x1]  ;;  %v12450_v13 = vld [vmem:[%s15798_s0 + $0xa0] sm:$0xff]  }
0x1291   :  { %6369 = vst [vmem:[#allocation6] sm:$0x1] %v6368_v48  ;;  %v6370_v22 = vld [vmem:[#allocation6 + $0x8] sm:$0x1]  ;;  %v10342_v30 = vcombine.low %v5250_v49, %v15046_v6  ;;  %v10343_v14 = vcombine.low %v15048_v19, %v15048_v19  ;;  %v5253_v3 = vsel %vm14463_vm10, %v15046_v6, 0  ;;  %v12451_v48 = vld [vmem:[%s15798_s0 + $0xa8] sm:$0xff]  }
0x1292   :  { %v6371_v29 = vsel %vm14649_vm11, 0, %v6370_v22  ;;  %v10352_v5 = vcombine.low %v5252_v45, %v5253_v3  ;;  %v12449_v49 = vld [vmem:[%s15798_s0 + $0x98] sm:$0xff]   ;;  %v5255_v22 = vld [vmem:[#allocation6] sm:$0xe] }
0x1293   :  { %6372 = vst [vmem:[#allocation6 + $0x8] sm:$0x1] %v6371_v29  ;;  %v5303_v26 = vshll.u32 %v10342_v30, 16  ;;  %v5308_v54 = vshll.u32 %v10343_v14, 16  ;;  %v5301_v28 = vshrl.u32 %v10342_v30, 16  ;;  %v5257_v30 = vsel %vm15800_vm13, %v15046_v6, 0 }
0x1294   :  { %v5258_v14 = vsel %vm15801_vm1, %v15048_v19, 0  ;;  %v12452_v29 = vld [vmem:[%s15798_s0 + $0xb0] sm:$0xff]   ;;  %vm15807_vm13 = vnez %v15702_v23  ;;  %vm15808_vm1 = vnez %v15706_v35 }
0x1295   :  { %v5305_v62 = vrot.slane %v5303_v26, 1  ;;  %v5310_v52 = vrot.slane %v5308_v54, 1  ;;  %v5256_v26 = vsel %vm14488_vm14, %v5255_v22, 0 }
0x1296   :  { %v10377_v54 = vcombine.low %v5256_v26, %v5257_v30 }
0x1297   :  { %v5306_v55 = vor.u32 %v5305_v62, %v5301_v28  ;;  %v10378_v28 = vcombine.low %v5258_v14, %v5258_v14  ;;  %v12453_v62 = vld [vmem:[%s15798_s0 + $0xb8] sm:$0xff]  }
0x1298   :  { %v5522_v6 = vrot.slane %v10377_v54, 1 }
0x1299   :  { %v5311_v42 = vsel %vm15799_vm9, %v5306_v55, %v5310_v52  ;;  %v5523_v55 = vrot.slane %v10378_v28, 1  ;;  %v12454_v52 = vld [vmem:[%s15802_s28] sm:$0xff]   ;;  %vm15806_vm9 = vmmov %vm15805_vm8 }
0x129a   :  { %11529 = vmatmul.mubr.bf16.vlgmr.msra.gmra.mrb[60].mxu0 %v5311_v42  ;;  %11585 = vmatpush3.bf16.msra.mxu1 %v12454_v52  ;;  %v12458_v42 = vld [vmem:[%s15802_s28 + $0x10] sm:$0xff]   ;;  %v12457_v52 = vld [vmem:[%s15804_s1 + $0x8] sm:$0xff]  }
0x129b   :  { %11533 = vmatpush3.bf16.msra.mxu0 %v12438_v0  ;;  %11548 = vmatprep.mubr.msk.bf16.mxu0 %vm15736_vm5, %v15793_v21  ;;  %v5524_v19 = vsel %vm15803_vm6, %v5522_v6, %v5523_v55  ;;  %v12456_v0 = vld [vmem:[%s15802_s28 + $0x8] sm:$0xff]   ;;  %v5630_v55 = vld [vmem:[#allocation30] sm:$0xf]  ;;  %vm15809_vm6 = vnez %v15748_v39 }
0x129c   :  { %11534 = vmatprep.subr.bf16.mxu0 %v15793_v21  ;;  %11586 = vmatprep.subr.bf16.mxu1 %v15793_v21  ;;  %v5629_v6 = vld [vmem:[#allocation29] sm:$0xf] }
0x129e   :  { %11587 = vmatpush3.bf16.msra.mxu1 %v12456_v0  ;;  %v12459_v0 = vld [vmem:[%s15804_s1 + $0x10] sm:$0xff]  }
0x129f   :  { %11535 = vmatpush3.bf16.msra.mxu0 %v12439_v38  ;;  %11588 = vmatprep.subr.bf16.mxu1 %v15793_v21  ;;  %v12460_v38 = vld [vmem:[%s15802_s28 + $0x18] sm:$0xff]  }
0x12a0   :  { %11536 = vmatprep.subr.bf16.mxu0 %v15793_v21 }
0x12a2   :  { %11589 = vmatpush3.bf16.msra.mxu1 %v12458_v42  ;;  %v12461_v42 = vld [vmem:[%s15804_s1 + $0x18] sm:$0xff]  }
0x12a3   :  { %11537 = vmatpush3.bf16.msra.mxu0 %v12440_v44  ;;  %11590 = vmatprep.subr.bf16.mxu1 %v15793_v21  ;;  %v12462_v44 = vld [vmem:[%s15802_s28 + $0x20] sm:$0xff]  }
0x12a4   :  { %11538 = vmatprep.subr.bf16.mxu0 %v15793_v21 }
0x12a6   :  { %11591 = vmatpush3.bf16.msra.mxu1 %v12460_v38  ;;  %v12463_v38 = vld [vmem:[%s15804_s1 + $0x20] sm:$0xff]  }
0x12a7   :  { %11539 = vmatpush3.bf16.msra.mxu0 %v12441_v16  ;;  %11592 = vmatprep.subr.bf16.mxu1 %v15793_v21 }
0x12a8   :  { %11540 = vmatprep.subr.bf16.mxu0 %v15793_v21 }
0x12aa   :  { %11593 = vmatpush3.bf16.msra.mxu1 %v12462_v44  ;;  %v12464_v44 = vld [vmem:[%s15802_s28 + $0x28] sm:$0xff]  }
0x12ab   :  { %11541 = vmatpush3.bf16.msra.mxu0 %v12442_v18  ;;  %11594 = vmatprep.subr.bf16.mxu1 %v15793_v21 }
0x12ac   :  { %11542 = vmatprep.subr.bf16.mxu0 %v15793_v21 }
0x12ae   :  { %11595 = vmatpush3.bf16.msra.mxu1 %v12464_v44  ;;  %v5930_v44 = vstv %s5928_s14 }
0x12af   :  { %11543 = vmatpush3.bf16.msra.mxu0 %v12443_v60  ;;  %11596 = vmatprep.subr.bf16.mxu1 %v15793_v21 }
0x12b0   :  { %11544 = vmatprep.subr.bf16.mxu0 %v15793_v21 }
0x12b3   :  { %11545 = vmatpush3.bf16.msra.mxu0 %v12444_v51 }
0x12b4   :  { %11546 = vmatprep.subr.bf16.mxu0 %v15793_v21 }
0x12b7   :  { %11547 = vmatpush3.bf16.msra.mxu0 %v12445_v59 }
0x12b8   :  { %11552 = vmatprep.subr.bf16.mxu0 %v15793_v21 }
0x12ba   :  { %11549 = vmatmul.mubr.bf16.vlgmr.msra.gmra.mrb[64].mxu0 %v10352_v5 }
0x12bb   :  { %11553 = vmatpush3.bf16.msra.mxu0 %v12446_v40  ;;  %11568 = vmatprep.mubr.msk.bf16.mxu0 %vm15736_vm5, %v15793_v21 }
0x12bc   :  { %11554 = vmatprep.subr.bf16.mxu0 %v15793_v21 }
0x12bf   :  { %11555 = vmatpush3.bf16.msra.mxu0 %v12447_v8 }
0x12c0   :  { %11556 = vmatprep.subr.bf16.mxu0 %v15793_v21 }
0x12c3   :  { %11557 = vmatpush3.bf16.msra.mxu0 %v12448_v61 }
0x12c4   :  { %11558 = vmatprep.subr.bf16.mxu0 %v15793_v21 }
0x12c7   :  { %11559 = vmatpush3.bf16.msra.mxu0 %v12449_v49  ;;  %v10387_v49 = vld [vmem:[#allocation32] ss:$0 sm:$0xff] }
0x12c8   :  { %11560 = vmatprep.subr.bf16.mxu0 %v15793_v21 }
0x12cb   :  { %11561 = vmatpush3.bf16.msra.mxu0 %v12450_v13 }
0x12cc   :  { %11562 = vmatprep.subr.bf16.mxu0 %v15793_v21 }
0x12cf   :  { %11563 = vmatpush3.bf16.msra.mxu0 %v12451_v48 }
0x12d0   :  { %11564 = vmatprep.subr.bf16.mxu0 %v15793_v21 }
0x12d3   :  { %11565 = vmatpush3.bf16.msra.mxu0 %v12452_v29 }
0x12d4   :  { %11566 = vmatprep.subr.bf16.mxu0 %v15793_v21 }
0x12d7   :  { %11567 = vmatpush3.bf16.msra.mxu0 %v12453_v62 }
0x12d8   :  { %11572 = vmatprep.subr.bf16.mxu0 %v15793_v21 }
0x12da   :  { %11569 = vmatmul.mubr.bf16.vlgmr.msra.gmra.mrb[68].mxu0 %v5524_v19  ;;  %v12455_v19 = vld [vmem:[%s15804_s1] sm:$0xff]  }
0x12db   :  { %11574 = vmatprep.mubr.msk.bf16.mxu0 %vm15736_vm5, %v15793_v21 }
0x136d   :  { %v5395_v16 = vpop.f32.mrb[60].mxu0 }
0x136e   :  { %v11530_v18 = vpop.f32.mrb[61].mxu0 }
0x136f   :  { %v5398_v60 = vpop.f32.mrb[62].mxu0  ;;  %v12466_v18 = vld [vmem:[%s15802_s28 + $0x30] sm:$0xff]  }
0x1370   :  { %v11531_v51 = vpop.f32.mrb[63].mxu0  ;;  %11597 = vmatpush3.bf16.msra.mxu1 %v12466_v18 }
0x1371   :  { %11598 = vmatprep.subr.bf16.mxu1 %v15793_v21  ;;  %v12468_v51 = vld [vmem:[%s15802_s28 + $0x38] sm:$0xff]  }
0x1374   :  { %11599 = vmatpush3.bf16.msra.mxu1 %v12468_v51 }
0x1375   :  { %11624 = vmatprep.subr.bf16.mxu1 %v15793_v21 }
0x138d   :  { %v5490_v59 = vpop.f32.mrb[64].mxu0 }
0x138e   :  { %v5491_v3 = vadd.f32 %v5490_v59, %v5395_v16  ;;  %v11550_v45 = vpop.f32.mrb[65].mxu0  ;;  %v12465_v16 = vld [vmem:[%s15804_s1 + $0x28] sm:$0xff]   ;;  %v12469_v59 = vld [vmem:[%s15804_s1 + $0x38] sm:$0xff]  }
0x138f   :  { %v5493_v40 = vpop.f32.mrb[66].mxu0 }
0x1390   :  { %v5494_v5 = vadd.f32 %v5493_v40, %v5398_v60  ;;  %v11551_v8 = vpop.f32.mrb[67].mxu0  ;;  %v12467_v60 = vld [vmem:[%s15804_s1 + $0x30] sm:$0xff]  }
0x13ad   :  { %v5608_v61 = vpop.f32.mrb[68].mxu0 }
0x13ae   :  { %v5615_v13 = vadd.f32 %v5608_v61, %v5491_v3  ;;  %v11570_v48 = vpop.f32.mrb[69].mxu0 }
0x13af   :  { %v5611_v22 = vpop.f32.mrb[70].mxu0 }
0x13b0   :  { %v5624_v30 = vadd.f32 %v10387_v49, %v5615_v13  ;;  %v5616_v14 = vadd.f32 %v5611_v22, %v5494_v5  ;;  %v11571_v29 = vpop.f32.mrb[71].mxu0 }
0x13b2   :  { %v5625_v26 = vadd.f32 %v10387_v49, %v5616_v14  ;;  %v5626_v54 = vmax.f32 %v5624_v30, 0.0  ;;  %v5937_v30 = vld [vmem:[#allocation7] sm:$0x1]  ;;  %v5940_v14 = vld [vmem:[#allocation7 + $0x4] sm:$0x1] }
0x13b3   :  { %v5938_v29 = vsel %vm14177_vm2, 0, %v5937_v30 }
0x13b4   :  { %v5627_v28 = vmax.f32 %v5625_v26, 0.0  ;;  %v5941_v26 = vsel %vm15807_vm13, 0, %v5940_v14  ;;  %5939 = vst [vmem:[#allocation7] sm:$0x1] %v5938_v29 }
0x13b5   :  { %5942 = vst [vmem:[#allocation7 + $0x4] sm:$0x1] %v5941_v26 }
0x13b6   :  { %v15118_v62 = vpack.c.bf16 %v5627_v28, %v5626_v54  ;;  %v12470_v54 = vld [vmem:[#allocation35] sm:$0xff]   ;;  %v12471_v28 = vld [vmem:[#allocation35 + $0x8] sm:$0xff]  }
0x13b8   :  { %11573 = vmatpush3.bf16.msra.mxu0 %v15118_v62 }
0x13b9   :  { %11578 = vmatprep.subr.bf16.mxu0 %v15793_v21 }
0x13bb   :  { %11575 = vmatmul.mubr.msk.bf16.vlgmr.msra.gmra.mrb[72].mxu0 %vm15805_vm8, %v5629_v6  ;;  %v12472_v6 = vld [vmem:[#allocation35 + $0x20] sm:$0xff]   ;;  %vm15810_vm8 = vcmask 523264  }
0x13bc   :  { %11579 = vmatpush3.bf16.msra.mxu0 %v15118_v62  ;;  %11580 = vmatprep.mubr.msk.bf16.mxu0 %vm15736_vm5, %v15793_v21  ;;  %v5956_v29 = vld [vmem:[#allocation7] sm:$0xf] }
0x13bd   :  { %11604 = vmatprep.subr.bf16.mxu0 %v15793_v21 }
0x13c3   :  { %11581 = vmatmul.mubr.msk.bf16.vlgmr.msra.gmra.mrb[76].mxu0 %vm15806_vm9, %v5630_v55  ;;  %v12473_v55 = vld [vmem:[#allocation35 + $0x10] sm:$0xff]   ;;  %vm15811_vm9 = vmmov %vm15810_vm8 }
0x13c4   :  { %11605 = vmatpush3.bf16.msra.mxu0 %v12455_v19  ;;  %11620 = vmatprep.mubr.msk.bf16.mxu0 %vm15736_vm5, %v15793_v21  ;;  %v12474_v19 = vld [vmem:[#allocation35 + $0x28] sm:$0xff]  }
0x13c5   :  { %11606 = vmatprep.subr.bf16.mxu0 %v15793_v21 }
0x13c8   :  { %11607 = vmatpush3.bf16.msra.mxu0 %v12457_v52  ;;  %v12475_v52 = vld [vmem:[#allocation35 + $0x18] sm:$0xff]  }
0x13c9   :  { %11608 = vmatprep.subr.bf16.mxu0 %v15793_v21 }
0x13cc   :  { %11609 = vmatpush3.bf16.msra.mxu0 %v12459_v0  ;;  %v12476_v0 = vld [vmem:[#allocation35 + $0x30] sm:$0xff]  }
0x13cd   :  { %11610 = vmatprep.subr.bf16.mxu0 %v15793_v21 }
0x13d0   :  { %11611 = vmatpush3.bf16.msra.mxu0 %v12461_v42  ;;  %v12478_v42 = vld [vmem:[#allocation35 + $0x38] sm:$0xff]  }
0x13d1   :  { %11612 = vmatprep.subr.bf16.mxu0 %v15793_v21 }
0x13d4   :  { %11613 = vmatpush3.bf16.msra.mxu0 %v12463_v38  ;;  %v5929_v38 = vunpack.c.l.bf16 %v14641_v7  ;;  %v5959_v7 = vld [vmem:[#allocation7 + $0x4] sm:$0x1] }
0x13d5   :  { %11614 = vmatprep.subr.bf16.mxu0 %v15793_v21 }
0x13d8   :  { %11615 = vmatpush3.bf16.msra.mxu0 %v12465_v16 }
0x13d9   :  { %11616 = vmatprep.subr.bf16.mxu0 %v15793_v21 }
0x13dc   :  { %11617 = vmatpush3.bf16.msra.mxu0 %v12467_v60  ;;  %v5933_v60 = vstv %s10406_s2 }
0x13dd   :  { %11618 = vmatprep.subr.bf16.mxu0 %v15793_v21 }
0x13e0   :  { %11619 = vmatpush3.bf16.msra.mxu0 %v12469_v59 }
0x13e1   :  { %11636 = vmatprep.subr.bf16.mxu0 %v15793_v21 }
0x148e   :  { %v5700_v3 = vpop.f32.mrb[72].mxu0 }
0x148f   :  { %v11576_v45 = vpop.f32.mrb[73].mxu0 }
0x1490   :  { %v5703_v40 = vpop.f32.mrb[74].mxu0 }
0x1491   :  { %v11577_v5 = vpop.f32.mrb[75].mxu0 }
0x1492   :  { %v5931_v5 = vmul.f32 %v5930_v44, %v5929_v38 }
0x1496   :  { %v5743_v8 = vpop.f32.mrb[76].mxu0 }
0x1497   :  { %v5749_v61 = vmax.f32 %v5700_v3, %v5743_v8  ;;  %v11582_v49 = vpop.f32.mrb[77].mxu0 }
0x1498   :  { %v5746_v13 = vpop.f32.mrb[78].mxu0 }
0x1499   :  { %v5750_v48 = vpack.c.bf16 %v5749_v61, %v5749_v61  ;;  %v11583_v22 = vpop.f32.mrb[79].mxu0 }
0x149b   :  { %11601 = vmatmul.mubr.bf16.vlgmr.msra.gmra.mrb[72].mxu1 %v5750_v48  ;;  %11621 = vmatmul.mubr.bf16.vlgmr.msra.gmra.mrb[80].mxu0 %v5750_v48 }
0x149c   :  { %11644 = vmatprep.mubr.msk.bf16.mxu0 %vm15736_vm5, %v15793_v21  ;;  %11632 = vmatprep.mubr.msk.bf16.mxu1 %vm15736_vm5, %v15793_v21 }
0x149d   :  { %11637 = vmatpush3.bf16.msra.mxu0 %v12470_v54  ;;  %11625 = vmatpush3.bf16.msra.mxu1 %v12472_v6 }
0x149e   :  { %11638 = vmatprep.subr.bf16.mxu0 %v15793_v21  ;;  %11626 = vmatprep.subr.bf16.mxu1 %v15793_v21 }
0x14a1   :  { %11639 = vmatpush3.bf16.msra.mxu0 %v12471_v28  ;;  %11627 = vmatpush3.bf16.msra.mxu1 %v12474_v19 }
0x14a2   :  { %11640 = vmatprep.subr.bf16.mxu0 %v15793_v21  ;;  %11628 = vmatprep.subr.bf16.mxu1 %v15793_v21 }
0x14a5   :  { %11641 = vmatpush3.bf16.msra.mxu0 %v12473_v55  ;;  %11629 = vmatpush3.bf16.msra.mxu1 %v12476_v0 }
0x14a6   :  { %11642 = vmatprep.subr.bf16.mxu0 %v15793_v21  ;;  %11630 = vmatprep.subr.bf16.mxu1 %v15793_v21 }
0x14a9   :  { %11643 = vmatpush3.bf16.msra.mxu0 %v12475_v52  ;;  %11631 = vmatpush3.bf16.msra.mxu1 %v12478_v42 }
0x14aa   :  { %11660 = vmatprep.subr.bf16.mxu0 %v15793_v21  ;;  %11648 = vmatprep.subr.bf16.mxu1 %v15793_v21 }
0x156e   :  { %v5833_v16 = vpop.f32.mrb[72].mxu1  ;;  %v5921_v18 = vpop.f32.mrb[80].mxu0 }
0x156f   :  { %v5927_v51 = vmax.f32 %v5833_v16, %v5921_v18  ;;  %v11602_v59 = vpop.f32.mrb[73].mxu1  ;;  %v11622_v3 = vpop.f32.mrb[81].mxu0 }
0x1570   :  { %v5836_v45 = vpop.f32.mrb[74].mxu1  ;;  %v5924_v40 = vpop.f32.mrb[82].mxu0  ;;  %v12479_v59 = vld [vmem:[#allocation35 + $0x40] sm:$0xff]  }
0x1571   :  { %v5934_v8 = vmul.f32 %v5933_v60, %v5927_v51  ;;  %v11603_v61 = vpop.f32.mrb[75].mxu1  ;;  %v11623_v49 = vpop.f32.mrb[83].mxu0  ;;  %v12480_v45 = vld [vmem:[#allocation35 + $0x48] sm:$0xff]   ;;  %v12481_v40 = vld [vmem:[#allocation35 + $0x50] sm:$0xff]  }
0x1572   :  { %v12482_v61 = vld [vmem:[#allocation35 + $0x58] sm:$0xff]  }
0x1573   :  { %v5935_v13 = vadd.f32 %v5934_v8, %v5931_v5 }
0x1575   :  { %v10758_v48 = vpack.c.bf16 %v5935_v13, %v5935_v13 }
0x1577   :  { %v5947_v22 = vshrl.u32 %v10758_v48, 16  ;;  %v5950_v14 = vshll.u32 %v10758_v48, 16  ;;  %v12483_v48 = vld [vmem:[#allocation51] sm:$0xff]  }
0x1579   :  { %v5949_v30 = vrot.slane %v5947_v22, 7  ;;  %v12484_v22 = vld [vmem:[#allocation51 + $0x8] sm:$0xff]  }
0x157b   :  { %v5952_v26 = vor.u32 %v5950_v14, %v5949_v30  ;;  %v5953_v54 = vrot.slane %v5949_v30, 4  ;;  %v12485_v30 = vld [vmem:[#allocation51 + $0x10] sm:$0xff]   ;;  %v12486_v14 = vld [vmem:[#allocation51 + $0x18] sm:$0xff]  }
0x157d   :  { %v5957_v28 = vsel %vm15808_vm1, %v5952_v26, %v5956_v29  ;;  %v5960_v6 = vsel %vm14177_vm2, %v5953_v54, %v5959_v7 }
0x157e   :  { %5958 = vst [vmem:[#allocation7] sm:$0xf] %v5957_v28  ;;  %5961 = vst [vmem:[#allocation7 + $0x4] sm:$0x1] %v5960_v6 }
0x1585   :  { %v5962_v55 = vld [vmem:[#allocation7] sm:$0xf]  ;;  %v5964_v19 = vld [vmem:[#allocation7 + $0x4] sm:$0x1] }
0x1586   :  { %v9217_v52 = vld [vmem:[#allocation7] sm:$0x1]  ;;  %v5963_v0 = vsel %vm15809_vm6, %v5962_v55, 0  ;;  %v10408_v42 = vcombine.low %v5962_v55, %v5964_v19  ;;  %v9220_v44 = vld [vmem:[#allocation7 + $0x4] sm:$0x1] }
0x1587   :  { %v9218_v38 = vsel %vm14177_vm2, 0, %v9217_v52  ;;  %11645 = vmatmul.mubr.msk.bf16.vlgmr.msra.gmra.mrb[84].mxu0 %vm15810_vm8, %v5963_v0  ;;  %v9221_v16 = vsel %vm15807_vm13, 0, %v9220_v44  ;;  %v5965_v23 = vld [vmem:[#allocation7] sm:$0xe]  ;;  %vm15812_vm13 = vnez %v15752_v57  ;;  %vm15813_vm8 = vcmp.ne.s16.totalorder %v14598_v58, 0 }
0x1588   :  { %9219 = vst [vmem:[#allocation7] sm:$0x1] %v9218_v38  ;;  %9222 = vst [vmem:[#allocation7 + $0x4] sm:$0x1] %v9221_v16  ;;  %v5993_v18 = vshll.u32 %v10408_v42, 16  ;;  %11668 = vmatprep.mubr.msk.bf16.mxu0 %vm15736_vm5, %v15793_v21  ;;  %v5991_v60 = vshrl.u32 %v10408_v42, 16  ;;  %11661 = vmatpush3.bf16.msra.mxu0 %v12483_v48 }
0x1589   :  { %v5966_v5 = vsel %vm15812_vm13, %v5965_v23, 0  ;;  %v5967_v8 = vsel %vm15813_vm8, %v5964_v19, 0  ;;  %11662 = vmatprep.subr.bf16.mxu0 %v15793_v21  ;;  %v10425_v42 = vld [vmem:[#allocation33] ss:$0 sm:$0xff]  ;;  %vm15814_vm8 = vmmov %vm15811_vm9  ;;  %vm15816_vm13 = vcmask 64512   ;;  %v12490_v48 = vld [vmem:[#allocation48 + $0x40] sm:$0xff]  }
0x158a   :  { %v5995_v51 = vrot.slane %v5993_v18, 1  ;;  %v10419_v49 = vcombine.low %v5966_v5, %v5967_v8 }
0x158c   :  { %v5996_v3 = vor.u32 %v5995_v51, %v5991_v60  ;;  %v6145_v13 = vrot.slane %v10419_v49, 1  ;;  %11663 = vmatpush3.bf16.msra.mxu0 %v12484_v22  ;;  %v12487_v49 = vld [vmem:[%s15755_s22] sm:$0xff]   ;;  %v12491_v22 = vld [vmem:[#allocation48 + $0x10] sm:$0xff]  }
0x158d   :  { %11664 = vmatprep.subr.bf16.mxu0 %v15793_v21 }
0x158e   :  { %11633 = vmatmul.mubr.msk.bf16.vlgmr.msra.gmra.mrb[76].mxu1 %vm15811_vm9, %v5996_v3  ;;  %v12488_v3 = vld [vmem:[#allocation48] sm:$0xff]  }
0x158f   :  { %11649 = vmatpush3.bf16.msra.mxu1 %v12479_v59  ;;  %11656 = vmatprep.mubr.msk.bf16.mxu1 %vm15736_vm5, %v15793_v21 }
0x1590   :  { %11650 = vmatprep.subr.bf16.mxu1 %v15793_v21  ;;  %11665 = vmatpush3.bf16.msra.mxu0 %v12485_v30  ;;  %v12492_v30 = vld [vmem:[#allocation48 + $0x48] sm:$0xff]  }
0x1591   :  { %11666 = vmatprep.subr.bf16.mxu0 %v15793_v21 }
0x1593   :  { %11651 = vmatpush3.bf16.msra.mxu1 %v12480_v45 }
0x1594   :  { %11652 = vmatprep.subr.bf16.mxu1 %v15793_v21  ;;  %11667 = vmatpush3.bf16.msra.mxu0 %v12486_v14  ;;  %v12493_v14 = vld [vmem:[#allocation48 + $0x18] sm:$0xff]  }
0x1595   :  { %11698 = vmatprep.subr.bf16.mxu0 %v15793_v21 }
0x1597   :  { %11653 = vmatpush3.bf16.msra.mxu1 %v12481_v40 }
0x1598   :  { %11654 = vmatprep.subr.bf16.mxu1 %v15793_v21 }
0x159b   :  { %11655 = vmatpush3.bf16.msra.mxu1 %v12482_v61 }
0x159c   :  { %11672 = vmatprep.subr.bf16.mxu1 %v15793_v21 }
0x159e   :  { %11657 = vmatmul.mubr.msk.bf16.vlgmr.msra.gmra.mrb[80].mxu1 %vm15811_vm9, %v6145_v13  ;;  %vm15815_vm9 = vcmask 1043456   ;;  %v12489_v13 = vld [vmem:[#allocation48 + $0x8] sm:$0xff]  }
0x159f   :  { %11674 = vmatprep.mubr.msk.bf16.mxu1 %vm15736_vm5, %v15793_v21 }
0x165a   :  { %v6125_v29 = vpop.f32.mrb[84].mxu0 }
0x165b   :  { %v11646_v7 = vpop.f32.mrb[85].mxu0 }
0x165c   :  { %v6128_v26 = vpop.f32.mrb[86].mxu0  ;;  %v12495_v7 = vld [vmem:[#allocation48 + $0x20] sm:$0xff]  }
0x165d   :  { %v11647_v54 = vpop.f32.mrb[87].mxu0  ;;  %v12496_v26 = vld [vmem:[#allocation48 + $0x58] sm:$0xff]  }
0x165e   :  { %v12497_v54 = vld [vmem:[#allocation48 + $0x28] sm:$0xff]  }
0x1661   :  { %v6058_v28 = vpop.f32.mrb[76].mxu1 }
0x1662   :  { %v6126_v6 = vadd.f32 %v6125_v29, %v6058_v28  ;;  %v11634_v55 = vpop.f32.mrb[77].mxu1  ;;  %v12494_v29 = vld [vmem:[#allocation48 + $0x50] sm:$0xff]   ;;  %v12498_v28 = vld [vmem:[#allocation48 + $0x60] sm:$0xff]  }
0x1663   :  { %v6061_v19 = vpop.f32.mrb[78].mxu1  ;;  %v12500_v55 = vld [vmem:[#allocation48 + $0x68] sm:$0xff]  }
0x1664   :  { %v11635_v52 = vpop.f32.mrb[79].mxu1  ;;  %v12501_v19 = vld [vmem:[#allocation48 + $0x38] sm:$0xff]  }
0x1665   :  { %v12502_v52 = vld [vmem:[#allocation48 + $0x70] sm:$0xff]  }
0x1671   :  { %v6207_v0 = vpop.f32.mrb[80].mxu1 }
0x1672   :  { %v6213_v38 = vadd.f32 %v6207_v0, %v6126_v6  ;;  %v11658_v44 = vpop.f32.mrb[81].mxu1  ;;  %v12499_v6 = vld [vmem:[#allocation48 + $0x30] sm:$0xff]   ;;  %v12503_v0 = vld [vmem:[#allocation48 + $0x78] sm:$0xff]  }
0x1673   :  { %v6210_v16 = vpop.f32.mrb[82].mxu1  ;;  %v6361_v44 = vstv %s10433_s9 }
0x1674   :  { %v6221_v18 = vadd.f32 %v10425_v42, %v6213_v38  ;;  %v11659_v60 = vpop.f32.mrb[83].mxu1  ;;  %v6355_v42 = vunpack.c.l.bf16 %v15118_v62  ;;  %v6357_v38 = vstv %s6354_s29  ;;  %v6356_v16 = vunpack.c.h.bf16 %v15118_v62  ;;  %v12548_v62 = vld [vmem:[#allocation45 + $0x130] ss:$8 sps:$4 sm:$0xff]  }
0x1676   :  { %v6222_v51 = vmax.f32 %v6221_v18, 0.0  ;;  %v6358_v60 = vmul.f32 %v6357_v38, %v6355_v42 }
0x1678   :  { %v15200_v59 = vpack.c.bf16 %v6222_v51, %v6222_v51 }
0x167a   :  { %11669 = vmatmul.mubr.msk.bf16.vlgmr.msra.gmra.mrb[88].mxu0 %vm15814_vm8, %v15200_v59  ;;  %vm15819_vm8 = vcmp.ne.s16.totalorder %v14475_v33, 0 }
0x167b   :  { %11714 = vmatprep.mubr.msk.bf16.mxu0 %vm15736_vm5, %v15793_v21  ;;  %11699 = vmatpush3.bf16.msra.mxu0 %v12488_v3 }
0x167c   :  { %11700 = vmatprep.subr.bf16.mxu0 %v15793_v21 }
0x167f   :  { %11701 = vmatpush3.bf16.msra.mxu0 %v12489_v13 }
0x1680   :  { %11702 = vmatprep.subr.bf16.mxu0 %v15793_v21 }
0x1683   :  { %11703 = vmatpush3.bf16.msra.mxu0 %v12491_v22 }
0x1684   :  { %11704 = vmatprep.subr.bf16.mxu0 %v15793_v21 }
0x1687   :  { %11705 = vmatpush3.bf16.msra.mxu0 %v12493_v14 }
0x1688   :  { %11706 = vmatprep.subr.bf16.mxu0 %v15793_v21 }
0x168b   :  { %11707 = vmatpush3.bf16.msra.mxu0 %v12495_v7 }
0x168c   :  { %11708 = vmatprep.subr.bf16.mxu0 %v15793_v21 }
0x168f   :  { %11709 = vmatpush3.bf16.msra.mxu0 %v12497_v54  ;;  %v6398_v54 = vld [vmem:[#allocation6] sm:$0xf] }
0x1690   :  { %11710 = vmatprep.subr.bf16.mxu0 %v15793_v21 }
0x1693   :  { %11711 = vmatpush3.bf16.msra.mxu0 %v12499_v6 }
0x1694   :  { %11712 = vmatprep.subr.bf16.mxu0 %v15793_v21 }
0x1697   :  { %11713 = vmatpush3.bf16.msra.mxu0 %v12501_v19 }
0x174d   :  { %v6295_v45 = vpop.f32.mrb[88].mxu0 }
0x174e   :  { %v6301_v23 = vpack.c.bf16 %v6295_v45, %v6295_v45  ;;  %v11670_v40 = vpop.f32.mrb[89].mxu0 }
0x174f   :  { %v6298_v5 = vpop.f32.mrb[90].mxu0  ;;  %v6359_v40 = vmul.f32 %v6357_v38, %v6356_v16 }
0x1750   :  { %v6311_v8 = vsel %vm15815_vm9, %v6301_v23, 0  ;;  %v11671_v61 = vpop.f32.mrb[91].mxu0  ;;  %vm15820_vm9 = vcmask 1046528  }
0x1751   :  { %11673 = vmatpush3.bf16.msra.mxu1 %v6311_v8 }
0x1752   :  { %11678 = vmatprep.subr.bf16.mxu1 %v15793_v21 }
0x1754   :  { %11675 = vmatmul.mubr.msk.bf16.vlgmr.msra.gmra.mrb[84].mxu1 %vm15816_vm13, %v12487_v49  ;;  %vm15817_vm13 = vsmask.f32 7424 }
0x1755   :  { %11694 = vmatprep.mubr.msk.bf16.mxu1 %vm15736_vm5, %v15793_v21  ;;  %11679 = vmatpush3.bf16.msra.mxu1 %v12490_v48 }
0x1756   :  { %11680 = vmatprep.subr.bf16.mxu1 %v15793_v21 }
0x1759   :  { %11681 = vmatpush3.bf16.msra.mxu1 %v12492_v30 }
0x175a   :  { %11682 = vmatprep.subr.bf16.mxu1 %v15793_v21 }
0x175d   :  { %11683 = vmatpush3.bf16.msra.mxu1 %v12494_v29 }
0x175e   :  { %11684 = vmatprep.subr.bf16.mxu1 %v15793_v21 }
0x1761   :  { %11685 = vmatpush3.bf16.msra.mxu1 %v12496_v26 }
0x1762   :  { %11686 = vmatprep.subr.bf16.mxu1 %v15793_v21 }
0x1765   :  { %11687 = vmatpush3.bf16.msra.mxu1 %v12498_v28 }
0x1766   :  { %11688 = vmatprep.subr.bf16.mxu1 %v15793_v21 }
0x1769   :  { %11689 = vmatpush3.bf16.msra.mxu1 %v12500_v55 }
0x176a   :  { %11690 = vmatprep.subr.bf16.mxu1 %v15793_v21 }
0x176d   :  { %11691 = vmatpush3.bf16.msra.mxu1 %v12502_v52  ;;  %v6402_v52 = vld [vmem:[#allocation6 + $0x8] sm:$0x1] }
0x176e   :  { %11692 = vmatprep.subr.bf16.mxu1 %v15793_v21 }
0x1771   :  { %11693 = vmatpush3.bf16.msra.mxu1 %v12503_v0 }
0x1772   :  { %11718 = vmatprep.subr.bf16.mxu1 %v15793_v21 }
0x1827   :  { %v6347_v18 = vpop.f32.mrb[84].mxu1 }
0x1828   :  { %v6362_v51 = vmul.f32 %v6361_v44, %v6347_v18  ;;  %v11676_v3 = vpop.f32.mrb[85].mxu1 }
0x1829   :  { %v6350_v45 = vpop.f32.mrb[86].mxu1 }
0x182a   :  { %v6364_v23 = vadd.f32 %v6362_v51, %v6358_v60  ;;  %v6363_v5 = vmul.f32 %v6361_v44, %v6350_v45  ;;  %v11677_v8 = vpop.f32.mrb[87].mxu1 }
0x182c   :  { %v10759_v61 = vpack.c.bf16 %v6364_v23, %v6364_v23  ;;  %v6365_v49 = vadd.f32 %v6363_v5, %v6359_v40 }
0x182e   :  { %v6379_v13 = vshrl.u32 %v10759_v61, 16  ;;  %v10760_v48 = vpack.c.bf16 %v6365_v49, %v6365_v49  ;;  %v6382_v30 = vshll.u32 %v10759_v61, 16 }
0x1830   :  { %v6381_v22 = vrot.slane %v6379_v13, 7  ;;  %v6387_v14 = vshrl.u32 %v10760_v48, 16  ;;  %v6390_v26 = vshll.u32 %v10760_v48, 16 }
0x1832   :  { %v6384_v29 = vor.u32 %v6382_v30, %v6381_v22  ;;  %v6389_v7 = vrot.slane %v6387_v14, 7  ;;  %v6385_v28 = vrot.slane %v6381_v22, 4 }
0x1834   :  { %v6399_v6 = vsel %vm14717_vm3, %v6384_v29, %v6398_v54  ;;  %v6392_v55 = vor.u32 %v6390_v26, %v6389_v7  ;;  %v6394_v19 = vrot.slane %v6389_v7, 4  ;;  %v12505_v7 = vld [vmem:[#allocation48 + $0x80] sm:$0xff]   ;;  %v12506_v26 = vld [vmem:[#allocation48 + $0x88] sm:$0xff]   ;;  %v12507_v54 = vld [vmem:[#allocation48 + $0x90] sm:$0xff]  }
0x1835   :  { %6400 = vst [vmem:[#allocation6] sm:$0xf] %v6399_v6  ;;  %v12509_v6 = vld [vmem:[#allocation48 + $0xa0] sm:$0xff]  }
0x1836   :  { %v6393_v0 = vsel %vm14191_vm7, %v6385_v28, %v6392_v55  ;;  %v6403_v38 = vsel %vm14264_vm12, %v6394_v19, %v6402_v52  ;;  %v12508_v28 = vld [vmem:[#allocation48 + $0x98] sm:$0xff]   ;;  %v12510_v55 = vld [vmem:[#allocation48 + $0xa8] sm:$0xff]  }
0x1837   :  { %6401 = vst [vmem:[#allocation6 + $0x4] sm:$0xf] %v6393_v0  ;;  %6404 = vst [vmem:[#allocation6 + $0x8] sm:$0x1] %v6403_v38  ;;  %v12511_v38 = vld [vmem:[#allocation48 + $0xb0] sm:$0xff]  }
0x183c   :  { %v6405_v44 = vld [vmem:[#allocation6] sm:$0xf] }
0x183d   :  { %v8492_v18 = vld [vmem:[#allocation6] sm:$0x1]  ;;  %v6407_v60 = vsel %vm14458_vm0, %v6405_v44, 0  ;;  %v6410_v19 = vld [vmem:[#allocation6] sm:$0xe] }
0x183e   :  { %v8493_v51 = vsel %vm14264_vm12, 0, %v8492_v18  ;;  %v8495_v3 = vld [vmem:[#allocation6 + $0x8] sm:$0x1]  ;;  %v6406_v45 = vld [vmem:[#allocation6 + $0x4] sm:$0xf] }
0x183f   :  { %8494 = vst [vmem:[#allocation6] sm:$0x1] %v8493_v51  ;;  %v6409_v23 = vld [vmem:[#allocation6 + $0x8] sm:$0x1]  ;;  %v8496_v40 = vsel %vm14649_vm11, 0, %v8495_v3  ;;  %v6408_v5 = vsel %vm14463_vm10, %v6406_v45, 0  ;;  %v10436_v8 = vcombine.low %v6405_v44, %v6406_v45 }
0x1840   :  { %v10437_v61 = vcombine.low %v6409_v23, %v6409_v23  ;;  %v10446_v49 = vcombine.low %v6407_v60, %v6408_v5  ;;  %8497 = vst [vmem:[#allocation6 + $0x8] sm:$0x1] %v8496_v40  ;;  %vm15818_vm11 = vcmp.ne.s16.totalorder %v14479_v37, 0  ;;  %v6413_v0 = vsel %vm15819_vm8, %v6409_v23, 0  ;;  %v12512_v51 = vld [vmem:[#allocation48 + $0xb8] sm:$0xff]  }
0x1841   :  { %v6458_v13 = vshll.u32 %v10436_v8, 16  ;;  %v6456_v22 = vshrl.u32 %v10436_v8, 16  ;;  %v6412_v52 = vsel %vm15818_vm11, %v6406_v45, 0  ;;  %v6411_v44 = vsel %vm14488_vm14, %v6410_v19, 0  ;;  %v12513_v23 = vld [vmem:[#allocation50] ss:$8 sps:$4 sm:$0xff]  }
0x1842   :  { %v6463_v48 = vshll.u32 %v10437_v61, 16  ;;  %11715 = vmatmul.mubr.bf16.vlgmr.msra.gmra.mrb[92].mxu0 %v10446_v49  ;;  %v10455_v18 = vcombine.low %v6411_v44, %v6412_v52  ;;  %v10456_v60 = vcombine.low %v6413_v0, %v6413_v0  ;;  %v12515_v5 = vld [vmem:[#allocation50 + $0x4] ss:$8 sps:$4 sm:$0xff]   ;;  %v12518_v8 = vld [vmem:[#allocation50 + $0x14] ss:$8 sps:$4 sm:$0xff]   ;;  %vm15823_vm8 = vnez %v15779_v20 }
0x1843   :  { %v6460_v30 = vrot.slane %v6458_v13, 1  ;;  %6916 = vmatprep.mubr.bf16.mxu0 %v15796_v32  ;;  %6884 = vmatprep.subr.bf16.mxu0 %v12515_v5  ;;  %v12516_v61 = vld [vmem:[#allocation50 + $0x10] ss:$8 sps:$4 sm:$0xff]   ;;  %v12521_v49 = vld [vmem:[#allocation50 + $0x24] ss:$8 sps:$4 sm:$0xff]  }
0x1844   :  { %v6465_v29 = vrot.slane %v6463_v48, 1  ;;  %v6677_v3 = vrot.slane %v10455_v18, 1  ;;  %v6678_v40 = vrot.slane %v10456_v60, 1  ;;  %6885 = vmatpush1.bf16.msra.mxu0 %v12513_v23  ;;  %v12519_v13 = vld [vmem:[#allocation50 + $0x20] ss:$8 sps:$4 sm:$0xff]  }
0x1845   :  { %v6461_v14 = vor.u32 %v6460_v30, %v6456_v22  ;;  %6886 = vmatprep.subr.bf16.mxu0 %v12518_v8  ;;  %v12524_v48 = vld [vmem:[#allocation50 + $0x34] ss:$8 sps:$4 sm:$0xff]   ;;  %v12522_v22 = vld [vmem:[#allocation50 + $0x30] ss:$8 sps:$4 sm:$0xff]   ;;  %v12527_v30 = vld [vmem:[#allocation50 + $0x44] ss:$8 sps:$4 sm:$0xff]  }
0x1846   :  { %v6679_v45 = vsel %vm15820_vm9, %v6677_v3, %v6678_v40  ;;  %v10465_v40 = vld [vmem:[#allocation47] ss:$0 sm:$0xff]  ;;  %vm15824_vm9 = vmor %vm15823_vm8, %vm14717_vm3  ;;  %vm15827_vm8 = vcmp.ne.s16.totalorder %v14238_v56, 0 }
0x1847   :  { %v6466_v11 = vsel %vm15817_vm13, %v6461_v14, %v6465_v29  ;;  %v12525_v14 = vld [vmem:[#allocation50 + $0x40] ss:$8 sps:$4 sm:$0xff]   ;;  %v12530_v29 = vld [vmem:[#allocation50 + $0x54] ss:$8 sps:$4 sm:$0xff]   ;;  %vm15821_vm13 = vcmask 130048  }
0x1848   :  { %11695 = vmatmul.mubr.bf16.vlgmr.msra.gmra.mrb[88].mxu1 %v6466_v11  ;;  %6887 = vmatpush1.bf16.msra.mxu0 %v12516_v61  ;;  %v12533_v11 = vld [vmem:[#allocation50 + $0x64] ss:$8 sps:$4 sm:$0xff]   ;;  %vm15822_vm11 = vmmov %vm15821_vm13 }
0x1849   :  { %11719 = vmatpush3.bf16.msra.mxu1 %v12505_v7  ;;  %11734 = vmatprep.mubr.msk.bf16.mxu1 %vm15736_vm5, %v15793_v21  ;;  %v12528_v7 = vld [vmem:[#allocation50 + $0x50] ss:$8 sps:$4 sm:$0xff]  }
0x184a   :  { %11720 = vmatprep.subr.bf16.mxu1 %v15793_v21  ;;  %6888 = vmatprep.subr.bf16.mxu0 %v12521_v49 }
0x184c   :  { %6889 = vmatpush1.bf16.msra.mxu0 %v12519_v13 }
0x184d   :  { %11721 = vmatpush3.bf16.msra.mxu1 %v12506_v26  ;;  %6890 = vmatprep.subr.bf16.mxu0 %v12524_v48  ;;  %v12531_v26 = vld [vmem:[#allocation50 + $0x60] ss:$8 sps:$4 sm:$0xff]  }
0x184e   :  { %11722 = vmatprep.subr.bf16.mxu1 %v15793_v21 }
0x1850   :  { %6891 = vmatpush1.bf16.msra.mxu0 %v12522_v22 }
0x1851   :  { %11723 = vmatpush3.bf16.msra.mxu1 %v12507_v54  ;;  %6892 = vmatprep.subr.bf16.mxu0 %v12527_v30  ;;  %v12536_v54 = vld [vmem:[#allocation50 + $0x74] ss:$8 sps:$4 sm:$0xff]  }
0x1852   :  { %11724 = vmatprep.subr.bf16.mxu1 %v15793_v21 }
0x1854   :  { %6893 = vmatpush1.bf16.msra.mxu0 %v12525_v14  ;;  %v8474_v14 = vstv %s8473_s13 }
0x1855   :  { %11725 = vmatpush3.bf16.msra.mxu1 %v12508_v28  ;;  %6894 = vmatprep.subr.bf16.mxu0 %v12530_v29  ;;  %v12534_v28 = vld [vmem:[#allocation50 + $0x70] ss:$8 sps:$4 sm:$0xff]   ;;  %v8480_v29 = vstv %s10639_s10 }
0x1856   :  { %11726 = vmatprep.subr.bf16.mxu1 %v15793_v21 }
0x1858   :  { %6895 = vmatpush1.bf16.msra.mxu0 %v12528_v7 }
0x1859   :  { %11727 = vmatpush3.bf16.msra.mxu1 %v12509_v6  ;;  %6896 = vmatprep.subr.bf16.mxu0 %v12533_v11 }
0x185a   :  { %11728 = vmatprep.subr.bf16.mxu1 %v15793_v21 }
0x185c   :  { %6897 = vmatpush1.bf16.msra.mxu0 %v12531_v26  ;;  %v8475_v26 = vmul.f32 %v8474_v14, %v6355_v42  ;;  %v12550_v42 = vld [vmem:[#allocation45 + $0x134] ss:$8 sps:$4 sm:$0xff]  }
0x185d   :  { %11729 = vmatpush3.bf16.msra.mxu1 %v12510_v55  ;;  %6898 = vmatprep.subr.bf16.mxu0 %v12536_v54  ;;  %v8476_v54 = vmul.f32 %v8474_v14, %v6356_v16  ;;  %v12553_v16 = vld [vmem:[#allocation45 + $0x144] ss:$8 sps:$4 sm:$0xff]   ;;  %v12562_v14 = vld [vmem:[#allocation45 + $0x174] ss:$8 sps:$4 sm:$0xff]  }
0x185e   :  { %11730 = vmatprep.subr.bf16.mxu1 %v15793_v21 }
0x1860   :  { %6899 = vmatpush1.bf16.msra.mxu0 %v12534_v28 }
0x1861   :  { %11731 = vmatpush3.bf16.msra.mxu1 %v12511_v38 }
0x1862   :  { %11732 = vmatprep.subr.bf16.mxu1 %v15793_v21 }
0x1865   :  { %11733 = vmatpush3.bf16.msra.mxu1 %v12512_v51 }
0x1868   :  { %11735 = vmatmul.mubr.bf16.vlgmr.msra.gmra.mrb[92].mxu1 %v6679_v45 }
0x1869   :  { %6977 = vmatprep.mubr.bf16.mxu1 %v15796_v32 }
0x1915   :  { %v6645_v6 = vpop.f32.mrb[92].mxu0 }
0x1916   :  { %v11716_v55 = vpop.f32.mrb[93].mxu0 }
0x1917   :  { %v6648_v19 = vpop.f32.mrb[94].mxu0 }
0x1918   :  { %v11717_v52 = vpop.f32.mrb[95].mxu0 }
0x1919   :  { %v12539_v52 = vld [vmem:[#allocation45 + $0x100] ss:$8 sps:$4 sm:$0xff]  }
0x191b   :  { %v6550_v0 = vpop.f32.mrb[88].mxu1 }
0x191c   :  { %v6646_v38 = vadd.f32 %v6645_v6, %v6550_v0  ;;  %v11696_v44 = vpop.f32.mrb[89].mxu1  ;;  %v12541_v0 = vld [vmem:[#allocation45 + $0x104] ss:$8 sps:$4 sm:$0xff]  }
0x191d   :  { %v6553_v18 = vpop.f32.mrb[90].mxu1  ;;  %7414 = vmatprep.subr.bf16.mxu0 %v12541_v0  ;;  %v12542_v44 = vld [vmem:[#allocation45 + $0x110] ss:$8 sps:$4 sm:$0xff]  }
0x191e   :  { %v6649_v60 = vadd.f32 %v6648_v19, %v6553_v18  ;;  %v11697_v51 = vpop.f32.mrb[91].mxu1  ;;  %v12547_v18 = vld [vmem:[#allocation45 + $0x124] ss:$8 sps:$4 sm:$0xff]   ;;  %v12572_v0 = vld [vmem:[#allocation45 + $0x1b0] ss:$8 sps:$4 sm:$0xff]  }
0x191f   :  { %v12551_v51 = vld [vmem:[#allocation45 + $0x140] ss:$8 sps:$4 sm:$0xff]  }
0x193b   :  { %v6763_v3 = vpop.f32.mrb[92].mxu1 }
0x193c   :  { %v6770_v45 = vadd.f32 %v6763_v3, %v6646_v38  ;;  %v11736_v23 = vpop.f32.mrb[93].mxu1  ;;  %v12544_v38 = vld [vmem:[#allocation45 + $0x114] ss:$8 sps:$4 sm:$0xff]  }
0x193d   :  { %v6766_v5 = vpop.f32.mrb[94].mxu1  ;;  %v12556_v3 = vld [vmem:[#allocation45 + $0x154] ss:$8 sps:$4 sm:$0xff]  }
0x193e   :  { %v6779_v8 = vadd.f32 %v10465_v40, %v6770_v45  ;;  %v6771_v61 = vadd.f32 %v6766_v5, %v6649_v60  ;;  %v11737_v49 = vpop.f32.mrb[95].mxu1  ;;  %v12545_v60 = vld [vmem:[#allocation45 + $0x120] ss:$8 sps:$4 sm:$0xff]  }
0x1940   :  { %v6780_v13 = vadd.f32 %v10465_v40, %v6771_v61  ;;  %v6781_v48 = vmax.f32 %v6779_v8, 0.0  ;;  %v12554_v40 = vld [vmem:[#allocation45 + $0x150] ss:$8 sps:$4 sm:$0xff]  }
0x1942   :  { %v6782_v22 = vmax.f32 %v6780_v13, 0.0  ;;  %v12537_v13 = vld [vmem:[%s15771_s6] sm:$0xff]  }
0x1944   :  { %v6783_v30 = vpack.c.bf16 %v6782_v22, %v6781_v48  ;;  %v12538_v48 = vld [vmem:[%s15771_s6 + $0x8] sm:$0xff]  }
0x1945   :  { %v12559_v22 = vld [vmem:[#allocation45 + $0x164] ss:$8 sps:$4 sm:$0xff]  }
0x1946   :  { %v8478_v7 = vunpack.c.l.bf16 %v6783_v30  ;;  %v8479_v11 = vunpack.c.h.bf16 %v6783_v30  ;;  %6917 = vmatmul.mubr.bf16.vlgmr.msra.gmra.mrb[96].mxu0 %v6783_v30  ;;  %v12557_v30 = vld [vmem:[#allocation45 + $0x160] ss:$8 sps:$4 sm:$0xff]  }
0x1947   :  { %7415 = vmatpush1.bf16.msra.mxu0 %v12539_v52  ;;  %v12574_v52 = vld [vmem:[#allocation45 + $0x1b4] ss:$8 sps:$4 sm:$0xff]  }
0x1948   :  { %v8481_v28 = vmul.f32 %v8480_v29, %v8478_v7  ;;  %v8482_v6 = vmul.f32 %v8480_v29, %v8479_v11  ;;  %7416 = vmatprep.subr.bf16.mxu0 %v12544_v38  ;;  %v12560_v29 = vld [vmem:[#allocation45 + $0x170] ss:$8 sps:$4 sm:$0xff]   ;;  %v12565_v7 = vld [vmem:[#allocation45 + $0x184] ss:$8 sps:$4 sm:$0xff]   ;;  %v12563_v11 = vld [vmem:[#allocation45 + $0x180] ss:$8 sps:$4 sm:$0xff]  }
0x1949   :  { %v12577_v38 = vld [vmem:[#allocation45 + $0x1c4] ss:$8 sps:$4 sm:$0xff]  }
0x194a   :  { %v15270_v55 = vadd.f32 %v8481_v28, %v8475_v26  ;;  %v15272_v19 = vadd.f32 %v8482_v6, %v8476_v54  ;;  %v12568_v26 = vld [vmem:[#allocation45 + $0x194] ss:$8 sps:$4 sm:$0xff]   ;;  %v12566_v54 = vld [vmem:[#allocation45 + $0x190] ss:$8 sps:$4 sm:$0xff]   ;;  %v12571_v28 = vld [vmem:[#allocation45 + $0x1a4] ss:$8 sps:$4 sm:$0xff]  }
0x194b   :  { %7417 = vmatpush1.bf16.msra.mxu0 %v12542_v44  ;;  %v12569_v6 = vld [vmem:[#allocation45 + $0x1a0] ss:$8 sps:$4 sm:$0xff]  }
0x194c   :  { %7418 = vmatprep.subr.bf16.mxu0 %v12547_v18  ;;  %v12575_v44 = vld [vmem:[#allocation45 + $0x1c0] ss:$8 sps:$4 sm:$0xff]   ;;  %v12580_v18 = vld [vmem:[#allocation45 + $0x1d4] ss:$8 sps:$4 sm:$0xff]  }
0x194f   :  { %7419 = vmatpush1.bf16.msra.mxu0 %v12545_v60  ;;  %v12578_v60 = vld [vmem:[#allocation45 + $0x1d0] ss:$8 sps:$4 sm:$0xff]  }
0x1950   :  { %7420 = vmatprep.subr.bf16.mxu0 %v12550_v42  ;;  %v12583_v42 = vld [vmem:[#allocation45 + $0x1e4] ss:$8 sps:$4 sm:$0xff]  }
0x1953   :  { %7421 = vmatpush1.bf16.msra.mxu0 %v12548_v62  ;;  %v12581_v62 = vld [vmem:[#allocation45 + $0x1e0] ss:$8 sps:$4 sm:$0xff]  }
0x1954   :  { %7422 = vmatprep.subr.bf16.mxu0 %v12553_v16  ;;  %v12584_v16 = vld [vmem:[#allocation45 + $0x1f0] ss:$8 sps:$4 sm:$0xff]  }
0x1957   :  { %7423 = vmatpush1.bf16.msra.mxu0 %v12551_v51  ;;  %v12586_v51 = vld [vmem:[#allocation45 + $0x1f4] ss:$8 sps:$4 sm:$0xff]  }
0x1958   :  { %7424 = vmatprep.subr.bf16.mxu0 %v12556_v3  ;;  %v12589_v3 = vld [vmem:[#allocation45 + $0x4] ss:$8 sps:$4 sm:$0xff]  }
0x195b   :  { %7425 = vmatpush1.bf16.msra.mxu0 %v12554_v40  ;;  %v6999_v40 = vunpack.c.l.bf16 %v14998_v27 }
0x195c   :  { %7426 = vmatprep.subr.bf16.mxu0 %v12559_v22 }
0x195f   :  { %7427 = vmatpush1.bf16.msra.mxu0 %v12557_v30 }
0x1960   :  { %7428 = vmatprep.subr.bf16.mxu0 %v12562_v14 }
0x1963   :  { %7429 = vmatpush1.bf16.msra.mxu0 %v12560_v29 }
0x1964   :  { %7430 = vmatprep.subr.bf16.mxu0 %v12565_v7 }
0x1967   :  { %7431 = vmatpush1.bf16.msra.mxu0 %v12563_v11 }
0x1968   :  { %7432 = vmatprep.subr.bf16.mxu0 %v12568_v26 }
0x196b   :  { %7433 = vmatpush1.bf16.msra.mxu0 %v12566_v54 }
0x196c   :  { %7434 = vmatprep.subr.bf16.mxu0 %v12571_v28 }
0x196f   :  { %7435 = vmatpush1.bf16.msra.mxu0 %v12569_v6 }
0x1970   :  { %7436 = vmatprep.subr.bf16.mxu0 %v12574_v52 }
0x1973   :  { %7437 = vmatpush1.bf16.msra.mxu0 %v12572_v0 }
0x1974   :  { %7438 = vmatprep.subr.bf16.mxu0 %v12577_v38  ;;  %v7003_v38 = vunpack.c.l.bf16 %v15004_v36 }
0x1977   :  { %7439 = vmatpush1.bf16.msra.mxu0 %v12575_v44 }
0x1978   :  { %7440 = vmatprep.subr.bf16.mxu0 %v12580_v18  ;;  %v7005_v18 = vunpack.c.h.bf16 %v15004_v36 }
0x197b   :  { %7441 = vmatpush1.bf16.msra.mxu0 %v12578_v60 }
0x197c   :  { %7442 = vmatprep.subr.bf16.mxu0 %v12583_v42 }
0x197f   :  { %7443 = vmatpush1.bf16.msra.mxu0 %v12581_v62 }
0x1980   :  { %7444 = vmatprep.subr.bf16.mxu0 %v12586_v51 }
0x1983   :  { %7445 = vmatpush1.bf16.msra.mxu0 %v12584_v16 }
0x1984   :  { %7647 = vmatprep.subr.bf16.mxu0 %v12589_v3 }
0x1a19   :  { %v6918_v45 = vpop.f32.mrb[96].mxu0 }
0x1a1a   :  { %v6920_v23 = vpop.f32.mrb[97].mxu0 }
0x1a1b   :  { %v6922_v5 = vpop.f32.mrb[98].mxu0 }
0x1a1c   :  { %v6927_v8 = vpack.c.bf16 %v6922_v5, %v6918_v45  ;;  %v6924_v61 = vpop.f32.mrb[99].mxu0  ;;  %v7007_v45 = vstv %s6998_s16  ;;  %v7000_v5 = vunpack.c.l.bf16 %v15000_v47 }
0x1a1d   :  { %v6928_v49 = vpack.c.bf16 %v6924_v61, %v6920_v23  ;;  %v7017_v23 = vstv %s10486_s18  ;;  %v7012_v16 = vmul.f32 %v7007_v45, %v7003_v38 }
0x1a1e   :  { %v7009_v30 = vmul.f32 %v7007_v45, %v7000_v5  ;;  %v7006_v5 = vunpack.c.h.bf16 %v15006_v41 }
0x1a1f   :  { %6945 = vmatprep.subr.bf16.mxu1 %v6928_v49  ;;  %v7002_v49 = vunpack.c.h.bf16 %v15000_v47 }
0x1a20   :  { %6946 = vmatpush1.bf16.msra.mxu1 %v6927_v8  ;;  %v7001_v8 = vunpack.c.h.bf16 %v14998_v27  ;;  %v7004_v27 = vunpack.c.l.bf16 %v15006_v41 }
0x1a21   :  { %v7011_v6 = vmul.f32 %v7007_v45, %v7002_v49 }
0x1a22   :  { %v7010_v11 = vmul.f32 %v7007_v45, %v7001_v8 }
0x1a23   :  { %10484 = vmatmul.mubr.msk.bf16.vlgmr.msra.gmra.mrb[96].mxu1 %vm15821_vm13, %v12537_v13  ;;  %v7008_v13 = vmul.f32 %v7007_v45, %v6999_v40  ;;  %v7013_v40 = vmul.f32 %v7007_v45, %v7004_v27  ;;  %vm15825_vm13 = vnez %v15721_v25 }
0x1a24   :  { %6987 = vmatprep.mubr.bf16.mxu1 %v15796_v32 }
0x1a2b   :  { %10485 = vmatmul.mubr.msk.bf16.gmra.mrb[100].mxu1 %vm15822_vm11, %v12538_v48  ;;  %vm15826_vm11 = vcmp.ne.s16.totalorder %v14282_v15, 0 }
0x1a2c   :  { %8129 = vmatprep.mubr.bf16.mxu1 %v15796_v32 }
0x1af6   :  { %v6979_v61 = vpop.f32.mrb[96].mxu1 }
0x1af7   :  { %v7018_v48 = vmul.f32 %v7017_v23, %v6979_v61  ;;  %v6981_v22 = vpop.f32.mrb[97].mxu1 }
0x1af8   :  { %v7019_v14 = vmul.f32 %v7017_v23, %v6981_v22  ;;  %v6983_v29 = vpop.f32.mrb[98].mxu1 }
0x1af9   :  { %v7026_v7 = vadd.f32 %v7018_v48, %v7008_v13  ;;  %v7020_v26 = vmul.f32 %v7017_v23, %v6983_v29  ;;  %v6985_v54 = vpop.f32.mrb[99].mxu1 }
0x1afa   :  { %v7027_v28 = vadd.f32 %v7019_v14, %v7009_v30  ;;  %v7021_v52 = vmul.f32 %v7017_v23, %v6985_v54  ;;  %v7014_v30 = vmul.f32 %v7007_v45, %v7005_v18  ;;  %v7100_v54 = vld [vmem:[#allocation5] sm:$0xff] }
0x1afb   :  { %v7028_v0 = vadd.f32 %v7020_v26, %v7010_v11 }
0x1afc   :  { %v10761_v44 = vpack.c.bf16 %v7027_v28, %v7026_v7  ;;  %v7029_v47 = vadd.f32 %v7021_v52, %v7011_v6  ;;  %v7015_v6 = vmul.f32 %v7007_v45, %v7006_v5 }
0x1afe   :  { %v7061_v60 = vshrl.u32 %v10761_v44, 16  ;;  %v10762_v42 = vpack.c.bf16 %v7029_v47, %v7028_v0  ;;  %v6989_v62 = vpop.f32.mrb[100].mxu1  ;;  %v7064_v61 = vshll.u32 %v10761_v44, 16 }
0x1aff   :  { %v7022_v51 = vmul.f32 %v7017_v23, %v6989_v62  ;;  %v6991_v3 = vpop.f32.mrb[101].mxu1 }
0x1b00   :  { %v7063_v8 = vrot.slane %v7061_v60, 7  ;;  %v7069_v49 = vshrl.u32 %v10762_v42, 16  ;;  %v7023_v13 = vmul.f32 %v7017_v23, %v6991_v3  ;;  %v6993_v48 = vpop.f32.mrb[102].mxu1  ;;  %v7072_v11 = vshll.u32 %v10762_v42, 16 }
0x1b01   :  { %v7030_v22 = vadd.f32 %v7022_v51, %v7012_v16  ;;  %v7024_v14 = vmul.f32 %v7017_v23, %v6993_v48  ;;  %v6995_v29 = vpop.f32.mrb[103].mxu1 }
0x1b02   :  { %v7066_v7 = vor.u32 %v7064_v61, %v7063_v8  ;;  %v7071_v36 = vrot.slane %v7069_v49, 7  ;;  %v7031_v26 = vadd.f32 %v7023_v13, %v7013_v40  ;;  %v7025_v52 = vmul.f32 %v7017_v23, %v6995_v29 }
0x1b03   :  { %v7032_v28 = vadd.f32 %v7024_v14, %v7014_v30  ;;  %v7067_v0 = vrot.slane %v7063_v8, 4 }
0x1b04   :  { %v7101_v41 = vsel %vm15824_vm9, %v7066_v7, %v7100_v54  ;;  %v7074_v38 = vor.u32 %v7072_v11, %v7071_v36  ;;  %v10763_v27 = vpack.c.bf16 %v7031_v26, %v7030_v22  ;;  %v7033_v44 = vadd.f32 %v7025_v52, %v7015_v6  ;;  %v7106_v26 = vld [vmem:[#allocation5 + $0x20] sm:$0x11] }
0x1b05   :  { %7102 = vst [vmem:[#allocation5] sm:$0xff] %v7101_v41  ;;  %v15297_v60 = vsel %vm15825_vm13, %v7101_v41, 0  ;;  %v7076_v25 = vrot.slane %v7071_v36, 4  ;;  %vm15828_vm9 = vnez %v15725_v34  ;;  %vm15829_vm13 = vnez %v15776_v1 }
0x1b06   :  { %v7075_v47 = vsel %vm14191_vm7, %v7067_v0, %v7074_v38  ;;  %v7078_v18 = vshrl.u32 %v10763_v27, 16  ;;  %v10764_v45 = vpack.c.bf16 %v7033_v44, %v7032_v28  ;;  %v7081_v16 = vshll.u32 %v10763_v27, 16 }
0x1b07   :  { %v10492_v23 = vcombine.high %v7101_v41, %v7075_v47  ;;  %v10491_v42 = vcombine.low %v7101_v41, %v7075_v47  ;;  %v15301_v20 = vsel %vm15780_vm4, %v7075_v47, 0  ;;  %v7120_v30 = vsel %vm15826_vm11, %v7075_v47, 0 }
0x1b08   :  { %v7080_v62 = vrot.slane %v7078_v18, 7  ;;  %v10529_v51 = vcombine.low %v15297_v60, %v15301_v20  ;;  %v10530_v3 = vcombine.high %v15297_v60, %v15301_v20  ;;  %v7087_v40 = vshrl.u32 %v10764_v45, 16  ;;  %v12646_v60 = vld [vmem:[#allocation45 + $0x230] ss:$8 sps:$4 sm:$0xff]   ;;  %v12651_v20 = vld [vmem:[#allocation45 + $0x244] ss:$8 sps:$4 sm:$0xff]  }
0x1b09   :  { %v7225_v5 = vshll.u32 %v10492_v23, 16  ;;  %v7213_v61 = vshll.u32 %v10491_v42, 16  ;;  %v7090_v13 = vshll.u32 %v10764_v45, 16  ;;  %v7223_v18 = vshrl.u32 %v10492_v23, 16 }
0x1b0a   :  { %v7083_v8 = vor.u32 %v7081_v16, %v7080_v62  ;;  %v7089_v49 = vrot.slane %v7087_v40, 7  ;;  %v7085_v14 = vrot.slane %v7080_v62, 4  ;;  %v7211_v62 = vshrl.u32 %v10491_v42, 16 }
0x1b0b   :  { %v7227_v11 = vrot.slane %v7225_v5, 1  ;;  %v7215_v54 = vrot.slane %v7213_v61, 1 }
0x1b0c   :  { %v7084_v48 = vsel %vm14191_vm7, %v7076_v25, %v7083_v8  ;;  %v7118_v22 = vld [vmem:[#allocation5] sm:$0xee]  ;;  %v7092_v29 = vor.u32 %v7090_v13, %v7089_v49  ;;  %v7094_v7 = vrot.slane %v7089_v49, 4 }
0x1b0d   :  { %v15313_v36 = vsel %vm15782_vm15, %v7084_v48, 0  ;;  %v7119_v28 = vsel %vm15827_vm8, %v7118_v22, 0  ;;  %v7121_v6 = vsel %vm15828_vm9, %v7084_v48, 0  ;;  %vm15830_vm15 = vcmp.ne.s16.totalorder %v14286_v17, 0  ;;  %v12587_v13 = vld [vmem:[#allocation45] ss:$8 sps:$4 sm:$0xff]  }
0x1b0e   :  { %v7093_v15 = vsel %vm14191_vm7, %v7085_v14, %v7092_v29  ;;  %v7107_v52 = vsel %vm15829_vm13, %v7094_v7, %v7106_v26  ;;  %v10565_v0 = vcombine.low %v7119_v28, %v7120_v30  ;;  %v10566_v41 = vcombine.high %v7119_v28, %v7120_v30  ;;  %v12593_v30 = vld [vmem:[#allocation45 + $0x14] ss:$8 sps:$4 sm:$0xff]   ;;  %v12591_v26 = vld [vmem:[#allocation45 + $0x10] ss:$8 sps:$4 sm:$0xff]  }
0x1b0f   :  { %7108 = vst [vmem:[#allocation5 + $0x20] sm:$0x11] %v7107_v52  ;;  %v10494_v38 = vcombine.high %v7084_v48, %v7093_v15  ;;  %v10493_v27 = vcombine.low %v7084_v48, %v7093_v15  ;;  %v15325_v31 = vsel %vm15780_vm4, %v7093_v15, 0  ;;  %v7122_v56 = vsel %vm15830_vm15, %v7093_v15, 0  ;;  %v12596_v52 = vld [vmem:[#allocation45 + $0x24] ss:$8 sps:$4 sm:$0xff]  }
0x1b10   :  { %v10532_v34 = vcombine.high %v15313_v36, %v15325_v31  ;;  %v10531_v44 = vcombine.low %v15313_v36, %v15325_v31  ;;  %v10567_v1 = vcombine.low %v7121_v6, %v7122_v56  ;;  %v10568_v47 = vcombine.high %v7121_v6, %v7122_v56  ;;  %v12658_v36 = vld [vmem:[#allocation45 + $0x270] ss:$8 sps:$4 sm:$0xff]   ;;  %v12663_v31 = vld [vmem:[#allocation45 + $0x284] ss:$8 sps:$4 sm:$0xff]  }
0x1b11   :  { %v7230_v45 = vshll.u32 %v10494_v38, 16  ;;  %v7218_v16 = vshll.u32 %v10493_v27, 16  ;;  %v7754_v40 = vrot.slane %v10565_v0, 1  ;;  %v7757_v50 = vrot.slane %v10566_v41, 1 }
0x1b12   :  { %v7755_v5 = vrot.slane %v10567_v1, 1  ;;  %v7758_v25 = vrot.slane %v10568_v47, 1  ;;  %v7228_v8 = vor.u32 %v7227_v11, %v7223_v18  ;;  %v7216_v17 = vor.u32 %v7215_v54, %v7211_v62 }
0x1b13   :  { %v7232_v61 = vrot.slane %v7230_v45, 1  ;;  %v7220_v49 = vrot.slane %v7218_v16, 1  ;;  %vm15831_vm4 = vcmask 1046528   ;;  %vm15833_vm8 = vsmask.f32 7424 }
0x1b14   :  { %v15334_v48 = vsel %vm15831_vm4, %v7757_v50, %v7758_v25  ;;  %vm15832_vm11 = vmmov %vm15831_vm4  ;;  %vm15835_vm13 = vcmp.ne.s16.totalorder %v14332_v46, 0  ;;  %v7242_v6 = vshrl.u32 %v10494_v38, 16  ;;  %v7234_v0 = vshrl.u32 %v10493_v27, 16  ;;  %v12594_v16 = vld [vmem:[#allocation45 + $0x20] ss:$8 sps:$4 sm:$0xff]  }
0x1b15   :  { %v15337_v22 = vsel %vm15832_vm11, %v7754_v40, %v7755_v5  ;;  %v7233_v23 = vsel %vm15833_vm8, %v7228_v8, %v7232_v61  ;;  %vm15834_vm9 = vmmov %vm15833_vm8  ;;  %v12600_v50 = vld [vmem:[#allocation45 + $0x34] ss:$8 sps:$4 sm:$0xff]   ;;  %v12598_v8 = vld [vmem:[#allocation45 + $0x30] ss:$8 sps:$4 sm:$0xff]  }
0x1b16   :  { %v7221_v42 = vsel %vm15834_vm9, %v7216_v17, %v7220_v49  ;;  %7446 = vmatprep.mubr.bf16.mxu0 %v7233_v23  ;;  %v7117_v14 = vld [vmem:[#allocation5 + $0x20] sm:$0x11]  ;;  %v7244_v47 = vor.u32 %v7242_v6, %v7232_v61  ;;  %v7236_v45 = vor.u32 %v7234_v0, %v7220_v49  ;;  %vm15836_vm15 = vmmov %vm15831_vm4  ;;  %v12604_v17 = vld [vmem:[#allocation45 + $0x50] ss:$8 sps:$4 sm:$0xff]   ;;  %vm15838_vm9 = vcmask 261120  }
0x1b17   :  { %7447 = vmatmul.mubr.bf16.vlgmr.msra.gmra.mrb[100].mxu0 %v7221_v42  ;;  %v10496_v29 = vcombine.high %v7117_v14, %v7117_v14  ;;  %v10495_v7 = vcombine.low %v7117_v14, %v7117_v14  ;;  %v7123_v11 = vsel %vm15835_vm13, %v7117_v14, 0  ;;  %vm15837_vm11 = vmmov %vm15833_vm8  ;;  %v12601_v61 = vld [vmem:[#allocation45 + $0x40] ss:$8 sps:$4 sm:$0xff]   ;;  %v12609_v49 = vld [vmem:[#allocation45 + $0x64] ss:$8 sps:$4 sm:$0xff]  }
0x1b18   :  { %7648 = vmatpush1.bf16.msra.mxu0 %v12587_v13  ;;  %v10570_v54 = vcombine.high %v7123_v11, %v7123_v11  ;;  %v10569_v28 = vcombine.low %v7123_v11, %v7123_v11  ;;  %v12607_v13 = vld [vmem:[#allocation45 + $0x60] ss:$8 sps:$4 sm:$0xff]   ;;  %v12612_v23 = vld [vmem:[#allocation45 + $0x74] ss:$8 sps:$4 sm:$0xff]   ;;  %v12610_v42 = vld [vmem:[#allocation45 + $0x70] ss:$8 sps:$4 sm:$0xff]  }
0x1b19   :  { %v7246_v15 = vshll.u32 %v10496_v29, 16  ;;  %7649 = vmatprep.subr.bf16.mxu0 %v12593_v30  ;;  %v7238_v41 = vshll.u32 %v10495_v7, 16  ;;  %v12615_v30 = vld [vmem:[#allocation45 + $0x84] ss:$8 sps:$4 sm:$0xff]   ;;  %v12618_v14 = vld [vmem:[#allocation45 + $0x94] ss:$8 sps:$4 sm:$0xff]   ;;  %vm15839_vm13 = vmmov %vm15838_vm9 }
0x1b1a   :  { %v7762_v56 = vrot.slane %v10570_v54, 1  ;;  %v7760_v1 = vrot.slane %v10569_v28, 1  ;;  %v12616_v29 = vld [vmem:[#allocation45 + $0x90] ss:$8 sps:$4 sm:$0xff]   ;;  %v12621_v7 = vld [vmem:[#allocation45 + $0xa4] ss:$8 sps:$4 sm:$0xff]  }
0x1b1b   :  { %v7248_v18 = vrot.slane %v7246_v15, 1  ;;  %v7240_v62 = vrot.slane %v7238_v41, 1  ;;  %v12619_v11 = vld [vmem:[#allocation45 + $0xa0] ss:$8 sps:$4 sm:$0xff]   ;;  %v12622_v54 = vld [vmem:[#allocation45 + $0xb0] ss:$8 sps:$4 sm:$0xff]  }
0x1b1c   :  { %7650 = vmatpush1.bf16.msra.mxu0 %v12591_v26  ;;  %v15344_v46 = vsel %vm15836_vm15, %v7758_v25, %v7762_v56  ;;  %v15347_v40 = vsel %vm15831_vm4, %v7755_v5, %v7760_v1  ;;  %v12603_v25 = vld [vmem:[#allocation45 + $0x44] ss:$8 sps:$4 sm:$0xff]   ;;  %v12606_v5 = vld [vmem:[#allocation45 + $0x54] ss:$8 sps:$4 sm:$0xff]   ;;  %v12625_v6 = vld [vmem:[#allocation45 + $0xc0] ss:$8 sps:$4 sm:$0xff]  }
0x1b1d   :  { %v7249_v38 = vsel %vm15837_vm11, %v7244_v47, %v7248_v18  ;;  %7651 = vmatprep.subr.bf16.mxu0 %v12596_v52  ;;  %v7241_v27 = vsel %vm15833_vm8, %v7236_v45, %v7240_v62  ;;  %v12624_v26 = vld [vmem:[#allocation45 + $0xb4] ss:$8 sps:$4 sm:$0xff]   ;;  %v12627_v28 = vld [vmem:[#allocation45 + $0xc4] ss:$8 sps:$4 sm:$0xff]   ;;  %v12628_v52 = vld [vmem:[#allocation45 + $0xd0] ss:$8 sps:$4 sm:$0xff]  }
0x1b1e   :  { %7456 = vmatprep.mubr.bf16.mxu0 %v7249_v38  ;;  %v12630_v15 = vld [vmem:[#allocation45 + $0xd4] ss:$8 sps:$4 sm:$0xff]   ;;  %v12633_v0 = vld [vmem:[#allocation45 + $0xe4] ss:$8 sps:$4 sm:$0xff]   ;;  %v12631_v41 = vld [vmem:[#allocation45 + $0xe0] ss:$8 sps:$4 sm:$0xff]  }
0x1b1f   :  { %7457 = vmatmul.mubr.bf16.gmra.mrb[104].mxu0 %v7241_v27  ;;  %v12636_v56 = vld [vmem:[#allocation45 + $0xf4] ss:$8 sps:$4 sm:$0xff]   ;;  %v12634_v1 = vld [vmem:[#allocation45 + $0xf0] ss:$8 sps:$4 sm:$0xff]   ;;  %v12639_v47 = vld [vmem:[#allocation45 + $0x204] ss:$8 sps:$4 sm:$0xff]  }
0x1b20   :  { %7652 = vmatpush1.bf16.msra.mxu0 %v12594_v16  ;;  %7679 = vmatprep.mubr.bf16.mxu0 %v10530_v3  ;;  %v12613_v3 = vld [vmem:[#allocation45 + $0x80] ss:$8 sps:$4 sm:$0xff]   ;;  %v12642_v45 = vld [vmem:[#allocation45 + $0x214] ss:$8 sps:$4 sm:$0xff]   ;;  %v12640_v62 = vld [vmem:[#allocation45 + $0x210] ss:$8 sps:$4 sm:$0xff]  }
0x1b21   :  { %7653 = vmatprep.subr.bf16.mxu0 %v12600_v50  ;;  %v12637_v18 = vld [vmem:[#allocation45 + $0x200] ss:$8 sps:$4 sm:$0xff]   ;;  %v12645_v16 = vld [vmem:[#allocation45 + $0x224] ss:$8 sps:$4 sm:$0xff]   ;;  %v12648_v27 = vld [vmem:[#allocation45 + $0x234] ss:$8 sps:$4 sm:$0xff]  }
0x1b22   :  { %v12643_v38 = vld [vmem:[#allocation45 + $0x220] ss:$8 sps:$4 sm:$0xff]   ;;  %v12652_v50 = vld [vmem:[#allocation45 + $0x250] ss:$8 sps:$4 sm:$0xff]   ;;  %vm15847_vm15 = vcmask 523264  }
0x1b24   :  { %7654 = vmatpush1.bf16.msra.mxu0 %v12598_v8  ;;  %v12657_v8 = vld [vmem:[#allocation45 + $0x264] ss:$8 sps:$4 sm:$0xff]  }
0x1b25   :  { %7655 = vmatprep.subr.bf16.mxu0 %v12603_v25  ;;  %v12655_v25 = vld [vmem:[#allocation45 + $0x260] ss:$8 sps:$4 sm:$0xff]  }
0x1b28   :  { %7656 = vmatpush1.bf16.msra.mxu0 %v12601_v61  ;;  %v12660_v61 = vld [vmem:[#allocation45 + $0x274] ss:$8 sps:$4 sm:$0xff]  }
0x1b29   :  { %7657 = vmatprep.subr.bf16.mxu0 %v12606_v5  ;;  %v12664_v5 = vld [vmem:[#allocation45 + $0x290] ss:$8 sps:$4 sm:$0xff]  }
0x1b2c   :  { %7658 = vmatpush1.bf16.msra.mxu0 %v12604_v17  ;;  %v12669_v17 = vld [vmem:[#allocation45 + $0x2a4] ss:$8 sps:$4 sm:$0xff]  }
0x1b2d   :  { %7659 = vmatprep.subr.bf16.mxu0 %v12609_v49  ;;  %v12667_v49 = vld [vmem:[#allocation45 + $0x2a0] ss:$8 sps:$4 sm:$0xff]  }
0x1b30   :  { %7660 = vmatpush1.bf16.msra.mxu0 %v12607_v13  ;;  %v12672_v13 = vld [vmem:[#allocation45 + $0x2b4] ss:$8 sps:$4 sm:$0xff]  }
0x1b31   :  { %7661 = vmatprep.subr.bf16.mxu0 %v12612_v23  ;;  %v12670_v23 = vld [vmem:[#allocation45 + $0x2b0] ss:$8 sps:$4 sm:$0xff]  }
0x1b34   :  { %7662 = vmatpush1.bf16.msra.mxu0 %v12610_v42  ;;  %v12675_v42 = vld [vmem:[#allocation45 + $0x2c4] ss:$8 sps:$4 sm:$0xff]  }
0x1b35   :  { %7663 = vmatprep.subr.bf16.mxu0 %v12615_v30  ;;  %v12673_v30 = vld [vmem:[#allocation45 + $0x2c0] ss:$8 sps:$4 sm:$0xff]  }
0x1b38   :  { %7664 = vmatpush1.bf16.msra.mxu0 %v12613_v3  ;;  %v12678_v3 = vld [vmem:[#allocation45 + $0x2d4] ss:$8 sps:$4 sm:$0xff]  }
0x1b39   :  { %7665 = vmatprep.subr.bf16.mxu0 %v12618_v14  ;;  %v12676_v14 = vld [vmem:[#allocation45 + $0x2d0] ss:$8 sps:$4 sm:$0xff]  }
0x1b3c   :  { %7666 = vmatpush1.bf16.msra.mxu0 %v12616_v29  ;;  %v12681_v29 = vld [vmem:[#allocation45 + $0x2e4] ss:$8 sps:$4 sm:$0xff]  }
0x1b3d   :  { %7667 = vmatprep.subr.bf16.mxu0 %v12621_v7  ;;  %v12679_v7 = vld [vmem:[#allocation45 + $0x2e0] ss:$8 sps:$4 sm:$0xff]  }
0x1b40   :  { %7668 = vmatpush1.bf16.msra.mxu0 %v12619_v11  ;;  %v12684_v11 = vld [vmem:[#allocation45 + $0x2f4] ss:$8 sps:$4 sm:$0xff]  }
0x1b41   :  { %7669 = vmatprep.subr.bf16.mxu0 %v12624_v26  ;;  %v12682_v26 = vld [vmem:[#allocation45 + $0x2f0] ss:$8 sps:$4 sm:$0xff]  }
0x1b44   :  { %7670 = vmatpush1.bf16.msra.mxu0 %v12622_v54  ;;  %v7989_v54 = vld [vmem:[#allocation44] sm:$0x3] }
0x1b45   :  { %7671 = vmatprep.subr.bf16.mxu0 %v12627_v28  ;;  %v7994_v28 = vrot.slane %v7989_v54, %v14417_v9 }
0x1b48   :  { %7672 = vmatpush1.bf16.msra.mxu0 %v12625_v6  ;;  %v7998_v6 = vrot.slane %v7989_v54, %v14421_v12  ;;  %v12692_v54 = vld [vmem:[#allocation23 + $0x10] sm:$0xff]  }
0x1b49   :  { %7673 = vmatprep.subr.bf16.mxu0 %v12630_v15 }
0x1b4c   :  { %7674 = vmatpush1.bf16.msra.mxu0 %v12628_v52 }
0x1b4d   :  { %7675 = vmatprep.subr.bf16.mxu0 %v12633_v0 }
0x1b50   :  { %7676 = vmatpush1.bf16.msra.mxu0 %v12631_v41 }
0x1b51   :  { %7677 = vmatprep.subr.bf16.mxu0 %v12636_v56 }
0x1b54   :  { %7678 = vmatpush1.bf16.msra.mxu0 %v12634_v1 }
0x1b55   :  { %7928 = vmatprep.subr.bf16.mxu0 %v12639_v47 }
0x1b57   :  { %7680 = vmatmul.mubr.bf16.vlgmr.msra.gmra.mrb[100].mxu0 %v10529_v51  ;;  %v12649_v51 = vld [vmem:[#allocation45 + $0x240] ss:$8 sps:$4 sm:$0xff]  }
0x1b58   :  { %7689 = vmatprep.mubr.bf16.mxu0 %v10532_v34  ;;  %7929 = vmatpush1.bf16.msra.mxu0 %v12637_v18  ;;  %v12654_v34 = vld [vmem:[#allocation45 + $0x254] ss:$8 sps:$4 sm:$0xff]  }
0x1b59   :  { %7930 = vmatprep.subr.bf16.mxu0 %v12642_v45 }
0x1b5c   :  { %7931 = vmatpush1.bf16.msra.mxu0 %v12640_v62 }
0x1b5d   :  { %7932 = vmatprep.subr.bf16.mxu0 %v12645_v16 }
0x1b5f   :  { %7690 = vmatmul.mubr.bf16.gmra.mrb[104].mxu0 %v10531_v44  ;;  %v12661_v44 = vld [vmem:[#allocation45 + $0x280] ss:$8 sps:$4 sm:$0xff]  }
0x1b60   :  { %7933 = vmatpush1.bf16.msra.mxu0 %v12643_v38  ;;  %7960 = vmatprep.mubr.bf16.mxu0 %v15334_v48  ;;  %v12666_v48 = vld [vmem:[#allocation45 + $0x294] ss:$8 sps:$4 sm:$0xff]  }
0x1b61   :  { %7934 = vmatprep.subr.bf16.mxu0 %v12648_v27 }
0x1b64   :  { %7935 = vmatpush1.bf16.msra.mxu0 %v12646_v60 }
0x1b65   :  { %7936 = vmatprep.subr.bf16.mxu0 %v12651_v20 }
0x1b68   :  { %7937 = vmatpush1.bf16.msra.mxu0 %v12649_v51 }
0x1b69   :  { %7938 = vmatprep.subr.bf16.mxu0 %v12654_v34 }
0x1b6c   :  { %7939 = vmatpush1.bf16.msra.mxu0 %v12652_v50 }
0x1b6d   :  { %7940 = vmatprep.subr.bf16.mxu0 %v12657_v8 }
0x1b70   :  { %7941 = vmatpush1.bf16.msra.mxu0 %v12655_v25 }
0x1b71   :  { %7942 = vmatprep.subr.bf16.mxu0 %v12660_v61 }
0x1b74   :  { %7943 = vmatpush1.bf16.msra.mxu0 %v12658_v36 }
0x1b75   :  { %7944 = vmatprep.subr.bf16.mxu0 %v12663_v31 }
0x1b78   :  { %7945 = vmatpush1.bf16.msra.mxu0 %v12661_v44 }
0x1b79   :  { %7946 = vmatprep.subr.bf16.mxu0 %v12666_v48 }
0x1b7c   :  { %7947 = vmatpush1.bf16.msra.mxu0 %v12664_v5 }
0x1b7d   :  { %7948 = vmatprep.subr.bf16.mxu0 %v12669_v17 }
0x1b80   :  { %7949 = vmatpush1.bf16.msra.mxu0 %v12667_v49 }
0x1b81   :  { %7950 = vmatprep.subr.bf16.mxu0 %v12672_v13 }
0x1b84   :  { %7951 = vmatpush1.bf16.msra.mxu0 %v12670_v23 }
0x1b85   :  { %7952 = vmatprep.subr.bf16.mxu0 %v12675_v42 }
0x1b88   :  { %7953 = vmatpush1.bf16.msra.mxu0 %v12673_v30  ;;  %v12685_v30 = vld [vmem:[#allocation26] sm:$0xff]  }
0x1b89   :  { %7954 = vmatprep.subr.bf16.mxu0 %v12678_v3  ;;  %v12687_v3 = vld [vmem:[#allocation23 + $0x40] sm:$0xff]  }
0x1b8c   :  { %7955 = vmatpush1.bf16.msra.mxu0 %v12676_v14  ;;  %v12686_v14 = vld [vmem:[#allocation27] sm:$0xff]  }
0x1b8d   :  { %7956 = vmatprep.subr.bf16.mxu0 %v12681_v29  ;;  %v12688_v29 = vld [vmem:[#allocation23] sm:$0xff]  }
0x1b90   :  { %7957 = vmatpush1.bf16.msra.mxu0 %v12679_v7  ;;  %v12689_v7 = vld [vmem:[#allocation23 + $0x48] sm:$0xff]  }
0x1b91   :  { %7958 = vmatprep.subr.bf16.mxu0 %v12684_v11  ;;  %v12690_v11 = vld [vmem:[#allocation23 + $0x8] sm:$0xff]  }
0x1b94   :  { %7959 = vmatpush1.bf16.msra.mxu0 %v12682_v26  ;;  %v12691_v26 = vld [vmem:[#allocation23 + $0x50] sm:$0xff]  }
0x1b95   :  { %11810 = vmatprep.subr.bf16.mxu0 %v15793_v21 }
0x1b97   :  { %7961 = vmatmul.mubr.bf16.vlgmr.msra.gmra.mrb[100].mxu0 %v15337_v22 }
0x1b98   :  { %7970 = vmatprep.mubr.bf16.mxu0 %v15344_v46 }
0x1b9f   :  { %7971 = vmatmul.mubr.bf16.gmra.mrb[104].mxu0 %v15347_v40 }
0x1ba0   :  { %11826 = vmatprep.mubr.msk.bf16.mxu0 %vm15736_vm5, %v15793_v21 }
0x1c6a   :  { %v7962_v15 = vpop.f32.mrb[100].mxu0 }
0x1c6b   :  { %v8001_v52 = vadd.f32 %v7994_v28, %v7962_v15  ;;  %v7964_v0 = vpop.f32.mrb[101].mxu0  ;;  %v12696_v15 = vld [vmem:[#allocation23 + $0x20] sm:$0xff]  }
0x1c6c   :  { %v8002_v41 = vadd.f32 %v7998_v6, %v7964_v0  ;;  %v7966_v56 = vpop.f32.mrb[102].mxu0  ;;  %v12698_v0 = vld [vmem:[#allocation23 + $0x28] sm:$0xff]  }
0x1c6d   :  { %v8003_v1 = vadd.f32 %v7994_v28, %v7966_v56  ;;  %v7968_v47 = vpop.f32.mrb[103].mxu0  ;;  %v8009_v18 = vmax.f32 %v8001_v52, 0.0  ;;  %v12697_v52 = vld [vmem:[#allocation23 + $0x68] sm:$0xff]   ;;  %v12700_v56 = vld [vmem:[#allocation23 + $0x30] sm:$0xff]  }
0x1c6e   :  { %v8004_v22 = vadd.f32 %v7998_v6, %v7968_v47  ;;  %v8010_v40 = vmax.f32 %v8002_v41, 0.0  ;;  %v12699_v41 = vld [vmem:[#allocation23 + $0x70] sm:$0xff]   ;;  %v12702_v47 = vld [vmem:[#allocation23 + $0x38] sm:$0xff]  }
0x1c6f   :  { %v8011_v46 = vmax.f32 %v8003_v1, 0.0  ;;  %v12701_v1 = vld [vmem:[#allocation23 + $0x78] sm:$0xff]  }
0x1c70   :  { %v8012_v45 = vmax.f32 %v8004_v22, 0.0  ;;  %v12703_v22 = vld [vmem:[#allocation24 + $0x40] sm:$0xff]  }
0x1c71   :  { %v8017_v62 = vpack.c.bf16 %v8011_v46, %v8009_v18 }
0x1c72   :  { %v8018_v16 = vpack.c.bf16 %v8012_v45, %v8010_v40  ;;  %v7972_v9 = vpop.f32.mrb[104].mxu0 }
0x1c73   :  { %v9745_v12 = vunpack.c.l.bf16 %v8017_v62  ;;  %v9747_v38 = vunpack.c.h.bf16 %v8017_v62  ;;  %v8005_v27 = vadd.f32 %v7994_v28, %v7972_v9  ;;  %v7974_v60 = vpop.f32.mrb[105].mxu0 }
0x1c74   :  { %v9746_v20 = vunpack.c.l.bf16 %v8018_v16  ;;  %v9748_v51 = vunpack.c.h.bf16 %v8018_v16  ;;  %v8006_v34 = vadd.f32 %v7998_v6, %v7974_v60  ;;  %v7976_v50 = vpop.f32.mrb[106].mxu0  ;;  %8097 = vmatprep.subr.bf16.mxu1 %v8018_v16 }
0x1c75   :  { %9753 = vst [vmem:[%s13954_s19] sm:$0xff] %v9745_v12  ;;  %9755 = vst [vmem:[%s13954_s19 + $0x10] sm:$0xff] %v9747_v38  ;;  %v8007_v8 = vadd.f32 %v7994_v28, %v7976_v50  ;;  %v7978_v25 = vpop.f32.mrb[107].mxu0  ;;  %8098 = vmatpush1.bf16.msra.mxu1 %v8017_v62  ;;  %v8013_v36 = vmax.f32 %v8005_v27, 0.0  ;;  %v12693_v28 = vld [vmem:[#allocation23 + $0x58] sm:$0xff]   ;;  %v12704_v50 = vld [vmem:[#allocation24] sm:$0xff]  }
0x1c76   :  { %9754 = vst [vmem:[%s13954_s19 + $0x8] sm:$0xff] %v9746_v20  ;;  %9756 = vst [vmem:[%s13954_s19 + $0x18] sm:$0xff] %v9748_v51  ;;  %v8008_v61 = vadd.f32 %v7998_v6, %v7978_v25  ;;  %v8014_v44 = vmax.f32 %v8006_v34, 0.0  ;;  %v12694_v6 = vld [vmem:[#allocation23 + $0x18] sm:$0xff]   ;;  %v12706_v25 = vld [vmem:[#allocation24 + $0x8] sm:$0xff]  }
0x1c77   :  { %v8015_v31 = vmax.f32 %v8007_v8, 0.0  ;;  %v12705_v8 = vld [vmem:[#allocation24 + $0x48] sm:$0xff]  }
0x1c78   :  { %v8016_v48 = vmax.f32 %v8008_v61, 0.0  ;;  %v12707_v61 = vld [vmem:[#allocation24 + $0x50] sm:$0xff]  }
0x1c79   :  { %v8019_v5 = vpack.c.bf16 %v8015_v31, %v8013_v36  ;;  %v12708_v36 = vld [vmem:[#allocation24 + $0x10] sm:$0xff]   ;;  %v12709_v31 = vld [vmem:[#allocation24 + $0x58] sm:$0xff]  }
0x1c7a   :  { %v8020_v17 = vpack.c.bf16 %v8016_v48, %v8014_v44  ;;  %v12710_v44 = vld [vmem:[#allocation24 + $0x18] sm:$0xff]   ;;  %v12711_v48 = vld [vmem:[#allocation24 + $0x60] sm:$0xff]  }
0x1c7b   :  { %v9749_v49 = vunpack.c.l.bf16 %v8019_v5  ;;  %v9751_v13 = vunpack.c.h.bf16 %v8019_v5 }
0x1c7c   :  { %v9750_v23 = vunpack.c.l.bf16 %v8020_v17  ;;  %v9752_v42 = vunpack.c.h.bf16 %v8020_v17  ;;  %8099 = vmatprep.subr.bf16.mxu1 %v8020_v17 }
0x1c7d   :  { %9757 = vst [vmem:[%s13954_s19 + $0x20] sm:$0xff] %v9749_v49  ;;  %9759 = vst [vmem:[%s13954_s19 + $0x30] sm:$0xff] %v9751_v13  ;;  %8100 = vmatpush1.bf16.msra.mxu1 %v8019_v5  ;;  %v12714_v49 = vld [vmem:[#allocation24 + $0x28] sm:$0xff]   ;;  %v12715_v13 = vld [vmem:[#allocation24 + $0x70] sm:$0xff]  }
0x1c7e   :  { %9758 = vst [vmem:[%s13954_s19 + $0x28] sm:$0xff] %v9750_v23  ;;  %9760 = vst [vmem:[%s13954_s19 + $0x38] sm:$0xff] %v9752_v42  ;;  %8148 = vmatprep.subr.bf16.mxu1 %v8018_v16  ;;  %s15840_s19 = sld [smem:[#allocation114_spill]]  ;;  %v12716_v23 = vld [vmem:[#allocation24 + $0x30] sm:$0xff]   ;;  %v12717_v42 = vld [vmem:[#allocation24 + $0x78] sm:$0xff]  }
0x1c80   :  { %10604 = vmatmul.mubr.msk.bf16.vlgmr.msra.gmra.mrb[104].mxu1 %vm15838_vm9, %v12685_v30  ;;  %v12718_v30 = vld [vmem:[#allocation24 + $0x38] sm:$0xff]  }
0x1c81   :  { %8149 = vmatpush1.bf16.msra.mxu1 %v8017_v62  ;;  %8180 = vmatprep.mubr.bf16.mxu1 %v15796_v32  ;;  %v12695_v32 = vld [vmem:[#allocation23 + $0x60] sm:$0xff]  }
0x1c82   :  { %8150 = vmatprep.subr.bf16.mxu1 %v8020_v17  ;;  %v12713_v17 = vld [vmem:[#allocation24 + $0x68] sm:$0xff]  }
0x1c84   :  { %v12739_v2 = vld [vmem:[%s15840_s19 + $0x90] sm:$0xff]   ;;  %v12740_v43 = vld [vmem:[%s15840_s19 + $0x98] sm:$0xff]  }
0x1c85   :  { %8151 = vmatpush1.bf16.msra.mxu1 %v8019_v5  ;;  %v12712_v5 = vld [vmem:[#allocation24 + $0x20] sm:$0xff]  }
0x1c86   :  { %11056 = vmatprep.subr.bf16.mxu1 %v12687_v3  ;;  %v12719_v3 = vld [vmem:[%s15840_s19 + $0x40] sm:$0xff]  }
0x1c88   :  { %10606 = vmatmul.mubr.msk.bf16.vlgmr.msra.gmra.mrb[108].mxu1 %vm15839_vm13, %v12686_v14  ;;  %v12720_v14 = vld [vmem:[%s15840_s19 + $0x48] sm:$0xff]  }
0x1c89   :  { %11057 = vmatpush3.bf16.msra.mxu1 %v12688_v29  ;;  %v12721_v29 = vld [vmem:[%s15840_s19 + $0x50] sm:$0xff]  }
0x1c8a   :  { %11058 = vmatprep.subr.bf16.mxu1 %v12689_v7  ;;  %v12722_v7 = vld [vmem:[%s15840_s19 + $0x58] sm:$0xff]  }
0x1c8d   :  { %11059 = vmatpush3.bf16.msra.mxu1 %v12690_v11  ;;  %v12723_v11 = vld [vmem:[%s15840_s19 + $0x60] sm:$0xff]  }
0x1c8e   :  { %11060 = vmatprep.subr.bf16.mxu1 %v12691_v26  ;;  %v12724_v26 = vld [vmem:[%s15840_s19 + $0x68] sm:$0xff]  }
0x1c91   :  { %11061 = vmatpush3.bf16.msra.mxu1 %v12692_v54  ;;  %v12725_v54 = vld [vmem:[%s15840_s19 + $0x70] sm:$0xff]  }
0x1c92   :  { %11062 = vmatprep.subr.bf16.mxu1 %v12693_v28  ;;  %v12726_v28 = vld [vmem:[%s15840_s19 + $0x78] sm:$0xff]  }
0x1c95   :  { %11063 = vmatpush3.bf16.msra.mxu1 %v12694_v6 }
0x1c96   :  { %11064 = vmatprep.subr.bf16.mxu1 %v12695_v32 }
0x1c99   :  { %11065 = vmatpush3.bf16.msra.mxu1 %v12696_v15 }
0x1c9a   :  { %11066 = vmatprep.subr.bf16.mxu1 %v12697_v52 }
0x1c9d   :  { %11067 = vmatpush3.bf16.msra.mxu1 %v12698_v0 }
0x1c9e   :  { %11068 = vmatprep.subr.bf16.mxu1 %v12699_v41 }
0x1ca1   :  { %11069 = vmatpush3.bf16.msra.mxu1 %v12700_v56 }
0x1ca2   :  { %11070 = vmatprep.subr.bf16.mxu1 %v12701_v1 }
0x1ca5   :  { %11071 = vmatpush3.bf16.msra.mxu1 %v12702_v47 }
0x1ca6   :  { %11078 = vmatprep.subr.bf16.mxu1 %v12703_v22 }
0x1d53   :  { %v8131_v18 = vpop.f32.mrb[104].mxu1 }
0x1d54   :  { %v8133_v46 = vpop.f32.mrb[105].mxu1 }
0x1d55   :  { %v8135_v40 = vpop.f32.mrb[106].mxu1 }
0x1d56   :  { %v8137_v45 = vpop.f32.mrb[107].mxu1 }
0x1d5b   :  { %v8182_v62 = vpop.f32.mrb[108].mxu1 }
0x1d5c   :  { %v8191_v16 = vmax.f32 %v8131_v18, %v8182_v62  ;;  %v8184_v9 = vpop.f32.mrb[109].mxu1  ;;  %v8486_v18 = vstv %s10640_s20 }
0x1d5d   :  { %v8192_v12 = vmax.f32 %v8133_v46, %v8184_v9  ;;  %v8186_v38 = vpop.f32.mrb[110].mxu1 }
0x1d5e   :  { %v8193_v27 = vmax.f32 %v8135_v40, %v8186_v38  ;;  %v8188_v60 = vpop.f32.mrb[111].mxu1 }
0x1d5f   :  { %v8194_v20 = vmax.f32 %v8137_v45, %v8188_v60 }
0x1d60   :  { %v8195_v51 = vpack.c.bf16 %v8193_v27, %v8191_v16 }
0x1d61   :  { %v8196_v34 = vpack.c.bf16 %v8194_v20, %v8192_v12 }
0x1d63   :  { %8325 = vmatprep.mubr.bf16.mxu1 %v8196_v34 }
0x1d64   :  { %8326 = vmatmul.mubr.bf16.vlgmr.msra.gmra.mrb[112].mxu1 %v8195_v51 }
0x1d65   :  { %11079 = vmatpush3.bf16.msra.mxu1 %v12704_v50  ;;  %8462 = vmatprep.mubr.bf16.mxu1 %v8196_v34 }
0x1d66   :  { %11080 = vmatprep.subr.bf16.mxu1 %v12705_v8 }
0x1d69   :  { %11081 = vmatpush3.bf16.msra.mxu1 %v12706_v25 }
0x1d6a   :  { %11082 = vmatprep.subr.bf16.mxu1 %v12707_v61 }
0x1d6d   :  { %11083 = vmatpush3.bf16.msra.mxu1 %v12708_v36  ;;  %v8523_v36 = vld [vmem:[#allocation6] sm:$0xf] }
0x1d6e   :  { %11084 = vmatprep.subr.bf16.mxu1 %v12709_v31 }
0x1d71   :  { %11085 = vmatpush3.bf16.msra.mxu1 %v12710_v44 }
0x1d72   :  { %11086 = vmatprep.subr.bf16.mxu1 %v12711_v48 }
0x1d75   :  { %11087 = vmatpush3.bf16.msra.mxu1 %v12712_v5 }
0x1d76   :  { %11088 = vmatprep.subr.bf16.mxu1 %v12713_v17 }
0x1d79   :  { %11089 = vmatpush3.bf16.msra.mxu1 %v12714_v49 }
0x1d7a   :  { %11090 = vmatprep.subr.bf16.mxu1 %v12715_v13 }
0x1d7d   :  { %11091 = vmatpush3.bf16.msra.mxu1 %v12716_v23 }
0x1d7e   :  { %11092 = vmatprep.subr.bf16.mxu1 %v12717_v42 }
0x1d81   :  { %11093 = vmatpush3.bf16.msra.mxu1 %v12718_v30 }
0x1d82   :  { %11738 = vmatprep.subr.bf16.mxu1 %v15793_v21 }
0x1d84   :  { %8463 = vmatmul.mubr.bf16.vlgmr.msra.gmra.mrb[116].mxu1 %v8195_v51 }
0x1d85   :  { %11754 = vmatprep.mubr.msk.bf16.mxu1 %vm15736_vm5, %v15793_v21  ;;  %11739 = vmatpush3.bf16.msra.mxu1 %v12719_v3 }
0x1d86   :  { %11740 = vmatprep.subr.bf16.mxu1 %v15793_v21 }
0x1d89   :  { %11741 = vmatpush3.bf16.msra.mxu1 %v12720_v14 }
0x1d8a   :  { %11742 = vmatprep.subr.bf16.mxu1 %v15793_v21 }
0x1d8d   :  { %11743 = vmatpush3.bf16.msra.mxu1 %v12721_v29 }
0x1d8e   :  { %11744 = vmatprep.subr.bf16.mxu1 %v15793_v21 }
0x1d91   :  { %11745 = vmatpush3.bf16.msra.mxu1 %v12722_v7 }
0x1d92   :  { %11746 = vmatprep.subr.bf16.mxu1 %v15793_v21 }
0x1d95   :  { %11747 = vmatpush3.bf16.msra.mxu1 %v12723_v11 }
0x1d96   :  { %11748 = vmatprep.subr.bf16.mxu1 %v15793_v21 }
0x1d99   :  { %11749 = vmatpush3.bf16.msra.mxu1 %v12724_v26 }
0x1d9a   :  { %11750 = vmatprep.subr.bf16.mxu1 %v15793_v21 }
0x1d9d   :  { %11751 = vmatpush3.bf16.msra.mxu1 %v12725_v54 }
0x1d9e   :  { %11752 = vmatprep.subr.bf16.mxu1 %v15793_v21 }
0x1da1   :  { %11753 = vmatpush3.bf16.msra.mxu1 %v12726_v28 }
0x1da2   :  { %11758 = vmatprep.subr.bf16.mxu1 %v15793_v21 }
0x1e37   :  { %v11072_v6 = vpop.f32.mrb[112].mxu1 }
0x1e38   :  { %v11073_v32 = vpop.f32.mrb[113].mxu1 }
0x1e39   :  { %v11074_v15 = vadd.f32 %v11073_v32, %v11072_v6  ;;  %v11075_v52 = vpop.f32.mrb[114].mxu1 }
0x1e3a   :  { %v11076_v0 = vpop.f32.mrb[115].mxu1 }
0x1e3b   :  { %v11077_v41 = vadd.f32 %v11076_v0, %v11075_v52  ;;  %v12730_v52 = vld [vmem:[%s15840_s19 + $0x8] sm:$0xff]   ;;  %v12731_v0 = vld [vmem:[%s15840_s19 + $0x10] sm:$0xff]  }
0x1e57   :  { %v11094_v56 = vpop.f32.mrb[116].mxu1 }
0x1e58   :  { %v11095_v1 = vpop.f32.mrb[117].mxu1 }
0x1e59   :  { %v11096_v47 = vadd.f32 %v11095_v1, %v11094_v56  ;;  %v11097_v22 = vpop.f32.mrb[118].mxu1  ;;  %v12733_v56 = vld [vmem:[%s15840_s19 + $0x20] sm:$0xff]   ;;  %v12734_v1 = vld [vmem:[%s15840_s19 + $0x28] sm:$0xff]  }
0x1e5a   :  { %v11098_v46 = vpop.f32.mrb[119].mxu1 }
0x1e5b   :  { %v8471_v40 = vmax.f32 %v11074_v15, %v11096_v47  ;;  %v11099_v45 = vadd.f32 %v11098_v46, %v11097_v22  ;;  %v12729_v15 = vld [vmem:[%s15840_s19] sm:$0xff]   ;;  %v12735_v47 = vld [vmem:[%s15840_s19 + $0x30] sm:$0xff]   ;;  %v12736_v22 = vld [vmem:[%s15840_s19 + $0x38] sm:$0xff]  }
0x1e5d   :  { %v8487_v62 = vmul.f32 %v8486_v18, %v8471_v40  ;;  %v8472_v16 = vmax.f32 %v11077_v41, %v11099_v45  ;;  %v12732_v41 = vld [vmem:[%s15840_s19 + $0x18] sm:$0xff]   ;;  %v12737_v40 = vld [vmem:[%s15840_s19 + $0x80] sm:$0xff]  }
0x1e5f   :  { %v8489_v9 = vadd.f32 %v8487_v62, %v15270_v55  ;;  %v8488_v12 = vmul.f32 %v8486_v18, %v8472_v16  ;;  %v8527_v55 = vld [vmem:[#allocation6 + $0x8] sm:$0x1]  ;;  %v12738_v62 = vld [vmem:[%s15840_s19 + $0x88] sm:$0xff]   ;;  %v12741_v16 = vld [vmem:[%s15840_s19 + $0xa0] sm:$0xff]  }
0x1e61   :  { %v10765_v38 = vpack.c.bf16 %v8489_v9, %v8489_v9  ;;  %v8490_v27 = vadd.f32 %v8488_v12, %v15272_v19  ;;  %v12742_v9 = vld [vmem:[%s15840_s19 + $0xa8] sm:$0xff]   ;;  %v12743_v12 = vld [vmem:[%s15840_s19 + $0xb0] sm:$0xff]  }
0x1e63   :  { %v8504_v60 = vshrl.u32 %v10765_v38, 16  ;;  %v10766_v20 = vpack.c.bf16 %v8490_v27, %v8490_v27  ;;  %v8507_v34 = vshll.u32 %v10765_v38, 16  ;;  %v12744_v38 = vld [vmem:[%s15840_s19 + $0xb8] sm:$0xff]   ;;  %v12745_v27 = vld [vmem:[%s15802_s28] sm:$0xff]  }
0x1e64   :  { %11811 = vmatpush3.bf16.msra.mxu0 %v12745_v27  ;;  %v12766_v27 = vld [vmem:[#allocation42 + $0x18] sm:$0xff]  }
0x1e65   :  { %v8506_v51 = vrot.slane %v8504_v60, 7  ;;  %v8512_v50 = vshrl.u32 %v10766_v20, 16  ;;  %v8515_v61 = vshll.u32 %v10766_v20, 16  ;;  %v12747_v60 = vld [vmem:[%s15802_s28 + $0x8] sm:$0xff]   ;;  %11812 = vmatprep.subr.bf16.mxu0 %v15793_v21  ;;  %v12749_v20 = vld [vmem:[%s15802_s28 + $0x10] sm:$0xff]  }
0x1e67   :  { %v8509_v8 = vor.u32 %v8507_v34, %v8506_v51  ;;  %v8514_v25 = vrot.slane %v8512_v50, 7  ;;  %v8510_v31 = vrot.slane %v8506_v51, 4  ;;  %v12751_v51 = vld [vmem:[%s15802_s28 + $0x18] sm:$0xff]   ;;  %v12753_v34 = vld [vmem:[%s15802_s28 + $0x20] sm:$0xff]  }
0x1e68   :  { %11813 = vmatpush3.bf16.msra.mxu0 %v12747_v60  ;;  %v12767_v60 = vld [vmem:[#allocation42 + $0x30] sm:$0xff]  }
0x1e69   :  { %v8524_v44 = vsel %vm14717_vm3, %v8509_v8, %v8523_v36  ;;  %v8517_v48 = vor.u32 %v8515_v61, %v8514_v25  ;;  %v8519_v5 = vrot.slane %v8514_v25, 4  ;;  %vm15841_vm3 = vcmp.ne.s16.totalorder %v14479_v37, 0  ;;  %11814 = vmatprep.subr.bf16.mxu0 %v15793_v21 }
0x1e6a   :  { %8525 = vst [vmem:[#allocation6] sm:$0xf] %v8524_v44 }
0x1e6b   :  { %v8518_v19 = vsel %vm14191_vm7, %v8510_v31, %v8517_v48  ;;  %v8528_v17 = vsel %vm14264_vm12, %v8519_v5, %v8527_v55  ;;  %vm15842_vm7 = vcmp.ne.s16.totalorder %v14475_v33, 0  ;;  %vm15843_vm12 = vmmov %vm15831_vm4 }
0x1e6c   :  { %8526 = vst [vmem:[#allocation6 + $0x4] sm:$0xf] %v8518_v19  ;;  %8529 = vst [vmem:[#allocation6 + $0x8] sm:$0x1] %v8528_v17  ;;  %11815 = vmatpush3.bf16.msra.mxu0 %v12749_v20  ;;  %v10704_v17 = vld [vmem:[#allocation39] ss:$0 sm:$0xff] }
0x1e6d   :  { %11816 = vmatprep.subr.bf16.mxu0 %v15793_v21  ;;  %v12769_v20 = vld [vmem:[#allocation42 + $0x38] sm:$0xff]  }
0x1e70   :  { %11817 = vmatpush3.bf16.msra.mxu0 %v12751_v51  ;;  %v9209_v51 = vunpack.c.l.bf16 %v15200_v59 }
0x1e71   :  { %v8535_v49 = vld [vmem:[#allocation6] sm:$0xe]  ;;  %11818 = vmatprep.subr.bf16.mxu0 %v15793_v21 }
0x1e72   :  { %v8530_v13 = vld [vmem:[#allocation6] sm:$0xf]  ;;  %v8536_v3 = vsel %vm14488_vm14, %v8535_v49, 0  ;;  %vm15844_vm14 = vmmov %vm15833_vm8  ;;  %vm15854_vm8 = vcmask 64512  }
0x1e73   :  { %v8531_v23 = vld [vmem:[#allocation6 + $0x4] sm:$0xf]  ;;  %v8534_v42 = vld [vmem:[#allocation6 + $0x8] sm:$0x1]  ;;  %v8532_v46 = vsel %vm14458_vm0, %v8530_v13, 0 }
0x1e74   :  { %v10659_v30 = vcombine.low %v8530_v13, %v8531_v23  ;;  %v10660_v53 = vcombine.low %v8534_v42, %v8534_v42  ;;  %v8537_v14 = vsel %vm15841_vm3, %v8531_v23, 0  ;;  %v8538_v24 = vsel %vm15842_vm7, %v8534_v42, 0  ;;  %11819 = vmatpush3.bf16.msra.mxu0 %v12753_v34 }
0x1e75   :  { %v10694_v4 = vcombine.low %v8536_v3, %v8537_v14  ;;  %v10695_v11 = vcombine.low %v8538_v24, %v8538_v24  ;;  %v8533_v18 = vsel %vm14463_vm10, %v8531_v23, 0  ;;  %11820 = vmatprep.subr.bf16.mxu0 %v15793_v21  ;;  %vm15845_vm10 = vcmask 130048  }
0x1e76   :  { %v8583_v29 = vshll.u32 %v10659_v30, 16  ;;  %v8588_v7 = vshll.u32 %v10660_v53, 16  ;;  %v8581_v54 = vshrl.u32 %v10659_v30, 16  ;;  %v10669_v45 = vcombine.low %v8532_v46, %v8533_v18  ;;  %vm15846_vm0 = vmmov %vm15845_vm10 }
0x1e77   :  { %v8802_v26 = vrot.slane %v10694_v4, 1  ;;  %v8803_v6 = vrot.slane %v10695_v11, 1  ;;  %v8909_v11 = vld [vmem:[#allocation29] sm:$0xf]  ;;  %vm15856_vm13 = vmmov %vm15846_vm0  ;;  %vm9743_vm3 = vcmask 74752  }
0x1e78   :  { %v8585_v28 = vrot.slane %v8583_v29, 1  ;;  %v8590_v63 = vrot.slane %v8588_v7, 1 }
0x1e79   :  { %v8804_v37 = vsel %vm15843_vm12, %v8802_v26, %v8803_v6  ;;  %v8910_v26 = vld [vmem:[#allocation30] sm:$0xf] }
0x1e7a   :  { %v8586_v32 = vor.u32 %v8585_v28, %v8581_v54  ;;  %v12746_v54 = vld [vmem:[%s15804_s1] sm:$0xff]   ;;  %v12748_v28 = vld [vmem:[%s15804_s1 + $0x8] sm:$0xff]   ;;  %v12750_v6 = vld [vmem:[%s15804_s1 + $0x10] sm:$0xff]  }
0x1e7c   :  { %v8591_v33 = vsel %vm15844_vm14, %v8586_v32, %v8590_v63  ;;  %v12752_v32 = vld [vmem:[%s15804_s1 + $0x18] sm:$0xff]   ;;  %v12754_v63 = vld [vmem:[%s15804_s1 + $0x20] sm:$0xff]  }
0x1e7d   :  { %11755 = vmatmul.mubr.bf16.vlgmr.msra.gmra.mrb[120].mxu1 %v8591_v33  ;;  %v12757_v33 = vld [vmem:[%s15802_s28 + $0x30] sm:$0xff]  }
0x1e7e   :  { %11759 = vmatpush3.bf16.msra.mxu1 %v12729_v15  ;;  %11774 = vmatprep.mubr.msk.bf16.mxu1 %vm15736_vm5, %v15793_v21  ;;  %v12755_v15 = vld [vmem:[%s15802_s28 + $0x28] sm:$0xff]  }
0x1e7f   :  { %11760 = vmatprep.subr.bf16.mxu1 %v15793_v21  ;;  %11821 = vmatpush3.bf16.msra.mxu0 %v12755_v15 }
0x1e80   :  { %11822 = vmatprep.subr.bf16.mxu0 %v15793_v21 }
0x1e82   :  { %11761 = vmatpush3.bf16.msra.mxu1 %v12730_v52  ;;  %v12758_v52 = vld [vmem:[%s15804_s1 + $0x30] sm:$0xff]  }
0x1e83   :  { %11762 = vmatprep.subr.bf16.mxu1 %v15793_v21  ;;  %11823 = vmatpush3.bf16.msra.mxu0 %v12757_v33  ;;  %v12773_v33 = vld [vmem:[#allocation42 + $0x58] sm:$0xff]  }
0x1e84   :  { %11824 = vmatprep.subr.bf16.mxu0 %v15793_v21 }
0x1e86   :  { %11763 = vmatpush3.bf16.msra.mxu1 %v12731_v0  ;;  %v12759_v0 = vld [vmem:[%s15802_s28 + $0x38] sm:$0xff]  }
0x1e87   :  { %11764 = vmatprep.subr.bf16.mxu1 %v15793_v21  ;;  %11825 = vmatpush3.bf16.msra.mxu0 %v12759_v0 }
0x1e88   :  { %11850 = vmatprep.subr.bf16.mxu0 %v15793_v21 }
0x1e8a   :  { %11765 = vmatpush3.bf16.msra.mxu1 %v12732_v41  ;;  %v12760_v41 = vld [vmem:[%s15804_s1 + $0x38] sm:$0xff]  }
0x1e8b   :  { %11766 = vmatprep.subr.bf16.mxu1 %v15793_v21 }
0x1e8e   :  { %11767 = vmatpush3.bf16.msra.mxu1 %v12733_v56 }
0x1e8f   :  { %11768 = vmatprep.subr.bf16.mxu1 %v15793_v21 }
0x1e92   :  { %11769 = vmatpush3.bf16.msra.mxu1 %v12734_v1 }
0x1e93   :  { %11770 = vmatprep.subr.bf16.mxu1 %v15793_v21 }
0x1e96   :  { %11771 = vmatpush3.bf16.msra.mxu1 %v12735_v47 }
0x1e97   :  { %11772 = vmatprep.subr.bf16.mxu1 %v15793_v21 }
0x1e9a   :  { %11773 = vmatpush3.bf16.msra.mxu1 %v12736_v22 }
0x1e9b   :  { %11778 = vmatprep.subr.bf16.mxu1 %v15793_v21 }
0x1e9d   :  { %11775 = vmatmul.mubr.bf16.vlgmr.msra.gmra.mrb[124].mxu1 %v10669_v45 }
0x1e9e   :  { %11779 = vmatpush3.bf16.msra.mxu1 %v12737_v40  ;;  %11794 = vmatprep.mubr.msk.bf16.mxu1 %vm15736_vm5, %v15793_v21 }
0x1e9f   :  { %11780 = vmatprep.subr.bf16.mxu1 %v15793_v21 }
0x1ea2   :  { %11781 = vmatpush3.bf16.msra.mxu1 %v12738_v62 }
0x1ea3   :  { %11782 = vmatprep.subr.bf16.mxu1 %v15793_v21 }
0x1ea6   :  { %11783 = vmatpush3.bf16.msra.mxu1 %v12739_v2 }
0x1ea7   :  { %11784 = vmatprep.subr.bf16.mxu1 %v15793_v21 }
0x1eaa   :  { %11785 = vmatpush3.bf16.msra.mxu1 %v12740_v43  ;;  %v12761_v43 = vld [vmem:[#allocation42] sm:$0xff]  }
0x1eab   :  { %11786 = vmatprep.subr.bf16.mxu1 %v15793_v21 }
0x1eae   :  { %11787 = vmatpush3.bf16.msra.mxu1 %v12741_v16  ;;  %v12762_v16 = vld [vmem:[#allocation42 + $0x8] sm:$0xff]  }
0x1eaf   :  { %11788 = vmatprep.subr.bf16.mxu1 %v15793_v21 }
0x1eb2   :  { %11789 = vmatpush3.bf16.msra.mxu1 %v12742_v9  ;;  %v12763_v9 = vld [vmem:[#allocation42 + $0x20] sm:$0xff]  }
0x1eb3   :  { %11790 = vmatprep.subr.bf16.mxu1 %v15793_v21 }
0x1eb6   :  { %11791 = vmatpush3.bf16.msra.mxu1 %v12743_v12  ;;  %v12764_v12 = vld [vmem:[#allocation42 + $0x10] sm:$0xff]  }
0x1eb7   :  { %11792 = vmatprep.subr.bf16.mxu1 %v15793_v21 }
0x1eba   :  { %11793 = vmatpush3.bf16.msra.mxu1 %v12744_v38  ;;  %v12765_v38 = vld [vmem:[#allocation42 + $0x28] sm:$0xff]  }
0x1ebb   :  { %11798 = vmatprep.subr.bf16.mxu1 %v15793_v21 }
0x1ebd   :  { %11795 = vmatmul.mubr.bf16.vlgmr.msra.gmra.mrb[128].mxu1 %v8804_v37  ;;  %v12756_v37 = vld [vmem:[%s15804_s1 + $0x28] sm:$0xff]  }
0x1ebe   :  { %11800 = vmatprep.mubr.msk.bf16.mxu1 %vm15736_vm5, %v15793_v21 }
0x1f50   :  { %v8675_v50 = vpop.f32.mrb[120].mxu1 }
0x1f51   :  { %v11756_v8 = vpop.f32.mrb[121].mxu1 }
0x1f52   :  { %v8678_v25 = vpop.f32.mrb[122].mxu1 }
0x1f53   :  { %v11757_v61 = vpop.f32.mrb[123].mxu1 }
0x1f70   :  { %v8770_v36 = vpop.f32.mrb[124].mxu1 }
0x1f71   :  { %v8771_v31 = vadd.f32 %v8770_v36, %v8675_v50  ;;  %v11776_v44 = vpop.f32.mrb[125].mxu1 }
0x1f72   :  { %v8773_v48 = vpop.f32.mrb[126].mxu1 }
0x1f73   :  { %v8774_v5 = vadd.f32 %v8773_v48, %v8678_v25  ;;  %v11777_v55 = vpop.f32.mrb[127].mxu1  ;;  %v9213_v25 = vstv %s10723_s24 }
0x1f90   :  { %v8888_v19 = vpop.f32.mrb[128].mxu1 }
0x1f91   :  { %v8895_v49 = vadd.f32 %v8888_v19, %v8771_v31  ;;  %v11796_v13 = vpop.f32.mrb[129].mxu1 }
0x1f92   :  { %v8891_v23 = vpop.f32.mrb[130].mxu1 }
0x1f93   :  { %v8904_v42 = vadd.f32 %v10704_v17, %v8895_v49  ;;  %v8896_v30 = vadd.f32 %v8891_v23, %v8774_v5  ;;  %v11797_v53 = vpop.f32.mrb[131].mxu1 }
0x1f95   :  { %v8905_v3 = vadd.f32 %v10704_v17, %v8896_v30  ;;  %v8906_v14 = vmax.f32 %v8904_v42, 0.0 }
0x1f97   :  { %v8907_v24 = vmax.f32 %v8905_v3, 0.0  ;;  %v9236_v3 = vld [vmem:[#allocation7] sm:$0xf] }
0x1f99   :  { %v8908_v4 = vpack.c.bf16 %v8907_v24, %v8906_v14  ;;  %v9239_v14 = vld [vmem:[#allocation7 + $0x4] sm:$0x1] }
0x1f9b   :  { %v9761_v29 = vunpack.c.l.bf16 %v8908_v4  ;;  %v9762_v7 = vunpack.c.h.bf16 %v8908_v4  ;;  %11799 = vmatpush3.bf16.msra.mxu1 %v8908_v4 }
0x1f9c   :  { %11804 = vmatprep.subr.bf16.mxu1 %v15793_v21 }
0x1f9d   :  { %9763 = vst [vmem:[%s13959_s8] sm:$0xff] %v9761_v29  ;;  %9764 = vst [vmem:[%s13959_s8 + $0x8] sm:$0xff] %v9762_v7  ;;  %s9208_s8 = sld [smem:[#allocation60]] }
0x1f9e   :  { %11801 = vmatmul.mubr.msk.bf16.vlgmr.msra.gmra.mrb[132].mxu1 %vm15845_vm10, %v8909_v11 }
0x1f9f   :  { %11805 = vmatpush3.bf16.msra.mxu1 %v8908_v4  ;;  %11806 = vmatprep.mubr.msk.bf16.mxu1 %vm15736_vm5, %v15793_v21 }
0x1fa0   :  { %11830 = vmatprep.subr.bf16.mxu1 %v15793_v21 }
0x1fa3   :  { %v9210_v8 = vstv %s9208_s8 }
0x1fa4   :  { %v9211_v5 = vmul.f32 %v9210_v8, %v9209_v51 }
0x1fa6   :  { %11807 = vmatmul.mubr.msk.bf16.vlgmr.msra.gmra.mrb[136].mxu1 %vm15846_vm0, %v8910_v26 }
0x1fa7   :  { %11831 = vmatpush3.bf16.msra.mxu1 %v12746_v54  ;;  %11846 = vmatprep.mubr.msk.bf16.mxu1 %vm15736_vm5, %v15793_v21 }
0x1fa8   :  { %11832 = vmatprep.subr.bf16.mxu1 %v15793_v21 }
0x1fab   :  { %11833 = vmatpush3.bf16.msra.mxu1 %v12748_v28 }
0x1fac   :  { %11834 = vmatprep.subr.bf16.mxu1 %v15793_v21 }
0x1faf   :  { %11835 = vmatpush3.bf16.msra.mxu1 %v12750_v6  ;;  %v12770_v6 = vld [vmem:[#allocation42 + $0x40] sm:$0xff]  }
0x1fb0   :  { %11836 = vmatprep.subr.bf16.mxu1 %v15793_v21 }
0x1fb3   :  { %11837 = vmatpush3.bf16.msra.mxu1 %v12752_v32 }
0x1fb4   :  { %11838 = vmatprep.subr.bf16.mxu1 %v15793_v21 }
0x1fb7   :  { %11839 = vmatpush3.bf16.msra.mxu1 %v12754_v63  ;;  %v12772_v63 = vld [vmem:[#allocation42 + $0x50] sm:$0xff]  }
0x1fb8   :  { %11840 = vmatprep.subr.bf16.mxu1 %v15793_v21 }
0x1fbb   :  { %11841 = vmatpush3.bf16.msra.mxu1 %v12756_v37 }
0x1fbc   :  { %11842 = vmatprep.subr.bf16.mxu1 %v15793_v21 }
0x1fbf   :  { %11843 = vmatpush3.bf16.msra.mxu1 %v12758_v52 }
0x1fc0   :  { %11844 = vmatprep.subr.bf16.mxu1 %v15793_v21 }
0x1fc3   :  { %11845 = vmatpush3.bf16.msra.mxu1 %v12760_v41  ;;  %v9581_v41 = vld [vmem:[%s15849_s7 + $0x10] sm:$0xff] }
0x1fc4   :  { %11862 = vmatprep.subr.bf16.mxu1 %v15793_v21 }
0x2071   :  { %v8980_v56 = vpop.f32.mrb[132].mxu1 }
0x2072   :  { %v11802_v1 = vpop.f32.mrb[133].mxu1 }
0x2073   :  { %v8983_v47 = vpop.f32.mrb[134].mxu1 }
0x2074   :  { %v11803_v22 = vpop.f32.mrb[135].mxu1  ;;  %v9582_v47 = vld [vmem:[%s15849_s7 + $0x18] sm:$0xff] }
0x2075   :  { %v11921_v22 = vpack.c.bf16 %v9582_v47, %v9581_v41 }
0x2079   :  { %v9023_v18 = vpop.f32.mrb[136].mxu1 }
0x207a   :  { %v9029_v46 = vmax.f32 %v8980_v56, %v9023_v18  ;;  %v11808_v40 = vpop.f32.mrb[137].mxu1  ;;  %v13654_v56 = vmov 0.0|0.0   ;;  %v9583_v18 = vld [vmem:[%s15849_s7 + $0x20] sm:$0xff] }
0x207b   :  { %v9026_v45 = vpop.f32.mrb[138].mxu1 }
0x207c   :  { %v9030_v62 = vpack.c.bf16 %v9029_v46, %v9029_v46  ;;  %v11809_v2 = vpop.f32.mrb[139].mxu1  ;;  %v9584_v46 = vld [vmem:[%s15849_s7 + $0x28] sm:$0xff]  ;;  %v9585_v45 = vld [vmem:[%s15849_s7 + $0x30] sm:$0xff] }
0x207d   :  { %v11924_v40 = vpack.c.bf16 %v9584_v46, %v9583_v18 }
0x207e   :  { %11827 = vmatmul.mubr.bf16.vlgmr.msra.gmra.mrb[108].mxu0 %v9030_v62  ;;  %11847 = vmatmul.mubr.bf16.vlgmr.msra.gmra.mrb[140].mxu1 %v9030_v62  ;;  %v9586_v62 = vld [vmem:[%s15849_s7 + $0x38] sm:$0xff] }
0x207f   :  { %11870 = vmatprep.mubr.msk.bf16.mxu1 %vm15736_vm5, %v15793_v21  ;;  %11858 = vmatprep.mubr.msk.bf16.mxu0 %vm15736_vm5, %v15793_v21  ;;  %v11927_v2 = vpack.c.bf16 %v9586_v62, %v9585_v45 }
0x2080   :  { %11863 = vmatpush3.bf16.msra.mxu1 %v12761_v43  ;;  %11851 = vmatpush3.bf16.msra.mxu0 %v12763_v9 }
0x2081   :  { %11864 = vmatprep.subr.bf16.mxu1 %v15793_v21  ;;  %11852 = vmatprep.subr.bf16.mxu0 %v15793_v21 }
0x2084   :  { %11865 = vmatpush3.bf16.msra.mxu1 %v12762_v16  ;;  %11853 = vmatpush3.bf16.msra.mxu0 %v12765_v38 }
0x2085   :  { %11866 = vmatprep.subr.bf16.mxu1 %v15793_v21  ;;  %11854 = vmatprep.subr.bf16.mxu0 %v15793_v21 }
0x2088   :  { %11867 = vmatpush3.bf16.msra.mxu1 %v12764_v12  ;;  %11855 = vmatpush3.bf16.msra.mxu0 %v12767_v60 }
0x2089   :  { %11868 = vmatprep.subr.bf16.mxu1 %v15793_v21  ;;  %11856 = vmatprep.subr.bf16.mxu0 %v15793_v21 }
0x208c   :  { %11869 = vmatpush3.bf16.msra.mxu1 %v12766_v27  ;;  %11857 = vmatpush3.bf16.msra.mxu0 %v12769_v20 }
0x208d   :  { %11886 = vmatprep.subr.mxu1 %v15793_v21  ;;  %11874 = vmatprep.subr.bf16.mxu0 %v15793_v21 }
0x2151   :  { %v9113_v34 = vpop.f32.mrb[108].mxu0  ;;  %v9201_v50 = vpop.f32.mrb[140].mxu1 }
0x2152   :  { %v9207_v61 = vmax.f32 %v9113_v34, %v9201_v50  ;;  %v11828_v36 = vpop.f32.mrb[109].mxu0  ;;  %v11848_v31 = vpop.f32.mrb[141].mxu1  ;;  %v10742_v50 = vld [vmem:[#allocation41] ss:$0 sm:$0xff] }
0x2153   :  { %v9116_v44 = vpop.f32.mrb[110].mxu0  ;;  %v9204_v48 = vpop.f32.mrb[142].mxu1 }
0x2154   :  { %v9214_v55 = vmul.f32 %v9213_v25, %v9207_v61  ;;  %v11829_v19 = vpop.f32.mrb[111].mxu0  ;;  %v11849_v17 = vpop.f32.mrb[143].mxu1 }
0x2156   :  { %v9215_v49 = vadd.f32 %v9214_v55, %v9211_v5  ;;  %v9505_v55 = vld [vmem:[#allocation18] sm:$0x3] }
0x2158   :  { %v10767_v13 = vpack.c.bf16 %v9215_v49, %v9215_v49  ;;  %v9661_v49 = vld [vmem:[#allocation21] sm:$0xff] }
0x215a   :  { %v9227_v23 = vshrl.u32 %v10767_v13, 16  ;;  %v9230_v30 = vshll.u32 %v10767_v13, 16  ;;  %v9662_v13 = vld [vmem:[#allocation21 + $0x8] sm:$0xff] }
0x215c   :  { %v9229_v42 = vrot.slane %v9227_v23, 7  ;;  %v11930_v23 = vpack.c.bf16 %v9662_v13, %v9661_v49 }
0x215e   :  { %v9232_v53 = vor.u32 %v9230_v30, %v9229_v42  ;;  %v9233_v59 = vrot.slane %v9229_v42, 4 }
0x2160   :  { %v9237_v24 = vsel %vm15808_vm1, %v9232_v53, %v9236_v3  ;;  %v9240_v4 = vsel %vm14177_vm2, %v9233_v59, %v9239_v14  ;;  %vm15848_vm1 = vmmov %vm15847_vm15  ;;  %vm15850_vm2 = vnez %v15752_v57  ;;  %v9579_v57 = vld [vmem:[%s15849_s7] sm:$0xff]  ;;  %v10745_v59 = vld [vmem:[#allocation20] ss:$0 sm:$0xff] }
0x2161   :  { %9238 = vst [vmem:[#allocation7] sm:$0xf] %v9237_v24  ;;  %9241 = vst [vmem:[#allocation7 + $0x4] sm:$0x1] %v9240_v4 }
0x2162   :  { %vm15852_vm4 = vmmov %vm15848_vm1 }
0x2163   :  { %vm15853_vm11 = vmmov %vm15848_vm1 }
0x2164   :  { %vm15855_vm9 = vmmov %vm15848_vm1 }
0x2168   :  { %v9242_v29 = vld [vmem:[#allocation7] sm:$0xf]  ;;  %v9244_v7 = vld [vmem:[#allocation7 + $0x4] sm:$0x1] }
0x2169   :  { %v9243_v11 = vsel %vm15809_vm6, %v9242_v29, 0  ;;  %v10725_v26 = vcombine.low %v9242_v29, %v9244_v7  ;;  %v9245_v39 = vld [vmem:[#allocation7] sm:$0xe]  ;;  %vm15851_vm6 = vcmp.ne.s16.totalorder %v14598_v58, 0  ;;  %v9580_v58 = vld [vmem:[%s15849_s7 + $0x8] sm:$0xff] }
0x216a   :  { %11871 = vmatmul.mubr.msk.bf16.vlgmr.msra.gmra.mrb[144].mxu1 %vm15847_vm15, %v9243_v11  ;;  %v9246_v15 = vsel %vm15850_vm2, %v9245_v39, 0  ;;  %v9247_v37 = vsel %vm15851_vm6, %v9244_v7, 0  ;;  %v11918_v1 = vpack.c.bf16 %v9580_v58, %v9579_v57 }
0x216b   :  { %v9273_v54 = vshll.u32 %v10725_v26, 16  ;;  %11888 = vmatprep.mubr.msk.f32.mxu1 %vm15736_vm5, %v15793_v21  ;;  %v9271_v28 = vshrl.u32 %v10725_v26, 16  ;;  %v10736_v52 = vcombine.low %v9246_v15, %v9247_v37 }
0x216d   :  { %v9275_v35 = vrot.slane %v9273_v54, 1  ;;  %v9425_v0 = vrot.slane %v10736_v52, 1 }
0x216f   :  { %v9276_v32 = vor.u32 %v9275_v35, %v9271_v28 }
0x2171   :  { %11859 = vmatmul.mubr.msk.bf16.vlgmr.msra.gmra.mrb[112].mxu0 %vm15848_vm1, %v9276_v32 }
0x2172   :  { %11875 = vmatpush3.bf16.msra.mxu0 %v12770_v6  ;;  %11882 = vmatprep.mubr.msk.bf16.mxu0 %vm15736_vm5, %v15793_v21 }
0x2173   :  { %11876 = vmatprep.subr.bf16.mxu0 %v15793_v21 }
0x2176   :  { %11877 = vmatpush3.bf16.msra.mxu0 %v12771_v10 }
0x2177   :  { %11878 = vmatprep.subr.bf16.mxu0 %v15793_v21 }
0x217a   :  { %11879 = vmatpush3.bf16.msra.mxu0 %v12772_v63 }
0x217b   :  { %11880 = vmatprep.subr.bf16.mxu0 %v15793_v21 }
0x217e   :  { %11881 = vmatpush3.bf16.msra.mxu0 %v12773_v33 }
0x217f   :  { %11917 = vmatprep.subr.bf16.mxu0 %v13654_v56 }
0x2181   :  { %11883 = vmatmul.mubr.msk.bf16.vlgmr.msra.gmra.mrb[116].mxu0 %vm15852_vm4, %v9425_v0 }
0x2182   :  { %11907 = vmatprep.mubr.msk.f32.mxu0 %vm15736_vm5, %v15793_v21  ;;  %11919 = vmatpush3.bf16.msra.mxu0 %v11918_v1 }
0x2183   :  { %11920 = vmatprep.subr.bf16.mxu0 %v13654_v56 }
0x2186   :  { %11922 = vmatpush3.bf16.msra.mxu0 %v11921_v22 }
0x2187   :  { %11923 = vmatprep.subr.bf16.mxu0 %v13654_v56 }
0x218a   :  { %11925 = vmatpush3.bf16.msra.mxu0 %v11924_v40 }
0x218b   :  { %11926 = vmatprep.subr.bf16.mxu0 %v13654_v56 }
0x218e   :  { %11928 = vmatpush3.bf16.msra.mxu0 %v11927_v2 }
0x223d   :  { %v9405_v43 = vpop.f32.mrb[144].mxu1 }
0x223e   :  { %v11872_v16 = vpop.f32.mrb[145].mxu1 }
0x223f   :  { %v9408_v9 = vpop.f32.mrb[146].mxu1 }
0x2240   :  { %v11873_v12 = vpop.f32.mrb[147].mxu1 }
0x2244   :  { %v9338_v38 = vpop.f32.mrb[112].mxu0 }
0x2245   :  { %v9406_v27 = vadd.f32 %v9405_v43, %v9338_v38  ;;  %v11860_v60 = vpop.f32.mrb[113].mxu0 }
0x2246   :  { %v9341_v20 = vpop.f32.mrb[114].mxu0 }
0x2247   :  { %v11861_v51 = vpop.f32.mrb[115].mxu0 }
0x2254   :  { %v9487_v34 = vpop.f32.mrb[116].mxu0 }
0x2255   :  { %v9493_v8 = vadd.f32 %v9487_v34, %v9406_v27  ;;  %v11884_v25 = vpop.f32.mrb[117].mxu0 }
0x2256   :  { %v9490_v61 = vpop.f32.mrb[118].mxu0 }
0x2257   :  { %v9501_v36 = vadd.f32 %v10742_v50, %v9493_v8  ;;  %v11885_v31 = vpop.f32.mrb[119].mxu0 }
0x2259   :  { %v9502_v44 = vmax.f32 %v9501_v36, 0.0 }
0x225b   :  { %v9503_v48 = vpack.c.bf16 %v9502_v44, %v9502_v44 }
0x225d   :  { %v9504_v5 = vunpack.c.l.bf16 %v9503_v48 }
0x225f   :  { %9765 = vst.msk [vmem:[%s13964_s25] sm:$0xff] %vm15853_vm11, %v9504_v5  ;;  %11887 = vmatpush3.msra.mxu1 %v9504_v5  ;;  %s13655_s25 = smov [#allocation65]  }
0x2260   :  { %11889 = vmatmul.mubr.msk.f32.vlgmr.msra.gmra.mrb[148].mxu1 %vm15854_vm8, %v9505_v55  ;;  %11929 = vmatprep.subr.bf16.mxu1 %v13654_v56  ;;  %s9772_s30 = sshll.u32 %s13655_s25, 4  ;;  %s9773_s30 = int_to_ptr.vmem [resolvable:$true] %s9772_s30 }
0x2261   :  { %11914 = vmatprep.mubr.msk.f32.mxu1 %vm15736_vm5, %v15793_v21  ;;  %11931 = vmatpush3.bf16.msra.mxu1 %v11930_v23  ;;  %s13486_s27 = scalar_lea.vmem %s9773_s30, 32  ;;  %p13491_p13 = scmp.lt.s32.totalorder %s9773_s30, %s9773_s30 }
0x2262   :  { %p13487_p12 = scmp.ne.s32.totalorder %s9773_s30, %s13486_s27  ;;  %p13492_p0 = scmp.lt.s32.totalorder %s13486_s27, %s13486_s27 }
0x2264   :  { %p13493_p1 = por %p13492_p0, %p13491_p13 }
0x2266   :  { %p13494_p2 = pnand %p13493_p1, %p13487_p12 }
0x2333   :  { %v9575_v19 = vpop.f32.mrb[148].mxu1 }
0x2334   :  { %v11890_v17 = vpop.f32.mrb[149].mxu1  ;;  %11908 = vmatmul.mubr.msk.f32.vlgmr.msra.gmra.mrb[120].mxu0 %vm15855_vm9, %v9575_v19 }
0x2407   :  { %v9656_v42 = vpop.f32.mrb[120].mxu0 }
0x2408   :  { %v9660_v30 = vmul.f32 0.0625, %v9656_v42  ;;  %v11909_v53 = vpop.f32.mrb[121].mxu0 }
0x240a   :  { %11915 = vmatmul.mubr.msk.f32.vlgmr.msra.gmra.mrb[150].mxu1 %vm15856_vm13, %v9660_v30 }
0x24dd   :  { %v9739_v3 = vpop.f32.mrb[150].mxu1 }
0x24de   :  { %v9740_v14 = vadd.f32 %v10745_v59, %v9739_v3  ;;  %v11916_v21 = vpop.f32.mrb[151].mxu1 }
0x24e0   :  { %9744 = vst.msk [vmem:[#allocation65] sm:$0x3] %vm9743_vm3, %v9740_v14 }
0x24e1   :  { %13497 = shalt.err (!%p13494_p2)
}
0x24e2   :  { %s13498_s22 = scalar_lea.hbm %s13949_s17, 32 }
0x24e3   :  { %p13499_p3 = scmp.ne.s32.totalorder %s13949_s17, %s13498_s22  ;;  %p13502_p4 = scmp.lt.u32.totalorder %s13498_s22, %s13949_s17 }
0x24e5   :  { %p13504_p5 = pnand %p13502_p4, %p13499_p3 }
0x24e7   :  { %13507 = shalt.err (!%p13504_p5)
}
0x24e8   :  { %9775 = dma.vmem_to_hbm [thread:$0]  %s9773_s30, 32, %s13949_s17, [#allocation10]  }
0x24e9   :  { %13548 = dma.done.wait [#allocation10], 32  }
0x24ea   :  { %13549 = vsyncadd [#allocation10], 4294967264 }
0x24eb   :  { %9791 = vsyncpa [#allocation9], 1 }
0x24ec   :  { %9792 = vsyncpa [#allocation13], 1 }
0x24ed   :  { %9793 = vsyncpa [#allocation16], 1 }
0x24ee   :  { %9794 = vsyncpa [#allocation19], 1 }
0x24ef   :  { %9795 = vsyncpa [#allocation22], 1 }
0x24f0   :  { %9796 = vsyncpa [#allocation25], 1 }
0x24f1   :  { %9797 = vsyncpa [#allocation28], 1 }
0x24f2   :  { %9798 = vsyncpa [#allocation31], 1 }
0x24f3   :  { %9799 = vsyncpa [#allocation34], 1 }
0x24f4   :  { %9800 = vsyncpa [#allocation37], 1 }
0x24f5   :  { %9801 = vsyncpa [#allocation40], 1 }
0x24f6   :  { %9802 = vsyncpa [#allocation43], 1 }
0x24f7   :  { %9803 = vsyncpa [#allocation46], 1 }
0x24f8   :  { %9804 = vsyncpa [#allocation49], 1 }
0x24f9   :  { %9805 = vsyncpa [#allocation52], 1 }
0x24fa   :  { %9806 = vsyncpa [#allocation10], 1 }
0x24fb   :  { %9807 = vsyncpa [#allocation11], 1 }
0x24fc   :  { %9808 = vsyncpa [#allocation55], 1 }
0x24fd   :  { %9809 = vsyncpa [#allocation58], 1 }
0x24fe   :  { %9810 = vsyncpa [#allocation61], 1 }
0x24ff   :  { %9811 = vsyncpa [#allocation64], 1 }

</bundles_post_ra>
